<compile_context>
chip_gen: v5e
topology: v5e:2x2
jax: 0.10.0
libtpu: 0.0.40
codegen_flags: <defaults>
</compile_context>

<pallas_src>
import functools

import jax
import jax.numpy as jnp
from jax.experimental import pallas as pl
from jax.experimental.pallas import tpu as pltpu

EPS = 1e-5  # torch.nn.LayerNorm default


def _layernorm_kernel(x_ref, gamma_ref, beta_ref, o_ref, *, bf16_apply):
    x = x_ref[...]                                    # (TM, H), input dtype
    xf = x.astype(jnp.float32)
    # One-pass statistics: avoids a live full-tile f32 `centered` temporary.
    # f32 accumulation; clamp var >= 0 to guard E[x^2]-mean^2 cancellation.
    mean = jnp.mean(xf, axis=-1, keepdims=True)       # (TM, 1) f32
    var = jnp.mean(xf * xf, axis=-1, keepdims=True) - mean * mean
    inv = jax.lax.rsqrt(jnp.maximum(var, 0.0) + EPS)  # EUP rsqrt
    if bf16_apply:
        # v6e/v7x: packed bf16 VALU (2 elem/lane) for the apply stage only.
        out = (x - mean.astype(jnp.bfloat16)) * inv.astype(jnp.bfloat16)
        out = out * gamma_ref[...].astype(jnp.bfloat16) \
              + beta_ref[...].astype(jnp.bfloat16)
    else:
        out = (xf - mean) * inv
        out = out * gamma_ref[...].astype(jnp.float32) \
              + beta_ref[...].astype(jnp.float32)
    o_ref[...] = out.astype(o_ref.dtype)


def _device_kind():
    try:
        return jax.devices()[0].device_kind.lower()
    except Exception:
        return ""


def _vmem_capacity_bytes(is_v7x):
    cap = 64 * 1024 * 1024  # conservative fallback
    try:
        cap = int(pltpu.get_tpu_info().vmem_capacity_bytes)
    except Exception:
        pass
    if is_v7x:
        # Guard against a per-chip (128 MiB) report: v7x VMEM is 64 MiB per TC.
        cap = min(cap, 64 * 1024 * 1024)
    return cap


def _sublane_multiple(itemsize):
    # f32 -> 8, bf16 -> 16, 8-bit -> 32 (sub-32-bit packs along sublanes).
    return 8 * max(1, 4 // max(int(itemsize), 1))


def _pick_tile_rows(rows, hidden, itemsize, vmem_budget_bytes):
    # Per-row VMEM footprint estimate:
    #   double-buffered input + output blocks : 2 * 2 * itemsize * hidden
    #   ~2 live f32 full-tile temporaries     : 2 * 4 * hidden
    per_row = hidden * (4 * itemsize + 8)
    tm = vmem_budget_bytes // max(per_row, 1)
    tm = min(tm, 1024)          # already far past the ~85%-of-roofline knee
    if tm >= rows:
        return rows             # full row extent: no (8,128) divisibility rule
    sub = _sublane_multiple(itemsize)
    return int(max((tm // sub) * sub, sub))


def layernorm(x, gamma, beta, *, tile_rows=None):
    """LayerNorm over the last axis of x with elementwise affine (gamma, beta)."""
    orig_shape = x.shape
    hidden = orig_shape[-1]
    x2 = x.reshape(-1, hidden)
    rows = x2.shape[0]
    itemsize = jnp.dtype(x.dtype).itemsize

    kind = _device_kind()
    is_v7x = "v7" in kind
    # bf16 apply stage only where the VPU executes packed bf16 (v6e / v7x).
    bf16_apply = (x.dtype == jnp.bfloat16) and (("v6" in kind) or is_v7x)

    physical_vmem = _vmem_capacity_bytes(is_v7x)
    vmem_budget = physical_vmem // 2          # headroom for compiler scratch
    if tile_rows is None:
        tile_rows = _pick_tile_rows(rows, hidden, itemsize, vmem_budget)
    else:
        sub = _sublane_multiple(itemsize)
        tile_rows = int(tile_rows)
        if tile_rows >= rows:
            tile_rows = rows                  # full extent always legal
        else:
            tile_rows = max((tile_rows // sub) * sub, sub)
    tile_rows = int(tile_rows)

    grid_rows = pl.cdiv(rows, tile_rows)      # no padding: partial last block
                                              # is per-row safe (writes masked)

    gamma2 = gamma.reshape(1, hidden)
    beta2 = beta.reshape(1, hidden)

    per_row = hidden * (4 * itemsize + 8)
    block_bytes = tile_rows * per_row + 4 * hidden * jnp.dtype(gamma.dtype).itemsize
    vmem_limit = int(min(physical_vmem * 3 // 4,
                         max(32 * 1024 * 1024, block_bytes + (8 << 20))))

    # v7x has 2 TensorCores/chip: CORE_PARALLEL shards the row grid across
    # them.  On 1-TC chips plain "parallel" is sufficient (and always safe).
    if is_v7x:
        dim_sem = (getattr(pltpu, "CORE_PARALLEL", "parallel"),)
    else:
        dim_sem = ("parallel",)

    cost = pl.CostEstimate(
        flops=8 * rows * hidden,
        transcendentals=rows,
        bytes_accessed=2 * rows * hidden * itemsize
        + 2 * hidden * jnp.dtype(gamma.dtype).itemsize,
    )

    kernel = functools.partial(_layernorm_kernel, bf16_apply=bf16_apply)

    out = pl.pallas_call(
        kernel,
        out_shape=jax.ShapeDtypeStruct((rows, hidden), x.dtype),
        grid_spec=pltpu.PrefetchScalarGridSpec(
            num_scalar_prefetch=0,
            grid=(grid_rows,),
            in_specs=[
                pl.BlockSpec((tile_rows, hidden), lambda i: (i, 0)),
                pl.BlockSpec((1, hidden), lambda i: (0, 0)),   # gamma: resident
                pl.BlockSpec((1, hidden), lambda i: (0, 0)),   # beta:  resident
            ],
            out_specs=pl.BlockSpec((tile_rows, hidden), lambda i: (i, 0)),
        ),
        compiler_params=pltpu.CompilerParams(
            dimension_semantics=dim_sem,
            vmem_limit_bytes=vmem_limit,
        ),
        cost_estimate=cost,
    )(x2, gamma2, beta2)

    return out.reshape(orig_shape)


def _reference_layernorm(x, gamma, beta):
    xf = x.astype(jnp.float32)
    mean = jnp.mean(xf, axis=-1, keepdims=True)
    var = jnp.mean((xf - mean) ** 2, axis=-1, keepdims=True)
    return ((xf - mean) * jax.lax.rsqrt(var + EPS)) * gamma + beta


if __name__ == "__main__":
    # Small shapes consistent with the module: [batch, seq, hidden], hidden=8192
    # (the module's default hidden_size).
    batch, seq, hidden = 2, 32, 8192

    key = jax.random.PRNGKey(0)
    kx, kg, kb = jax.random.split(key, 3)
    x = jax.random.normal(kx, (batch, seq, hidden), dtype=jnp.float32)
    gamma = jax.random.normal(kg, (hidden,), dtype=jnp.float32)  # ln.weight
    beta = jax.random.normal(kb, (hidden,), dtype=jnp.float32)   # ln.bias

    out = jax.block_until_ready(layernorm(x, gamma, beta))

    ref = _reference_layernorm(x, gamma, beta)
    assert out.shape == x.shape
    assert jnp.allclose(out, ref, atol=2e-4, rtol=2e-4), "mismatch vs reference"

    print("KERNEL_OK")
</pallas_src>

<mosaic_0001>
module attributes {stable_mosaic.version = 11 : i64} {
  func.func @_layernorm_kernel(%arg0: i32, %arg1: memref<64x8192xf32, #tpu.memory_space<vmem>>, %arg2: memref<1x8192xf32, #tpu.memory_space<vmem>>, %arg3: memref<1x8192xf32, #tpu.memory_space<vmem>>, %arg4: memref<64x8192xf32, #tpu.memory_space<vmem>>) attributes {dimension_semantics = [#tpu.dimension_semantics<parallel>], iteration_bounds = array<i64: 1>, scalar_prefetch = 0 : i64, scratch_operands = 0 : i64, tpu.core_type = #tpu.core_type<tc>, window_params = [{transform_indices = @transform_0, window_bounds = array<i64: 64, 8192>}, {pipeline_mode = #tpu.pipeline_mode<synchronous>, transform_indices = @transform_1, window_bounds = array<i64: 1, 8192>}, {pipeline_mode = #tpu.pipeline_mode<synchronous>, transform_indices = @transform_2, window_bounds = array<i64: 1, 8192>}, {transform_indices = @transform_3, window_bounds = array<i64: 64, 8192>}]} {
    %c0 = arith.constant 0 : index
    %c0_0 = arith.constant 0 : index
    %0 = vector.load %arg1[%c0, %c0_0] : memref<64x8192xf32, #tpu.memory_space<vmem>>, vector<64x8192xf32>
    %cst = arith.constant dense<0.000000e+00> : vector<64xf32>
    %1 = vector.multi_reduction <add>, %0, %cst [1] : vector<64x8192xf32> to vector<64xf32>
    %2 = vector.shape_cast %1 : vector<64xf32> to vector<64x1xf32>
    %cst_1 = arith.constant 8.192000e+03 : f32
    %3 = vector.broadcast %cst_1 : f32 to vector<64x1xf32>
    %4 = arith.divf %2, %3 : vector<64x1xf32>
    %5 = arith.mulf %0, %0 : vector<64x8192xf32>
    %cst_2 = arith.constant dense<0.000000e+00> : vector<64xf32>
    %6 = vector.multi_reduction <add>, %5, %cst_2 [1] : vector<64x8192xf32> to vector<64xf32>
    %7 = vector.shape_cast %6 : vector<64xf32> to vector<64x1xf32>
    %cst_3 = arith.constant 8.192000e+03 : f32
    %8 = vector.broadcast %cst_3 : f32 to vector<64x1xf32>
    %9 = arith.divf %7, %8 : vector<64x1xf32>
    %10 = arith.mulf %4, %4 : vector<64x1xf32>
    %11 = arith.subf %9, %10 : vector<64x1xf32>
    %cst_4 = arith.constant 0.000000e+00 : f32
    %12 = vector.broadcast %cst_4 : f32 to vector<64x1xf32>
    %13 = arith.maximumf %11, %12 : vector<64x1xf32>
    %cst_5 = arith.constant 9.99999974E-6 : f32
    %14 = vector.broadcast %cst_5 : f32 to vector<64x1xf32>
    %15 = arith.addf %13, %14 : vector<64x1xf32>
    %16 = math.rsqrt %15 : vector<64x1xf32>
    %17 = vector.broadcast %4 : vector<64x1xf32> to vector<64x8192xf32>
    %18 = arith.subf %0, %17 : vector<64x8192xf32>
    %19 = vector.broadcast %16 : vector<64x1xf32> to vector<64x8192xf32>
    %20 = arith.mulf %18, %19 : vector<64x8192xf32>
    %c0_6 = arith.constant 0 : index
    %c0_7 = arith.constant 0 : index
    %21 = vector.load %arg2[%c0_6, %c0_7] : memref<1x8192xf32, #tpu.memory_space<vmem>>, vector<1x8192xf32>
    %22 = vector.broadcast %21 : vector<1x8192xf32> to vector<64x8192xf32>
    %23 = arith.mulf %20, %22 : vector<64x8192xf32>
    %c0_8 = arith.constant 0 : index
    %c0_9 = arith.constant 0 : index
    %24 = vector.load %arg3[%c0_8, %c0_9] : memref<1x8192xf32, #tpu.memory_space<vmem>>, vector<1x8192xf32>
    %25 = vector.broadcast %24 : vector<1x8192xf32> to vector<64x8192xf32>
    %26 = arith.addf %23, %25 : vector<64x8192xf32>
    %c0_10 = arith.constant 0 : index
    %c0_11 = arith.constant 0 : index
    %27 = vector.load %arg4[%c0_10, %c0_11] : memref<64x8192xf32, #tpu.memory_space<vmem>>, vector<64x8192xf32>
    tpu.vector_store %arg4[%c0_10, %c0_11], %26 {strides = array<i32>} : memref<64x8192xf32, #tpu.memory_space<vmem>>, vector<64x8192xf32>,
    return
  }
  func.func @transform_0(%arg0: i32) -> (i32, i32) {
    %c0_i32 = arith.constant 0 : i32
    %c0_i32_0 = arith.constant 0 : i32
    return %arg0, %c0_i32 : i32, i32
  }
  func.func @transform_1(%arg0: i32) -> (i32, i32) {
    %c0_i32 = arith.constant 0 : i32
    %c0_i32_0 = arith.constant 0 : i32
    %c0_i32_1 = arith.constant 0 : i32
    return %c0_i32, %c0_i32_0 : i32, i32
  }
  func.func @transform_2(%arg0: i32) -> (i32, i32) {
    %c0_i32 = arith.constant 0 : i32
    %c0_i32_0 = arith.constant 0 : i32
    %c0_i32_1 = arith.constant 0 : i32
    return %c0_i32, %c0_i32_0 : i32, i32
  }
  func.func @transform_3(%arg0: i32) -> (i32, i32) {
    %c0_i32 = arith.constant 0 : i32
    %c0_i32_0 = arith.constant 0 : i32
    return %arg0, %c0_i32 : i32, i32
  }
}

</mosaic_0001>

<bundles_post_ra>
// kernel: tpu_custom_call.1
= control target key start
LH: loop header
LB: loop body
LE: loop exit
PB: predicated region body
PF: predicated region fallthrough
CT: control target
= control target key end

     0   :  { %8 = vsyncpa [#allocation3], 0  ;;  %s10443_s0 = inlined_call_operand.hbm [shape: f32[64,8192], index: 0, kind: input, shape index: {}]   ;;  %s10444_s1 = inlined_call_operand.hbm [shape: f32[1,8192], index: 1, kind: input, shape index: {}]   ;;  %s10445_s2 = inlined_call_operand.hbm [shape: f32[1,8192], index: 2, kind: input, shape index: {}]   ;;  %s10446_s3 = inlined_call_operand.hbm [shape: f32[64,8192], index: 3, kind: output, shape index: {}]  }
   0x1   :  { %9 = vsyncpa [#allocation6], 0  ;;  %s29_s14 = sshll.u32 %s10444_s1, 4  ;;  %s30_s14 = int_to_ptr.hbm [resolvable:$true] %s29_s14 }
   0x2   :  { %10 = vsyncpa [#allocation4], 0  ;;  %s6212_s15 = smov [#allocation5]   ;;  %s15_s19 = sshll.u32 %s10443_s0, 4  ;;  %s16_s19 = int_to_ptr.hbm [resolvable:$true] %s15_s19 }
   0x3   :  { %s31_s16 = sshll.u32 %s6212_s15, 4  ;;  %s6213_s20 = smov [#allocation2]   ;;  %s32_s16 = int_to_ptr.vmem [resolvable:$true] %s31_s16 }
   0x4   :  { %34 = dma.hbm_to_vmem [thread:$0]  %s30_s14, 1024, %s32_s16, [#allocation6]  }
   0x5   :  { %s17_s21 = sshll.u32 %s6213_s20, 4  ;;  %s6214_s22 = smov 8192   ;;  %s18_s21 = int_to_ptr.vmem [resolvable:$true] %s17_s21 }
   0x6   :  { %s6215_s23 = smov 512   ;;  %s40_s25 = sshll.u32 %s10445_s2, 4  ;;  %s41_s25 = int_to_ptr.hbm [resolvable:$true] %s40_s25 }
   0x7   :  { %23 = dma.hbm_to_vmem [thread:$0]  %s16_s19, 65536, %s18_s21, [#allocation3], %s6214_s22, %s6214_s22, %s6215_s23  }
   0x8   :  { %s6216_s26 = smov [#allocation7]  }
   0x9   :  { %s42_s27 = sshll.u32 %s6216_s26, 4  ;;  %s43_s27 = int_to_ptr.vmem [resolvable:$true] %s42_s27 }
   0xa   :  { %45 = dma.hbm_to_vmem [thread:$0]  %s41_s25, 1024, %s43_s27, [#allocation6]  }
   0xb   :  { %6206 = dma.done.wait [#allocation3], 65536  }
   0xc   :  { %6207 = vsyncadd [#allocation3], 4294901760 }
   0xd   :  { %6208 = dma.done.wait [#allocation6], 2048  }
   0xe   :  { %6209 = vsyncadd [#allocation6], 4294965248  ;;  %v314_v0 = vld [vmem:[#allocation2 + $0x800] sm:$0xff]  ;;  %v315_v1 = vld [vmem:[#allocation2 + $0x808] sm:$0xff]  ;;  %s6218_s0 = smov [#allocation8]   ;;  %s5111_s30 = sshll.u32 %s10446_s3, 4  ;;  %s5112_s30 = int_to_ptr.hbm [resolvable:$true] %s5111_s30 }
   0xf   :  { %v316_v2 = vld [vmem:[#allocation2 + $0x810] sm:$0xff]  ;;  %v830_v3 = vadd.f32 %v315_v1, %v314_v0  ;;  %v317_v4 = vld [vmem:[#allocation2 + $0x818] sm:$0xff]  ;;  %v318_v6 = vld [vmem:[#allocation2 + $0x820] sm:$0xff]  ;;  %s5109_s2 = sshll.u32 %s6218_s0, 4  ;;  %s5110_s2 = int_to_ptr.vmem [resolvable:$true] %s5109_s2 }
  0x10   :  { %v319_v8 = vld [vmem:[#allocation2 + $0x828] sm:$0xff]  ;;  %v320_v10 = vld [vmem:[#allocation2 + $0x830] sm:$0xff]  ;;  %v321_v12 = vld [vmem:[#allocation2 + $0x838] sm:$0xff] }
  0x11   :  { %v831_v5 = vadd.f32 %v830_v3, %v316_v2  ;;  %v322_v14 = vld [vmem:[#allocation2 + $0x840] sm:$0xff]  ;;  %v323_v16 = vld [vmem:[#allocation2 + $0x848] sm:$0xff]  ;;  %v324_v18 = vld [vmem:[#allocation2 + $0x850] sm:$0xff] }
  0x12   :  { %v325_v20 = vld [vmem:[#allocation2 + $0x858] sm:$0xff]  ;;  %v326_v22 = vld [vmem:[#allocation2 + $0x860] sm:$0xff]  ;;  %v187_v25 = vld [vmem:[#allocation2 + $0x408] sm:$0xff] }
  0x13   :  { %v832_v7 = vadd.f32 %v831_v5, %v317_v4  ;;  %v186_v24 = vld [vmem:[#allocation2 + $0x400] sm:$0xff]  ;;  %v327_v26 = vld [vmem:[#allocation2 + $0x868] sm:$0xff]  ;;  %v188_v27 = vld [vmem:[#allocation2 + $0x410] sm:$0xff] }
  0x14   :  { %v700_v28 = vadd.f32 %v187_v25, %v186_v24  ;;  %v189_v30 = vld [vmem:[#allocation2 + $0x418] sm:$0xff]  ;;  %v328_v31 = vld [vmem:[#allocation2 + $0x870] sm:$0xff]  ;;  %v190_v34 = vld [vmem:[#allocation2 + $0x420] sm:$0xff] }
  0x15   :  { %v833_v9 = vadd.f32 %v832_v7, %v318_v6  ;;  %v329_v35 = vld [vmem:[#allocation2 + $0x878] sm:$0xff]  ;;  %v191_v38 = vld [vmem:[#allocation2 + $0x428] sm:$0xff]  ;;  %v330_v39 = vld [vmem:[#allocation2 + $0x880] sm:$0xff] }
  0x16   :  { %v701_v32 = vadd.f32 %v700_v28, %v188_v27  ;;  %v6251_v41 = vld [vmem:[#allocation2] sm:$0xff]  ;;  %v6253_v42 = vld [vmem:[#allocation2 + $0x8] sm:$0xff]  ;;  %v192_v44 = vld [vmem:[#allocation2 + $0x430] sm:$0xff] }
  0x17   :  { %v834_v11 = vadd.f32 %v833_v9, %v319_v8  ;;  %v6255_v45 = vld [vmem:[#allocation2 + $0x10] sm:$0xff]  ;;  %v570_v46 = vadd.f32 %v6253_v42, %v6251_v41  ;;  %v331_v47 = vld [vmem:[#allocation2 + $0x888] sm:$0xff]  ;;  %v6259_v49 = vld [vmem:[#allocation2 + $0x18] sm:$0xff] }
  0x18   :  { %v702_v36 = vadd.f32 %v701_v32, %v189_v30  ;;  %v193_v51 = vld [vmem:[#allocation2 + $0x438] sm:$0xff]  ;;  %v332_v53 = vld [vmem:[#allocation2 + $0x890] sm:$0xff]  ;;  %v6262_v55 = vld [vmem:[#allocation2 + $0x20] sm:$0xff] }
  0x19   :  { %v835_v13 = vadd.f32 %v834_v11, %v320_v10  ;;  %v571_v52 = vadd.f32 %v570_v46, %v6255_v45  ;;  %v194_v57 = vld [vmem:[#allocation2 + $0x440] sm:$0xff]  ;;  %v333_v59 = vld [vmem:[#allocation2 + $0x898] sm:$0xff]  ;;  %v6265_v61 = vld [vmem:[#allocation2 + $0x28] sm:$0xff] }
  0x1a   :  { %v703_v40 = vadd.f32 %v702_v36, %v190_v34  ;;  %v195_v63 = vld [vmem:[#allocation2 + $0x448] sm:$0xff]  ;;  %v334_v1 = vld [vmem:[#allocation2 + $0x8a0] sm:$0xff]  ;;  %v6268_v3 = vld [vmem:[#allocation2 + $0x30] sm:$0xff] }
  0x1b   :  { %v836_v15 = vadd.f32 %v835_v13, %v321_v12  ;;  %v572_v58 = vadd.f32 %v571_v52, %v6259_v49  ;;  %v196_v5 = vld [vmem:[#allocation2 + $0x450] sm:$0xff]  ;;  %v378_v7 = vld [vmem:[#allocation2 + $0xa00] sm:$0xff]  ;;  %v379_v8 = vld [vmem:[#allocation2 + $0xa08] sm:$0xff] }
  0x1c   :  { %v704_v48 = vadd.f32 %v703_v40, %v191_v38  ;;  %v335_v9 = vld [vmem:[#allocation2 + $0x8a8] sm:$0xff]  ;;  %v6271_v11 = vld [vmem:[#allocation2 + $0x38] sm:$0xff]  ;;  %v380_v12 = vld [vmem:[#allocation2 + $0xa10] sm:$0xff]  ;;  %v895_v13 = vadd.f32 %v379_v8, %v378_v7 }
  0x1d   :  { %v837_v17 = vadd.f32 %v836_v15, %v322_v14  ;;  %v573_v0 = vadd.f32 %v572_v58, %v6262_v55  ;;  %v197_v15 = vld [vmem:[#allocation2 + $0x458] sm:$0xff]  ;;  %v382_v25 = vld [vmem:[#allocation2 + $0xa20] sm:$0xff]  ;;  %v6277_v28 = vld [vmem:[#allocation2 + $0x48] sm:$0xff] }
  0x1e   :  { %v705_v54 = vadd.f32 %v704_v48, %v192_v44  ;;  %v338_v34 = vld [vmem:[#allocation2 + $0x8c0] sm:$0xff]  ;;  %v6280_v36 = vld [vmem:[#allocation2 + $0x50] sm:$0xff]  ;;  %v339_v44 = vld [vmem:[#allocation2 + $0x8c8] sm:$0xff] }
  0x1f   :  { %v838_v19 = vadd.f32 %v837_v17, %v323_v16  ;;  %v574_v6 = vadd.f32 %v573_v0, %v6265_v61  ;;  %v381_v17 = vld [vmem:[#allocation2 + $0xa18] sm:$0xff]  ;;  %v386_v0 = vld [vmem:[#allocation2 + $0xa40] sm:$0xff]  ;;  %v252_v7 = vld [vmem:[#allocation2 + $0x610] sm:$0xff] }
  0x20   :  { %v706_v60 = vadd.f32 %v705_v54, %v193_v51  ;;  %v201_v51 = vld [vmem:[#allocation2 + $0x478] sm:$0xff]  ;;  %v340_v54 = vld [vmem:[#allocation2 + $0x8d0] sm:$0xff] }
  0x21   :  { %v839_v21 = vadd.f32 %v838_v19, %v324_v18  ;;  %v575_v16 = vadd.f32 %v574_v6, %v6268_v3  ;;  %v336_v18 = vld [vmem:[#allocation2 + $0x8b0] sm:$0xff] }
  0x22   :  { %v707_v2 = vadd.f32 %v706_v60, %v194_v57  ;;  %v6286_v57 = vld [vmem:[#allocation2 + $0x60] sm:$0xff] }
  0x23   :  { %v840_v23 = vadd.f32 %v839_v21, %v325_v20  ;;  %v6274_v20 = vld [vmem:[#allocation2 + $0x40] sm:$0xff]  ;;  %v896_v21 = vadd.f32 %v895_v13, %v380_v12  ;;  %v576_v24 = vadd.f32 %v575_v16, %v6271_v11  ;;  %v387_v13 = vld [vmem:[#allocation2 + $0xa48] sm:$0xff] }
  0x24   :  { %v708_v10 = vadd.f32 %v707_v2, %v195_v63  ;;  %v341_v2 = vld [vmem:[#allocation2 + $0x8d8] sm:$0xff] }
  0x25   :  { %v841_v29 = vadd.f32 %v840_v23, %v326_v22  ;;  %v198_v23 = vld [vmem:[#allocation2 + $0x460] sm:$0xff]  ;;  %v577_v32 = vadd.f32 %v576_v24, %v6274_v20  ;;  %v388_v24 = vld [vmem:[#allocation2 + $0xa50] sm:$0xff] }
  0x26   :  { %v709_v19 = vadd.f32 %v708_v10, %v196_v5  ;;  %v6289_v5 = vld [vmem:[#allocation2 + $0x68] sm:$0xff] }
  0x27   :  { %v842_v33 = vadd.f32 %v841_v29, %v327_v26  ;;  %v337_v26 = vld [vmem:[#allocation2 + $0x8b8] sm:$0xff]  ;;  %v897_v29 = vadd.f32 %v896_v21, %v381_v17  ;;  %v578_v40 = vadd.f32 %v577_v32, %v6277_v28  ;;  %v203_v10 = vld [vmem:[#allocation2 + $0x488] sm:$0xff]  ;;  %v6292_v17 = vld [vmem:[#allocation2 + $0x70] sm:$0xff] }
  0x28   :  { %v710_v27 = vadd.f32 %v709_v19, %v197_v15  ;;  %v342_v15 = vld [vmem:[#allocation2 + $0x8e0] sm:$0xff] }
  0x29   :  { %v843_v37 = vadd.f32 %v842_v33, %v328_v31  ;;  %v199_v31 = vld [vmem:[#allocation2 + $0x468] sm:$0xff]  ;;  %v579_v52 = vadd.f32 %v578_v40, %v6280_v36  ;;  %v6298_v40 = vld [vmem:[#allocation2 + $0x80] sm:$0xff] }
  0x2a   :  { %v383_v33 = vld [vmem:[#allocation2 + $0xa28] sm:$0xff] }
  0x2b   :  { %v844_v43 = vadd.f32 %v843_v37, %v329_v35  ;;  %v711_v35 = vadd.f32 %v710_v27, %v198_v23  ;;  %v898_v37 = vadd.f32 %v897_v29, %v382_v25  ;;  %v254_v25 = vld [vmem:[#allocation2 + $0x620] sm:$0xff]  ;;  %v6295_v29 = vld [vmem:[#allocation2 + $0x78] sm:$0xff] }
  0x2d   :  { %v845_v50 = vadd.f32 %v844_v43, %v330_v39  ;;  %v200_v39 = vld [vmem:[#allocation2 + $0x470] sm:$0xff]  ;;  %v712_v46 = vadd.f32 %v711_v35, %v199_v31  ;;  %v899_v48 = vadd.f32 %v898_v37, %v383_v33  ;;  %v205_v33 = vld [vmem:[#allocation2 + $0x498] sm:$0xff]  ;;  %v255_v37 = vld [vmem:[#allocation2 + $0x628] sm:$0xff] }
  0x2e   :  { %v384_v43 = vld [vmem:[#allocation2 + $0xa30] sm:$0xff]  ;;  %v389_v35 = vld [vmem:[#allocation2 + $0xa58] sm:$0xff] }
  0x2f   :  { %v846_v56 = vadd.f32 %v845_v50, %v331_v47  ;;  %v6283_v47 = vld [vmem:[#allocation2 + $0x58] sm:$0xff]  ;;  %v900_v58 = vadd.f32 %v899_v48, %v384_v43  ;;  %v206_v48 = vld [vmem:[#allocation2 + $0x4a0] sm:$0xff] }
  0x30   :  { %v580_v63 = vadd.f32 %v579_v52, %v6283_v47  ;;  %v256_v52 = vld [vmem:[#allocation2 + $0x630] sm:$0xff] }
  0x31   :  { %v847_v62 = vadd.f32 %v846_v56, %v332_v53  ;;  %v385_v53 = vld [vmem:[#allocation2 + $0xa38] sm:$0xff]  ;;  %v713_v56 = vadd.f32 %v712_v46, %v200_v39 }
  0x32   :  { %v901_v6 = vadd.f32 %v900_v58, %v385_v53  ;;  %v581_v12 = vadd.f32 %v580_v63, %v6286_v57  ;;  %v345_v53 = vld [vmem:[#allocation2 + $0x8f8] sm:$0xff] }
  0x33   :  { %v848_v4 = vadd.f32 %v847_v62, %v333_v59  ;;  %v250_v59 = vld [vmem:[#allocation2 + $0x600] sm:$0xff] }
  0x34   :  { %v202_v62 = vld [vmem:[#allocation2 + $0x480] sm:$0xff]  ;;  %v582_v23 = vadd.f32 %v581_v12, %v6289_v5 }
  0x35   :  { %v849_v14 = vadd.f32 %v848_v4, %v334_v1  ;;  %v251_v1 = vld [vmem:[#allocation2 + $0x608] sm:$0xff]  ;;  %v714_v4 = vadd.f32 %v713_v56, %v201_v51  ;;  %v390_v51 = vld [vmem:[#allocation2 + $0xa60] sm:$0xff] }
  0x36   :  { %v765_v8 = vadd.f32 %v251_v1, %v250_v59  ;;  %v6301_v56 = vld [vmem:[#allocation2 + $0x88] sm:$0xff]  ;;  %v257_v1 = vld [vmem:[#allocation2 + $0x638] sm:$0xff] }
  0x37   :  { %v850_v22 = vadd.f32 %v849_v14, %v335_v9  ;;  %v253_v14 = vld [vmem:[#allocation2 + $0x618] sm:$0xff]  ;;  %v715_v16 = vadd.f32 %v714_v4, %v202_v62  ;;  %v207_v62 = vld [vmem:[#allocation2 + $0x4a8] sm:$0xff] }
  0x38   :  { %v766_v19 = vadd.f32 %v765_v8, %v252_v7 }
  0x39   :  { %v851_v30 = vadd.f32 %v850_v22, %v336_v18  ;;  %v902_v18 = vadd.f32 %v901_v6, %v386_v0  ;;  %v204_v22 = vld [vmem:[#allocation2 + $0x490] sm:$0xff]  ;;  %v716_v27 = vadd.f32 %v715_v16, %v203_v10  ;;  %v391_v0 = vld [vmem:[#allocation2 + $0xa68] sm:$0xff] }
  0x3a   :  { %v767_v31 = vadd.f32 %v766_v19, %v253_v14  ;;  %v6304_v6 = vld [vmem:[#allocation2 + $0x90] sm:$0xff]  ;;  %v258_v14 = vld [vmem:[#allocation2 + $0x640] sm:$0xff] }
  0x3b   :  { %v852_v38 = vadd.f32 %v851_v30, %v337_v26  ;;  %v343_v26 = vld [vmem:[#allocation2 + $0x8e8] sm:$0xff]  ;;  %v903_v30 = vadd.f32 %v902_v18, %v387_v13  ;;  %v717_v39 = vadd.f32 %v716_v27, %v204_v22  ;;  %v208_v10 = vld [vmem:[#allocation2 + $0x4b0] sm:$0xff]  ;;  %v6307_v18 = vld [vmem:[#allocation2 + $0x98] sm:$0xff] }
  0x3c   :  { %v392_v13 = vld [vmem:[#allocation2 + $0xa70] sm:$0xff] }
  0x3d   :  { %v853_v50 = vadd.f32 %v852_v38, %v338_v34  ;;  %v583_v34 = vadd.f32 %v582_v23, %v6292_v17  ;;  %v344_v38 = vld [vmem:[#allocation2 + $0x8f0] sm:$0xff]  ;;  %v904_v43 = vadd.f32 %v903_v30, %v388_v24  ;;  %v209_v23 = vld [vmem:[#allocation2 + $0x4b8] sm:$0xff] }
  0x3e   :  { %v348_v27 = vld [vmem:[#allocation2 + $0x910] sm:$0xff]  ;;  %v349_v30 = vld [vmem:[#allocation2 + $0x918] sm:$0xff] }
  0x3f   :  { %v854_v60 = vadd.f32 %v853_v50, %v339_v44  ;;  %v768_v44 = vadd.f32 %v767_v31, %v254_v25  ;;  %v584_v50 = vadd.f32 %v583_v34, %v6295_v29  ;;  %v905_v58 = vadd.f32 %v904_v43, %v389_v35  ;;  %v393_v25 = vld [vmem:[#allocation2 + $0xa78] sm:$0xff]  ;;  %v260_v43 = vld [vmem:[#allocation2 + $0x650] sm:$0xff] }
  0x41   :  { %v855_v9 = vadd.f32 %v854_v60, %v340_v54  ;;  %v718_v54 = vadd.f32 %v717_v39, %v205_v33  ;;  %v769_v59 = vadd.f32 %v768_v44, %v255_v37  ;;  %v585_v63 = vadd.f32 %v584_v50, %v6298_v40  ;;  %v210_v37 = vld [vmem:[#allocation2 + $0x4c0] sm:$0xff] }
  0x42   :  { %v906_v7 = vadd.f32 %v905_v58, %v390_v51  ;;  %v394_v39 = vld [vmem:[#allocation2 + $0xa80] sm:$0xff]  ;;  %v211_v58 = vld [vmem:[#allocation2 + $0x4c8] sm:$0xff] }
  0x43   :  { %v856_v21 = vadd.f32 %v855_v9, %v341_v2  ;;  %v346_v2 = vld [vmem:[#allocation2 + $0x900] sm:$0xff]  ;;  %v719_v4 = vadd.f32 %v718_v54, %v206_v48  ;;  %v770_v8 = vadd.f32 %v769_v59, %v256_v52  ;;  %v586_v12 = vadd.f32 %v585_v63, %v6301_v56  ;;  %v6313_v48 = vld [vmem:[#allocation2 + $0xa8] sm:$0xff] }
  0x44   :  { %v907_v19 = vadd.f32 %v906_v7, %v391_v0  ;;  %v350_v44 = vld [vmem:[#allocation2 + $0x920] sm:$0xff]  ;;  %v351_v0 = vld [vmem:[#allocation2 + $0x928] sm:$0xff] }
  0x45   :  { %v857_v32 = vadd.f32 %v856_v21, %v342_v15  ;;  %v347_v15 = vld [vmem:[#allocation2 + $0x908] sm:$0xff]  ;;  %v720_v16 = vadd.f32 %v719_v4, %v207_v62  ;;  %v771_v21 = vadd.f32 %v770_v8, %v257_v1  ;;  %v587_v24 = vadd.f32 %v586_v12, %v6304_v6  ;;  %v122_v52 = vld [vmem:[#allocation2 + $0x200] sm:$0xff]  ;;  %v261_v62 = vld [vmem:[#allocation2 + $0x658] sm:$0xff] }
  0x46   :  { %v908_v33 = vadd.f32 %v907_v19, %v392_v13  ;;  %v124_v8 = vld [vmem:[#allocation2 + $0x210] sm:$0xff] }
  0x47   :  { %v858_v46 = vadd.f32 %v857_v32, %v343_v26  ;;  %v259_v26 = vld [vmem:[#allocation2 + $0x648] sm:$0xff]  ;;  %v721_v31 = vadd.f32 %v720_v16, %v208_v10  ;;  %v6310_v32 = vld [vmem:[#allocation2 + $0xa0] sm:$0xff]  ;;  %v772_v34 = vadd.f32 %v771_v21, %v258_v14  ;;  %v212_v12 = vld [vmem:[#allocation2 + $0x4d0] sm:$0xff] }
  0x48   :  { %v909_v50 = vadd.f32 %v908_v33, %v393_v25  ;;  %v396_v14 = vld [vmem:[#allocation2 + $0xa90] sm:$0xff]  ;;  %v126_v25 = vld [vmem:[#allocation2 + $0x220] sm:$0xff]  ;;  %v397_v33 = vld [vmem:[#allocation2 + $0xa98] sm:$0xff] }
  0x49   :  { %v859_v60 = vadd.f32 %v858_v46, %v344_v38  ;;  %v588_v38 = vadd.f32 %v587_v24, %v6307_v18  ;;  %v722_v46 = vadd.f32 %v721_v31, %v209_v23  ;;  %v773_v51 = vadd.f32 %v772_v34, %v259_v26  ;;  %v352_v19 = vld [vmem:[#allocation2 + $0x930] sm:$0xff]  ;;  %v263_v34 = vld [vmem:[#allocation2 + $0x668] sm:$0xff] }
  0x4a   :  { %v910_v4 = vadd.f32 %v909_v50, %v394_v39 }
  0x4b   :  { %v860_v9 = vadd.f32 %v859_v60, %v345_v53  ;;  %v123_v53 = vld [vmem:[#allocation2 + $0x208] sm:$0xff]  ;;  %v589_v59 = vadd.f32 %v588_v38, %v6310_v32  ;;  %v723_v1 = vadd.f32 %v722_v46, %v210_v37  ;;  %v774_v7 = vadd.f32 %v773_v51, %v260_v43  ;;  %v6322_v38 = vld [vmem:[#allocation2 + $0xc0] sm:$0xff] }
  0x4c   :  { %v395_v60 = vld [vmem:[#allocation2 + $0xa88] sm:$0xff]  ;;  %v635_v63 = vadd.f32 %v123_v53, %v122_v52  ;;  %v214_v51 = vld [vmem:[#allocation2 + $0x4e0] sm:$0xff] }
  0x4d   :  { %v861_v22 = vadd.f32 %v860_v9, %v346_v2  ;;  %v6316_v2 = vld [vmem:[#allocation2 + $0xb0] sm:$0xff]  ;;  %v125_v9 = vld [vmem:[#allocation2 + $0x218] sm:$0xff]  ;;  %v590_v13 = vadd.f32 %v589_v59, %v6313_v48  ;;  %v724_v21 = vadd.f32 %v723_v1, %v211_v58  ;;  %v911_v23 = vadd.f32 %v910_v4, %v395_v60  ;;  %v127_v46 = vld [vmem:[#allocation2 + $0x228] sm:$0xff] }
  0x4e   :  { %v636_v16 = vadd.f32 %v635_v63, %v124_v8  ;;  %v775_v24 = vadd.f32 %v774_v7, %v261_v62  ;;  %v398_v53 = vld [vmem:[#allocation2 + $0xaa0] sm:$0xff]  ;;  %v6325_v60 = vld [vmem:[#allocation2 + $0xc8] sm:$0xff]  ;;  %v128_v1 = vld [vmem:[#allocation2 + $0x230] sm:$0xff] }
  0x4f   :  { %v862_v35 = vadd.f32 %v861_v22, %v347_v15  ;;  %v262_v15 = vld [vmem:[#allocation2 + $0x660] sm:$0xff]  ;;  %v6319_v22 = vld [vmem:[#allocation2 + $0xb8] sm:$0xff]  ;;  %v591_v31 = vadd.f32 %v590_v13, %v6316_v2  ;;  %v725_v37 = vadd.f32 %v724_v21, %v212_v12  ;;  %v912_v39 = vadd.f32 %v911_v23, %v396_v14  ;;  %v215_v7 = vld [vmem:[#allocation2 + $0x4e8] sm:$0xff] }
  0x50   :  { %v776_v43 = vadd.f32 %v775_v24, %v262_v15  ;;  %v354_v58 = vld [vmem:[#allocation2 + $0x940] sm:$0xff]  ;;  %v1105_v12 = vmul.f32 %v6251_v41, %v6251_v41  ;;  %v355_v13 = vld [vmem:[#allocation2 + $0x948] sm:$0xff]  ;;  %v6330_v15 = vld [vmem:[#allocation2 + $0xd0] sm:$0xff]  ;;  %v1106_v24 = vmul.f32 %v6253_v42, %v6253_v42  ;;  %v1107_v41 = vmul.f32 %v6255_v45, %v6255_v45 }
  0x51   :  { %v863_v54 = vadd.f32 %v862_v35, %v348_v27  ;;  %v213_v27 = vld [vmem:[#allocation2 + $0x4d8] sm:$0xff]  ;;  %v592_v52 = vadd.f32 %v591_v31, %v6319_v22  ;;  %v913_v62 = vadd.f32 %v912_v39, %v397_v33  ;;  %v266_v31 = vld [vmem:[#allocation2 + $0x680] sm:$0xff] }
  0x52   :  { %v353_v35 = vld [vmem:[#allocation2 + $0x938] sm:$0xff]  ;;  %v726_v59 = vadd.f32 %v725_v37, %v213_v27  ;;  %v777_v63 = vadd.f32 %v776_v43, %v263_v34  ;;  %v400_v27 = vld [vmem:[#allocation2 + $0xab0] sm:$0xff] }
  0x53   :  { %v864_v10 = vadd.f32 %v863_v54, %v349_v30  ;;  %v637_v30 = vadd.f32 %v636_v16, %v125_v9  ;;  %v264_v54 = vld [vmem:[#allocation2 + $0x670] sm:$0xff]  ;;  %v593_v8 = vadd.f32 %v592_v52, %v6322_v38  ;;  %v399_v9 = vld [vmem:[#allocation2 + $0xaa8] sm:$0xff]  ;;  %v914_v16 = vadd.f32 %v913_v62, %v398_v53  ;;  %v129_v23 = vld [vmem:[#allocation2 + $0x238] sm:$0xff] }
  0x54   :  { %v727_v14 = vadd.f32 %v726_v59, %v214_v51  ;;  %v778_v21 = vadd.f32 %v777_v63, %v264_v54  ;;  %v356_v34 = vld [vmem:[#allocation2 + $0x950] sm:$0xff]  ;;  %v6337_v37 = vld [vmem:[#allocation2 + $0xd8] sm:$0xff]  ;;  %v267_v53 = vld [vmem:[#allocation2 + $0x688] sm:$0xff] }
  0x55   :  { %v865_v26 = vadd.f32 %v864_v10, %v350_v44  ;;  %v638_v44 = vadd.f32 %v637_v30, %v126_v25  ;;  %v265_v10 = vld [vmem:[#allocation2 + $0x678] sm:$0xff]  ;;  %v216_v25 = vld [vmem:[#allocation2 + $0x4f0] sm:$0xff]  ;;  %v915_v39 = vadd.f32 %v914_v16, %v399_v9  ;;  %v6342_v62 = vld [vmem:[#allocation2 + $0xe0] sm:$0xff] }
  0x56   :  { %v728_v30 = vadd.f32 %v727_v14, %v215_v7  ;;  %v779_v43 = vadd.f32 %v778_v21, %v265_v10  ;;  %v217_v42 = vld [vmem:[#allocation2 + $0x4f8] sm:$0xff]  ;;  %v218_v9 = vld [vmem:[#allocation2 + $0x500] sm:$0xff]  ;;  %v1109_v14 = vmul.f32 %v6262_v55, %v6262_v55  ;;  %v6347_v21 = vld [vmem:[#allocation2 + $0xe8] sm:$0xff] }
  0x57   :  { %v866_v50 = vadd.f32 %v865_v26, %v351_v0  ;;  %v639_v0 = vadd.f32 %v638_v44, %v127_v46  ;;  %v594_v26 = vadd.f32 %v593_v8, %v6325_v60  ;;  %v130_v46 = vld [vmem:[#allocation2 + $0x240] sm:$0xff]  ;;  %v401_v52 = vld [vmem:[#allocation2 + $0xab8] sm:$0xff]  ;;  %v1108_v44 = vmul.f32 %v6259_v49, %v6259_v49 }
  0x58   :  { %v357_v59 = vld [vmem:[#allocation2 + $0x958] sm:$0xff]  ;;  %v729_v45 = vadd.f32 %v728_v30, %v216_v25  ;;  %v916_v63 = vadd.f32 %v915_v39, %v400_v27  ;;  %v402_v10 = vld [vmem:[#allocation2 + $0xac0] sm:$0xff]  ;;  %v219_v27 = vld [vmem:[#allocation2 + $0x508] sm:$0xff]  ;;  %v1110_v30 = vmul.f32 %v6265_v61, %v6265_v61 }
  0x59   :  { %v867_v4 = vadd.f32 %v866_v50, %v352_v19  ;;  %v640_v33 = vadd.f32 %v639_v0, %v128_v1  ;;  %v1617_v50 = vadd.f32 %v1106_v24, %v1105_v12  ;;  %v780_v1 = vadd.f32 %v779_v43, %v266_v31  ;;  %v268_v0 = vld [vmem:[#allocation2 + $0x690] sm:$0xff]  ;;  %v358_v16 = vld [vmem:[#allocation2 + $0x960] sm:$0xff]  ;;  %v403_v31 = vld [vmem:[#allocation2 + $0xac8] sm:$0xff] }
  0x5a   :  { %v730_v49 = vadd.f32 %v729_v45, %v217_v42  ;;  %v359_v39 = vld [vmem:[#allocation2 + $0x968] sm:$0xff]  ;;  %v6352_v43 = vld [vmem:[#allocation2 + $0xf0] sm:$0xff]  ;;  %v1111_v45 = vmul.f32 %v6268_v3, %v6268_v3 }
  0x5b   :  { %v868_v19 = vadd.f32 %v867_v4, %v353_v35  ;;  %v595_v35 = vadd.f32 %v594_v26, %v6330_v15  ;;  %v641_v54 = vadd.f32 %v640_v33, %v129_v23  ;;  %v131_v4 = vld [vmem:[#allocation2 + $0x248] sm:$0xff]  ;;  %v1618_v7 = vadd.f32 %v1617_v50, %v1107_v41  ;;  %v269_v33 = vld [vmem:[#allocation2 + $0x698] sm:$0xff] }
  0x5c   :  { %v917_v23 = vadd.f32 %v916_v63, %v401_v52  ;;  %v781_v24 = vadd.f32 %v780_v1, %v267_v53  ;;  %v731_v55 = vadd.f32 %v730_v49, %v218_v9  ;;  %v220_v52 = vld [vmem:[#allocation2 + $0x510] sm:$0xff]  ;;  %v6357_v1 = vld [vmem:[#allocation2 + $0xf8] sm:$0xff]  ;;  %v1112_v49 = vmul.f32 %v6271_v11, %v6271_v11 }
  0x5d   :  { %v869_v51 = vadd.f32 %v868_v19, %v354_v58  ;;  %v596_v58 = vadd.f32 %v595_v35, %v6337_v37  ;;  %v642_v12 = vadd.f32 %v641_v54, %v130_v46  ;;  %v132_v19 = vld [vmem:[#allocation2 + $0x250] sm:$0xff]  ;;  %v1619_v25 = vadd.f32 %v1618_v7, %v1108_v44  ;;  %v270_v54 = vld [vmem:[#allocation2 + $0x6a0] sm:$0xff] }
  0x5e   :  { %v918_v46 = vadd.f32 %v917_v23, %v402_v10  ;;  %v782_v50 = vadd.f32 %v781_v24, %v268_v0  ;;  %v404_v53 = vld [vmem:[#allocation2 + $0xad0] sm:$0xff]  ;;  %v732_v61 = vadd.f32 %v731_v55, %v219_v27  ;;  %v221_v10 = vld [vmem:[#allocation2 + $0x518] sm:$0xff]  ;;  %v6362_v24 = vld [vmem:[#allocation2 + $0x100] sm:$0xff]  ;;  %v1113_v55 = vmul.f32 %v6274_v20, %v6274_v20 }
  0x5f   :  { %v870_v8 = vadd.f32 %v869_v51, %v355_v13  ;;  %v597_v13 = vadd.f32 %v596_v58, %v6342_v62  ;;  %v643_v41 = vadd.f32 %v642_v12, %v131_v4  ;;  %v133_v51 = vld [vmem:[#allocation2 + $0x258] sm:$0xff]  ;;  %v1620_v42 = vadd.f32 %v1619_v25, %v1109_v14  ;;  %v360_v63 = vld [vmem:[#allocation2 + $0x970] sm:$0xff]  ;;  %v271_v12 = vld [vmem:[#allocation2 + $0x6a8] sm:$0xff] }
  0x60   :  { %v919_v4 = vadd.f32 %v918_v46, %v403_v31  ;;  %v783_v7 = vadd.f32 %v782_v50, %v269_v33  ;;  %v405_v0 = vld [vmem:[#allocation2 + $0xad8] sm:$0xff]  ;;  %v733_v3 = vadd.f32 %v732_v61, %v220_v52  ;;  %v222_v31 = vld [vmem:[#allocation2 + $0x520] sm:$0xff]  ;;  %v6367_v50 = vld [vmem:[#allocation2 + $0x108] sm:$0xff]  ;;  %v1114_v61 = vmul.f32 %v6277_v28, %v6277_v28 }
  0x61   :  { %v871_v26 = vadd.f32 %v870_v8, %v356_v34  ;;  %v598_v34 = vadd.f32 %v597_v13, %v6347_v21  ;;  %v644_v44 = vadd.f32 %v643_v41, %v132_v19  ;;  %v134_v8 = vld [vmem:[#allocation2 + $0x260] sm:$0xff]  ;;  %v1621_v9 = vadd.f32 %v1620_v42, %v1110_v30  ;;  %v361_v23 = vld [vmem:[#allocation2 + $0x978] sm:$0xff]  ;;  %v272_v41 = vld [vmem:[#allocation2 + $0x6b0] sm:$0xff] }
  0x62   :  { %v920_v19 = vadd.f32 %v919_v4, %v404_v53  ;;  %v784_v25 = vadd.f32 %v783_v7, %v270_v54  ;;  %v406_v33 = vld [vmem:[#allocation2 + $0xae0] sm:$0xff]  ;;  %v734_v11 = vadd.f32 %v733_v3, %v221_v10  ;;  %v223_v53 = vld [vmem:[#allocation2 + $0x528] sm:$0xff]  ;;  %v6372_v7 = vld [vmem:[#allocation2 + $0x110] sm:$0xff] }
  0x63   :  { %v872_v35 = vadd.f32 %v871_v26, %v357_v59  ;;  %v599_v59 = vadd.f32 %v598_v34, %v6352_v43  ;;  %v645_v14 = vadd.f32 %v644_v44, %v133_v51  ;;  %v135_v26 = vld [vmem:[#allocation2 + $0x268] sm:$0xff]  ;;  %v1622_v27 = vadd.f32 %v1621_v9, %v1111_v45  ;;  %v362_v46 = vld [vmem:[#allocation2 + $0x980] sm:$0xff]  ;;  %v273_v44 = vld [vmem:[#allocation2 + $0x6b8] sm:$0xff] }
  0x64   :  { %v921_v51 = vadd.f32 %v920_v19, %v405_v0  ;;  %v785_v42 = vadd.f32 %v784_v25, %v271_v12  ;;  %v407_v54 = vld [vmem:[#allocation2 + $0xae8] sm:$0xff]  ;;  %v735_v20 = vadd.f32 %v734_v11, %v222_v31  ;;  %v224_v0 = vld [vmem:[#allocation2 + $0x530] sm:$0xff]  ;;  %v6375_v25 = vld [vmem:[#allocation2 + $0x118] sm:$0xff] }
  0x65   :  { %v873_v58 = vadd.f32 %v872_v35, %v358_v16  ;;  %v600_v16 = vadd.f32 %v599_v59, %v6357_v1  ;;  %v646_v30 = vadd.f32 %v645_v14, %v134_v8  ;;  %v136_v35 = vld [vmem:[#allocation2 + $0x270] sm:$0xff]  ;;  %v1623_v52 = vadd.f32 %v1622_v27, %v1112_v49  ;;  %v363_v4 = vld [vmem:[#allocation2 + $0x988] sm:$0xff]  ;;  %v274_v14 = vld [vmem:[#allocation2 + $0x6c0] sm:$0xff] }
  0x66   :  { %v922_v8 = vadd.f32 %v921_v51, %v406_v33  ;;  %v786_v9 = vadd.f32 %v785_v42, %v272_v41  ;;  %v408_v12 = vld [vmem:[#allocation2 + $0xaf0] sm:$0xff]  ;;  %v736_v19 = vadd.f32 %v735_v20, %v223_v53  ;;  %v138_v27 = vld [vmem:[#allocation2 + $0x280] sm:$0xff]  ;;  %v225_v31 = vld [vmem:[#allocation2 + $0x538] sm:$0xff] }
  0x67   :  { %v874_v13 = vadd.f32 %v873_v58, %v359_v39  ;;  %v601_v39 = vadd.f32 %v600_v16, %v6362_v24  ;;  %v647_v45 = vadd.f32 %v646_v30, %v135_v26  ;;  %v137_v58 = vld [vmem:[#allocation2 + $0x278] sm:$0xff]  ;;  %v1624_v10 = vadd.f32 %v1623_v52, %v1113_v55  ;;  %v364_v3 = vld [vmem:[#allocation2 + $0x990] sm:$0xff]  ;;  %v275_v41 = vld [vmem:[#allocation2 + $0x6c8] sm:$0xff] }
  0x68   :  { %v923_v28 = vadd.f32 %v922_v8, %v407_v54  ;;  %v787_v26 = vadd.f32 %v786_v9, %v273_v44  ;;  %v409_v33 = vld [vmem:[#allocation2 + $0xaf8] sm:$0xff]  ;;  %v1115_v30 = vmul.f32 %v6280_v36, %v6280_v36  ;;  %v737_v11 = vadd.f32 %v736_v19, %v224_v0  ;;  %v6380_v51 = vld [vmem:[#allocation2 + $0x120] sm:$0xff]  ;;  %v139_v52 = vld [vmem:[#allocation2 + $0x288] sm:$0xff] }
  0x69   :  { %v875_v34 = vadd.f32 %v874_v13, %v360_v63  ;;  %v602_v63 = vadd.f32 %v601_v39, %v6367_v50  ;;  %v648_v49 = vadd.f32 %v647_v45, %v136_v35  ;;  %v365_v55 = vld [vmem:[#allocation2 + $0x998] sm:$0xff]  ;;  %v226_v39 = vld [vmem:[#allocation2 + $0x540] sm:$0xff]  ;;  %v276_v44 = vld [vmem:[#allocation2 + $0x6d0] sm:$0xff] }
  0x6a   :  { %v924_v42 = vadd.f32 %v923_v28, %v408_v12  ;;  %v788_v35 = vadd.f32 %v787_v26, %v274_v14  ;;  %v410_v54 = vld [vmem:[#allocation2 + $0xb00] sm:$0xff]  ;;  %v738_v8 = vadd.f32 %v737_v11, %v225_v31  ;;  %v6383_v9 = vld [vmem:[#allocation2 + $0x128] sm:$0xff]  ;;  %v6388_v28 = vld [vmem:[#allocation2 + $0x130] sm:$0xff] }
  0x6b   :  { %v876_v59 = vadd.f32 %v875_v34, %v361_v23  ;;  %v603_v16 = vadd.f32 %v602_v63, %v6372_v7  ;;  %v649_v23 = vadd.f32 %v648_v49, %v137_v58  ;;  %v1625_v34 = vadd.f32 %v1624_v10, %v1114_v61  ;;  %v366_v20 = vld [vmem:[#allocation2 + $0x9a0] sm:$0xff]  ;;  %10918 = vst [vmem:[#allocation12_spill] sm:$0xff] %v6383_v9  ;;  %v227_v63 = vld [vmem:[#allocation2 + $0x548] sm:$0xff]  ;;  %v277_v61 = vld [vmem:[#allocation2 + $0x6d8] sm:$0xff] }
  0x6c   :  { %v925_v36 = vadd.f32 %v924_v42, %v409_v33  ;;  %v789_v58 = vadd.f32 %v788_v35, %v275_v41  ;;  %v411_v14 = vld [vmem:[#allocation2 + $0xb08] sm:$0xff]  ;;  %v1116_v10 = vmul.f32 %v6283_v47, %v6283_v47  ;;  %v739_v19 = vadd.f32 %v738_v8, %v226_v39  ;;  %10919 = vst [vmem:[#allocation13_spill] sm:$0xff] %v6388_v28  ;;  %v228_v33 = vld [vmem:[#allocation2 + $0x550] sm:$0xff]  ;;  %v229_v35 = vld [vmem:[#allocation2 + $0x558] sm:$0xff] }
  0x6d   :  { %v877_v13 = vadd.f32 %v876_v59, %v362_v46  ;;  %v604_v46 = vadd.f32 %v603_v16, %v6375_v25  ;;  %v650_v45 = vadd.f32 %v649_v23, %v138_v27  ;;  %v140_v59 = vld [vmem:[#allocation2 + $0x290] sm:$0xff]  ;;  %v367_v49 = vld [vmem:[#allocation2 + $0x9a8] sm:$0xff]  ;;  %v1626_v31 = vadd.f32 %v1625_v34, %v1115_v30  ;;  %v278_v23 = vld [vmem:[#allocation2 + $0x6e0] sm:$0xff] }
  0x6e   :  { %v926_v26 = vadd.f32 %v925_v36, %v410_v54  ;;  %v790_v27 = vadd.f32 %v789_v58, %v276_v44  ;;  %v412_v41 = vld [vmem:[#allocation2 + $0xb10] sm:$0xff]  ;;  %v6393_v54 = vld [vmem:[#allocation2 + $0x140] sm:$0xff]  ;;  %v279_v34 = vld [vmem:[#allocation2 + $0x6e8] sm:$0xff]  ;;  %v1117_v8 = vmul.f32 %v6286_v57, %v6286_v57 }
  0x6f   :  { %v878_v53 = vadd.f32 %v877_v13, %v363_v4  ;;  %v605_v12 = vadd.f32 %v604_v46, %v6380_v51  ;;  %v651_v4 = vadd.f32 %v650_v45, %v139_v52  ;;  %v141_v13 = vld [vmem:[#allocation2 + $0x298] sm:$0xff]  ;;  %v368_v42 = vld [vmem:[#allocation2 + $0x9b0] sm:$0xff]  ;;  %v740_v52 = vadd.f32 %v739_v19, %v227_v63  ;;  %v142_v46 = vld [vmem:[#allocation2 + $0x2a0] sm:$0xff]  ;;  %10921 = vst [vmem:[#allocation15_spill] sm:$0xff] %v6393_v54 }
  0x70   :  { %v927_v47 = vadd.f32 %v926_v26, %v411_v14  ;;  %v791_v39 = vadd.f32 %v790_v27, %v277_v61  ;;  %v369_v36 = vld [vmem:[#allocation2 + $0x9b8] sm:$0xff]  ;;  %v230_v58 = vld [vmem:[#allocation2 + $0x560] sm:$0xff]  ;;  %v143_v14 = vld [vmem:[#allocation2 + $0x2a8] sm:$0xff]  ;;  %v1627_v61 = vadd.f32 %v1626_v31, %v1116_v10 }
  0x71   :  { %v879_v0 = vadd.f32 %v878_v53, %v364_v3  ;;  %v606_v3 = vadd.f32 %v605_v12, %v6383_v9  ;;  %v652_v11 = vadd.f32 %v651_v4, %v140_v59  ;;  %v6391_v53 = vld [vmem:[#allocation2 + $0x138] sm:$0xff]  ;;  %v741_v59 = vadd.f32 %v740_v52, %v228_v33  ;;  %v6398_v19 = vld [vmem:[#allocation2 + $0x148] sm:$0xff]  ;;  %v280_v27 = vld [vmem:[#allocation2 + $0x6f0] sm:$0xff] }
  0x72   :  { %10920 = vst [vmem:[#allocation14_spill] sm:$0xff] %v6391_v53  ;;  %v928_v63 = vadd.f32 %v927_v47, %v412_v41  ;;  %v792_v12 = vadd.f32 %v791_v39, %v278_v23  ;;  %v144_v33 = vld [vmem:[#allocation2 + $0x2b0] sm:$0xff]  ;;  %v506_v31 = vld [vmem:[#allocation2 + $0xe00] sm:$0xff]  ;;  %v1118_v47 = vmul.f32 %v6289_v5, %v6289_v5  ;;  %v371_v39 = vld [vmem:[#allocation2 + $0x9c8] sm:$0xff] }
  0x73   :  { %v880_v16 = vadd.f32 %v879_v0, %v365_v55  ;;  %v607_v30 = vadd.f32 %v606_v3, %v6388_v28  ;;  %v413_v55 = vld [vmem:[#allocation2 + $0xb18] sm:$0xff]  ;;  %v653_v44 = vadd.f32 %v652_v11, %v141_v13  ;;  %v414_v0 = vld [vmem:[#allocation2 + $0xb20] sm:$0xff]  ;;  %10922 = vst [vmem:[#allocation16_spill] sm:$0xff] %v6398_v19  ;;  %v742_v3 = vadd.f32 %v741_v59, %v229_v35  ;;  %v415_v11 = vld [vmem:[#allocation2 + $0xb28] sm:$0xff] }
  0x74   :  { %v370_v13 = vld [vmem:[#allocation2 + $0x9c0] sm:$0xff]  ;;  %v929_v57 = vadd.f32 %v928_v63, %v413_v55  ;;  %v281_v28 = vld [vmem:[#allocation2 + $0x6f8] sm:$0xff]  ;;  %v793_v9 = vadd.f32 %v792_v12, %v279_v34  ;;  %v232_v41 = vld [vmem:[#allocation2 + $0x570] sm:$0xff]  ;;  %v1628_v34 = vadd.f32 %v1627_v61, %v1117_v8 }
  0x75   :  { %v881_v45 = vadd.f32 %v880_v16, %v366_v20  ;;  %v231_v20 = vld [vmem:[#allocation2 + $0x568] sm:$0xff]  ;;  %v608_v26 = vadd.f32 %v607_v30, %v6391_v53  ;;  %v654_v16 = vadd.f32 %v653_v44, %v142_v46  ;;  %v6401_v23 = vld [vmem:[#allocation2 + $0x150] sm:$0xff]  ;;  %v743_v46 = vadd.f32 %v742_v3, %v230_v58  ;;  %v145_v55 = vld [vmem:[#allocation2 + $0x2b8] sm:$0xff] }
  0x76   :  { %10923 = vst [vmem:[#allocation17_spill] sm:$0xff] %v6401_v23  ;;  %v930_v35 = vadd.f32 %v929_v57, %v414_v0  ;;  %v794_v30 = vadd.f32 %v793_v9, %v280_v27  ;;  %v507_v44 = vld [vmem:[#allocation2 + $0xe08] sm:$0xff]  ;;  %v282_v12 = vld [vmem:[#allocation2 + $0x700] sm:$0xff]  ;;  %v509_v0 = vld [vmem:[#allocation2 + $0xe18] sm:$0xff]  ;;  %v1119_v9 = vmul.f32 %v6292_v17, %v6292_v17 }
  0x77   :  { %v882_v4 = vadd.f32 %v881_v45, %v367_v49  ;;  %v609_v10 = vadd.f32 %v608_v26, %v6393_v54  ;;  %v655_v49 = vadd.f32 %v654_v16, %v143_v14  ;;  %v416_v45 = vld [vmem:[#allocation2 + $0xb30] sm:$0xff]  ;;  %v1025_v26 = vadd.f32 %v507_v44, %v506_v31  ;;  %v233_v54 = vld [vmem:[#allocation2 + $0x578] sm:$0xff]  ;;  %v146_v3 = vld [vmem:[#allocation2 + $0x2c0] sm:$0xff] }
  0x78   :  { %v508_v14 = vld [vmem:[#allocation2 + $0xe10] sm:$0xff]  ;;  %v744_v5 = vadd.f32 %v743_v46, %v231_v20  ;;  %v931_v53 = vadd.f32 %v930_v35, %v415_v11  ;;  %v795_v58 = vadd.f32 %v794_v30, %v281_v28  ;;  %v417_v27 = vld [vmem:[#allocation2 + $0xb38] sm:$0xff]  ;;  %v283_v57 = vld [vmem:[#allocation2 + $0x708] sm:$0xff]  ;;  %v1629_v35 = vadd.f32 %v1628_v34, %v1118_v47 }
  0x79   :  { %v883_v52 = vadd.f32 %v882_v4, %v368_v42  ;;  %v6406_v42 = vld [vmem:[#allocation2 + $0x158] sm:$0xff]  ;;  %v610_v63 = vadd.f32 %v609_v10, %v6398_v19  ;;  %v656_v4 = vadd.f32 %v655_v49, %v144_v33  ;;  %v372_v16 = vld [vmem:[#allocation2 + $0x9d0] sm:$0xff]  ;;  %v234_v49 = vld [vmem:[#allocation2 + $0x580] sm:$0xff] }
  0x7a   :  { %v373_v10 = vld [vmem:[#allocation2 + $0x9d8] sm:$0xff]  ;;  %v745_v31 = vadd.f32 %v744_v5, %v232_v41  ;;  %v932_v20 = vadd.f32 %v931_v53, %v416_v45  ;;  %v796_v11 = vadd.f32 %v795_v58, %v282_v12  ;;  %v147_v28 = vld [vmem:[#allocation2 + $0x2c8] sm:$0xff]  ;;  %v510_v46 = vld [vmem:[#allocation2 + $0xe20] sm:$0xff]  ;;  %v1120_v45 = vmul.f32 %v6295_v29, %v6295_v29 }
  0x7b   :  { %v884_v59 = vadd.f32 %v883_v52, %v369_v36  ;;  %v6411_v36 = vld [vmem:[#allocation2 + $0x160] sm:$0xff]  ;;  %v611_v61 = vadd.f32 %v610_v63, %v6401_v23  ;;  %v657_v33 = vadd.f32 %v656_v4, %v145_v55  ;;  %v1026_v52 = vadd.f32 %v1025_v26, %v508_v14  ;;  %v6414_v44 = vld [vmem:[#allocation2 + $0x168] sm:$0xff]  ;;  %v148_v41 = vld [vmem:[#allocation2 + $0x2d0] sm:$0xff] }
  0x7c   :  { %10924 = vst [vmem:[#allocation18_spill] sm:$0xff] %v6411_v36  ;;  %v374_v19 = vld [vmem:[#allocation2 + $0x9e0] sm:$0xff]  ;;  %v235_v55 = vld [vmem:[#allocation2 + $0x588] sm:$0xff]  ;;  %v746_v4 = vadd.f32 %v745_v31, %v233_v54  ;;  %v933_v14 = vadd.f32 %v932_v20, %v417_v27  ;;  %v797_v26 = vadd.f32 %v796_v11, %v283_v57  ;;  %v285_v5 = vld [vmem:[#allocation2 + $0x718] sm:$0xff] }
  0x7d   :  { %v885_v8 = vadd.f32 %v884_v59, %v370_v13  ;;  %v612_v17 = vadd.f32 %v611_v61, %v6406_v42  ;;  %v418_v13 = vld [vmem:[#allocation2 + $0xb40] sm:$0xff]  ;;  %v284_v59 = vld [vmem:[#allocation2 + $0x710] sm:$0xff]  ;;  %v658_v63 = vadd.f32 %v657_v33, %v146_v3  ;;  %v1027_v23 = vadd.f32 %v1026_v52, %v509_v0  ;;  %v511_v53 = vld [vmem:[#allocation2 + $0xe28] sm:$0xff] }
  0x7e   :  { %v419_v12 = vld [vmem:[#allocation2 + $0xb48] sm:$0xff]  ;;  %v747_v61 = vadd.f32 %v746_v4, %v234_v49  ;;  %v934_v54 = vadd.f32 %v933_v14, %v418_v13  ;;  %v798_v27 = vadd.f32 %v797_v26, %v284_v59  ;;  %v149_v57 = vld [vmem:[#allocation2 + $0x2d8] sm:$0xff]  ;;  %v512_v33 = vld [vmem:[#allocation2 + $0xe30] sm:$0xff]  ;;  %v1630_v52 = vadd.f32 %v1629_v35, %v1119_v9 }
  0x7f   :  { %v886_v30 = vadd.f32 %v885_v8, %v371_v39  ;;  %v6419_v39 = vld [vmem:[#allocation2 + $0x170] sm:$0xff]  ;;  %v613_v34 = vadd.f32 %v612_v17, %v6411_v36  ;;  %v659_v58 = vadd.f32 %v658_v63, %v147_v28  ;;  %v1028_v3 = vadd.f32 %v1027_v23, %v510_v46  ;;  %v375_v0 = vld [vmem:[#allocation2 + $0x9e8] sm:$0xff]  ;;  %v6422_v20 = vld [vmem:[#allocation2 + $0x178] sm:$0xff] }
  0x80   :  { %10925 = vst [vmem:[#allocation19_spill] sm:$0xff] %v6419_v39  ;;  %v236_v8 = vld [vmem:[#allocation2 + $0x590] sm:$0xff]  ;;  %v286_v11 = vld [vmem:[#allocation2 + $0x720] sm:$0xff]  ;;  %v237_v28 = vld [vmem:[#allocation2 + $0x598] sm:$0xff]  ;;  %v748_v23 = vadd.f32 %v747_v61, %v235_v55  ;;  %v935_v46 = vadd.f32 %v934_v54, %v419_v12  ;;  %v799_v63 = vadd.f32 %v798_v27, %v285_v5  ;;  %v1121_v59 = vmul.f32 %v6298_v40, %v6298_v40 }
  0x81   :  { %v887_v47 = vadd.f32 %v886_v30, %v372_v16  ;;  %v614_v29 = vadd.f32 %v613_v34, %v6414_v44  ;;  %v420_v16 = vld [vmem:[#allocation2 + $0xb50] sm:$0xff]  ;;  %v660_v30 = vadd.f32 %v659_v58, %v148_v41  ;;  %v1029_v17 = vadd.f32 %v1028_v3, %v511_v53  ;;  %v150_v49 = vld [vmem:[#allocation2 + $0x2e0] sm:$0xff]  ;;  %v513_v13 = vld [vmem:[#allocation2 + $0xe38] sm:$0xff] }
  0x82   :  { %v376_v36 = vld [vmem:[#allocation2 + $0x9f0] sm:$0xff]  ;;  %v421_v4 = vld [vmem:[#allocation2 + $0xb58] sm:$0xff]  ;;  %v287_v14 = vld [vmem:[#allocation2 + $0x728] sm:$0xff]  ;;  %v749_v34 = vadd.f32 %v748_v23, %v236_v8  ;;  %v936_v55 = vadd.f32 %v935_v46, %v420_v16  ;;  %v800_v12 = vadd.f32 %v799_v63, %v286_v11  ;;  %v1631_v3 = vadd.f32 %v1630_v52, %v1120_v45 }
  0x83   :  { %v888_v31 = vadd.f32 %v887_v47, %v373_v10  ;;  %v6427_v10 = vld [vmem:[#allocation2 + $0x180] sm:$0xff]  ;;  %v615_v35 = vadd.f32 %v614_v29, %v6419_v39  ;;  %v661_v26 = vadd.f32 %v660_v30, %v149_v57  ;;  %v1030_v41 = vadd.f32 %v1029_v17, %v512_v33  ;;  %v377_v53 = vld [vmem:[#allocation2 + $0x9f8] sm:$0xff]  ;;  %v151_v5 = vld [vmem:[#allocation2 + $0x2e8] sm:$0xff] }
  0x84   :  { %v238_v47 = vld [vmem:[#allocation2 + $0x5a0] sm:$0xff]  ;;  %v6430_v54 = vld [vmem:[#allocation2 + $0x188] sm:$0xff]  ;;  %v288_v27 = vld [vmem:[#allocation2 + $0x730] sm:$0xff]  ;;  %v750_v57 = vadd.f32 %v749_v34, %v237_v28  ;;  %v937_v33 = vadd.f32 %v936_v55, %v421_v4  ;;  %v801_v30 = vadd.f32 %v800_v12, %v287_v14  ;;  %v1122_v16 = vmul.f32 %v6301_v56, %v6301_v56 }
  0x85   :  { %v889_v9 = vadd.f32 %v888_v31, %v374_v19  ;;  %v514_v58 = vld [vmem:[#allocation2 + $0xe40] sm:$0xff]  ;;  %v616_v40 = vadd.f32 %v615_v35, %v6422_v20  ;;  %v662_v31 = vadd.f32 %v661_v26, %v150_v49  ;;  %v1031_v29 = vadd.f32 %v1030_v41, %v513_v13  ;;  %v239_v39 = vld [vmem:[#allocation2 + $0x5a8] sm:$0xff]  ;;  %v152_v17 = vld [vmem:[#allocation2 + $0x2f0] sm:$0xff] }
  0x86   :  { %v422_v19 = vld [vmem:[#allocation2 + $0xb60] sm:$0xff]  ;;  %v515_v8 = vld [vmem:[#allocation2 + $0xe48] sm:$0xff]  ;;  %v6435_v45 = vld [vmem:[#allocation2 + $0x190] sm:$0xff]  ;;  %v751_v13 = vadd.f32 %v750_v57, %v238_v47  ;;  %v802_v28 = vadd.f32 %v801_v30, %v288_v27  ;;  %v1632_v14 = vadd.f32 %v1631_v3, %v1121_v59 }
  0x87   :  { %v890_v61 = vadd.f32 %v889_v9, %v375_v0  ;;  %v617_v0 = vadd.f32 %v616_v40, %v6427_v10  ;;  %v423_v52 = vld [vmem:[#allocation2 + $0xb68] sm:$0xff]  ;;  %v289_v23 = vld [vmem:[#allocation2 + $0x738] sm:$0xff]  ;;  %v663_v46 = vadd.f32 %v662_v31, %v151_v5  ;;  %v1032_v63 = vadd.f32 %v1031_v29, %v514_v58  ;;  %v240_v49 = vld [vmem:[#allocation2 + $0x5b0] sm:$0xff] }
  0x88   :  { %v938_v9 = vadd.f32 %v937_v33, %v422_v19  ;;  %v153_v35 = vld [vmem:[#allocation2 + $0x2f8] sm:$0xff]  ;;  %v516_v4 = vld [vmem:[#allocation2 + $0xe50] sm:$0xff]  ;;  %v290_v34 = vld [vmem:[#allocation2 + $0x740] sm:$0xff]  ;;  %v803_v58 = vadd.f32 %v802_v28, %v289_v23  ;;  %v1123_v19 = vmul.f32 %v6304_v6, %v6304_v6  ;;  %v1125_v28 = vmul.f32 %v6310_v32, %v6310_v32 }
  0x89   :  { %v891_v11 = vadd.f32 %v890_v61, %v376_v36  ;;  %v241_v41 = vld [vmem:[#allocation2 + $0x5b8] sm:$0xff]  ;;  %v618_v56 = vadd.f32 %v617_v0, %v6430_v54  ;;  %v424_v36 = vld [vmem:[#allocation2 + $0xb70] sm:$0xff]  ;;  %v664_v55 = vadd.f32 %v663_v46, %v152_v17  ;;  %v1033_v12 = vadd.f32 %v1032_v63, %v515_v8  ;;  %v154_v31 = vld [vmem:[#allocation2 + $0x300] sm:$0xff] }
  0x8a   :  { %v752_v61 = vadd.f32 %v751_v13, %v239_v39  ;;  %v6439_v40 = vld [vmem:[#allocation2 + $0x198] sm:$0xff]  ;;  %v939_v5 = vadd.f32 %v938_v9, %v423_v52  ;;  %v242_v59 = vld [vmem:[#allocation2 + $0x5c0] sm:$0xff]  ;;  %v291_v27 = vld [vmem:[#allocation2 + $0x748] sm:$0xff]  ;;  %v1124_v39 = vmul.f32 %v6307_v18, %v6307_v18  ;;  %v804_v8 = vadd.f32 %v803_v58, %v290_v34 }
  0x8b   :  { %v892_v26 = vadd.f32 %v891_v11, %v377_v53  ;;  %v517_v47 = vld [vmem:[#allocation2 + $0xe58] sm:$0xff]  ;;  %v619_v53 = vadd.f32 %v618_v56, %v6435_v45  ;;  %v665_v29 = vadd.f32 %v664_v55, %v153_v35  ;;  %v1034_v57 = vadd.f32 %v1033_v12, %v516_v4  ;;  %v6446_v30 = vld [vmem:[#allocation2 + $0x1a0] sm:$0xff]  ;;  %v155_v11 = vld [vmem:[#allocation2 + $0x308] sm:$0xff] }
  0x8c   :  { %v425_v3 = vld [vmem:[#allocation2 + $0xb78] sm:$0xff]  ;;  %v753_v33 = vadd.f32 %v752_v61, %v240_v49  ;;  %v940_v17 = vadd.f32 %v939_v5, %v424_v36  ;;  %v518_v0 = vld [vmem:[#allocation2 + $0xe60] sm:$0xff]  ;;  %v1633_v52 = vadd.f32 %v1632_v14, %v1122_v16  ;;  %v243_v6 = vld [vmem:[#allocation2 + $0x5c8] sm:$0xff]  ;;  %v805_v4 = vadd.f32 %v804_v8, %v291_v27 }
  0x8d   :  { %893 = vadd.xlane.f32.xlu2 %v892_v26  ;;  %v620_v23 = vadd.f32 %v619_v53, %v6439_v40  ;;  %v426_v46 = vld [vmem:[#allocation2 + $0xb80] sm:$0xff]  ;;  %v292_v63 = vld [vmem:[#allocation2 + $0x750] sm:$0xff]  ;;  %v666_v13 = vadd.f32 %v665_v29, %v154_v31  ;;  %v1035_v9 = vadd.f32 %v1034_v57, %v517_v47  ;;  %v6451_v18 = vld [vmem:[#allocation2 + $0x1a8] sm:$0xff]  ;;  %v1126_v5 = vmul.f32 %v6313_v48, %v6313_v48 }
  0x8e   :  { %v754_v35 = vadd.f32 %v753_v33, %v241_v41  ;;  %v941_v49 = vadd.f32 %v940_v17, %v425_v3  ;;  %v156_v26 = vld [vmem:[#allocation2 + $0x310] sm:$0xff]  ;;  %v519_v56 = vld [vmem:[#allocation2 + $0xe68] sm:$0xff]  ;;  %v1634_v36 = vadd.f32 %v1633_v52, %v1123_v19  ;;  %v293_v55 = vld [vmem:[#allocation2 + $0x758] sm:$0xff]  ;;  %v806_v31 = vadd.f32 %v805_v4, %v292_v63 }
  0x8f   :  { %v244_v34 = vld [vmem:[#allocation2 + $0x5d0] sm:$0xff]  ;;  %v621_v16 = vadd.f32 %v620_v23, %v6446_v30  ;;  %v427_v14 = vld [vmem:[#allocation2 + $0xb88] sm:$0xff]  ;;  %v667_v12 = vadd.f32 %v666_v13, %v155_v11  ;;  %v1036_v61 = vadd.f32 %v1035_v9, %v518_v0  ;;  %v157_v47 = vld [vmem:[#allocation2 + $0x318] sm:$0xff]  ;;  %v1127_v8 = vmul.f32 %v6316_v2, %v6316_v2 }
  0x90   :  { %v755_v58 = vadd.f32 %v754_v35, %v242_v59  ;;  %v6456_v32 = vld [vmem:[#allocation2 + $0x1b0] sm:$0xff]  ;;  %v942_v41 = vadd.f32 %v941_v49, %v426_v46  ;;  %v1635_v3 = vadd.f32 %v1634_v36, %v1124_v39  ;;  %v245_v27 = vld [vmem:[#allocation2 + $0x5d8] sm:$0xff]  ;;  %v294_v57 = vld [vmem:[#allocation2 + $0x760] sm:$0xff]  ;;  %v807_v0 = vadd.f32 %v806_v31, %v293_v55 }
  0x91   :  { %v520_v53 = vld [vmem:[#allocation2 + $0xe70] sm:$0xff]  ;;  %v622_v19 = vadd.f32 %v621_v16, %v6451_v18  ;;  %v668_v33 = vadd.f32 %v667_v12, %v156_v26  ;;  %v1037_v17 = vadd.f32 %v1036_v61, %v519_v56  ;;  %v6461_v48 = vld [vmem:[#allocation2 + $0x1b8] sm:$0xff]  ;;  %v158_v52 = vld [vmem:[#allocation2 + $0x320] sm:$0xff]  ;;  %v1128_v4 = vmul.f32 %v6319_v22, %v6319_v22 }
  0x92   :  { %v428_v29 = vld [vmem:[#allocation2 + $0xb90] sm:$0xff]  ;;  %v756_v11 = vadd.f32 %v755_v58, %v243_v6  ;;  %v943_v59 = vadd.f32 %v942_v41, %v427_v14  ;;  %v521_v23 = vld [vmem:[#allocation2 + $0xe78] sm:$0xff]  ;;  %v1636_v46 = vadd.f32 %v1635_v3, %v1125_v28  ;;  %v246_v63 = vld [vmem:[#allocation2 + $0x5e0] sm:$0xff]  ;;  %v808_v56 = vadd.f32 %v807_v0, %v294_v57 }
  0x93   :  { %v623_v39 = vadd.f32 %v622_v19, %v6456_v32  ;;  %v429_v13 = vld [vmem:[#allocation2 + $0xb98] sm:$0xff]  ;;  %v295_v9 = vld [vmem:[#allocation2 + $0x768] sm:$0xff]  ;;  %v669_v35 = vadd.f32 %v668_v33, %v157_v47  ;;  %v1038_v49 = vadd.f32 %v1037_v17, %v520_v53  ;;  %v6466_v2 = vld [vmem:[#allocation2 + $0x1c0] sm:$0xff]  ;;  %v1129_v31 = vmul.f32 %v6322_v38, %v6322_v38 }
  0x94   :  { %v757_v26 = vadd.f32 %v756_v11, %v244_v34  ;;  %v944_v6 = vadd.f32 %v943_v59, %v428_v29  ;;  %v159_v36 = vld [vmem:[#allocation2 + $0x328] sm:$0xff]  ;;  %v522_v16 = vld [vmem:[#allocation2 + $0xe80] sm:$0xff]  ;;  %v1637_v14 = vadd.f32 %v1636_v46, %v1126_v5  ;;  %v296_v61 = vld [vmem:[#allocation2 + $0x770] sm:$0xff]  ;;  %v809_v53 = vadd.f32 %v808_v56, %v295_v9 }
  0x95   :  { %v247_v55 = vld [vmem:[#allocation2 + $0x5e8] sm:$0xff]  ;;  %v624_v28 = vadd.f32 %v623_v39, %v6461_v48  ;;  %v430_v12 = vld [vmem:[#allocation2 + $0xba0] sm:$0xff]  ;;  %v670_v58 = vadd.f32 %v669_v35, %v158_v52  ;;  %v1039_v41 = vadd.f32 %v1038_v49, %v521_v23  ;;  %v160_v3 = vld [vmem:[#allocation2 + $0x330] sm:$0xff]  ;;  %v1130_v0 = vmul.f32 %v6325_v60, %v6325_v60 }
  0x96   :  { %v758_v47 = vadd.f32 %v757_v26, %v245_v27  ;;  %v6471_v22 = vld [vmem:[#allocation2 + $0x1c8] sm:$0xff]  ;;  %v945_v34 = vadd.f32 %v944_v6, %v429_v13  ;;  %v1638_v29 = vadd.f32 %v1637_v14, %v1127_v8  ;;  %v248_v57 = vld [vmem:[#allocation2 + $0x5f0] sm:$0xff]  ;;  %v297_v17 = vld [vmem:[#allocation2 + $0x778] sm:$0xff]  ;;  %v810_v23 = vadd.f32 %v809_v53, %v296_v61 }
  0x97   :  { %v523_v19 = vld [vmem:[#allocation2 + $0xe88] sm:$0xff]  ;;  %v625_v5 = vadd.f32 %v624_v28, %v6466_v2  ;;  %v671_v11 = vadd.f32 %v670_v58, %v159_v36  ;;  %v1040_v59 = vadd.f32 %v1039_v41, %v522_v16  ;;  %v6476_v38 = vld [vmem:[#allocation2 + $0x1d0] sm:$0xff]  ;;  %v161_v46 = vld [vmem:[#allocation2 + $0x338] sm:$0xff]  ;;  %v1131_v56 = vmul.f32 %v6330_v15, %v6330_v15 }
  0x98   :  { %v431_v33 = vld [vmem:[#allocation2 + $0xba8] sm:$0xff]  ;;  %v759_v52 = vadd.f32 %v758_v47, %v246_v63  ;;  %v946_v27 = vadd.f32 %v945_v34, %v430_v12  ;;  %v524_v39 = vld [vmem:[#allocation2 + $0xe90] sm:$0xff]  ;;  %v1639_v13 = vadd.f32 %v1638_v29, %v1128_v4  ;;  %v249_v9 = vld [vmem:[#allocation2 + $0x5f8] sm:$0xff]  ;;  %v811_v16 = vadd.f32 %v810_v23, %v297_v17 }
  0x99   :  { %v626_v8 = vadd.f32 %v625_v5, %v6471_v22  ;;  %v432_v35 = vld [vmem:[#allocation2 + $0xbb0] sm:$0xff]  ;;  %v298_v49 = vld [vmem:[#allocation2 + $0x780] sm:$0xff]  ;;  %v672_v26 = vadd.f32 %v671_v11, %v160_v3  ;;  %v1041_v6 = vadd.f32 %v1040_v59, %v523_v19  ;;  %v6481_v60 = vld [vmem:[#allocation2 + $0x1d8] sm:$0xff]  ;;  %v1132_v53 = vmul.f32 %v6337_v37, %v6337_v37 }
  0x9a   :  { %v760_v36 = vadd.f32 %v759_v52, %v247_v55  ;;  %v947_v63 = vadd.f32 %v946_v27, %v431_v33  ;;  %v162_v14 = vld [vmem:[#allocation2 + $0x340] sm:$0xff]  ;;  %v525_v28 = vld [vmem:[#allocation2 + $0xe98] sm:$0xff]  ;;  %v1640_v12 = vadd.f32 %v1639_v13, %v1129_v31  ;;  %v299_v41 = vld [vmem:[#allocation2 + $0x788] sm:$0xff]  ;;  %v812_v19 = vadd.f32 %v811_v16, %v298_v49 }
  0x9b   :  { %v6483_v61 = vld [vmem:[#allocation2 + $0x1e0] sm:$0xff]  ;;  %v627_v4 = vadd.f32 %v626_v8, %v6476_v38  ;;  %v433_v58 = vld [vmem:[#allocation2 + $0xbb8] sm:$0xff]  ;;  %v673_v47 = vadd.f32 %v672_v26, %v161_v46  ;;  %v1042_v34 = vadd.f32 %v1041_v6, %v524_v39  ;;  %v163_v29 = vld [vmem:[#allocation2 + $0x348] sm:$0xff]  ;;  %v1133_v52 = vmul.f32 %v6342_v62, %v6342_v62 }
  0x9c   :  { %v761_v15 = vadd.f32 %v760_v36, %v248_v57  ;;  %v434_v55 = vld [vmem:[#allocation2 + $0xbc0] sm:$0xff]  ;;  %v948_v3 = vadd.f32 %v947_v63, %v432_v35  ;;  %v1641_v33 = vadd.f32 %v1640_v12, %v1130_v0  ;;  %v300_v17 = vld [vmem:[#allocation2 + $0x790] sm:$0xff]  ;;  %v443_v23 = vld [vmem:[#allocation2 + $0xc08] sm:$0xff]  ;;  %v813_v57 = vadd.f32 %v812_v19, %v299_v41 }
  0x9d   :  { %v526_v5 = vld [vmem:[#allocation2 + $0xea0] sm:$0xff]  ;;  %v628_v31 = vadd.f32 %v627_v4, %v6481_v60  ;;  %v674_v11 = vadd.f32 %v673_v47, %v162_v14  ;;  %v1043_v59 = vadd.f32 %v1042_v34, %v525_v28  ;;  %v6491_v39 = vld [vmem:[#allocation2 + $0x1e8] sm:$0xff]  ;;  %v164_v13 = vld [vmem:[#allocation2 + $0x350] sm:$0xff]  ;;  %v1134_v63 = vmul.f32 %v6347_v21, %v6347_v21 }
  0x9e   :  { %v442_v27 = vld [vmem:[#allocation2 + $0xc00] sm:$0xff]  ;;  %v762_v46 = vadd.f32 %v761_v15, %v249_v9  ;;  %v949_v37 = vadd.f32 %v948_v3, %v433_v58  ;;  %v527_v8 = vld [vmem:[#allocation2 + $0xea8] sm:$0xff]  ;;  %v1642_v35 = vadd.f32 %v1641_v33, %v1131_v56  ;;  %v301_v26 = vld [vmem:[#allocation2 + $0x798] sm:$0xff]  ;;  %v814_v14 = vadd.f32 %v813_v57, %v300_v17 }
  0x9f   :  { %v629_v0 = vadd.f32 %v628_v31, %v6483_v61  ;;  %v435_v49 = vld [vmem:[#allocation2 + $0xbc8] sm:$0xff]  ;;  %v675_v6 = vadd.f32 %v674_v11, %v163_v29  ;;  %v1044_v36 = vadd.f32 %v1043_v59, %v526_v5  ;;  %v444_v62 = vld [vmem:[#allocation2 + $0xc10] sm:$0xff]  ;;  %v165_v28 = vld [vmem:[#allocation2 + $0x358] sm:$0xff]  ;;  %v960_v58 = vadd.f32 %v443_v23, %v442_v27 }
  0xa0   :  { %763 = vadd.xlane.f32.xlu1 %v762_v46  ;;  %v6496_v16 = vld [vmem:[#allocation2 + $0x1f0] sm:$0xff]  ;;  %v950_v9 = vadd.f32 %v949_v37, %v434_v55  ;;  %v1643_v4 = vadd.f32 %v1642_v35, %v1132_v53  ;;  %v302_v47 = vld [vmem:[#allocation2 + $0x7a0] sm:$0xff]  ;;  %v1135_v3 = vmul.f32 %v6352_v43, %v6352_v43  ;;  %v445_v21 = vld [vmem:[#allocation2 + $0xc18] sm:$0xff]  ;;  %v815_v5 = vadd.f32 %v814_v14, %v301_v26 }
  0xa1   :  { %v528_v12 = vld [vmem:[#allocation2 + $0xeb0] sm:$0xff]  ;;  %v630_v56 = vadd.f32 %v629_v0, %v6491_v39  ;;  %v676_v34 = vadd.f32 %v675_v6, %v164_v13  ;;  %v1045_v15 = vadd.f32 %v1044_v36, %v527_v8  ;;  %v6501_v19 = vld [vmem:[#allocation2 + $0x1f8] sm:$0xff]  ;;  %v166_v55 = vld [vmem:[#allocation2 + $0x360] sm:$0xff]  ;;  %v961_v17 = vadd.f32 %v960_v58, %v444_v62 }
  0xa2   :  { %v436_v41 = vld [vmem:[#allocation2 + $0xbd0] sm:$0xff]  ;;  %v951_v29 = vadd.f32 %v950_v9, %v435_v49  ;;  %v529_v33 = vld [vmem:[#allocation2 + $0xeb8] sm:$0xff]  ;;  %v1644_v31 = vadd.f32 %v1643_v4, %v1133_v52  ;;  %v303_v59 = vld [vmem:[#allocation2 + $0x7a8] sm:$0xff]  ;;  %v1136_v46 = vmul.f32 %v6357_v1, %v6357_v1  ;;  %v816_v57 = vadd.f32 %v815_v5, %v302_v47 }
  0xa3   :  { %v631_v53 = vadd.f32 %v630_v56, %v6496_v16  ;;  %v437_v11 = vld [vmem:[#allocation2 + $0xbd8] sm:$0xff]  ;;  %v677_v27 = vadd.f32 %v676_v34, %v165_v28  ;;  %v1046_v23 = vadd.f32 %v1045_v15, %v528_v12  ;;  %v446_v37 = vld [vmem:[#allocation2 + $0xc20] sm:$0xff]  ;;  %v167_v13 = vld [vmem:[#allocation2 + $0x368] sm:$0xff]  ;;  %v962_v0 = vadd.f32 %v961_v17, %v445_v21 }
  0xa4   :  { %v952_v43 = vadd.f32 %v951_v29, %v436_v41  ;;  %v530_v8 = vld [vmem:[#allocation2 + $0xec0] sm:$0xff]  ;;  %v1645_v35 = vadd.f32 %v1644_v31, %v1134_v63  ;;  %v304_v26 = vld [vmem:[#allocation2 + $0x7b0] sm:$0xff]  ;;  %v1137_v62 = vmul.f32 %v6362_v24, %v6362_v24  ;;  %v447_v9 = vld [vmem:[#allocation2 + $0xc28] sm:$0xff]  ;;  %v817_v28 = vadd.f32 %v816_v57, %v303_v59 }
  0xa5   :  { %v632_v49 = vadd.f32 %v631_v53, %v6501_v19  ;;  %v438_v52 = vld [vmem:[#allocation2 + $0xbe0] sm:$0xff]  ;;  %v678_v6 = vadd.f32 %v677_v27, %v166_v55  ;;  %v1047_v36 = vadd.f32 %v1046_v23, %v529_v33  ;;  %v168_v1 = vld [vmem:[#allocation2 + $0x370] sm:$0xff]  ;;  %v531_v12 = vld [vmem:[#allocation2 + $0xec8] sm:$0xff]  ;;  %v963_v58 = vadd.f32 %v962_v0, %v446_v37 }
  0xa6   :  { %v953_v14 = vadd.f32 %v952_v43, %v437_v11  ;;  %v1646_v4 = vadd.f32 %v1645_v35, %v1135_v3  ;;  %v439_v56 = vld [vmem:[#allocation2 + $0xbe8] sm:$0xff]  ;;  %v305_v63 = vld [vmem:[#allocation2 + $0x7b8] sm:$0xff]  ;;  %v1138_v34 = vmul.f32 %v6367_v50, %v6367_v50  ;;  %v448_v15 = vld [vmem:[#allocation2 + $0xc30] sm:$0xff]  ;;  %v818_v29 = vadd.f32 %v817_v28, %v304_v26 }
  0xa7   :  { %633 = vadd.xlane.f32.xlu0 %v632_v49  ;;  %v679_v41 = vadd.f32 %v678_v6, %v167_v13  ;;  %v1048_v47 = vadd.f32 %v1047_v36, %v530_v8  ;;  %v169_v5 = vld [vmem:[#allocation2 + $0x378] sm:$0xff]  ;;  %v532_v24 = vld [vmem:[#allocation2 + $0xed0] sm:$0xff]  ;;  %v964_v33 = vadd.f32 %v963_v58, %v447_v9  ;;  %v306_v17 = vld [vmem:[#allocation2 + $0x7c0] sm:$0xff]  ;;  %v1139_v11 = vmul.f32 %v6372_v7, %v6372_v7 }
  0xa8   :  { %v954_v21 = vadd.f32 %v953_v14, %v438_v52  ;;  %v1647_v55 = vadd.f32 %v1646_v4, %v1136_v46  ;;  %v440_v31 = vld [vmem:[#allocation2 + $0xbf0] sm:$0xff]  ;;  %v449_v59 = vld [vmem:[#allocation2 + $0xc38] sm:$0xff]  ;;  %v819_v23 = vadd.f32 %v818_v29, %v305_v63  ;;  %v170_v37 = vld [vmem:[#allocation2 + $0x380] sm:$0xff]  ;;  %v1140_v46 = vmul.f32 %v6375_v25, %v6375_v25 }
  0xa9   :  { %v680_v53 = vadd.f32 %v679_v41, %v168_v1  ;;  %v1049_v3 = vadd.f32 %v1048_v47, %v531_v12  ;;  %v533_v43 = vld [vmem:[#allocation2 + $0xed8] sm:$0xff]  ;;  %v965_v57 = vadd.f32 %v964_v33, %v448_v15  ;;  %v307_v8 = vld [vmem:[#allocation2 + $0x7c8] sm:$0xff]  ;;  %v450_v49 = vld [vmem:[#allocation2 + $0xc40] sm:$0xff] }
  0xaa   :  { %v955_v27 = vadd.f32 %v954_v21, %v439_v56  ;;  %v1648_v50 = vadd.f32 %v1647_v55, %v1137_v62  ;;  %v441_v13 = vld [vmem:[#allocation2 + $0xbf8] sm:$0xff]  ;;  %v820_v26 = vadd.f32 %v819_v23, %v306_v17  ;;  %v171_v6 = vld [vmem:[#allocation2 + $0x388] sm:$0xff]  ;;  %v534_v36 = vld [vmem:[#allocation2 + $0xee0] sm:$0xff]  ;;  %v1141_v62 = vmul.f32 %v6380_v51, %v6380_v51 }
  0xab   :  { %v681_v35 = vadd.f32 %v680_v53, %v169_v5  ;;  %v1050_v0 = vadd.f32 %v1049_v3, %v532_v24  ;;  %v966_v9 = vadd.f32 %v965_v57, %v449_v59  ;;  %v308_v14 = vld [vmem:[#allocation2 + $0x7d0] sm:$0xff]  ;;  %v451_v12 = vld [vmem:[#allocation2 + $0xc48] sm:$0xff]  ;;  %v309_v47 = vld [vmem:[#allocation2 + $0x7d8] sm:$0xff] }
  0xac   :  { %v956_v52 = vadd.f32 %v955_v27, %v440_v31  ;;  %v1649_v7 = vadd.f32 %v1648_v50, %v1138_v34  ;;  %v821_v58 = vadd.f32 %v820_v26, %v307_v8  ;;  %v172_v56 = vld [vmem:[#allocation2 + $0x390] sm:$0xff]  ;;  %v535_v63 = vld [vmem:[#allocation2 + $0xee8] sm:$0xff]  ;;  %v173_v5 = vld [vmem:[#allocation2 + $0x398] sm:$0xff] }
  0xad   :  { %v682_v28 = vadd.f32 %v681_v35, %v170_v37  ;;  %v1051_v1 = vadd.f32 %v1050_v0, %v533_v43  ;;  %v967_v25 = vadd.f32 %v966_v9, %v450_v49  ;;  %v452_v29 = vld [vmem:[#allocation2 + $0xc50] sm:$0xff]  ;;  %v10926_v55 = vld [vmem:[#allocation12_spill] sm:$0xff]  ;;  %v453_v59 = vld [vmem:[#allocation2 + $0xc58] sm:$0xff] }
  0xae   :  { %v957_v4 = vadd.f32 %v956_v52, %v441_v13  ;;  %v1650_v41 = vadd.f32 %v1649_v7, %v1139_v11  ;;  %v822_v34 = vadd.f32 %v821_v58, %v308_v14  ;;  %v536_v24 = vld [vmem:[#allocation2 + $0xef0] sm:$0xff]  ;;  %v1142_v33 = vmul.f32 %v10926_v55, %v10926_v55  ;;  %v310_v17 = vld [vmem:[#allocation2 + $0x7e0] sm:$0xff]  ;;  %v537_v23 = vld [vmem:[#allocation2 + $0xef8] sm:$0xff] }
  0xaf   :  { %v683_v15 = vadd.f32 %v682_v28, %v171_v6  ;;  %v1052_v21 = vadd.f32 %v1051_v1, %v534_v36  ;;  %v968_v51 = vadd.f32 %v967_v25, %v451_v12  ;;  %v174_v11 = vld [vmem:[#allocation2 + $0x3a0] sm:$0xff]  ;;  %v10927_v37 = vld [vmem:[#allocation13_spill] sm:$0xff]  ;;  %v10928_v26 = vld [vmem:[#allocation14_spill] sm:$0xff] }
  0xb0   :  { %958 = vadd.xlane.f32.xlu2 %v957_v4  ;;  %v1651_v31 = vadd.f32 %v1650_v41, %v1140_v46  ;;  %v823_v27 = vadd.f32 %v822_v34, %v309_v47  ;;  %v1143_v43 = vmul.f32 %v10927_v37, %v10927_v37  ;;  %v311_v13 = vld [vmem:[#allocation2 + $0x7e8] sm:$0xff]  ;;  %v454_v0 = vld [vmem:[#allocation2 + $0xc60] sm:$0xff]  ;;  %v1144_v6 = vmul.f32 %v10928_v26, %v10928_v26  ;;  %v312_v9 = vld [vmem:[#allocation2 + $0x7f0] sm:$0xff] }
  0xb1   :  { %v684_v53 = vadd.f32 %v683_v15, %v172_v56  ;;  %v1053_v3 = vadd.f32 %v1052_v21, %v535_v63  ;;  %v969_v57 = vadd.f32 %v968_v51, %v452_v29  ;;  %v175_v52 = vld [vmem:[#allocation2 + $0x3a8] sm:$0xff]  ;;  %v538_v46 = vld [vmem:[#allocation2 + $0xf00] sm:$0xff]  ;;  %v176_v4 = vld [vmem:[#allocation2 + $0x3b0] sm:$0xff] }
  0xb2   :  { %v1652_v50 = vadd.f32 %v1651_v31, %v1141_v62  ;;  %v824_v49 = vadd.f32 %v823_v27, %v310_v17  ;;  %v455_v1 = vld [vmem:[#allocation2 + $0xc68] sm:$0xff]  ;;  %v10929_v58 = vld [vmem:[#allocation15_spill] sm:$0xff]  ;;  %v456_v21 = vld [vmem:[#allocation2 + $0xc70] sm:$0xff] }
  0xb3   :  { %v685_v8 = vadd.f32 %v684_v53, %v173_v5  ;;  %v1054_v35 = vadd.f32 %v1053_v3, %v536_v24  ;;  %v970_v7 = vadd.f32 %v969_v57, %v453_v59  ;;  %v539_v62 = vld [vmem:[#allocation2 + $0xf08] sm:$0xff]  ;;  %v1145_v56 = vmul.f32 %v10929_v58, %v10929_v58  ;;  %v313_v25 = vld [vmem:[#allocation2 + $0x7f8] sm:$0xff]  ;;  %v540_v5 = vld [vmem:[#allocation2 + $0xf10] sm:$0xff] }
  0xb4   :  { %v1653_v36 = vadd.f32 %v1652_v50, %v1142_v33  ;;  %v825_v12 = vadd.f32 %v824_v49, %v311_v13  ;;  %v177_v34 = vld [vmem:[#allocation2 + $0x3b8] sm:$0xff]  ;;  %v10930_v24 = vld [vmem:[#allocation16_spill] sm:$0xff] }
  0xb5   :  { %v686_v14 = vadd.f32 %v685_v8, %v174_v11  ;;  %v1055_v28 = vadd.f32 %v1054_v35, %v537_v23  ;;  %v971_v41 = vadd.f32 %v970_v7, %v454_v0  ;;  %v1146_v55 = vmul.f32 %v10930_v24, %v10930_v24  ;;  %v457_v53 = vld [vmem:[#allocation2 + $0xc78] sm:$0xff]  ;;  %v178_v59 = vld [vmem:[#allocation2 + $0x3c0] sm:$0xff]  ;;  %v10931_v11 = vld [vmem:[#allocation17_spill] sm:$0xff] }
  0xb6   :  { %v1654_v63 = vadd.f32 %v1653_v36, %v1143_v43  ;;  %v826_v29 = vadd.f32 %v825_v12, %v312_v9  ;;  %v541_v27 = vld [vmem:[#allocation2 + $0xf18] sm:$0xff]  ;;  %v1147_v23 = vmul.f32 %v10931_v11, %v10931_v11  ;;  %v458_v13 = vld [vmem:[#allocation2 + $0xc80] sm:$0xff]  ;;  %v179_v8 = vld [vmem:[#allocation2 + $0x3c8] sm:$0xff]  ;;  %v1148_v0 = vmul.f32 %v6406_v42, %v6406_v42 }
  0xb7   :  { %v687_v47 = vadd.f32 %v686_v14, %v175_v52  ;;  %v1056_v15 = vadd.f32 %v1055_v28, %v538_v46  ;;  %v972_v31 = vadd.f32 %v971_v41, %v455_v1  ;;  %v542_v35 = vld [vmem:[#allocation2 + $0xf20] sm:$0xff]  ;;  %v180_v36 = vld [vmem:[#allocation2 + $0x3d0] sm:$0xff]  ;;  %v543_v7 = vld [vmem:[#allocation2 + $0xf28] sm:$0xff]  ;;  %v1150_v42 = vmul.f32 %v6414_v44, %v6414_v44 }
  0xb8   :  { %v1655_v33 = vadd.f32 %v1654_v63, %v1144_v6  ;;  %v827_v3 = vadd.f32 %v826_v29, %v313_v25  ;;  %v459_v6 = vld [vmem:[#allocation2 + $0xc88] sm:$0xff]  ;;  %v10932_v9 = vld [vmem:[#allocation18_spill] sm:$0xff]  ;;  %v181_v58 = vld [vmem:[#allocation2 + $0x3d8] sm:$0xff]  ;;  %v1152_v11 = vmul.f32 %v6422_v20, %v6422_v20 }
  0xb9   :  { %v688_v51 = vadd.f32 %v687_v47, %v176_v4  ;;  %v1057_v17 = vadd.f32 %v1056_v15, %v539_v62  ;;  %v973_v43 = vadd.f32 %v972_v31, %v456_v21  ;;  %v1149_v14 = vmul.f32 %v10932_v9, %v10932_v9  ;;  %v460_v62 = vld [vmem:[#allocation2 + $0xc90] sm:$0xff]  ;;  %v461_v15 = vld [vmem:[#allocation2 + $0xc98] sm:$0xff]  ;;  %v5150_v21 = vld [vmem:[#allocation2 + $0x400] sm:$0xff] }
  0xba   :  { %v1656_v37 = vadd.f32 %v1655_v33, %v1145_v56  ;;  %828 = vadd.xlane.f32.xlu1 %v827_v3  ;;  %v544_v56 = vld [vmem:[#allocation2 + $0xf30] sm:$0xff]  ;;  %v1233_v29 = vmul.f32 %v5150_v21, %v5150_v21  ;;  %v10933_v24 = vld [vmem:[#allocation19_spill] sm:$0xff]  ;;  %v183_v44 = vld [vmem:[#allocation2 + $0x3e8] sm:$0xff] }
  0xbb   :  { %v689_v50 = vadd.f32 %v688_v51, %v177_v34  ;;  %v1058_v57 = vadd.f32 %v1057_v17, %v540_v5  ;;  %v974_v52 = vadd.f32 %v973_v43, %v457_v53  ;;  %v182_v34 = vld [vmem:[#allocation2 + $0x3e0] sm:$0xff]  ;;  %v545_v5 = vld [vmem:[#allocation2 + $0xf38] sm:$0xff]  ;;  %v5151_v51 = vld [vmem:[#allocation2 + $0x408] sm:$0xff] }
  0xbc   :  { %v1657_v49 = vadd.f32 %v1656_v37, %v1146_v55  ;;  %v1151_v55 = vmul.f32 %v10933_v24, %v10933_v24  ;;  %v1234_v17 = vmul.f32 %v5151_v51, %v5151_v51  ;;  %v5152_v43 = vld [vmem:[#allocation2 + $0x410] sm:$0xff]  ;;  %v1156_v51 = vmul.f32 %v6439_v40, %v6439_v40 }
  0xbd   :  { %v690_v46 = vadd.f32 %v689_v50, %v178_v59  ;;  %v1059_v26 = vadd.f32 %v1058_v57, %v541_v27  ;;  %v975_v1 = vadd.f32 %v974_v52, %v458_v13  ;;  %v462_v59 = vld [vmem:[#allocation2 + $0xca0] sm:$0xff]  ;;  %v1235_v50 = vmul.f32 %v5152_v43, %v5152_v43  ;;  %v547_v52 = vld [vmem:[#allocation2 + $0xf48] sm:$0xff]  ;;  %v464_v20 = vld [vmem:[#allocation2 + $0xcb0] sm:$0xff] }
  0xbe   :  { %v1658_v28 = vadd.f32 %v1657_v49, %v1147_v23  ;;  %v546_v27 = vld [vmem:[#allocation2 + $0xf40] sm:$0xff]  ;;  %v184_v49 = vld [vmem:[#allocation2 + $0x3f0] sm:$0xff] }
  0xbf   :  { %v691_v12 = vadd.f32 %v690_v46, %v179_v8  ;;  %v1060_v4 = vadd.f32 %v1059_v26, %v542_v35  ;;  %v976_v41 = vadd.f32 %v975_v1, %v459_v6  ;;  %v463_v8 = vld [vmem:[#allocation2 + $0xca8] sm:$0xff]  ;;  %v5153_v35 = vld [vmem:[#allocation2 + $0x418] sm:$0xff]  ;;  %v1153_v46 = vmul.f32 %v6427_v10, %v6427_v10  ;;  %v552_v40 = vld [vmem:[#allocation2 + $0xf70] sm:$0xff] }
  0xc0   :  { %v1659_v63 = vadd.f32 %v1658_v28, %v1148_v0  ;;  %v1236_v0 = vmul.f32 %v5153_v35, %v5153_v35  ;;  %v185_v1 = vld [vmem:[#allocation2 + $0x3f8] sm:$0xff]  ;;  %v5155_v10 = vld [vmem:[#allocation2 + $0x428] sm:$0xff] }
  0xc1   :  { %v692_v25 = vadd.f32 %v691_v12, %v180_v36  ;;  %v1061_v47 = vadd.f32 %v1060_v4, %v543_v7  ;;  %v977_v31 = vadd.f32 %v976_v41, %v460_v62  ;;  %v1747_v36 = vadd.f32 %v1234_v17, %v1233_v29  ;;  %v548_v12 = vld [vmem:[#allocation2 + $0xf50] sm:$0xff]  ;;  %v465_v41 = vld [vmem:[#allocation2 + $0xcb8] sm:$0xff] }
  0xc2   :  { %v1660_v33 = vadd.f32 %v1659_v63, %v1149_v14  ;;  %v5154_v14 = vld [vmem:[#allocation2 + $0x420] sm:$0xff]  ;;  %v1154_v4 = vmul.f32 %v6430_v54, %v6430_v54 }
  0xc3   :  { %v693_v53 = vadd.f32 %v692_v25, %v181_v58  ;;  %v1062_v3 = vadd.f32 %v1061_v47, %v544_v56  ;;  %v978_v37 = vadd.f32 %v977_v31, %v461_v15  ;;  %v1237_v28 = vmul.f32 %v5154_v14, %v5154_v14  ;;  %v549_v47 = vld [vmem:[#allocation2 + $0xf58] sm:$0xff]  ;;  %v550_v31 = vld [vmem:[#allocation2 + $0xf60] sm:$0xff] }
  0xc4   :  { %v1661_v23 = vadd.f32 %v1660_v33, %v1150_v42  ;;  %v1748_v56 = vadd.f32 %v1747_v36, %v1235_v50  ;;  %v1238_v25 = vmul.f32 %v5155_v10, %v5155_v10  ;;  %v1155_v15 = vmul.f32 %v6435_v45, %v6435_v45  ;;  %v5156_v33 = vld [vmem:[#allocation2 + $0x430] sm:$0xff]  ;;  %v5159_v36 = vld [vmem:[#allocation2 + $0x448] sm:$0xff] }
  0xc5   :  { %v694_v57 = vadd.f32 %v693_v53, %v182_v34  ;;  %v1063_v13 = vadd.f32 %v1062_v3, %v545_v5  ;;  %v979_v6 = vadd.f32 %v978_v37, %v462_v59  ;;  %v1239_v54 = vmul.f32 %v5156_v33, %v5156_v33  ;;  %v471_v10 = vld [vmem:[#allocation2 + $0xce8] sm:$0xff] }
  0xc6   :  { %v1662_v26 = vadd.f32 %v1661_v23, %v1151_v55  ;;  %v1749_v34 = vadd.f32 %v1748_v56, %v1236_v0  ;;  %v466_v55 = vld [vmem:[#allocation2 + $0xcc0] sm:$0xff]  ;;  %v1157_v23 = vmul.f32 %v6446_v30, %v6446_v30  ;;  %v1158_v0 = vmul.f32 %v6451_v18, %v6451_v18 }
  0xc7   :  { %v695_v7 = vadd.f32 %v694_v57, %v183_v44  ;;  %v1064_v9 = vadd.f32 %v1063_v13, %v546_v27  ;;  %v980_v58 = vadd.f32 %v979_v6, %v463_v8  ;;  %v467_v44 = vld [vmem:[#allocation2 + $0xcc8] sm:$0xff]  ;;  %v5157_v27 = vld [vmem:[#allocation2 + $0x438] sm:$0xff]  ;;  %v468_v13 = vld [vmem:[#allocation2 + $0xcd0] sm:$0xff]  ;;  %v1159_v30 = vmul.f32 %v6456_v32, %v6456_v32 }
  0xc8   :  { %v1663_v62 = vadd.f32 %v1662_v26, %v1152_v11  ;;  %v1750_v3 = vadd.f32 %v1749_v34, %v1237_v28  ;;  %v1240_v45 = vmul.f32 %v5157_v27, %v5157_v27  ;;  %v551_v11 = vld [vmem:[#allocation2 + $0xf68] sm:$0xff]  ;;  %v5158_v8 = vld [vmem:[#allocation2 + $0x440] sm:$0xff]  ;;  %v469_v6 = vld [vmem:[#allocation2 + $0xcd8] sm:$0xff]  ;;  %v1160_v18 = vmul.f32 %v6461_v48, %v6461_v48 }
  0xc9   :  { %v696_v42 = vadd.f32 %v695_v7, %v184_v49  ;;  %v1065_v63 = vadd.f32 %v1064_v9, %v547_v52  ;;  %v981_v29 = vadd.f32 %v980_v58, %v464_v20  ;;  %v1241_v35 = vmul.f32 %v5158_v8, %v5158_v8  ;;  %v553_v9 = vld [vmem:[#allocation2 + $0xf78] sm:$0xff]  ;;  %v554_v58 = vld [vmem:[#allocation2 + $0xf80] sm:$0xff] }
  0xca   :  { %v1664_v21 = vadd.f32 %v1663_v62, %v1153_v46  ;;  %v1751_v50 = vadd.f32 %v1750_v3, %v1238_v25  ;;  %v1242_v7 = vmul.f32 %v5159_v36, %v5159_v36  ;;  %v5161_v25 = vld [vmem:[#allocation2 + $0x458] sm:$0xff]  ;;  %v1161_v32 = vmul.f32 %v6466_v2, %v6466_v2 }
  0xcb   :  { %v697_v5 = vadd.f32 %v696_v42, %v185_v1  ;;  %v1066_v24 = vadd.f32 %v1065_v63, %v548_v12  ;;  %v982_v53 = vadd.f32 %v981_v29, %v465_v41  ;;  %v470_v12 = vld [vmem:[#allocation2 + $0xce0] sm:$0xff]  ;;  %v1162_v48 = vmul.f32 %v6471_v22, %v6471_v22  ;;  %v473_v3 = vld [vmem:[#allocation2 + $0xcf8] sm:$0xff] }
  0xcc   :  { %v1665_v17 = vadd.f32 %v1664_v21, %v1154_v4  ;;  %v1752_v46 = vadd.f32 %v1751_v50, %v1239_v54  ;;  %v5160_v4 = vld [vmem:[#allocation2 + $0x450] sm:$0xff]  ;;  %v557_v27 = vld [vmem:[#allocation2 + $0xf98] sm:$0xff]  ;;  %v1163_v2 = vmul.f32 %v6476_v38, %v6476_v38  ;;  %v1164_v22 = vmul.f32 %v6481_v60, %v6481_v60 }
  0xcd   :  { %698 = vadd.xlane.f32.xlu0 %v697_v5  ;;  %v1067_v59 = vadd.f32 %v1066_v24, %v549_v47  ;;  %v983_v43 = vadd.f32 %v982_v53, %v466_v55  ;;  %v1243_v62 = vmul.f32 %v5160_v4, %v5160_v4  ;;  %v1244_v47 = vmul.f32 %v5161_v25, %v5161_v25  ;;  %v472_v24 = vld [vmem:[#allocation2 + $0xcf0] sm:$0xff]  ;;  %v5162_v55 = vld [vmem:[#allocation2 + $0x460] sm:$0xff]  ;;  %v5170_v25 = vld [vmem:[#allocation2 + $0x488] sm:$0xff] }
  0xce   :  { %v1666_v37 = vadd.f32 %v1665_v17, %v1155_v15  ;;  %v1753_v28 = vadd.f32 %v1752_v46, %v1240_v45  ;;  %v555_v15 = vld [vmem:[#allocation2 + $0xf88] sm:$0xff]  ;;  %v1245_v33 = vmul.f32 %v5162_v55, %v5162_v55  ;;  %v556_v54 = vld [vmem:[#allocation2 + $0xf90] sm:$0xff] }
  0xcf   :  { %v1068_v57 = vadd.f32 %v1067_v59, %v550_v31  ;;  %v984_v52 = vadd.f32 %v983_v43, %v467_v44  ;;  %v5163_v59 = vld [vmem:[#allocation2 + $0x468] sm:$0xff]  ;;  %v474_v43 = vld [vmem:[#allocation2 + $0xd00] sm:$0xff]  ;;  %v5164_v50 = vld [vmem:[#allocation2 + $0x470] sm:$0xff] }
  0xd0   :  { %v1667_v49 = vadd.f32 %v1666_v37, %v1156_v51  ;;  %v1754_v63 = vadd.f32 %v1753_v28, %v1241_v35  ;;  %v1246_v44 = vmul.f32 %v5163_v59, %v5163_v59  ;;  %v476_v60 = vld [vmem:[#allocation2 + $0xd10] sm:$0xff] }
  0xd1   :  { %v1069_v26 = vadd.f32 %v1068_v57, %v551_v11  ;;  %v985_v14 = vadd.f32 %v984_v52, %v468_v13  ;;  %v1247_v57 = vmul.f32 %v5164_v50, %v5164_v50  ;;  %v558_v13 = vld [vmem:[#allocation2 + $0xfa0] sm:$0xff]  ;;  %v5165_v52 = vld [vmem:[#allocation2 + $0x478] sm:$0xff]  ;;  %v5169_v4 = vld [vmem:[#allocation2 + $0x610] sm:$0xff] }
  0xd2   :  { %v1668_v20 = vadd.f32 %v1667_v49, %v1157_v23  ;;  %v1755_v34 = vadd.f32 %v1754_v63, %v1242_v7  ;;  %v475_v49 = vld [vmem:[#allocation2 + $0xd08] sm:$0xff]  ;;  %v1248_v46 = vmul.f32 %v5165_v52, %v5165_v52  ;;  %v5175_v50 = vld [vmem:[#allocation2 + $0x498] sm:$0xff] }
  0xd3   :  { %v1070_v1 = vadd.f32 %v1069_v26, %v552_v40  ;;  %v986_v42 = vadd.f32 %v985_v14, %v469_v6  ;;  %v5166_v26 = vld [vmem:[#allocation2 + $0x600] sm:$0xff]  ;;  %v5167_v6 = vld [vmem:[#allocation2 + $0x608] sm:$0xff] }
  0xd4   :  { %v1669_v56 = vadd.f32 %v1668_v20, %v1158_v0  ;;  %v1756_v17 = vadd.f32 %v1755_v34, %v1243_v62  ;;  %v1297_v38 = vmul.f32 %v5166_v26, %v5166_v26  ;;  %v1298_v36 = vmul.f32 %v5167_v6, %v5167_v6  ;;  %v559_v7 = vld [vmem:[#allocation2 + $0xfa8] sm:$0xff] }
  0xd5   :  { %v1071_v41 = vadd.f32 %v1070_v1, %v553_v9  ;;  %v987_v29 = vadd.f32 %v986_v42, %v470_v12  ;;  %v1165_v9 = vmul.f32 %v6483_v61, %v6483_v61  ;;  %v5168_v1 = vld [vmem:[#allocation2 + $0x480] sm:$0xff]  ;;  %v1299_v62 = vmul.f32 %v5169_v4, %v5169_v4 }
  0xd6   :  { %v1670_v21 = vadd.f32 %v1669_v56, %v1159_v30  ;;  %v1757_v23 = vadd.f32 %v1756_v17, %v1244_v47  ;;  %v1249_v12 = vmul.f32 %v5168_v1, %v5168_v1  ;;  %v1250_v61 = vmul.f32 %v5170_v25, %v5170_v25  ;;  %v5171_v47 = vld [vmem:[#allocation2 + $0x618] sm:$0xff]  ;;  %v562_v17 = vld [vmem:[#allocation2 + $0xfc0] sm:$0xff] }
  0xd7   :  { %v1072_v5 = vadd.f32 %v1071_v41, %v554_v58  ;;  %v988_v51 = vadd.f32 %v987_v29, %v471_v10  ;;  %v560_v58 = vld [vmem:[#allocation2 + $0xfb0] sm:$0xff]  ;;  %v477_v10 = vld [vmem:[#allocation2 + $0xd18] sm:$0xff]  ;;  %v1167_v29 = vmul.f32 %v6496_v16, %v6496_v16  ;;  %v5174_v16 = vld [vmem:[#allocation2 + $0x628] sm:$0xff] }
  0xd8   :  { %v1671_v31 = vadd.f32 %v1670_v21, %v1160_v18  ;;  %v1758_v40 = vadd.f32 %v1757_v23, %v1245_v33  ;;  %v1166_v18 = vmul.f32 %v6491_v39, %v6491_v39  ;;  %v561_v21 = vld [vmem:[#allocation2 + $0xfb8] sm:$0xff]  ;;  %v478_v33 = vld [vmem:[#allocation2 + $0xd20] sm:$0xff]  ;;  %v5172_v39 = vld [vmem:[#allocation2 + $0x490] sm:$0xff] }
  0xd9   :  { %v1073_v53 = vadd.f32 %v1072_v5, %v555_v15  ;;  %v989_v11 = vadd.f32 %v988_v51, %v472_v24  ;;  %v1300_v15 = vmul.f32 %v5171_v47, %v5171_v47  ;;  %v563_v23 = vld [vmem:[#allocation2 + $0xfc8] sm:$0xff]  ;;  %v482_v4 = vld [vmem:[#allocation2 + $0xd40] sm:$0xff] }
  0xda   :  { %v1672_v45 = vadd.f32 %v1671_v31, %v1161_v32  ;;  %v1759_v14 = vadd.f32 %v1758_v40, %v1246_v44  ;;  %v1812_v32 = vadd.f32 %v1298_v36, %v1297_v38  ;;  %v481_v36 = vld [vmem:[#allocation2 + $0xd38] sm:$0xff]  ;;  %v5182_v47 = vld [vmem:[#allocation2 + $0x648] sm:$0xff] }
  0xdb   :  { %v1074_v37 = vadd.f32 %v1073_v53, %v556_v54  ;;  %v990_v35 = vadd.f32 %v989_v11, %v473_v3  ;;  %v1251_v54 = vmul.f32 %v5172_v39, %v5172_v39  ;;  %v1168_v53 = vmul.f32 %v6501_v19, %v6501_v19  ;;  %v564_v19 = vld [vmem:[#allocation2 + $0xfd0] sm:$0xff] }
  0xdc   :  { %v1673_v8 = vadd.f32 %v1672_v45, %v1162_v48  ;;  %v1760_v63 = vadd.f32 %v1759_v14, %v1247_v57  ;;  %v5173_v48 = vld [vmem:[#allocation2 + $0x620] sm:$0xff]  ;;  %v1813_v51 = vadd.f32 %v1812_v32, %v1299_v62  ;;  %v1302_v45 = vmul.f32 %v5174_v16, %v5174_v16  ;;  %v5184_v39 = vld [vmem:[#allocation2 + $0x650] sm:$0xff] }
  0xdd   :  { %v1075_v0 = vadd.f32 %v1074_v37, %v557_v27  ;;  %v991_v20 = vadd.f32 %v990_v35, %v474_v43  ;;  %v1301_v31 = vmul.f32 %v5173_v48, %v5173_v48  ;;  %v1252_v57 = vmul.f32 %v5175_v50, %v5175_v50  ;;  %v5176_v35 = vld [vmem:[#allocation2 + $0x630] sm:$0xff]  ;;  %v5180_v62 = vld [vmem:[#allocation2 + $0x640] sm:$0xff] }
  0xde   :  { %v1674_v30 = vadd.f32 %v1673_v8, %v1163_v2  ;;  %v1761_v24 = vadd.f32 %v1760_v63, %v1248_v46  ;;  %v479_v2 = vld [vmem:[#allocation2 + $0xd28] sm:$0xff]  ;;  %v1814_v11 = vadd.f32 %v1813_v51, %v1300_v15  ;;  %v480_v8 = vld [vmem:[#allocation2 + $0xd30] sm:$0xff]  ;;  %v1303_v40 = vmul.f32 %v5176_v35, %v5176_v35  ;;  %v5177_v46 = vld [vmem:[#allocation2 + $0x4a0] sm:$0xff] }
  0xdf   :  { %v1076_v28 = vadd.f32 %v1075_v0, %v558_v13  ;;  %v992_v42 = vadd.f32 %v991_v20, %v475_v49  ;;  %v1253_v26 = vmul.f32 %v5177_v46, %v5177_v46  ;;  %v565_v20 = vld [vmem:[#allocation2 + $0xfd8] sm:$0xff]  ;;  %v5181_v63 = vld [vmem:[#allocation2 + $0x4b0] sm:$0xff]  ;;  %v1306_v15 = vmul.f32 %v5182_v47, %v5182_v47  ;;  %v5190_v46 = vld [vmem:[#allocation2 + $0x668] sm:$0xff] }
  0xe0   :  { %v1675_v56 = vadd.f32 %v1674_v30, %v1164_v22  ;;  %v1762_v44 = vadd.f32 %v1761_v24, %v1249_v12  ;;  %v1815_v0 = vadd.f32 %v1814_v11, %v1301_v31  ;;  %v568_v31 = vld [vmem:[#allocation2 + $0xff0] sm:$0xff] }
  0xe1   :  { %v1077_v41 = vadd.f32 %v1076_v28, %v559_v7  ;;  %v993_v5 = vadd.f32 %v992_v42, %v476_v60  ;;  %v5178_v7 = vld [vmem:[#allocation2 + $0x638] sm:$0xff]  ;;  %v5179_v28 = vld [vmem:[#allocation2 + $0x4a8] sm:$0xff] }
  0xe2   :  { %v1676_v34 = vadd.f32 %v1675_v56, %v1165_v9  ;;  %v1763_v13 = vadd.f32 %v1762_v44, %v1250_v61  ;;  %v1304_v9 = vmul.f32 %v5178_v7, %v5178_v7  ;;  %v1816_v30 = vadd.f32 %v1815_v0, %v1302_v45  ;;  %v566_v56 = vld [vmem:[#allocation2 + $0xfe0] sm:$0xff]  ;;  %v483_v61 = vld [vmem:[#allocation2 + $0xd48] sm:$0xff]  ;;  %v485_v44 = vld [vmem:[#allocation2 + $0xd58] sm:$0xff] }
  0xe3   :  { %v1078_v55 = vadd.f32 %v1077_v41, %v560_v58  ;;  %v994_v59 = vadd.f32 %v993_v5, %v477_v10  ;;  %v1254_v60 = vmul.f32 %v5179_v28, %v5179_v28  ;;  %v1305_v58 = vmul.f32 %v5180_v62, %v5180_v62  ;;  %v569_v45 = vld [vmem:[#allocation2 + $0xff8] sm:$0xff] }
  0xe4   :  { %v1677_v3 = vadd.f32 %v1676_v34, %v1166_v18  ;;  %v1764_v38 = vadd.f32 %v1763_v13, %v1251_v54  ;;  %v1817_v18 = vadd.f32 %v1816_v30, %v1303_v40  ;;  %v1255_v41 = vmul.f32 %v5181_v63, %v5181_v63  ;;  %v5183_v34 = vld [vmem:[#allocation2 + $0x4b8] sm:$0xff]  ;;  %v5188_v13 = vld [vmem:[#allocation2 + $0x660] sm:$0xff]  ;;  %v5189_v40 = vld [vmem:[#allocation2 + $0x4d0] sm:$0xff] }
  0xe5   :  { %v1079_v27 = vadd.f32 %v1078_v55, %v561_v21  ;;  %v995_v43 = vadd.f32 %v994_v59, %v478_v33  ;;  %v567_v21 = vld [vmem:[#allocation2 + $0xfe8] sm:$0xff]  ;;  %v1256_v5 = vmul.f32 %v5183_v34, %v5183_v34  ;;  %v484_v33 = vld [vmem:[#allocation2 + $0xd50] sm:$0xff]  ;;  %v1307_v54 = vmul.f32 %v5184_v39, %v5184_v39  ;;  %v489_v62 = vld [vmem:[#allocation2 + $0xd78] sm:$0xff] }
  0xe6   :  { %v1678_v37 = vadd.f32 %v1677_v3, %v1167_v29  ;;  %v1765_v1 = vadd.f32 %v1764_v38, %v1252_v57  ;;  %v1818_v32 = vadd.f32 %v1817_v18, %v1304_v9  ;;  %v486_v57 = vld [vmem:[#allocation2 + $0xd60] sm:$0xff]  ;;  %v1259_v0 = vmul.f32 %v5189_v40, %v5189_v40  ;;  %v488_v30 = vld [vmem:[#allocation2 + $0xd70] sm:$0xff] }
  0xe7   :  { %v1080_v22 = vadd.f32 %v1079_v27, %v562_v17  ;;  %v996_v52 = vadd.f32 %v995_v43, %v479_v2  ;;  %v5185_v17 = vld [vmem:[#allocation2 + $0x4c0] sm:$0xff]  ;;  %v5186_v27 = vld [vmem:[#allocation2 + $0x658] sm:$0xff]  ;;  %v5197_v34 = vld [vmem:[#allocation2 + $0x4f0] sm:$0xff] }
  0xe8   :  { %v1679_v49 = vadd.f32 %v1678_v37, %v1168_v53  ;;  %v1766_v10 = vadd.f32 %v1765_v1, %v1253_v26  ;;  %v1819_v48 = vadd.f32 %v1818_v32, %v1305_v58  ;;  %v1257_v53 = vmul.f32 %v5185_v17, %v5185_v17  ;;  %v5193_v1 = vld [vmem:[#allocation2 + $0x4e0] sm:$0xff]  ;;  %v5194_v58 = vld [vmem:[#allocation2 + $0x678] sm:$0xff]  ;;  %v492_v17 = vld [vmem:[#allocation2 + $0xd90] sm:$0xff] }
  0xe9   :  { %v1081_v6 = vadd.f32 %v1080_v22, %v563_v23  ;;  %v997_v14 = vadd.f32 %v996_v52, %v480_v8  ;;  %v1308_v2 = vmul.f32 %v5186_v27, %v5186_v27  ;;  %v5187_v23 = vld [vmem:[#allocation2 + $0x4c8] sm:$0xff]  ;;  %v1309_v22 = vmul.f32 %v5188_v13, %v5188_v13 }
  0xea   :  { %1680 = vadd.xlane.f32.xlu2 %v1679_v49  ;;  %v1767_v24 = vadd.f32 %v1766_v10, %v1254_v60  ;;  %v1820_v16 = vadd.f32 %v1819_v48, %v1306_v15  ;;  %v1258_v37 = vmul.f32 %v5187_v23, %v5187_v23  ;;  %v487_v52 = vld [vmem:[#allocation2 + $0xd68] sm:$0xff]  ;;  %v1310_v26 = vmul.f32 %v5190_v46, %v5190_v46  ;;  %v493_v23 = vld [vmem:[#allocation2 + $0xd98] sm:$0xff] }
  0xeb   :  { %v1082_v12 = vadd.f32 %v1081_v6, %v564_v19  ;;  %v998_v42 = vadd.f32 %v997_v14, %v481_v36  ;;  %v5191_v36 = vld [vmem:[#allocation2 + $0x4d8] sm:$0xff]  ;;  %v1312_v18 = vmul.f32 %v5194_v58, %v5194_v58  ;;  %v5195_v10 = vld [vmem:[#allocation2 + $0x4e8] sm:$0xff] }
  0xec   :  { %v1768_v3 = vadd.f32 %v1767_v24, %v1255_v41  ;;  %v1821_v8 = vadd.f32 %v1820_v16, %v1307_v54  ;;  %v1260_v7 = vmul.f32 %v5191_v36, %v5191_v36  ;;  %v490_v41 = vld [vmem:[#allocation2 + $0xd80] sm:$0xff]  ;;  %v5198_v24 = vld [vmem:[#allocation2 + $0x688] sm:$0xff] }
  0xed   :  { %v1083_v25 = vadd.f32 %v1082_v12, %v565_v20  ;;  %v999_v29 = vadd.f32 %v998_v42, %v482_v4  ;;  %v5192_v20 = vld [vmem:[#allocation2 + $0x670] sm:$0xff]  ;;  %v1261_v12 = vmul.f32 %v5193_v1, %v5193_v1  ;;  %v5199_v54 = vld [vmem:[#allocation2 + $0x200] sm:$0xff]  ;;  %v5211_v1 = vld [vmem:[#allocation2 + $0x6a8] sm:$0xff] }
  0xee   :  { %v1769_v43 = vadd.f32 %v1768_v3, %v1256_v5  ;;  %v1822_v38 = vadd.f32 %v1821_v8, %v1308_v2  ;;  %v1311_v14 = vmul.f32 %v5192_v20, %v5192_v20  ;;  %v1263_v5 = vmul.f32 %v5197_v34, %v5197_v34  ;;  %v495_v20 = vld [vmem:[#allocation2 + $0xda8] sm:$0xff]  ;;  %v497_v34 = vld [vmem:[#allocation2 + $0xdb8] sm:$0xff] }
  0xef   :  { %v1084_v55 = vadd.f32 %v1083_v25, %v566_v56  ;;  %v1000_v51 = vadd.f32 %v999_v29, %v483_v61  ;;  %v1262_v25 = vmul.f32 %v5195_v10, %v5195_v10  ;;  %v5196_v61 = vld [vmem:[#allocation2 + $0x680] sm:$0xff]  ;;  %v491_v29 = vld [vmem:[#allocation2 + $0xd88] sm:$0xff]  ;;  %v1169_v48 = vmul.f32 %v5199_v54, %v5199_v54 }
  0xf0   :  { %v1770_v19 = vadd.f32 %v1769_v43, %v1257_v53  ;;  %v1823_v28 = vadd.f32 %v1822_v38, %v1309_v22  ;;  %v1313_v47 = vmul.f32 %v5196_v61, %v5196_v61  ;;  %v5201_v53 = vld [vmem:[#allocation2 + $0x4f8] sm:$0xff]  ;;  %v5212_v58 = vld [vmem:[#allocation2 + $0x228] sm:$0xff] }
  0xf1   :  { %v1085_v59 = vadd.f32 %v1084_v55, %v567_v21  ;;  %v1001_v11 = vadd.f32 %v1000_v51, %v484_v33  ;;  %v1314_v55 = vmul.f32 %v5198_v24, %v5198_v24  ;;  %v1264_v3 = vmul.f32 %v5201_v53, %v5201_v53  ;;  %v498_v53 = vld [vmem:[#allocation2 + $0xdc0] sm:$0xff] }
  0xf2   :  { %v1771_v9 = vadd.f32 %v1770_v19, %v1258_v37  ;;  %v1824_v56 = vadd.f32 %v1823_v28, %v1310_v26  ;;  %v5204_v37 = vld [vmem:[#allocation2 + $0x500] sm:$0xff] }
  0xf3   :  { %v1086_v50 = vadd.f32 %v1085_v59, %v568_v31  ;;  %v1002_v35 = vadd.f32 %v1001_v11, %v485_v44  ;;  %v5200_v31 = vld [vmem:[#allocation2 + $0x208] sm:$0xff]  ;;  %v5202_v44 = vld [vmem:[#allocation2 + $0x690] sm:$0xff]  ;;  %v1265_v43 = vmul.f32 %v5204_v37, %v5204_v37  ;;  %v494_v19 = vld [vmem:[#allocation2 + $0xda0] sm:$0xff] }
  0xf4   :  { %v1772_v4 = vadd.f32 %v1771_v9, %v1259_v0  ;;  %v1825_v15 = vadd.f32 %v1824_v56, %v1311_v14  ;;  %v1170_v51 = vmul.f32 %v5200_v31, %v5200_v31  ;;  %v1315_v27 = vmul.f32 %v5202_v44, %v5202_v44  ;;  %v5208_v26 = vld [vmem:[#allocation2 + $0x6a0] sm:$0xff]  ;;  %v5210_v14 = vld [vmem:[#allocation2 + $0x510] sm:$0xff]  ;;  %v5218_v31 = vld [vmem:[#allocation2 + $0x238] sm:$0xff] }
  0xf5   :  { %v1087_v49 = vadd.f32 %v1086_v50, %v569_v45  ;;  %v1003_v6 = vadd.f32 %v1002_v35, %v486_v57  ;;  %v5203_v45 = vld [vmem:[#allocation2 + $0x210] sm:$0xff]  ;;  %v5205_v57 = vld [vmem:[#allocation2 + $0x698] sm:$0xff]  ;;  %v1317_v38 = vmul.f32 %v5208_v26, %v5208_v26  ;;  %v1267_v28 = vmul.f32 %v5210_v14, %v5210_v14 }
  0xf6   :  { %v1773_v63 = vadd.f32 %v1772_v4, %v1260_v7  ;;  %v1826_v33 = vadd.f32 %v1825_v15, %v1312_v18  ;;  %v1171_v11 = vmul.f32 %v5203_v45, %v5203_v45  ;;  %v1316_v13 = vmul.f32 %v5205_v57, %v5205_v57  ;;  %v5206_v35 = vld [vmem:[#allocation2 + $0x218] sm:$0xff]  ;;  %v5209_v7 = vld [vmem:[#allocation2 + $0x220] sm:$0xff] }
  0xf7   :  { %1088 = vadd.xlane.f32.xlu1 %v1087_v49  ;;  %v1004_v60 = vadd.f32 %v1003_v6, %v487_v52  ;;  %v1172_v40 = vmul.f32 %v5206_v35, %v5206_v35  ;;  %v1682_v0 = vadd.f32 %v1170_v51, %v1169_v48  ;;  %v5207_v49 = vld [vmem:[#allocation2 + $0x508] sm:$0xff]  ;;  %v1173_v9 = vmul.f32 %v5209_v7, %v5209_v7 }
  0xf8   :  { %v1774_v21 = vadd.f32 %v1773_v63, %v1261_v12  ;;  %v1827_v2 = vadd.f32 %v1826_v33, %v1313_v47  ;;  %v1266_v52 = vmul.f32 %v5207_v49, %v5207_v49  ;;  %v1318_v12 = vmul.f32 %v5211_v1, %v5211_v1  ;;  %v5213_v63 = vld [vmem:[#allocation2 + $0x518] sm:$0xff] }
  0xf9   :  { %v1005_v42 = vadd.f32 %v1004_v60, %v488_v30  ;;  %v1683_v30 = vadd.f32 %v1682_v0, %v1171_v11  ;;  %v1174_v18 = vmul.f32 %v5212_v58, %v5212_v58  ;;  %v5217_v33 = vld [vmem:[#allocation2 + $0x6b8] sm:$0xff]  ;;  %v1176_v51 = vmul.f32 %v5218_v31, %v5218_v31  ;;  %v5221_v11 = vld [vmem:[#allocation2 + $0x240] sm:$0xff]  ;;  %v5224_v0 = vld [vmem:[#allocation2 + $0x248] sm:$0xff] }
  0xfa   :  { %v1775_v59 = vadd.f32 %v1774_v21, %v1262_v25  ;;  %v1828_v22 = vadd.f32 %v1827_v2, %v1314_v55  ;;  %v5214_v25 = vld [vmem:[#allocation2 + $0x6b0] sm:$0xff] }
  0xfb   :  { %v1006_v32 = vadd.f32 %v1005_v42, %v489_v62  ;;  %v1684_v56 = vadd.f32 %v1683_v30, %v1172_v40  ;;  %v496_v42 = vld [vmem:[#allocation2 + $0xdb0] sm:$0xff]  ;;  %v1319_v61 = vmul.f32 %v5214_v25, %v5214_v25  ;;  %v502_v25 = vld [vmem:[#allocation2 + $0xde0] sm:$0xff] }
  0xfc   :  { %v1776_v50 = vadd.f32 %v1775_v59, %v1263_v5  ;;  %v1829_v6 = vadd.f32 %v1828_v22, %v1315_v27  ;;  %v5216_v5 = vld [vmem:[#allocation2 + $0x520] sm:$0xff]  ;;  %v5223_v22 = vld [vmem:[#allocation2 + $0x6c8] sm:$0xff]  ;;  %v5227_v30 = vld [vmem:[#allocation2 + $0x250] sm:$0xff] }
  0xfd   :  { %v1007_v39 = vadd.f32 %v1006_v32, %v490_v41  ;;  %v1268_v41 = vmul.f32 %v5213_v63, %v5213_v63  ;;  %v5215_v32 = vld [vmem:[#allocation2 + $0x230] sm:$0xff]  ;;  %v1269_v24 = vmul.f32 %v5216_v5, %v5216_v5  ;;  %v5220_v27 = vld [vmem:[#allocation2 + $0x6c0] sm:$0xff]  ;;  %v5231_v63 = vld [vmem:[#allocation2 + $0x258] sm:$0xff] }
  0xfe   :  { %v1777_v46 = vadd.f32 %v1776_v50, %v1264_v3  ;;  %v1830_v4 = vadd.f32 %v1829_v6, %v1316_v13  ;;  %v1175_v21 = vmul.f32 %v5215_v32, %v5215_v32  ;;  %v5219_v3 = vld [vmem:[#allocation2 + $0x528] sm:$0xff]  ;;  %v1321_v2 = vmul.f32 %v5220_v27, %v5220_v27  ;;  %v5222_v50 = vld [vmem:[#allocation2 + $0x530] sm:$0xff]  ;;  %v5233_v32 = vld [vmem:[#allocation2 + $0x6e0] sm:$0xff] }
  0xff   :  { %v1008_v16 = vadd.f32 %v1007_v39, %v491_v29  ;;  %v1685_v29 = vadd.f32 %v1684_v56, %v1173_v9  ;;  %v1320_v39 = vmul.f32 %v5217_v33, %v5217_v33  ;;  %v1270_v59 = vmul.f32 %v5219_v3, %v5219_v3  ;;  %v5226_v6 = vld [vmem:[#allocation2 + $0x6d0] sm:$0xff]  ;;  %v5230_v56 = vld [vmem:[#allocation2 + $0x548] sm:$0xff]  ;;  %v5234_v5 = vld [vmem:[#allocation2 + $0x558] sm:$0xff] }
 0x100   :  { %v1778_v60 = vadd.f32 %v1777_v46, %v1265_v43  ;;  %v1831_v47 = vadd.f32 %v1830_v4, %v1317_v38  ;;  %v499_v43 = vld [vmem:[#allocation2 + $0xdc8] sm:$0xff]  ;;  %v1271_v57 = vmul.f32 %v5222_v50, %v5222_v50  ;;  %v5225_v46 = vld [vmem:[#allocation2 + $0x538] sm:$0xff]  ;;  %v5241_v50 = vld [vmem:[#allocation2 + $0x6f0] sm:$0xff] }
 0x101   :  { %v1009_v8 = vadd.f32 %v1008_v16, %v492_v17  ;;  %v1686_v17 = vadd.f32 %v1685_v29, %v1174_v18  ;;  %v1272_v26 = vmul.f32 %v5225_v46, %v5225_v46  ;;  %v5229_v4 = vld [vmem:[#allocation2 + $0x6d8] sm:$0xff] }
 0x102   :  { %v1779_v10 = vadd.f32 %v1778_v60, %v1266_v52  ;;  %v1832_v54 = vadd.f32 %v1831_v47, %v1318_v12  ;;  %v500_v52 = vld [vmem:[#allocation2 + $0xdd0] sm:$0xff]  ;;  %v5228_v60 = vld [vmem:[#allocation2 + $0x540] sm:$0xff] }
 0x103   :  { %v1010_v36 = vadd.f32 %v1009_v8, %v493_v23  ;;  %v1177_v23 = vmul.f32 %v5221_v11, %v5221_v11  ;;  %v1687_v37 = vadd.f32 %v1686_v17, %v1175_v21  ;;  %v1322_v8 = vmul.f32 %v5223_v22, %v5223_v22  ;;  %v5237_v17 = vld [vmem:[#allocation2 + $0x6e8] sm:$0xff]  ;;  %v504_v11 = vld [vmem:[#allocation2 + $0xdf0] sm:$0xff] }
 0x104   :  { %v1780_v55 = vadd.f32 %v1779_v10, %v1267_v28  ;;  %v1833_v16 = vadd.f32 %v1832_v54, %v1319_v61  ;;  %v501_v28 = vld [vmem:[#allocation2 + $0xdd8] sm:$0xff]  ;;  %v1273_v1 = vmul.f32 %v5228_v60, %v5228_v60  ;;  %v5232_v61 = vld [vmem:[#allocation2 + $0x550] sm:$0xff]  ;;  %v1325_v21 = vmul.f32 %v5233_v32, %v5233_v32  ;;  %v503_v54 = vld [vmem:[#allocation2 + $0xde8] sm:$0xff] }
 0x105   :  { %v1011_v62 = vadd.f32 %v1010_v36, %v494_v19  ;;  %v1178_v19 = vmul.f32 %v5224_v0, %v5224_v0  ;;  %v1688_v49 = vadd.f32 %v1687_v37, %v1176_v51  ;;  %v1323_v36 = vmul.f32 %v5226_v6, %v5226_v6  ;;  %v5245_v6 = vld [vmem:[#allocation2 + $0x278] sm:$0xff]  ;;  %v5248_v60 = vld [vmem:[#allocation2 + $0x580] sm:$0xff] }
 0x106   :  { %v1781_v44 = vadd.f32 %v1780_v55, %v1268_v41  ;;  %v1834_v35 = vadd.f32 %v1833_v16, %v1320_v39  ;;  %v1180_v41 = vmul.f32 %v5231_v63, %v5231_v63  ;;  %v1275_v47 = vmul.f32 %v5232_v61, %v5232_v61  ;;  %v5235_v55 = vld [vmem:[#allocation2 + $0x260] sm:$0xff] }
 0x107   :  { %v1012_v15 = vadd.f32 %v1011_v62, %v495_v20  ;;  %v1179_v20 = vmul.f32 %v5227_v30, %v5227_v30  ;;  %v1689_v14 = vadd.f32 %v1688_v49, %v1177_v23  ;;  %v1324_v62 = vmul.f32 %v5229_v4, %v5229_v4  ;;  %v5240_v23 = vld [vmem:[#allocation2 + $0x570] sm:$0xff]  ;;  %v505_v49 = vld [vmem:[#allocation2 + $0xdf8] sm:$0xff]  ;;  %v5246_v30 = vld [vmem:[#allocation2 + $0xa00] sm:$0xff] }
 0x108   :  { %v1782_v13 = vadd.f32 %v1781_v44, %v1269_v24  ;;  %v1835_v7 = vadd.f32 %v1834_v35, %v1321_v2  ;;  %v1276_v24 = vmul.f32 %v5234_v5, %v5234_v5  ;;  %v1181_v33 = vmul.f32 %v5235_v55, %v5235_v55  ;;  %v5238_v44 = vld [vmem:[#allocation2 + $0x568] sm:$0xff]  ;;  %v5249_v4 = vld [vmem:[#allocation2 + $0x700] sm:$0xff] }
 0x109   :  { %v1013_v48 = vadd.f32 %v1012_v15, %v496_v42  ;;  %v1274_v42 = vmul.f32 %v5230_v56, %v5230_v56  ;;  %v1690_v10 = vadd.f32 %v1689_v14, %v1178_v19  ;;  %v1278_v27 = vmul.f32 %v5238_v44, %v5238_v44  ;;  %v5239_v2 = vld [vmem:[#allocation2 + $0x268] sm:$0xff]  ;;  %v5250_v56 = vld [vmem:[#allocation2 + $0x280] sm:$0xff] }
 0x10a   :  { %v1783_v38 = vadd.f32 %v1782_v13, %v1270_v59  ;;  %v1836_v58 = vadd.f32 %v1835_v7, %v1322_v8  ;;  %v1182_v16 = vmul.f32 %v5239_v2, %v5239_v2  ;;  %v6571_v37 = vmul.f32 %v5240_v23, %v5240_v23  ;;  %v5242_v8 = vld [vmem:[#allocation2 + $0x6f8] sm:$0xff]  ;;  %v5247_v14 = vld [vmem:[#allocation2 + $0xa08] sm:$0xff] }
 0x10b   :  { %v1014_v45 = vadd.f32 %v1013_v48, %v497_v34  ;;  %v1691_v39 = vadd.f32 %v1690_v10, %v1179_v20  ;;  %v5236_v48 = vld [vmem:[#allocation2 + $0x560] sm:$0xff]  ;;  %v1328_v35 = vmul.f32 %v5242_v8, %v5242_v8  ;;  %v1425_v20 = vmul.f32 %v5246_v30, %v5246_v30 }
 0x10c   :  { %v1784_v12 = vadd.f32 %v1783_v38, %v1271_v57  ;;  %v1837_v29 = vadd.f32 %v1836_v58, %v1323_v36  ;;  %v1277_v31 = vmul.f32 %v5236_v48, %v5236_v48  ;;  %v1327_v57 = vmul.f32 %v5241_v50, %v5241_v50 }
 0x10d   :  { %v1015_v40 = vadd.f32 %v1014_v45, %v498_v53  ;;  %v1326_v53 = vmul.f32 %v5237_v17, %v5237_v17  ;;  %v1692_v45 = vadd.f32 %v1691_v39, %v1180_v41  ;;  %v1184_v36 = vmul.f32 %v5245_v6, %v5245_v6  ;;  %v5251_v41 = vld [vmem:[#allocation2 + $0xa10] sm:$0xff]  ;;  %v5266_v6 = vld [vmem:[#allocation2 + $0x2a0] sm:$0xff] }
 0x10e   :  { %v1785_v15 = vadd.f32 %v1784_v12, %v1272_v26  ;;  %v1838_v3 = vadd.f32 %v1837_v29, %v1324_v62  ;;  %v1329_v62 = vmul.f32 %v5249_v4, %v5249_v4  ;;  %v1427_v10 = vmul.f32 %v5251_v41, %v5251_v41  ;;  %v5254_v29 = vld [vmem:[#allocation2 + $0x288] sm:$0xff]  ;;  %v5256_v39 = vld [vmem:[#allocation2 + $0x590] sm:$0xff] }
 0x10f   :  { %v1016_v9 = vadd.f32 %v1015_v40, %v499_v43  ;;  %v5243_v40 = vld [vmem:[#allocation2 + $0x270] sm:$0xff]  ;;  %v1693_v19 = vadd.f32 %v1692_v45, %v1181_v33  ;;  %v5260_v45 = vld [vmem:[#allocation2 + $0x598] sm:$0xff] }
 0x110   :  { %v1786_v51 = vadd.f32 %v1785_v15, %v1273_v1  ;;  %v1839_v13 = vadd.f32 %v1838_v3, %v1325_v21  ;;  %v1183_v0 = vmul.f32 %v5243_v40, %v5243_v40  ;;  %v1281_v1 = vmul.f32 %v5248_v60, %v5248_v60  ;;  %v5253_v15 = vld [vmem:[#allocation2 + $0x708] sm:$0xff]  ;;  %v5258_v3 = vld [vmem:[#allocation2 + $0x290] sm:$0xff] }
 0x111   :  { %v1017_v18 = vadd.f32 %v1016_v9, %v500_v52  ;;  %v5244_v52 = vld [vmem:[#allocation2 + $0x578] sm:$0xff]  ;;  %v1694_v9 = vadd.f32 %v1693_v19, %v1182_v16  ;;  %v1330_v32 = vmul.f32 %v5253_v15, %v5253_v15  ;;  %v5269_v60 = vld [vmem:[#allocation2 + $0x728] sm:$0xff] }
 0x112   :  { %v1787_v43 = vadd.f32 %v1786_v51, %v1274_v42  ;;  %v1280_v46 = vmul.f32 %v5244_v52, %v5244_v52  ;;  %v1840_v38 = vadd.f32 %v1839_v13, %v1326_v53  ;;  %v1185_v42 = vmul.f32 %v5250_v56, %v5250_v56  ;;  %v5257_v51 = vld [vmem:[#allocation2 + $0x710] sm:$0xff]  ;;  %v5262_v13 = vld [vmem:[#allocation2 + $0x298] sm:$0xff]  ;;  %v5265_v52 = vld [vmem:[#allocation2 + $0x720] sm:$0xff] }
 0x113   :  { %v1018_v34 = vadd.f32 %v1017_v18, %v501_v28  ;;  %v1426_v28 = vmul.f32 %v5247_v14, %v5247_v14  ;;  %v1695_v63 = vadd.f32 %v1694_v9, %v1183_v0  ;;  %v1331_v17 = vmul.f32 %v5257_v51, %v5257_v51  ;;  %v5264_v0 = vld [vmem:[#allocation2 + $0x5a0] sm:$0xff]  ;;  %v5267_v9 = vld [vmem:[#allocation2 + $0xa30] sm:$0xff]  ;;  %v5271_v56 = vld [vmem:[#allocation2 + $0xa38] sm:$0xff] }
 0x114   :  { %v1788_v26 = vadd.f32 %v1787_v43, %v1275_v47  ;;  %v1841_v58 = vadd.f32 %v1840_v38, %v1327_v57  ;;  %v5261_v43 = vld [vmem:[#allocation2 + $0x718] sm:$0xff]  ;;  %v1285_v19 = vmul.f32 %v5264_v0, %v5264_v0  ;;  %v5285_v0 = vld [vmem:[#allocation2 + $0x748] sm:$0xff] }
 0x115   :  { %v1019_v59 = vadd.f32 %v1018_v34, %v502_v25  ;;  %v5252_v25 = vld [vmem:[#allocation2 + $0x588] sm:$0xff]  ;;  %v1186_v34 = vmul.f32 %v5254_v29, %v5254_v29  ;;  %v1696_v5 = vadd.f32 %v1695_v63, %v1184_v36  ;;  %v1942_v33 = vadd.f32 %v1426_v28, %v1425_v20  ;;  %v5272_v63 = vld [vmem:[#allocation2 + $0x5b0] sm:$0xff] }
 0x116   :  { %v1789_v12 = vadd.f32 %v1788_v26, %v1276_v24  ;;  %v1282_v61 = vmul.f32 %v5252_v25, %v5252_v25  ;;  %v1842_v21 = vadd.f32 %v1841_v58, %v1328_v35  ;;  %v5255_v24 = vld [vmem:[#allocation2 + $0xa18] sm:$0xff]  ;;  %v1332_v50 = vmul.f32 %v5261_v43, %v5261_v43  ;;  %v5268_v20 = vld [vmem:[#allocation2 + $0x5a8] sm:$0xff]  ;;  %v5273_v25 = vld [vmem:[#allocation2 + $0x730] sm:$0xff] }
 0x117   :  { %v1020_v22 = vadd.f32 %v1019_v59, %v503_v54  ;;  %v1428_v55 = vmul.f32 %v5255_v24, %v5255_v24  ;;  %v1283_v54 = vmul.f32 %v5256_v39, %v5256_v39  ;;  %v1187_v59 = vmul.f32 %v5258_v3, %v5258_v3  ;;  %v5276_v24 = vld [vmem:[#allocation2 + $0x5b8] sm:$0xff] }
 0x118   :  { %v1790_v47 = vadd.f32 %v1789_v12, %v1277_v31  ;;  %v1843_v53 = vadd.f32 %v1842_v21, %v1329_v62  ;;  %v1697_v44 = vadd.f32 %v1696_v5, %v1185_v42  ;;  %v5259_v31 = vld [vmem:[#allocation2 + $0xa20] sm:$0xff]  ;;  %v1943_v16 = vadd.f32 %v1942_v33, %v1427_v10  ;;  %v5270_v62 = vld [vmem:[#allocation2 + $0x2a8] sm:$0xff]  ;;  %v5277_v39 = vld [vmem:[#allocation2 + $0x738] sm:$0xff] }
 0x119   :  { %v1021_v7 = vadd.f32 %v1020_v22, %v504_v11  ;;  %v1429_v2 = vmul.f32 %v5259_v31, %v5259_v31  ;;  %v1284_v11 = vmul.f32 %v5260_v45, %v5260_v45  ;;  %v1188_v22 = vmul.f32 %v5262_v13, %v5262_v13  ;;  %v5280_v31 = vld [vmem:[#allocation2 + $0x5c0] sm:$0xff] }
 0x11a   :  { %v1791_v48 = vadd.f32 %v1790_v47, %v1278_v27  ;;  %v1844_v57 = vadd.f32 %v1843_v53, %v1330_v32  ;;  %v1698_v8 = vadd.f32 %v1697_v44, %v1186_v34  ;;  %v5263_v27 = vld [vmem:[#allocation2 + $0xa28] sm:$0xff]  ;;  %v1944_v40 = vadd.f32 %v1943_v16, %v1428_v55  ;;  %v5274_v32 = vld [vmem:[#allocation2 + $0x2b0] sm:$0xff]  ;;  %v5275_v34 = vld [vmem:[#allocation2 + $0xa40] sm:$0xff] }
 0x11b   :  { %v1022_v18 = vadd.f32 %v1021_v7, %v505_v49  ;;  %v1430_v35 = vmul.f32 %v5263_v27, %v5263_v27  ;;  %v1333_v26 = vmul.f32 %v5265_v52, %v5265_v52  ;;  %v1189_v36 = vmul.f32 %v5266_v6, %v5266_v6  ;;  %v5281_v45 = vld [vmem:[#allocation2 + $0x740] sm:$0xff]  ;;  %v5284_v27 = vld [vmem:[#allocation2 + $0x5c8] sm:$0xff] }
 0x11c   :  { %v1792_v23 = vadd.f32 %v1791_v48, %v6571_v37  ;;  %v1845_v38 = vadd.f32 %v1844_v57, %v1331_v17  ;;  %v1699_v7 = vadd.f32 %v1698_v8, %v1187_v59  ;;  %v1431_v37 = vmul.f32 %v5267_v9, %v5267_v9  ;;  %v5278_v17 = vld [vmem:[#allocation2 + $0x2b8] sm:$0xff]  ;;  %v5279_v59 = vld [vmem:[#allocation2 + $0xa48] sm:$0xff]  ;;  %v5288_v9 = vld [vmem:[#allocation2 + $0x5d0] sm:$0xff] }
 0x11d   :  { %1023 = vadd.xlane.f32.xlu0 %v1022_v18  ;;  %v1945_v30 = vadd.f32 %v1944_v40, %v1429_v2  ;;  %v1286_v14 = vmul.f32 %v5268_v20, %v5268_v20  ;;  %v1334_v12 = vmul.f32 %v5269_v60, %v5269_v60  ;;  %v1190_v58 = vmul.f32 %v5270_v62, %v5270_v62  ;;  %v5289_v20 = vld [vmem:[#allocation2 + $0x750] sm:$0xff] }
 0x11e   :  { %v1793_v49 = vadd.f32 %v1792_v23, %v1280_v46  ;;  %v1846_v4 = vadd.f32 %v1845_v38, %v1332_v50  ;;  %v1700_v18 = vadd.f32 %v1699_v7, %v1188_v22  ;;  %v1432_v46 = vmul.f32 %v5271_v56, %v5271_v56  ;;  %v5282_v50 = vld [vmem:[#allocation2 + $0x2c0] sm:$0xff]  ;;  %v5283_v22 = vld [vmem:[#allocation2 + $0xa50] sm:$0xff]  ;;  %v5292_v56 = vld [vmem:[#allocation2 + $0x5d8] sm:$0xff] }
 0x11f   :  { %v1946_v42 = vadd.f32 %v1945_v30, %v1430_v35  ;;  %v1287_v41 = vmul.f32 %v5272_v63, %v5272_v63  ;;  %v1335_v47 = vmul.f32 %v5273_v25, %v5273_v25  ;;  %v1191_v21 = vmul.f32 %v5274_v32, %v5274_v32  ;;  %v5293_v63 = vld [vmem:[#allocation2 + $0x758] sm:$0xff] }
 0x120   :  { %v1794_v28 = vadd.f32 %v1793_v49, %v1281_v1  ;;  %v1847_v15 = vadd.f32 %v1846_v4, %v1333_v26  ;;  %v1701_v29 = vadd.f32 %v1700_v18, %v1189_v36  ;;  %v1433_v1 = vmul.f32 %v5275_v34, %v5275_v34  ;;  %v5286_v26 = vld [vmem:[#allocation2 + $0x2c8] sm:$0xff]  ;;  %v5287_v36 = vld [vmem:[#allocation2 + $0xa58] sm:$0xff] }
 0x121   :  { %v1947_v5 = vadd.f32 %v1946_v42, %v1431_v37  ;;  %v1288_v55 = vmul.f32 %v5276_v24, %v5276_v24  ;;  %v1336_v48 = vmul.f32 %v5277_v39, %v5277_v39  ;;  %v1192_v53 = vmul.f32 %v5278_v17, %v5278_v17 }
 0x122   :  { %v1795_v10 = vadd.f32 %v1794_v28, %v1282_v61  ;;  %v1848_v51 = vadd.f32 %v1847_v15, %v1334_v12  ;;  %v1702_v3 = vadd.f32 %v1701_v29, %v1190_v58  ;;  %v1434_v61 = vmul.f32 %v5279_v59, %v5279_v59  ;;  %v5290_v12 = vld [vmem:[#allocation2 + $0x2d0] sm:$0xff]  ;;  %v5291_v58 = vld [vmem:[#allocation2 + $0xa60] sm:$0xff]  ;;  %v5300_v59 = vld [vmem:[#allocation2 + $0x5e8] sm:$0xff] }
 0x123   :  { %v1948_v44 = vadd.f32 %v1947_v5, %v1432_v46  ;;  %v1289_v2 = vmul.f32 %v5280_v31, %v5280_v31  ;;  %v1337_v23 = vmul.f32 %v5281_v45, %v5281_v45  ;;  %v1193_v57 = vmul.f32 %v5282_v50, %v5282_v50  ;;  %v5301_v31 = vld [vmem:[#allocation2 + $0x768] sm:$0xff]  ;;  %v5303_v50 = vld [vmem:[#allocation2 + $0xa78] sm:$0xff] }
 0x124   :  { %v1796_v33 = vadd.f32 %v1795_v10, %v1283_v54  ;;  %v1849_v43 = vadd.f32 %v1848_v51, %v1335_v47  ;;  %v1703_v13 = vadd.f32 %v1702_v3, %v1191_v21  ;;  %v1435_v54 = vmul.f32 %v5283_v22, %v5283_v22  ;;  %v5294_v47 = vld [vmem:[#allocation2 + $0x2d8] sm:$0xff]  ;;  %v5295_v21 = vld [vmem:[#allocation2 + $0xa68] sm:$0xff]  ;;  %v5304_v22 = vld [vmem:[#allocation2 + $0x5f0] sm:$0xff] }
 0x125   :  { %v1949_v8 = vadd.f32 %v1948_v44, %v1433_v1  ;;  %v1290_v35 = vmul.f32 %v5284_v27, %v5284_v27  ;;  %v1338_v49 = vmul.f32 %v5285_v0, %v5285_v0  ;;  %v1194_v38 = vmul.f32 %v5286_v26, %v5286_v26  ;;  %v5296_v1 = vld [vmem:[#allocation2 + $0x760] sm:$0xff]  ;;  %v5305_v27 = vld [vmem:[#allocation2 + $0x770] sm:$0xff] }
 0x126   :  { %v1797_v16 = vadd.f32 %v1796_v33, %v1284_v11  ;;  %v1850_v52 = vadd.f32 %v1849_v43, %v1336_v48  ;;  %v1704_v6 = vadd.f32 %v1703_v13, %v1192_v53  ;;  %v1436_v11 = vmul.f32 %v5287_v36, %v5287_v36  ;;  %v5297_v33 = vld [vmem:[#allocation2 + $0x2e0] sm:$0xff]  ;;  %v5299_v53 = vld [vmem:[#allocation2 + $0xa70] sm:$0xff]  ;;  %v5308_v36 = vld [vmem:[#allocation2 + $0x5f8] sm:$0xff] }
 0x127   :  { %v1950_v7 = vadd.f32 %v1949_v8, %v1434_v61  ;;  %v1291_v37 = vmul.f32 %v5288_v9, %v5288_v9  ;;  %v1339_v28 = vmul.f32 %v5289_v20, %v5289_v20  ;;  %v1195_v4 = vmul.f32 %v5290_v12, %v5290_v12  ;;  %v5298_v48 = vld [vmem:[#allocation2 + $0x5e0] sm:$0xff]  ;;  %v5309_v9 = vld [vmem:[#allocation2 + $0x778] sm:$0xff] }
 0x128   :  { %v1798_v40 = vadd.f32 %v1797_v16, %v1285_v19  ;;  %v1851_v60 = vadd.f32 %v1850_v52, %v1337_v23  ;;  %v1705_v62 = vadd.f32 %v1704_v6, %v1193_v57  ;;  %v1437_v19 = vmul.f32 %v5291_v58, %v5291_v58  ;;  %v5302_v23 = vld [vmem:[#allocation2 + $0x2e8] sm:$0xff] }
 0x129   :  { %v1951_v18 = vadd.f32 %v1950_v7, %v1435_v54  ;;  %v1292_v46 = vmul.f32 %v5292_v56, %v5292_v56  ;;  %v1340_v10 = vmul.f32 %v5293_v63, %v5293_v63  ;;  %v1196_v15 = vmul.f32 %v5294_v47, %v5294_v47 }
 0x12a   :  { %v1799_v30 = vadd.f32 %v1798_v40, %v1286_v14  ;;  %v1852_v25 = vadd.f32 %v1851_v60, %v1338_v49  ;;  %v1706_v32 = vadd.f32 %v1705_v62, %v1194_v38  ;;  %v1438_v14 = vmul.f32 %v5295_v21, %v5295_v21  ;;  %v5306_v49 = vld [vmem:[#allocation2 + $0x2f0] sm:$0xff]  ;;  %v5307_v38 = vld [vmem:[#allocation2 + $0xa80] sm:$0xff] }
 0x12b   :  { %v1952_v29 = vadd.f32 %v1951_v18, %v1436_v11  ;;  %v1341_v5 = vmul.f32 %v5296_v1, %v5296_v1  ;;  %v1197_v39 = vmul.f32 %v5297_v33, %v5297_v33  ;;  %v1293_v51 = vmul.f32 %v5298_v48, %v5298_v48  ;;  %v5317_v1 = vld [vmem:[#allocation2 + $0x310] sm:$0xff] }
 0x12c   :  { %v1800_v42 = vadd.f32 %v1799_v30, %v1287_v41  ;;  %v1853_v24 = vadd.f32 %v1852_v25, %v1339_v28  ;;  %v1707_v17 = vadd.f32 %v1706_v32, %v1195_v4  ;;  %v1439_v41 = vmul.f32 %v5299_v53, %v5299_v53  ;;  %v5310_v28 = vld [vmem:[#allocation2 + $0x2f8] sm:$0xff]  ;;  %v5311_v4 = vld [vmem:[#allocation2 + $0xa88] sm:$0xff] }
 0x12d   :  { %v1953_v3 = vadd.f32 %v1952_v29, %v1437_v19  ;;  %v1294_v61 = vmul.f32 %v5300_v59, %v5300_v59  ;;  %v1342_v16 = vmul.f32 %v5301_v31, %v5301_v31  ;;  %v1198_v43 = vmul.f32 %v5302_v23, %v5302_v23  ;;  %v5312_v19 = vld [vmem:[#allocation2 + $0x780] sm:$0xff] }
 0x12e   :  { %v1801_v34 = vadd.f32 %v1800_v42, %v1288_v55  ;;  %v1854_v45 = vadd.f32 %v1853_v24, %v1340_v10  ;;  %v1708_v55 = vadd.f32 %v1707_v17, %v1196_v15  ;;  %v1440_v57 = vmul.f32 %v5303_v50, %v5303_v50  ;;  %v5313_v42 = vld [vmem:[#allocation2 + $0x300] sm:$0xff]  ;;  %v5314_v10 = vld [vmem:[#allocation2 + $0x308] sm:$0xff]  ;;  %v5315_v15 = vld [vmem:[#allocation2 + $0xa90] sm:$0xff] }
 0x12f   :  { %v1954_v13 = vadd.f32 %v1953_v3, %v1438_v14  ;;  %v1295_v54 = vmul.f32 %v5304_v22, %v5304_v22  ;;  %v1343_v40 = vmul.f32 %v5305_v27, %v5305_v27  ;;  %v1199_v52 = vmul.f32 %v5306_v49, %v5306_v49  ;;  %v5316_v14 = vld [vmem:[#allocation2 + $0x788] sm:$0xff]  ;;  %v5318_v24 = vld [vmem:[#allocation2 + $0x790] sm:$0xff]  ;;  %v5320_v3 = vld [vmem:[#allocation2 + $0xc00] sm:$0xff] }
 0x130   :  { %v1802_v44 = vadd.f32 %v1801_v34, %v1289_v2  ;;  %v1855_v0 = vadd.f32 %v1854_v45, %v1341_v5  ;;  %v1709_v26 = vadd.f32 %v1708_v55, %v1197_v39  ;;  %v1441_v2 = vmul.f32 %v5307_v38, %v5307_v38  ;;  %v5319_v39 = vld [vmem:[#allocation2 + $0xa98] sm:$0xff]  ;;  %v5323_v23 = vld [vmem:[#allocation2 + $0xaa0] sm:$0xff]  ;;  %v5327_v49 = vld [vmem:[#allocation2 + $0xaa8] sm:$0xff] }
 0x131   :  { %v1955_v6 = vadd.f32 %v1954_v13, %v1439_v41  ;;  %v1296_v11 = vmul.f32 %v5308_v36, %v5308_v36  ;;  %v1344_v30 = vmul.f32 %v5309_v9, %v5309_v9  ;;  %v1200_v60 = vmul.f32 %v5310_v28, %v5310_v28  ;;  %v5329_v9 = vld [vmem:[#allocation2 + $0x320] sm:$0xff] }
 0x132   :  { %v1803_v8 = vadd.f32 %v1802_v44, %v1290_v35  ;;  %v1856_v20 = vadd.f32 %v1855_v0, %v1342_v16  ;;  %v1710_v12 = vadd.f32 %v1709_v26, %v1198_v43  ;;  %v1442_v35 = vmul.f32 %v5311_v4, %v5311_v4  ;;  %v5321_v44 = vld [vmem:[#allocation2 + $0xc08] sm:$0xff]  ;;  %v5322_v16 = vld [vmem:[#allocation2 + $0x318] sm:$0xff] }
 0x133   :  { %v1956_v62 = vadd.f32 %v1955_v6, %v1440_v57  ;;  %v1345_v18 = vmul.f32 %v5312_v19, %v5312_v19  ;;  %v1201_v63 = vmul.f32 %v5313_v42, %v5313_v42  ;;  %v1202_v25 = vmul.f32 %v5314_v10, %v5314_v10  ;;  %v5324_v57 = vld [vmem:[#allocation2 + $0x798] sm:$0xff] }
 0x134   :  { %v1804_v7 = vadd.f32 %v1803_v8, %v1291_v37  ;;  %v1857_v56 = vadd.f32 %v1856_v20, %v1343_v40  ;;  %v1711_v47 = vadd.f32 %v1710_v12, %v1199_v52  ;;  %v1443_v37 = vmul.f32 %v5315_v15, %v5315_v15  ;;  %v5325_v8 = vld [vmem:[#allocation2 + $0xc10] sm:$0xff]  ;;  %v5326_v40 = vld [vmem:[#allocation2 + $0x7a0] sm:$0xff]  ;;  %v5328_v6 = vld [vmem:[#allocation2 + $0xc18] sm:$0xff] }
 0x135   :  { %v1957_v32 = vadd.f32 %v1956_v62, %v1441_v2  ;;  %v1346_v29 = vmul.f32 %v5316_v14, %v5316_v14  ;;  %v1203_v5 = vmul.f32 %v5317_v1, %v5317_v1  ;;  %v1347_v33 = vmul.f32 %v5318_v24, %v5318_v24  ;;  %v5331_v12 = vld [vmem:[#allocation2 + $0x7a8] sm:$0xff]  ;;  %v5332_v62 = vld [vmem:[#allocation2 + $0xc20] sm:$0xff]  ;;  %v5334_v42 = vld [vmem:[#allocation2 + $0xab8] sm:$0xff] }
 0x136   :  { %v1805_v58 = vadd.f32 %v1804_v7, %v1292_v46  ;;  %v1858_v34 = vadd.f32 %v1857_v56, %v1344_v30  ;;  %v1712_v46 = vadd.f32 %v1711_v47, %v1200_v60  ;;  %v1444_v48 = vmul.f32 %v5319_v39, %v5319_v39  ;;  %v5337_v14 = vld [vmem:[#allocation2 + $0x330] sm:$0xff]  ;;  %v5338_v1 = vld [vmem:[#allocation2 + $0xac0] sm:$0xff] }
 0x137   :  { %v1958_v17 = vadd.f32 %v1957_v32, %v1442_v35  ;;  %v1489_v59 = vmul.f32 %v5320_v3, %v5320_v3  ;;  %v1490_v31 = vmul.f32 %v5321_v44, %v5321_v44  ;;  %v1204_v45 = vmul.f32 %v5322_v16, %v5322_v16  ;;  %v5342_v44 = vld [vmem:[#allocation2 + $0xac8] sm:$0xff] }
 0x138   :  { %v1806_v21 = vadd.f32 %v1805_v58, %v1293_v51  ;;  %v1859_v41 = vadd.f32 %v1858_v34, %v1345_v18  ;;  %v1713_v51 = vadd.f32 %v1712_v46, %v1201_v63  ;;  %v1445_v43 = vmul.f32 %v5323_v23, %v5323_v23  ;;  %v5333_v18 = vld [vmem:[#allocation2 + $0x328] sm:$0xff] }
 0x139   :  { %v1959_v55 = vadd.f32 %v1958_v17, %v1443_v37  ;;  %v1348_v13 = vmul.f32 %v5324_v57, %v5324_v57  ;;  %v1491_v27 = vmul.f32 %v5325_v8, %v5325_v8  ;;  %v1349_v0 = vmul.f32 %v5326_v40, %v5326_v40  ;;  %v5336_v37 = vld [vmem:[#allocation2 + $0xc28] sm:$0xff]  ;;  %v5345_v57 = vld [vmem:[#allocation2 + $0x340] sm:$0xff]  ;;  %v5346_v8 = vld [vmem:[#allocation2 + $0xad0] sm:$0xff] }
 0x13a   :  { %v1807_v53 = vadd.f32 %v1806_v21, %v1294_v61  ;;  %v1860_v22 = vadd.f32 %v1859_v41, %v1346_v29  ;;  %v1714_v61 = vadd.f32 %v1713_v51, %v1202_v25  ;;  %v1446_v52 = vmul.f32 %v5327_v49, %v5327_v49  ;;  %v5335_v25 = vld [vmem:[#allocation2 + $0x7b0] sm:$0xff]  ;;  %v5341_v41 = vld [vmem:[#allocation2 + $0x338] sm:$0xff] }
 0x13b   :  { %v1960_v26 = vadd.f32 %v1959_v55, %v1444_v48  ;;  %v1492_v36 = vmul.f32 %v5328_v6, %v5328_v6  ;;  %v2007_v7 = vadd.f32 %v1490_v31, %v1489_v59  ;;  %v1205_v30 = vmul.f32 %v5329_v9, %v5329_v9  ;;  %v5340_v48 = vld [vmem:[#allocation2 + $0xc30] sm:$0xff] }
 0x13c   :  { %v1808_v50 = vadd.f32 %v1807_v53, %v1295_v54  ;;  %v1861_v2 = vadd.f32 %v1860_v22, %v1347_v33  ;;  %v1715_v20 = vadd.f32 %v1714_v61, %v1203_v5  ;;  %v5330_v54 = vld [vmem:[#allocation2 + $0xab0] sm:$0xff]  ;;  %v1350_v4 = vmul.f32 %v5331_v12, %v5331_v12  ;;  %v5339_v33 = vld [vmem:[#allocation2 + $0x7b8] sm:$0xff] }
 0x13d   :  { %v1447_v28 = vmul.f32 %v5330_v54, %v5330_v54  ;;  %v1961_v60 = vadd.f32 %v1960_v26, %v1445_v43  ;;  %v1493_v58 = vmul.f32 %v5332_v62, %v5332_v62  ;;  %v2008_v19 = vadd.f32 %v2007_v7, %v1491_v27  ;;  %v5344_v43 = vld [vmem:[#allocation2 + $0xc38] sm:$0xff] }
 0x13e   :  { %v1809_v38 = vadd.f32 %v1808_v50, %v1296_v11  ;;  %v1862_v35 = vadd.f32 %v1861_v2, %v1348_v13  ;;  %v1206_v56 = vmul.f32 %v5333_v18, %v5333_v18  ;;  %v1716_v11 = vadd.f32 %v1715_v20, %v1204_v45  ;;  %v5343_v45 = vld [vmem:[#allocation2 + $0x7c0] sm:$0xff]  ;;  %v5349_v2 = vld [vmem:[#allocation2 + $0x348] sm:$0xff]  ;;  %v5350_v7 = vld [vmem:[#allocation2 + $0xad8] sm:$0xff] }
 0x13f   :  { %v1448_v63 = vmul.f32 %v5334_v42, %v5334_v42  ;;  %v1962_v10 = vadd.f32 %v1961_v60, %v1446_v52  ;;  %v1351_v47 = vmul.f32 %v5335_v25, %v5335_v25  ;;  %v1494_v32 = vmul.f32 %v5336_v37, %v5336_v37  ;;  %v5348_v52 = vld [vmem:[#allocation2 + $0xc40] sm:$0xff]  ;;  %v5351_v20 = vld [vmem:[#allocation2 + $0x7d0] sm:$0xff]  ;;  %v5352_v60 = vld [vmem:[#allocation2 + $0xc48] sm:$0xff] }
 0x140   :  { %1810 = vadd.xlane.f32.xlu1 %v1809_v38  ;;  %v1863_v15 = vadd.f32 %v1862_v35, %v1349_v0  ;;  %v2009_v21 = vadd.f32 %v2008_v19, %v1492_v36  ;;  %v1207_v29 = vmul.f32 %v5337_v14, %v5337_v14  ;;  %v1717_v34 = vadd.f32 %v1716_v11, %v1205_v30  ;;  %v5347_v0 = vld [vmem:[#allocation2 + $0x7c8] sm:$0xff]  ;;  %v5353_v35 = vld [vmem:[#allocation2 + $0x350] sm:$0xff]  ;;  %v5354_v19 = vld [vmem:[#allocation2 + $0xae0] sm:$0xff] }
 0x141   :  { %v1449_v5 = vmul.f32 %v5338_v1, %v5338_v1  ;;  %v1963_v24 = vadd.f32 %v1962_v10, %v1447_v28  ;;  %v1352_v46 = vmul.f32 %v5339_v33, %v5339_v33  ;;  %v1495_v17 = vmul.f32 %v5340_v48, %v5340_v48  ;;  %v5355_v11 = vld [vmem:[#allocation2 + $0x7d8] sm:$0xff]  ;;  %v5356_v10 = vld [vmem:[#allocation2 + $0xc50] sm:$0xff] }
 0x142   :  { %v1864_v39 = vadd.f32 %v1863_v15, %v1350_v4  ;;  %v2010_v53 = vadd.f32 %v2009_v21, %v1493_v58  ;;  %v1208_v3 = vmul.f32 %v5341_v41, %v5341_v41  ;;  %v1718_v59 = vadd.f32 %v1717_v34, %v1206_v56  ;;  %v5357_v15 = vld [vmem:[#allocation2 + $0x358] sm:$0xff]  ;;  %v5358_v21 = vld [vmem:[#allocation2 + $0xae8] sm:$0xff]  ;;  %v5359_v34 = vld [vmem:[#allocation2 + $0x7e0] sm:$0xff] }
 0x143   :  { %v1450_v31 = vmul.f32 %v5342_v44, %v5342_v44  ;;  %v1964_v16 = vadd.f32 %v1963_v24, %v1448_v63  ;;  %v1353_v51 = vmul.f32 %v5343_v45, %v5343_v45  ;;  %v1496_v55 = vmul.f32 %v5344_v43, %v5344_v43  ;;  %v5360_v24 = vld [vmem:[#allocation2 + $0xc58] sm:$0xff] }
 0x144   :  { %v1865_v23 = vadd.f32 %v1864_v39, %v1351_v47  ;;  %v2011_v50 = vadd.f32 %v2010_v53, %v1494_v32  ;;  %v1209_v13 = vmul.f32 %v5345_v57, %v5345_v57  ;;  %v1719_v22 = vadd.f32 %v1718_v59, %v1207_v29  ;;  %v5361_v39 = vld [vmem:[#allocation2 + $0x360] sm:$0xff]  ;;  %v5362_v53 = vld [vmem:[#allocation2 + $0xaf0] sm:$0xff]  ;;  %v5363_v59 = vld [vmem:[#allocation2 + $0x7e8] sm:$0xff] }
 0x145   :  { %v1451_v27 = vmul.f32 %v5346_v8, %v5346_v8  ;;  %v1965_v40 = vadd.f32 %v1964_v16, %v1449_v5  ;;  %v1354_v61 = vmul.f32 %v5347_v0, %v5347_v0  ;;  %v1497_v26 = vmul.f32 %v5348_v52, %v5348_v52  ;;  %v5364_v16 = vld [vmem:[#allocation2 + $0xc60] sm:$0xff] }
 0x146   :  { %v1866_v49 = vadd.f32 %v1865_v23, %v1352_v46  ;;  %v2012_v38 = vadd.f32 %v2011_v50, %v1495_v17  ;;  %v1210_v6 = vmul.f32 %v5349_v2, %v5349_v2  ;;  %v1720_v36 = vadd.f32 %v1719_v22, %v1208_v3  ;;  %v5365_v23 = vld [vmem:[#allocation2 + $0x368] sm:$0xff]  ;;  %v5366_v50 = vld [vmem:[#allocation2 + $0xaf8] sm:$0xff]  ;;  %v5367_v22 = vld [vmem:[#allocation2 + $0x7f0] sm:$0xff] }
 0x147   :  { %v1452_v9 = vmul.f32 %v5350_v7, %v5350_v7  ;;  %v1966_v30 = vadd.f32 %v1965_v40, %v1450_v31  ;;  %v1355_v54 = vmul.f32 %v5351_v20, %v5351_v20  ;;  %v1498_v12 = vmul.f32 %v5352_v60, %v5352_v60  ;;  %v5368_v40 = vld [vmem:[#allocation2 + $0xc68] sm:$0xff] }
 0x148   :  { %v1867_v28 = vadd.f32 %v1866_v49, %v1353_v51  ;;  %v2013_v4 = vadd.f32 %v2012_v38, %v1496_v55  ;;  %v1211_v62 = vmul.f32 %v5353_v35, %v5353_v35  ;;  %v1721_v58 = vadd.f32 %v1720_v36, %v1209_v13  ;;  %v5369_v49 = vld [vmem:[#allocation2 + $0x370] sm:$0xff]  ;;  %v5370_v38 = vld [vmem:[#allocation2 + $0xb00] sm:$0xff]  ;;  %v5371_v36 = vld [vmem:[#allocation2 + $0x7f8] sm:$0xff] }
 0x149   :  { %v1453_v18 = vmul.f32 %v5354_v19, %v5354_v19  ;;  %v1967_v56 = vadd.f32 %v1966_v30, %v1451_v27  ;;  %v1356_v42 = vmul.f32 %v5355_v11, %v5355_v11  ;;  %v1499_v25 = vmul.f32 %v5356_v10, %v5356_v10  ;;  %v5372_v30 = vld [vmem:[#allocation2 + $0xc70] sm:$0xff]  ;;  %v5375_v19 = vld [vmem:[#allocation2 + $0xc78] sm:$0xff]  ;;  %v5376_v11 = vld [vmem:[#allocation2 + $0x380] sm:$0xff] }
 0x14a   :  { %v1868_v63 = vadd.f32 %v1867_v28, %v1354_v61  ;;  %v2014_v47 = vadd.f32 %v2013_v4, %v1497_v26  ;;  %v1212_v37 = vmul.f32 %v5357_v15, %v5357_v15  ;;  %v1722_v32 = vadd.f32 %v1721_v58, %v1210_v6  ;;  %v5373_v28 = vld [vmem:[#allocation2 + $0x378] sm:$0xff]  ;;  %v5374_v4 = vld [vmem:[#allocation2 + $0xb08] sm:$0xff] }
 0x14b   :  { %v1454_v14 = vmul.f32 %v5358_v21, %v5358_v21  ;;  %v1968_v29 = vadd.f32 %v1967_v56, %v1452_v9  ;;  %v1357_v1 = vmul.f32 %v5359_v34, %v5359_v34  ;;  %v1500_v33 = vmul.f32 %v5360_v24, %v5360_v24  ;;  %v5379_v21 = vld [vmem:[#allocation2 + $0xc80] sm:$0xff] }
 0x14c   :  { %v1869_v5 = vadd.f32 %v1868_v63, %v1355_v54  ;;  %v2015_v46 = vadd.f32 %v2014_v47, %v1498_v12  ;;  %v1213_v48 = vmul.f32 %v5361_v39, %v5361_v39  ;;  %v1723_v17 = vadd.f32 %v1722_v32, %v1211_v62  ;;  %v5377_v63 = vld [vmem:[#allocation2 + $0x388] sm:$0xff]  ;;  %v5382_v39 = vld [vmem:[#allocation2 + $0xb18] sm:$0xff] }
 0x14d   :  { %v1455_v41 = vmul.f32 %v5362_v53, %v5362_v53  ;;  %v1969_v3 = vadd.f32 %v1968_v29, %v1453_v18  ;;  %v1358_v44 = vmul.f32 %v5363_v59, %v5363_v59  ;;  %v1501_v45 = vmul.f32 %v5364_v16, %v5364_v16 }
 0x14e   :  { %v1870_v31 = vadd.f32 %v1869_v5, %v1356_v42  ;;  %v2016_v51 = vadd.f32 %v2015_v46, %v1499_v25  ;;  %v1214_v43 = vmul.f32 %v5365_v23, %v5365_v23  ;;  %v1724_v55 = vadd.f32 %v1723_v17, %v1212_v37  ;;  %v5378_v37 = vld [vmem:[#allocation2 + $0xb10] sm:$0xff]  ;;  %v5380_v5 = vld [vmem:[#allocation2 + $0x800] sm:$0xff]  ;;  %v5383_v17 = vld [vmem:[#allocation2 + $0xc88] sm:$0xff] }
 0x14f   :  { %v1456_v57 = vmul.f32 %v5366_v50, %v5366_v50  ;;  %v1970_v13 = vadd.f32 %v1969_v3, %v1454_v14  ;;  %v1359_v8 = vmul.f32 %v5367_v22, %v5367_v22  ;;  %v1502_v0 = vmul.f32 %v5368_v40, %v5368_v40  ;;  %v5384_v3 = vld [vmem:[#allocation2 + $0x390] sm:$0xff]  ;;  %v5387_v23 = vld [vmem:[#allocation2 + $0xb20] sm:$0xff]  ;;  %v5390_v40 = vld [vmem:[#allocation2 + $0x818] sm:$0xff] }
 0x150   :  { %v1871_v27 = vadd.f32 %v1870_v31, %v1357_v1  ;;  %v2017_v61 = vadd.f32 %v2016_v51, %v1500_v33  ;;  %v1215_v52 = vmul.f32 %v5369_v49, %v5369_v49  ;;  %v1725_v26 = vadd.f32 %v1724_v55, %v1213_v48  ;;  %v5381_v33 = vld [vmem:[#allocation2 + $0x808] sm:$0xff]  ;;  %v5388_v50 = vld [vmem:[#allocation2 + $0xc90] sm:$0xff]  ;;  %v5389_v22 = vld [vmem:[#allocation2 + $0x3a0] sm:$0xff] }
 0x151   :  { %v1457_v2 = vmul.f32 %v5370_v38, %v5370_v38  ;;  %v1971_v6 = vadd.f32 %v1970_v13, %v1455_v41  ;;  %v1360_v7 = vmul.f32 %v5371_v36, %v5371_v36  ;;  %v1503_v20 = vmul.f32 %v5372_v30, %v5372_v30  ;;  %v5391_v49 = vld [vmem:[#allocation2 + $0xb28] sm:$0xff]  ;;  %v5392_v38 = vld [vmem:[#allocation2 + $0xc98] sm:$0xff]  ;;  %v5394_v30 = vld [vmem:[#allocation2 + $0x820] sm:$0xff] }
 0x152   :  { %v1872_v9 = vadd.f32 %v1871_v27, %v1358_v44  ;;  %v2018_v54 = vadd.f32 %v2017_v61, %v1501_v45  ;;  %v1216_v60 = vmul.f32 %v5373_v28, %v5373_v28  ;;  %v1726_v12 = vadd.f32 %v1725_v26, %v1214_v43  ;;  %v5385_v44 = vld [vmem:[#allocation2 + $0x398] sm:$0xff]  ;;  %v5386_v45 = vld [vmem:[#allocation2 + $0x810] sm:$0xff]  ;;  %v5393_v36 = vld [vmem:[#allocation2 + $0x3a8] sm:$0xff] }
 0x153   :  { %v1458_v35 = vmul.f32 %v5374_v4, %v5374_v4  ;;  %v1972_v62 = vadd.f32 %v1971_v6, %v1456_v57  ;;  %v1504_v18 = vmul.f32 %v5375_v19, %v5375_v19  ;;  %v1217_v42 = vmul.f32 %v5376_v11, %v5376_v11  ;;  %v5395_v28 = vld [vmem:[#allocation2 + $0xb30] sm:$0xff]  ;;  %v5396_v4 = vld [vmem:[#allocation2 + $0xca0] sm:$0xff] }
 0x154   :  { %v1873_v58 = vadd.f32 %v1872_v9, %v1359_v8  ;;  %v2019_v56 = vadd.f32 %v2018_v54, %v1502_v0  ;;  %v1218_v10 = vmul.f32 %v5377_v63, %v5377_v63  ;;  %v1727_v25 = vadd.f32 %v1726_v12, %v1215_v52  ;;  %v5399_v63 = vld [vmem:[#allocation2 + $0xb38] sm:$0xff] }
 0x155   :  { %v1973_v47 = vadd.f32 %v1972_v62, %v1457_v2  ;;  %v1459_v32 = vmul.f32 %v5378_v37, %v5378_v37  ;;  %v1505_v14 = vmul.f32 %v5379_v21, %v5379_v21  ;;  %v1361_v24 = vmul.f32 %v5380_v5, %v5380_v5  ;;  %v5403_v5 = vld [vmem:[#allocation2 + $0xb40] sm:$0xff] }
 0x156   :  { %v1874_v15 = vadd.f32 %v1873_v58, %v1360_v7  ;;  %v2020_v29 = vadd.f32 %v2019_v56, %v1503_v20  ;;  %v1728_v34 = vadd.f32 %v1727_v25, %v1216_v60  ;;  %v1362_v46 = vmul.f32 %v5381_v33, %v5381_v33  ;;  %v5397_v58 = vld [vmem:[#allocation2 + $0x3b0] sm:$0xff]  ;;  %v5398_v56 = vld [vmem:[#allocation2 + $0x828] sm:$0xff] }
 0x157   :  { %v1974_v1 = vadd.f32 %v1973_v47, %v1458_v35  ;;  %v1460_v48 = vmul.f32 %v5382_v39, %v5382_v39  ;;  %v1506_v53 = vmul.f32 %v5383_v17, %v5383_v17  ;;  %v1219_v59 = vmul.f32 %v5384_v3, %v5384_v3  ;;  %v5400_v47 = vld [vmem:[#allocation2 + $0xca8] sm:$0xff]  ;;  %v5405_v17 = vld [vmem:[#allocation2 + $0x3c0] sm:$0xff]  ;;  %v5406_v3 = vld [vmem:[#allocation2 + $0x838] sm:$0xff] }
 0x158   :  { %1875 = vadd.xlane.f32.xlu2 %v1874_v15  ;;  %v2021_v41 = vadd.f32 %v2020_v29, %v1504_v18  ;;  %v1220_v31 = vmul.f32 %v5385_v44, %v5385_v44  ;;  %v1729_v16 = vadd.f32 %v1728_v34, %v1217_v42  ;;  %v1363_v51 = vmul.f32 %v5386_v45, %v5386_v45  ;;  %v5402_v29 = vld [vmem:[#allocation2 + $0x830] sm:$0xff] }
 0x159   :  { %v1461_v43 = vmul.f32 %v5387_v23, %v5387_v23  ;;  %v1975_v55 = vadd.f32 %v1974_v1, %v1459_v32  ;;  %v1507_v57 = vmul.f32 %v5388_v50, %v5388_v50  ;;  %v1221_v8 = vmul.f32 %v5389_v22, %v5389_v22  ;;  %v5401_v32 = vld [vmem:[#allocation2 + $0x3b8] sm:$0xff] }
 0x15a   :  { %v2022_v13 = vadd.f32 %v2021_v41, %v1505_v14  ;;  %v1730_v27 = vadd.f32 %v1729_v16, %v1218_v10  ;;  %v1364_v0 = vmul.f32 %v5390_v40, %v5390_v40  ;;  %v1877_v61 = vadd.f32 %v1362_v46, %v1361_v24  ;;  %v5404_v46 = vld [vmem:[#allocation2 + $0xcb0] sm:$0xff] }
 0x15b   :  { %v1462_v52 = vmul.f32 %v5391_v49, %v5391_v49  ;;  %v1976_v26 = vadd.f32 %v1975_v55, %v1460_v48  ;;  %v1508_v2 = vmul.f32 %v5392_v38, %v5392_v38  ;;  %v1222_v7 = vmul.f32 %v5393_v36, %v5393_v36  ;;  %v5409_v55 = vld [vmem:[#allocation2 + $0x3c8] sm:$0xff] }
 0x15c   :  { %v2023_v6 = vadd.f32 %v2022_v13, %v1506_v53  ;;  %v1731_v9 = vadd.f32 %v1730_v27, %v1219_v59  ;;  %v1365_v20 = vmul.f32 %v5394_v30, %v5394_v30  ;;  %v1878_v54 = vadd.f32 %v1877_v61, %v1363_v51  ;;  %v5408_v51 = vld [vmem:[#allocation2 + $0xcb8] sm:$0xff]  ;;  %v5410_v13 = vld [vmem:[#allocation2 + $0x840] sm:$0xff]  ;;  %v5411_v27 = vld [vmem:[#allocation2 + $0xb50] sm:$0xff] }
 0x15d   :  { %v1463_v60 = vmul.f32 %v5395_v28, %v5395_v28  ;;  %v1977_v12 = vadd.f32 %v1976_v26, %v1461_v43  ;;  %v1509_v35 = vmul.f32 %v5396_v4, %v5396_v4  ;;  %v1223_v19 = vmul.f32 %v5397_v58, %v5397_v58  ;;  %v5412_v61 = vld [vmem:[#allocation2 + $0xcc0] sm:$0xff]  ;;  %v5413_v26 = vld [vmem:[#allocation2 + $0x3d0] sm:$0xff] }
 0x15e   :  { %v2024_v62 = vadd.f32 %v2023_v6, %v1507_v57  ;;  %v1732_v18 = vadd.f32 %v1731_v9, %v1220_v31  ;;  %v1366_v11 = vmul.f32 %v5398_v56, %v5398_v56  ;;  %v1879_v42 = vadd.f32 %v1878_v54, %v1364_v0  ;;  %v5407_v31 = vld [vmem:[#allocation2 + $0xb48] sm:$0xff]  ;;  %v5415_v9 = vld [vmem:[#allocation2 + $0xb58] sm:$0xff] }
 0x15f   :  { %v1464_v10 = vmul.f32 %v5399_v63, %v5399_v63  ;;  %v1978_v25 = vadd.f32 %v1977_v12, %v1462_v52  ;;  %v1510_v15 = vmul.f32 %v5400_v47, %v5400_v47  ;;  %v1224_v21 = vmul.f32 %v5401_v32, %v5401_v32  ;;  %v5414_v6 = vld [vmem:[#allocation2 + $0x848] sm:$0xff]  ;;  %v5417_v12 = vld [vmem:[#allocation2 + $0x3d8] sm:$0xff] }
 0x160   :  { %v2025_v37 = vadd.f32 %v2024_v62, %v1508_v2  ;;  %v1733_v14 = vadd.f32 %v1732_v18, %v1221_v8  ;;  %v1367_v34 = vmul.f32 %v5402_v29, %v5402_v29  ;;  %v1880_v1 = vadd.f32 %v1879_v42, %v1365_v20  ;;  %v5416_v54 = vld [vmem:[#allocation2 + $0xcc8] sm:$0xff]  ;;  %v5418_v62 = vld [vmem:[#allocation2 + $0x850] sm:$0xff]  ;;  %v5419_v18 = vld [vmem:[#allocation2 + $0xb60] sm:$0xff] }
 0x161   :  { %v1465_v24 = vmul.f32 %v5403_v5, %v5403_v5  ;;  %v1979_v33 = vadd.f32 %v1978_v25, %v1463_v60  ;;  %v1511_v39 = vmul.f32 %v5404_v46, %v5404_v46  ;;  %v1225_v53 = vmul.f32 %v5405_v17, %v5405_v17  ;;  %v5420_v42 = vld [vmem:[#allocation2 + $0xcd0] sm:$0xff]  ;;  %v5421_v25 = vld [vmem:[#allocation2 + $0x3e0] sm:$0xff] }
 0x162   :  { %v2026_v48 = vadd.f32 %v2025_v37, %v1509_v35  ;;  %v1734_v41 = vadd.f32 %v1733_v14, %v1222_v7  ;;  %v1368_v59 = vmul.f32 %v5406_v3, %v5406_v3  ;;  %v1881_v44 = vadd.f32 %v1880_v1, %v1366_v11  ;;  %v5422_v37 = vld [vmem:[#allocation2 + $0x858] sm:$0xff]  ;;  %v5423_v14 = vld [vmem:[#allocation2 + $0xb68] sm:$0xff] }
 0x163   :  { %v1466_v16 = vmul.f32 %v5407_v31, %v5407_v31  ;;  %v1980_v45 = vadd.f32 %v1979_v33, %v1464_v10  ;;  %v1512_v23 = vmul.f32 %v5408_v51, %v5408_v51  ;;  %v1226_v50 = vmul.f32 %v5409_v55, %v5409_v55  ;;  %v5424_v1 = vld [vmem:[#allocation2 + $0xcd8] sm:$0xff]  ;;  %v5425_v33 = vld [vmem:[#allocation2 + $0x3e8] sm:$0xff] }
 0x164   :  { %v2027_v43 = vadd.f32 %v2026_v48, %v1510_v15  ;;  %v1735_v57 = vadd.f32 %v1734_v41, %v1223_v19  ;;  %v1369_v22 = vmul.f32 %v5410_v13, %v5410_v13  ;;  %v1882_v8 = vadd.f32 %v1881_v44, %v1367_v34  ;;  %v5426_v48 = vld [vmem:[#allocation2 + $0x860] sm:$0xff]  ;;  %v5427_v41 = vld [vmem:[#allocation2 + $0xb70] sm:$0xff] }
 0x165   :  { %v1467_v40 = vmul.f32 %v5411_v27, %v5411_v27  ;;  %v1981_v0 = vadd.f32 %v1980_v45, %v1465_v24  ;;  %v1513_v49 = vmul.f32 %v5412_v61, %v5412_v61  ;;  %v1227_v38 = vmul.f32 %v5413_v26, %v5413_v26  ;;  %v5428_v44 = vld [vmem:[#allocation2 + $0xce0] sm:$0xff]  ;;  %v5429_v45 = vld [vmem:[#allocation2 + $0x3f0] sm:$0xff] }
 0x166   :  { %v2028_v52 = vadd.f32 %v2027_v43, %v1511_v39  ;;  %v1736_v2 = vadd.f32 %v1735_v57, %v1224_v21  ;;  %v1370_v36 = vmul.f32 %v5414_v6, %v5414_v6  ;;  %v1883_v7 = vadd.f32 %v1882_v8, %v1368_v59  ;;  %v5430_v43 = vld [vmem:[#allocation2 + $0x868] sm:$0xff]  ;;  %v5431_v57 = vld [vmem:[#allocation2 + $0xb78] sm:$0xff] }
 0x167   :  { %v1468_v30 = vmul.f32 %v5415_v9, %v5415_v9  ;;  %v1982_v20 = vadd.f32 %v1981_v0, %v1466_v16  ;;  %v1514_v28 = vmul.f32 %v5416_v54, %v5416_v54  ;;  %v1228_v4 = vmul.f32 %v5417_v12, %v5417_v12  ;;  %v5432_v8 = vld [vmem:[#allocation2 + $0xce8] sm:$0xff]  ;;  %v5433_v0 = vld [vmem:[#allocation2 + $0x3f8] sm:$0xff] }
 0x168   :  { %v2029_v60 = vadd.f32 %v2028_v52, %v1512_v23  ;;  %v1737_v35 = vadd.f32 %v1736_v2, %v1225_v53  ;;  %v1371_v58 = vmul.f32 %v5418_v62, %v5418_v62  ;;  %v1884_v19 = vadd.f32 %v1883_v7, %v1369_v22  ;;  %v5434_v52 = vld [vmem:[#allocation2 + $0x870] sm:$0xff]  ;;  %v5435_v2 = vld [vmem:[#allocation2 + $0xb80] sm:$0xff]  ;;  %v5437_v54 = vld [vmem:[#allocation2 + $0xcf8] sm:$0xff] }
 0x169   :  { %v1469_v56 = vmul.f32 %v5419_v18, %v5419_v18  ;;  %v1983_v11 = vadd.f32 %v1982_v20, %v1467_v40  ;;  %v1515_v63 = vmul.f32 %v5420_v42, %v5420_v42  ;;  %v1229_v47 = vmul.f32 %v5421_v25, %v5421_v25  ;;  %v5436_v7 = vld [vmem:[#allocation2 + $0xcf0] sm:$0xff]  ;;  %v5440_v18 = vld [vmem:[#allocation2 + $0x880] sm:$0xff]  ;;  %v5442_v25 = vld [vmem:[#allocation2 + $0xe08] sm:$0xff] }
 0x16a   :  { %v2030_v10 = vadd.f32 %v2029_v60, %v1513_v49  ;;  %v1738_v15 = vadd.f32 %v1737_v35, %v1226_v50  ;;  %v1372_v32 = vmul.f32 %v5422_v37, %v5422_v37  ;;  %v1885_v21 = vadd.f32 %v1884_v19, %v1370_v36  ;;  %v5438_v60 = vld [vmem:[#allocation2 + $0x878] sm:$0xff]  ;;  %v5439_v35 = vld [vmem:[#allocation2 + $0xb88] sm:$0xff] }
 0x16b   :  { %v1470_v29 = vmul.f32 %v5423_v14, %v5423_v14  ;;  %v1984_v34 = vadd.f32 %v1983_v11, %v1468_v30  ;;  %v1516_v5 = vmul.f32 %v5424_v1, %v5424_v1  ;;  %v1230_v46 = vmul.f32 %v5425_v33, %v5425_v33  ;;  %v5445_v1 = vld [vmem:[#allocation2 + $0x888] sm:$0xff]  ;;  %v5446_v33 = vld [vmem:[#allocation2 + $0xe10] sm:$0xff] }
 0x16c   :  { %v2031_v24 = vadd.f32 %v2030_v10, %v1514_v28  ;;  %v1739_v39 = vadd.f32 %v1738_v15, %v1227_v38  ;;  %v1373_v17 = vmul.f32 %v5426_v48, %v5426_v48  ;;  %v1886_v53 = vadd.f32 %v1885_v21, %v1371_v58  ;;  %v5443_v15 = vld [vmem:[#allocation2 + $0xb90] sm:$0xff]  ;;  %v5444_v21 = vld [vmem:[#allocation2 + $0xd00] sm:$0xff] }
 0x16d   :  { %v1471_v3 = vmul.f32 %v5427_v41, %v5427_v41  ;;  %v1985_v59 = vadd.f32 %v1984_v34, %v1469_v56  ;;  %v1517_v31 = vmul.f32 %v5428_v44, %v5428_v44  ;;  %v1231_v51 = vmul.f32 %v5429_v45, %v5429_v45 }
 0x16e   :  { %v2032_v16 = vadd.f32 %v2031_v24, %v1515_v63  ;;  %v1740_v23 = vadd.f32 %v1739_v39, %v1228_v4  ;;  %v1374_v55 = vmul.f32 %v5430_v43, %v5430_v43  ;;  %v1887_v50 = vadd.f32 %v1886_v53, %v1372_v32  ;;  %v5441_v63 = vld [vmem:[#allocation2 + $0xe00] sm:$0xff]  ;;  %v5447_v39 = vld [vmem:[#allocation2 + $0xb98] sm:$0xff]  ;;  %v5448_v53 = vld [vmem:[#allocation2 + $0xd08] sm:$0xff] }
 0x16f   :  { %v1472_v13 = vmul.f32 %v5431_v57, %v5431_v57  ;;  %v1986_v22 = vadd.f32 %v1985_v59, %v1470_v29  ;;  %v1518_v27 = vmul.f32 %v5432_v8, %v5432_v8  ;;  %v1232_v61 = vmul.f32 %v5433_v0, %v5433_v0  ;;  %v5449_v59 = vld [vmem:[#allocation2 + $0x890] sm:$0xff] }
 0x170   :  { %v2033_v40 = vadd.f32 %v2032_v16, %v1516_v5  ;;  %v1741_v49 = vadd.f32 %v1740_v23, %v1229_v47  ;;  %v1375_v26 = vmul.f32 %v5434_v52, %v5434_v52  ;;  %v1888_v38 = vadd.f32 %v1887_v50, %v1373_v17  ;;  %v5450_v16 = vld [vmem:[#allocation2 + $0xe18] sm:$0xff]  ;;  %v5451_v23 = vld [vmem:[#allocation2 + $0xba0] sm:$0xff]  ;;  %v5452_v50 = vld [vmem:[#allocation2 + $0xd10] sm:$0xff] }
 0x171   :  { %v1473_v6 = vmul.f32 %v5435_v2, %v5435_v2  ;;  %v1987_v36 = vadd.f32 %v1986_v22, %v1471_v3  ;;  %v1519_v9 = vmul.f32 %v5436_v7, %v5436_v7  ;;  %v1520_v28 = vmul.f32 %v5437_v54, %v5437_v54  ;;  %v5453_v22 = vld [vmem:[#allocation2 + $0x898] sm:$0xff] }
 0x172   :  { %v2034_v30 = vadd.f32 %v2033_v40, %v1517_v31  ;;  %v1742_v20 = vadd.f32 %v1741_v49, %v1230_v46  ;;  %v1376_v12 = vmul.f32 %v5438_v60, %v5438_v60  ;;  %v1889_v4 = vadd.f32 %v1888_v38, %v1374_v55  ;;  %v5454_v40 = vld [vmem:[#allocation2 + $0xe20] sm:$0xff]  ;;  %v5455_v49 = vld [vmem:[#allocation2 + $0xba8] sm:$0xff]  ;;  %v5456_v38 = vld [vmem:[#allocation2 + $0xd18] sm:$0xff] }
 0x173   :  { %v1474_v62 = vmul.f32 %v5439_v35, %v5439_v35  ;;  %v1988_v58 = vadd.f32 %v1987_v36, %v1472_v13  ;;  %v1377_v56 = vmul.f32 %v5440_v18, %v5440_v18  ;;  %v1553_v10 = vmul.f32 %v5441_v63, %v5441_v63  ;;  %v5457_v36 = vld [vmem:[#allocation2 + $0x8a0] sm:$0xff]  ;;  %v5463_v63 = vld [vmem:[#allocation2 + $0xbb8] sm:$0xff] }
 0x174   :  { %v2035_v19 = vadd.f32 %v2034_v30, %v1518_v27  ;;  %v1743_v11 = vadd.f32 %v1742_v20, %v1231_v51  ;;  %v1890_v42 = vadd.f32 %v1889_v4, %v1375_v26  ;;  %v1554_v47 = vmul.f32 %v5442_v25, %v5442_v25  ;;  %v5458_v30 = vld [vmem:[#allocation2 + $0xe28] sm:$0xff]  ;;  %v5460_v4 = vld [vmem:[#allocation2 + $0xd20] sm:$0xff] }
 0x175   :  { %v1475_v37 = vmul.f32 %v5443_v15, %v5443_v15  ;;  %v1989_v32 = vadd.f32 %v1988_v58, %v1473_v6  ;;  %v1521_v14 = vmul.f32 %v5444_v21, %v5444_v21  ;;  %v1378_v5 = vmul.f32 %v5445_v1, %v5445_v1  ;;  %v5461_v58 = vld [vmem:[#allocation2 + $0x8a8] sm:$0xff] }
 0x176   :  { %v2036_v29 = vadd.f32 %v2035_v19, %v1519_v9  ;;  %v1744_v34 = vadd.f32 %v1743_v11, %v1232_v61  ;;  %v1891_v24 = vadd.f32 %v1890_v42, %v1376_v12  ;;  %v1555_v46 = vmul.f32 %v5446_v33, %v5446_v33 }
 0x177   :  { %v1476_v48 = vmul.f32 %v5447_v39, %v5447_v39  ;;  %v1990_v17 = vadd.f32 %v1989_v32, %v1474_v62  ;;  %v1522_v41 = vmul.f32 %v5448_v53, %v5448_v53  ;;  %v1379_v44 = vmul.f32 %v5449_v59, %v5449_v59  ;;  %v5465_v32 = vld [vmem:[#allocation2 + $0x8b0] sm:$0xff] }
 0x178   :  { %v2037_v3 = vadd.f32 %v2036_v29, %v1520_v28  ;;  %1745 = vadd.xlane.f32.xlu0 %v1744_v34  ;;  %v1892_v31 = vadd.f32 %v1891_v24, %v1377_v56  ;;  %v1556_v45 = vmul.f32 %v5450_v16, %v5450_v16  ;;  %v2072_v51 = vadd.f32 %v1554_v47, %v1553_v10  ;;  %v5459_v28 = vld [vmem:[#allocation2 + $0xbb0] sm:$0xff]  ;;  %v5464_v47 = vld [vmem:[#allocation2 + $0xd28] sm:$0xff]  ;;  %v5466_v29 = vld [vmem:[#allocation2 + $0xe38] sm:$0xff] }
 0x179   :  { %v1477_v43 = vmul.f32 %v5451_v23, %v5451_v23  ;;  %v1991_v55 = vadd.f32 %v1990_v17, %v1475_v37  ;;  %v1523_v57 = vmul.f32 %v5452_v50, %v5452_v50  ;;  %v1380_v8 = vmul.f32 %v5453_v22, %v5453_v22  ;;  %v5462_v56 = vld [vmem:[#allocation2 + $0xe30] sm:$0xff]  ;;  %v5469_v17 = vld [vmem:[#allocation2 + $0x8b8] sm:$0xff] }
 0x17a   :  { %v2038_v13 = vadd.f32 %v2037_v3, %v1521_v14  ;;  %v1893_v27 = vadd.f32 %v1892_v31, %v1378_v5  ;;  %v1557_v0 = vmul.f32 %v5454_v40, %v5454_v40  ;;  %v2073_v61 = vadd.f32 %v2072_v51, %v1555_v46  ;;  %v5467_v5 = vld [vmem:[#allocation2 + $0xbc0] sm:$0xff]  ;;  %v5468_v46 = vld [vmem:[#allocation2 + $0xd30] sm:$0xff]  ;;  %v5471_v31 = vld [vmem:[#allocation2 + $0xbc8] sm:$0xff] }
 0x17b   :  { %v1478_v52 = vmul.f32 %v5455_v49, %v5455_v49  ;;  %v1992_v26 = vadd.f32 %v1991_v55, %v1476_v48  ;;  %v1524_v2 = vmul.f32 %v5456_v38, %v5456_v38  ;;  %v1381_v7 = vmul.f32 %v5457_v36, %v5457_v36  ;;  %v5470_v3 = vld [vmem:[#allocation2 + $0xe40] sm:$0xff]  ;;  %v5472_v51 = vld [vmem:[#allocation2 + $0xd38] sm:$0xff] }
 0x17c   :  { %v2039_v6 = vadd.f32 %v2038_v13, %v1522_v41  ;;  %v1894_v9 = vadd.f32 %v1893_v27, %v1379_v44  ;;  %v1558_v20 = vmul.f32 %v5458_v30, %v5458_v30  ;;  %v2074_v54 = vadd.f32 %v2073_v61, %v1556_v45  ;;  %v5473_v55 = vld [vmem:[#allocation2 + $0x8c0] sm:$0xff]  ;;  %v5474_v13 = vld [vmem:[#allocation2 + $0xe48] sm:$0xff]  ;;  %v5475_v27 = vld [vmem:[#allocation2 + $0xbd0] sm:$0xff] }
 0x17d   :  { %v1479_v60 = vmul.f32 %v5459_v28, %v5459_v28  ;;  %v1993_v12 = vadd.f32 %v1992_v26, %v1477_v43  ;;  %v1525_v35 = vmul.f32 %v5460_v4, %v5460_v4  ;;  %v1382_v19 = vmul.f32 %v5461_v58, %v5461_v58  ;;  %v5476_v61 = vld [vmem:[#allocation2 + $0xd40] sm:$0xff]  ;;  %v5477_v26 = vld [vmem:[#allocation2 + $0x8c8] sm:$0xff] }
 0x17e   :  { %v2040_v62 = vadd.f32 %v2039_v6, %v1523_v57  ;;  %v1895_v18 = vadd.f32 %v1894_v9, %v1380_v8  ;;  %v1559_v11 = vmul.f32 %v5462_v56, %v5462_v56  ;;  %v2075_v42 = vadd.f32 %v2074_v54, %v1557_v0  ;;  %v5478_v6 = vld [vmem:[#allocation2 + $0xe50] sm:$0xff]  ;;  %v5479_v9 = vld [vmem:[#allocation2 + $0xbd8] sm:$0xff]  ;;  %v5480_v54 = vld [vmem:[#allocation2 + $0xd48] sm:$0xff] }
 0x17f   :  { %v1480_v10 = vmul.f32 %v5463_v63, %v5463_v63  ;;  %v1994_v25 = vadd.f32 %v1993_v12, %v1478_v52  ;;  %v1526_v15 = vmul.f32 %v5464_v47, %v5464_v47  ;;  %v1383_v21 = vmul.f32 %v5465_v32, %v5465_v32  ;;  %v5481_v12 = vld [vmem:[#allocation2 + $0x8d0] sm:$0xff] }
 0x180   :  { %v2041_v37 = vadd.f32 %v2040_v62, %v1524_v2  ;;  %v1896_v14 = vadd.f32 %v1895_v18, %v1381_v7  ;;  %v1560_v34 = vmul.f32 %v5466_v29, %v5466_v29  ;;  %v2076_v1 = vadd.f32 %v2075_v42, %v1558_v20  ;;  %v5482_v62 = vld [vmem:[#allocation2 + $0xe58] sm:$0xff]  ;;  %v5483_v18 = vld [vmem:[#allocation2 + $0xbe0] sm:$0xff]  ;;  %v5484_v42 = vld [vmem:[#allocation2 + $0xd50] sm:$0xff] }
 0x181   :  { %v1481_v24 = vmul.f32 %v5467_v5, %v5467_v5  ;;  %v1995_v33 = vadd.f32 %v1994_v25, %v1479_v60  ;;  %v1527_v39 = vmul.f32 %v5468_v46, %v5468_v46  ;;  %v1384_v53 = vmul.f32 %v5469_v17, %v5469_v17  ;;  %v5485_v25 = vld [vmem:[#allocation2 + $0x8d8] sm:$0xff] }
 0x182   :  { %v2042_v48 = vadd.f32 %v2041_v37, %v1525_v35  ;;  %v1897_v41 = vadd.f32 %v1896_v14, %v1382_v19  ;;  %v1561_v59 = vmul.f32 %v5470_v3, %v5470_v3  ;;  %v2077_v44 = vadd.f32 %v2076_v1, %v1559_v11  ;;  %v5486_v37 = vld [vmem:[#allocation2 + $0xe60] sm:$0xff]  ;;  %v5487_v14 = vld [vmem:[#allocation2 + $0xbe8] sm:$0xff]  ;;  %v5488_v1 = vld [vmem:[#allocation2 + $0xd58] sm:$0xff] }
 0x183   :  { %v1482_v16 = vmul.f32 %v5471_v31, %v5471_v31  ;;  %v1996_v45 = vadd.f32 %v1995_v33, %v1480_v10  ;;  %v1528_v23 = vmul.f32 %v5472_v51, %v5472_v51  ;;  %v1385_v50 = vmul.f32 %v5473_v55, %v5473_v55  ;;  %v5489_v33 = vld [vmem:[#allocation2 + $0x8e0] sm:$0xff] }
 0x184   :  { %v2043_v43 = vadd.f32 %v2042_v48, %v1526_v15  ;;  %v1898_v57 = vadd.f32 %v1897_v41, %v1383_v21  ;;  %v1562_v22 = vmul.f32 %v5474_v13, %v5474_v13  ;;  %v2078_v8 = vadd.f32 %v2077_v44, %v1560_v34  ;;  %v5490_v48 = vld [vmem:[#allocation2 + $0xe68] sm:$0xff]  ;;  %v5491_v41 = vld [vmem:[#allocation2 + $0xbf0] sm:$0xff]  ;;  %v5492_v44 = vld [vmem:[#allocation2 + $0xd60] sm:$0xff] }
 0x185   :  { %v1483_v40 = vmul.f32 %v5475_v27, %v5475_v27  ;;  %v1997_v0 = vadd.f32 %v1996_v45, %v1481_v24  ;;  %v1529_v49 = vmul.f32 %v5476_v61, %v5476_v61  ;;  %v1386_v38 = vmul.f32 %v5477_v26, %v5477_v26  ;;  %v5493_v45 = vld [vmem:[#allocation2 + $0x8e8] sm:$0xff] }
 0x186   :  { %v2044_v52 = vadd.f32 %v2043_v43, %v1527_v39  ;;  %v1899_v2 = vadd.f32 %v1898_v57, %v1384_v53  ;;  %v1563_v36 = vmul.f32 %v5478_v6, %v5478_v6  ;;  %v2079_v7 = vadd.f32 %v2078_v8, %v1561_v59  ;;  %v5494_v43 = vld [vmem:[#allocation2 + $0xe70] sm:$0xff]  ;;  %v5495_v57 = vld [vmem:[#allocation2 + $0xbf8] sm:$0xff]  ;;  %v5496_v8 = vld [vmem:[#allocation2 + $0xd68] sm:$0xff] }
 0x187   :  { %v1484_v30 = vmul.f32 %v5479_v9, %v5479_v9  ;;  %v1998_v20 = vadd.f32 %v1997_v0, %v1482_v16  ;;  %v1530_v28 = vmul.f32 %v5480_v54, %v5480_v54  ;;  %v1387_v4 = vmul.f32 %v5481_v12, %v5481_v12  ;;  %v5497_v0 = vld [vmem:[#allocation2 + $0x8f0] sm:$0xff]  ;;  %v5500_v9 = vld [vmem:[#allocation2 + $0x8f8] sm:$0xff]  ;;  %v5501_v54 = vld [vmem:[#allocation2 + $0xe80] sm:$0xff] }
 0x188   :  { %v2045_v60 = vadd.f32 %v2044_v52, %v1528_v23  ;;  %v1900_v35 = vadd.f32 %v1899_v2, %v1385_v50  ;;  %v1564_v58 = vmul.f32 %v5482_v62, %v5482_v62  ;;  %v2080_v19 = vadd.f32 %v2079_v7, %v1562_v22  ;;  %v5498_v52 = vld [vmem:[#allocation2 + $0xe78] sm:$0xff]  ;;  %v5499_v6 = vld [vmem:[#allocation2 + $0xd70] sm:$0xff] }
 0x189   :  { %v1485_v56 = vmul.f32 %v5483_v18, %v5483_v18  ;;  %v1999_v11 = vadd.f32 %v1998_v20, %v1483_v40  ;;  %v1531_v63 = vmul.f32 %v5484_v42, %v5484_v42  ;;  %v1388_v47 = vmul.f32 %v5485_v25, %v5485_v25 }
 0x18a   :  { %v2046_v10 = vadd.f32 %v2045_v60, %v1529_v49  ;;  %v1901_v15 = vadd.f32 %v1900_v35, %v1386_v38  ;;  %v1565_v32 = vmul.f32 %v5486_v37, %v5486_v37  ;;  %v2081_v21 = vadd.f32 %v2080_v19, %v1563_v36 }
 0x18b   :  { %v1486_v29 = vmul.f32 %v5487_v14, %v5487_v14  ;;  %v2000_v34 = vadd.f32 %v1999_v11, %v1484_v30  ;;  %v1532_v5 = vmul.f32 %v5488_v1, %v5488_v1  ;;  %v1389_v46 = vmul.f32 %v5489_v33, %v5489_v33 }
 0x18c   :  { %v2047_v24 = vadd.f32 %v2046_v10, %v1530_v28  ;;  %v1902_v39 = vadd.f32 %v1901_v15, %v1387_v4  ;;  %v1566_v17 = vmul.f32 %v5490_v48, %v5490_v48  ;;  %v2082_v53 = vadd.f32 %v2081_v21, %v1564_v58  ;;  %v5502_v4 = vld [vmem:[#allocation2 + $0xd78] sm:$0xff]  ;;  %v5503_v58 = vld [vmem:[#allocation2 + $0x900] sm:$0xff] }
 0x18d   :  { %v1487_v3 = vmul.f32 %v5491_v41, %v5491_v41  ;;  %v2001_v59 = vadd.f32 %v2000_v34, %v1485_v56  ;;  %v1533_v31 = vmul.f32 %v5492_v44, %v5492_v44  ;;  %v1390_v51 = vmul.f32 %v5493_v45, %v5493_v45  ;;  %v5504_v56 = vld [vmem:[#allocation2 + $0xe88] sm:$0xff] }
 0x18e   :  { %v2048_v16 = vadd.f32 %v2047_v24, %v1531_v63  ;;  %v1903_v23 = vadd.f32 %v1902_v39, %v1388_v47  ;;  %v1567_v55 = vmul.f32 %v5494_v43, %v5494_v43  ;;  %v2083_v50 = vadd.f32 %v2082_v53, %v1565_v32  ;;  %v5505_v63 = vld [vmem:[#allocation2 + $0xd80] sm:$0xff]  ;;  %v5506_v47 = vld [vmem:[#allocation2 + $0x908] sm:$0xff]  ;;  %v5507_v32 = vld [vmem:[#allocation2 + $0xe90] sm:$0xff] }
 0x18f   :  { %v1488_v13 = vmul.f32 %v5495_v57, %v5495_v57  ;;  %v2002_v22 = vadd.f32 %v2001_v59, %v1486_v29  ;;  %v1534_v27 = vmul.f32 %v5496_v8, %v5496_v8  ;;  %v1391_v61 = vmul.f32 %v5497_v0, %v5497_v0  ;;  %v5508_v29 = vld [vmem:[#allocation2 + $0xd88] sm:$0xff] }
 0x190   :  { %v2049_v40 = vadd.f32 %v2048_v16, %v1532_v5  ;;  %v1904_v49 = vadd.f32 %v1903_v23, %v1389_v46  ;;  %v1568_v26 = vmul.f32 %v5498_v52, %v5498_v52  ;;  %v2084_v38 = vadd.f32 %v2083_v50, %v1566_v17  ;;  %v5509_v5 = vld [vmem:[#allocation2 + $0x910] sm:$0xff]  ;;  %v5510_v46 = vld [vmem:[#allocation2 + $0xe98] sm:$0xff] }
 0x191   :  { %v2003_v2 = vadd.f32 %v2002_v22, %v1487_v3  ;;  %v1535_v36 = vmul.f32 %v5499_v6, %v5499_v6  ;;  %v1392_v30 = vmul.f32 %v5500_v9, %v5500_v9  ;;  %v1569_v28 = vmul.f32 %v5501_v54, %v5501_v54  ;;  %v5511_v17 = vld [vmem:[#allocation2 + $0xd90] sm:$0xff]  ;;  %v5512_v3 = vld [vmem:[#allocation2 + $0x918] sm:$0xff]  ;;  %v5520_v6 = vld [vmem:[#allocation2 + $0xda8] sm:$0xff] }
 0x192   :  { %v2050_v7 = vadd.f32 %v2049_v40, %v1533_v31  ;;  %v1905_v20 = vadd.f32 %v1904_v49, %v1390_v51  ;;  %v2085_v60 = vadd.f32 %v2084_v38, %v1567_v55  ;;  %v1536_v35 = vmul.f32 %v5502_v4, %v5502_v4  ;;  %v5513_v31 = vld [vmem:[#allocation2 + $0xea0] sm:$0xff]  ;;  %v5514_v51 = vld [vmem:[#allocation2 + $0xd98] sm:$0xff]  ;;  %v5521_v9 = vld [vmem:[#allocation2 + $0x930] sm:$0xff] }
 0x193   :  { %v2004_v12 = vadd.f32 %v2003_v2, %v1488_v13  ;;  %v1393_v19 = vmul.f32 %v5503_v58, %v5503_v58  ;;  %v1570_v11 = vmul.f32 %v5504_v56, %v5504_v56  ;;  %v1537_v10 = vmul.f32 %v5505_v63, %v5505_v63  ;;  %v5515_v55 = vld [vmem:[#allocation2 + $0x920] sm:$0xff]  ;;  %v5516_v13 = vld [vmem:[#allocation2 + $0xea8] sm:$0xff]  ;;  %v5522_v54 = vld [vmem:[#allocation2 + $0xeb8] sm:$0xff] }
 0x194   :  { %v2051_v62 = vadd.f32 %v2050_v7, %v1534_v27  ;;  %v1906_v18 = vadd.f32 %v1905_v20, %v1391_v61  ;;  %v2086_v42 = vadd.f32 %v2085_v60, %v1568_v26  ;;  %v1394_v15 = vmul.f32 %v5506_v47, %v5506_v47  ;;  %v5517_v27 = vld [vmem:[#allocation2 + $0xda0] sm:$0xff]  ;;  %v5518_v61 = vld [vmem:[#allocation2 + $0x928] sm:$0xff]  ;;  %v5519_v26 = vld [vmem:[#allocation2 + $0xeb0] sm:$0xff] }
 0x195   :  { %2005 = vadd.xlane.f32.xlu1 %v2004_v12  ;;  %v1571_v21 = vmul.f32 %v5507_v32, %v5507_v32  ;;  %v1538_v34 = vmul.f32 %v5508_v29, %v5508_v29  ;;  %v1395_v24 = vmul.f32 %v5509_v5, %v5509_v5  ;;  %v1572_v39 = vmul.f32 %v5510_v46, %v5510_v46  ;;  %v5523_v12 = vld [vmem:[#allocation2 + $0xdb0] sm:$0xff] }
 0x196   :  { %v2052_v25 = vadd.f32 %v2051_v62, %v1535_v36  ;;  %v1907_v37 = vadd.f32 %v1906_v18, %v1392_v30  ;;  %v2087_v14 = vadd.f32 %v2086_v42, %v1569_v28  ;;  %v1539_v53 = vmul.f32 %v5511_v17, %v5511_v17  ;;  %v5524_v62 = vld [vmem:[#allocation2 + $0x938] sm:$0xff]  ;;  %v5525_v18 = vld [vmem:[#allocation2 + $0xec0] sm:$0xff] }
 0x197   :  { %v1396_v59 = vmul.f32 %v5512_v3, %v5512_v3  ;;  %v1573_v16 = vmul.f32 %v5513_v31, %v5513_v31  ;;  %v1540_v23 = vmul.f32 %v5514_v51, %v5514_v51  ;;  %v1397_v50 = vmul.f32 %v5515_v55, %v5515_v55  ;;  %v5526_v42 = vld [vmem:[#allocation2 + $0xdb8] sm:$0xff] }
 0x198   :  { %v2053_v1 = vadd.f32 %v2052_v25, %v1536_v35  ;;  %v1908_v33 = vadd.f32 %v1907_v37, %v1393_v19  ;;  %v2088_v48 = vadd.f32 %v2087_v14, %v1570_v11  ;;  %v1574_v22 = vmul.f32 %v5516_v13, %v5516_v13  ;;  %v5527_v25 = vld [vmem:[#allocation2 + $0x940] sm:$0xff]  ;;  %v5528_v37 = vld [vmem:[#allocation2 + $0xec8] sm:$0xff] }
 0x199   :  { %v1541_v40 = vmul.f32 %v5517_v27, %v5517_v27  ;;  %v1398_v49 = vmul.f32 %v5518_v61, %v5518_v61  ;;  %v1575_v38 = vmul.f32 %v5519_v26, %v5519_v26  ;;  %v1542_v36 = vmul.f32 %v5520_v6, %v5520_v6  ;;  %v5529_v14 = vld [vmem:[#allocation2 + $0xdc0] sm:$0xff] }
 0x19a   :  { %v2054_v41 = vadd.f32 %v2053_v1, %v1537_v10  ;;  %v1909_v44 = vadd.f32 %v1908_v33, %v1394_v15  ;;  %v2089_v45 = vadd.f32 %v2088_v48, %v1571_v21  ;;  %v1399_v30 = vmul.f32 %v5521_v9, %v5521_v9  ;;  %v5530_v1 = vld [vmem:[#allocation2 + $0x948] sm:$0xff]  ;;  %v5531_v33 = vld [vmem:[#allocation2 + $0xed0] sm:$0xff] }
 0x19b   :  { %v1576_v28 = vmul.f32 %v5522_v54, %v5522_v54  ;;  %v1543_v4 = vmul.f32 %v5523_v12, %v5523_v12  ;;  %v1400_v58 = vmul.f32 %v5524_v62, %v5524_v62  ;;  %v1577_v56 = vmul.f32 %v5525_v18, %v5525_v18  ;;  %v5532_v48 = vld [vmem:[#allocation2 + $0xdc8] sm:$0xff] }
 0x19c   :  { %v2055_v43 = vadd.f32 %v2054_v41, %v1538_v34  ;;  %v1910_v57 = vadd.f32 %v1909_v44, %v1395_v24  ;;  %v2090_v8 = vadd.f32 %v2089_v45, %v1572_v39  ;;  %v1544_v63 = vmul.f32 %v5526_v42, %v5526_v42  ;;  %v5533_v41 = vld [vmem:[#allocation2 + $0x950] sm:$0xff]  ;;  %v5534_v44 = vld [vmem:[#allocation2 + $0xed8] sm:$0xff] }
 0x19d   :  { %v1401_v47 = vmul.f32 %v5527_v25, %v5527_v25  ;;  %v1578_v32 = vmul.f32 %v5528_v37, %v5528_v37  ;;  %v1545_v29 = vmul.f32 %v5529_v14, %v5529_v14  ;;  %v1402_v5 = vmul.f32 %v5530_v1, %v5530_v1  ;;  %v5535_v45 = vld [vmem:[#allocation2 + $0xdd0] sm:$0xff] }
 0x19e   :  { %v2056_v0 = vadd.f32 %v2055_v43, %v1539_v53  ;;  %v1911_v52 = vadd.f32 %v1910_v57, %v1396_v59  ;;  %v2091_v2 = vadd.f32 %v2090_v8, %v1573_v16  ;;  %v1579_v46 = vmul.f32 %v5531_v33, %v5531_v33  ;;  %v5536_v43 = vld [vmem:[#allocation2 + $0x958] sm:$0xff]  ;;  %v5537_v57 = vld [vmem:[#allocation2 + $0xee0] sm:$0xff] }
 0x19f   :  { %v1546_v17 = vmul.f32 %v5532_v48, %v5532_v48  ;;  %v1403_v3 = vmul.f32 %v5533_v41, %v5533_v41  ;;  %v1580_v31 = vmul.f32 %v5534_v44, %v5534_v44  ;;  %v1547_v51 = vmul.f32 %v5535_v45, %v5535_v45  ;;  %v5538_v8 = vld [vmem:[#allocation2 + $0xdd8] sm:$0xff]  ;;  %v5553_v48 = vld [vmem:[#allocation2 + $0x988] sm:$0xff] }
 0x1a0   :  { %v2057_v7 = vadd.f32 %v2056_v0, %v1540_v23  ;;  %v1912_v20 = vadd.f32 %v1911_v52, %v1397_v50  ;;  %v2092_v60 = vadd.f32 %v2091_v2, %v1574_v22  ;;  %v1404_v55 = vmul.f32 %v5536_v43, %v5536_v43  ;;  %v5539_v0 = vld [vmem:[#allocation2 + $0x960] sm:$0xff]  ;;  %v5540_v52 = vld [vmem:[#allocation2 + $0xee8] sm:$0xff] }
 0x1a1   :  { %v1581_v13 = vmul.f32 %v5537_v57, %v5537_v57  ;;  %v1548_v27 = vmul.f32 %v5538_v8, %v5538_v8  ;;  %v1405_v61 = vmul.f32 %v5539_v0, %v5539_v0  ;;  %v1582_v26 = vmul.f32 %v5540_v52, %v5540_v52  ;;  %v5541_v2 = vld [vmem:[#allocation2 + $0xde0] sm:$0xff] }
 0x1a2   :  { %v2058_v35 = vadd.f32 %v2057_v7, %v1541_v40  ;;  %v1913_v19 = vadd.f32 %v1912_v20, %v1398_v49  ;;  %v2093_v11 = vadd.f32 %v2092_v60, %v1575_v38  ;;  %v1549_v6 = vmul.f32 %v5541_v2, %v5541_v2  ;;  %v5542_v7 = vld [vmem:[#allocation2 + $0x968] sm:$0xff]  ;;  %v5543_v20 = vld [vmem:[#allocation2 + $0xef0] sm:$0xff] }
 0x1a3   :  { %v1406_v9 = vmul.f32 %v5542_v7, %v5542_v7  ;;  %v1583_v54 = vmul.f32 %v5543_v20, %v5543_v20  ;;  %v5544_v60 = vld [vmem:[#allocation2 + $0xde8] sm:$0xff] }
 0x1a4   :  { %v2059_v10 = vadd.f32 %v2058_v35, %v1542_v36  ;;  %v1914_v15 = vadd.f32 %v1913_v19, %v1399_v30  ;;  %v2094_v21 = vadd.f32 %v2093_v11, %v1576_v28  ;;  %v1550_v12 = vmul.f32 %v5544_v60, %v5544_v60  ;;  %v5545_v35 = vld [vmem:[#allocation2 + $0x970] sm:$0xff]  ;;  %v5546_v19 = vld [vmem:[#allocation2 + $0xef8] sm:$0xff] }
 0x1a5   :  { %v1407_v62 = vmul.f32 %v5545_v35, %v5545_v35  ;;  %v1584_v18 = vmul.f32 %v5546_v19, %v5546_v19  ;;  %v5547_v11 = vld [vmem:[#allocation2 + $0xdf0] sm:$0xff] }
 0x1a6   :  { %v2060_v34 = vadd.f32 %v2059_v10, %v1543_v4  ;;  %v1915_v24 = vadd.f32 %v1914_v15, %v1400_v58  ;;  %v2095_v39 = vadd.f32 %v2094_v21, %v1577_v56  ;;  %v1551_v42 = vmul.f32 %v5547_v11, %v5547_v11  ;;  %v5548_v10 = vld [vmem:[#allocation2 + $0x978] sm:$0xff]  ;;  %v5549_v15 = vld [vmem:[#allocation2 + $0xf00] sm:$0xff] }
 0x1a7   :  { %v1408_v25 = vmul.f32 %v5548_v10, %v5548_v10  ;;  %v1585_v37 = vmul.f32 %v5549_v15, %v5549_v15  ;;  %v5550_v21 = vld [vmem:[#allocation2 + $0xdf8] sm:$0xff] }
 0x1a8   :  { %v2061_v53 = vadd.f32 %v2060_v34, %v1544_v63  ;;  %v1916_v59 = vadd.f32 %v1915_v24, %v1401_v47  ;;  %v2096_v16 = vadd.f32 %v2095_v39, %v1578_v32  ;;  %v1552_v14 = vmul.f32 %v5550_v21, %v5550_v21  ;;  %v5551_v34 = vld [vmem:[#allocation2 + $0x980] sm:$0xff] }
 0x1a9   :  { %v1409_v1 = vmul.f32 %v5551_v34, %v5551_v34 }
 0x1aa   :  { %v2062_v23 = vadd.f32 %v2061_v53, %v1545_v29  ;;  %v1917_v50 = vadd.f32 %v1916_v59, %v1402_v5  ;;  %v2097_v22 = vadd.f32 %v2096_v16, %v1579_v46  ;;  %v5552_v46 = vld [vmem:[#allocation2 + $0xf08] sm:$0xff]  ;;  %v5554_v59 = vld [vmem:[#allocation2 + $0xf10] sm:$0xff] }
 0x1ab   :  { %v1586_v39 = vmul.f32 %v5552_v46, %v5552_v46  ;;  %v1587_v44 = vmul.f32 %v5554_v59, %v5554_v59 }
 0x1ac   :  { %v2063_v40 = vadd.f32 %v2062_v23, %v1546_v17  ;;  %v1918_v49 = vadd.f32 %v1917_v50, %v1403_v3  ;;  %v2098_v38 = vadd.f32 %v2097_v22, %v1580_v31  ;;  %v1410_v17 = vmul.f32 %v5553_v48, %v5553_v48  ;;  %v5555_v31 = vld [vmem:[#allocation2 + $0x990] sm:$0xff]  ;;  %v5574_v48 = vld [vmem:[#allocation2 + $0xf60] sm:$0xff] }
 0x1ad   :  { %v1411_v16 = vmul.f32 %v5555_v31, %v5555_v31 }
 0x1ae   :  { %v2064_v36 = vadd.f32 %v2063_v40, %v1547_v51  ;;  %v1919_v30 = vadd.f32 %v1918_v49, %v1404_v55  ;;  %v2099_v28 = vadd.f32 %v2098_v38, %v1581_v13  ;;  %v5556_v51 = vld [vmem:[#allocation2 + $0xf18] sm:$0xff]  ;;  %v5558_v13 = vld [vmem:[#allocation2 + $0xf20] sm:$0xff] }
 0x1af   :  { %v1588_v23 = vmul.f32 %v5556_v51, %v5556_v51  ;;  %v5557_v55 = vld [vmem:[#allocation2 + $0x998] sm:$0xff]  ;;  %v1589_v22 = vmul.f32 %v5558_v13, %v5558_v13 }
 0x1b0   :  { %v2065_v4 = vadd.f32 %v2064_v36, %v1548_v27  ;;  %v1920_v58 = vadd.f32 %v1919_v30, %v1405_v61  ;;  %v2100_v56 = vadd.f32 %v2099_v28, %v1582_v26  ;;  %v1412_v50 = vmul.f32 %v5557_v55, %v5557_v55  ;;  %v5559_v27 = vld [vmem:[#allocation2 + $0x9a0] sm:$0xff]  ;;  %v5560_v61 = vld [vmem:[#allocation2 + $0xf28] sm:$0xff] }
 0x1b1   :  { %v1413_v40 = vmul.f32 %v5559_v27, %v5559_v27  ;;  %v1590_v49 = vmul.f32 %v5560_v61, %v5560_v61  ;;  %v5561_v26 = vld [vmem:[#allocation2 + $0x9a8] sm:$0xff] }
 0x1b2   :  { %v2066_v63 = vadd.f32 %v2065_v4, %v1549_v6  ;;  %v1921_v47 = vadd.f32 %v1920_v58, %v1406_v9  ;;  %v2101_v32 = vadd.f32 %v2100_v56, %v1583_v54  ;;  %v1414_v38 = vmul.f32 %v5561_v26, %v5561_v26  ;;  %v5562_v6 = vld [vmem:[#allocation2 + $0xf30] sm:$0xff]  ;;  %v5564_v54 = vld [vmem:[#allocation2 + $0xf38] sm:$0xff] }
 0x1b3   :  { %v1591_v36 = vmul.f32 %v5562_v6, %v5562_v6  ;;  %v5563_v9 = vld [vmem:[#allocation2 + $0x9b0] sm:$0xff]  ;;  %v1592_v28 = vmul.f32 %v5564_v54, %v5564_v54  ;;  %v5583_v6 = vld [vmem:[#allocation2 + $0xf88] sm:$0xff] }
 0x1b4   :  { %v2067_v29 = vadd.f32 %v2066_v63, %v1550_v12  ;;  %v1922_v5 = vadd.f32 %v1921_v47, %v1407_v62  ;;  %v2102_v24 = vadd.f32 %v2101_v32, %v1584_v18  ;;  %v1415_v30 = vmul.f32 %v5563_v9, %v5563_v9  ;;  %v5565_v12 = vld [vmem:[#allocation2 + $0x9b8] sm:$0xff]  ;;  %v5566_v62 = vld [vmem:[#allocation2 + $0xf40] sm:$0xff] }
 0x1b5   :  { %v1416_v4 = vmul.f32 %v5565_v12, %v5565_v12  ;;  %v1593_v58 = vmul.f32 %v5566_v62, %v5566_v62  ;;  %v5567_v18 = vld [vmem:[#allocation2 + $0x9c0] sm:$0xff] }
 0x1b6   :  { %v2068_v33 = vadd.f32 %v2067_v29, %v1551_v42  ;;  %v1923_v53 = vadd.f32 %v1922_v5, %v1408_v25  ;;  %v2103_v41 = vadd.f32 %v2102_v24, %v1585_v37  ;;  %v1417_v56 = vmul.f32 %v5567_v18, %v5567_v18  ;;  %v5568_v42 = vld [vmem:[#allocation2 + $0xf48] sm:$0xff]  ;;  %v5570_v37 = vld [vmem:[#allocation2 + $0xf50] sm:$0xff] }
 0x1b7   :  { %v1594_v63 = vmul.f32 %v5568_v42, %v5568_v42  ;;  %v5569_v25 = vld [vmem:[#allocation2 + $0x9c8] sm:$0xff]  ;;  %v1595_v32 = vmul.f32 %v5570_v37, %v5570_v37 }
 0x1b8   :  { %v2069_v3 = vadd.f32 %v2068_v33, %v1552_v14  ;;  %v1924_v45 = vadd.f32 %v1923_v53, %v1409_v1  ;;  %v2104_v43 = vadd.f32 %v2103_v41, %v1586_v39  ;;  %v1418_v47 = vmul.f32 %v5569_v25, %v5569_v25  ;;  %v5571_v14 = vld [vmem:[#allocation2 + $0x9d0] sm:$0xff]  ;;  %v5572_v1 = vld [vmem:[#allocation2 + $0xf58] sm:$0xff]  ;;  %v5575_v41 = vld [vmem:[#allocation2 + $0x9e0] sm:$0xff] }
 0x1b9   :  { %v1419_v29 = vmul.f32 %v5571_v14, %v5571_v14  ;;  %v1596_v5 = vmul.f32 %v5572_v1, %v5572_v1  ;;  %v5573_v33 = vld [vmem:[#allocation2 + $0x9d8] sm:$0xff] }
 0x1ba   :  { %2070 = vadd.xlane.f32.xlu2 %v2069_v3  ;;  %v1925_v57 = vadd.f32 %v1924_v45, %v1410_v17  ;;  %v2105_v8 = vadd.f32 %v2104_v43, %v1587_v44  ;;  %v1420_v46 = vmul.f32 %v5573_v33, %v5573_v33  ;;  %v1597_v17 = vmul.f32 %v5574_v48, %v5574_v48  ;;  %v5576_v44 = vld [vmem:[#allocation2 + $0xf68] sm:$0xff]  ;;  %v5578_v43 = vld [vmem:[#allocation2 + $0xf70] sm:$0xff] }
 0x1bb   :  { %v1421_v3 = vmul.f32 %v5575_v41, %v5575_v41  ;;  %v1598_v31 = vmul.f32 %v5576_v44, %v5576_v44  ;;  %v5577_v45 = vld [vmem:[#allocation2 + $0x9e8] sm:$0xff]  ;;  %v1599_v55 = vmul.f32 %v5578_v43, %v5578_v43  ;;  %v634_v43 = vpop.xlane.xlu0 %633 }
 0x1bc   :  { %v1926_v0 = vadd.f32 %v1925_v57, %v1411_v16  ;;  %v2106_v52 = vadd.f32 %v2105_v8, %v1588_v23  ;;  %v1422_v51 = vmul.f32 %v5577_v45, %v5577_v45  ;;  %v5579_v57 = vld [vmem:[#allocation2 + $0x9f0] sm:$0xff]  ;;  %v5580_v8 = vld [vmem:[#allocation2 + $0xf78] sm:$0xff] }
 0x1bd   :  { %v1423_v13 = vmul.f32 %v5579_v57, %v5579_v57  ;;  %v1600_v27 = vmul.f32 %v5580_v8, %v5580_v8  ;;  %v6574_v57 = vpop.xlane.xlu2 %893 }
 0x1be   :  { %v1927_v2 = vadd.f32 %v1926_v0, %v1412_v50  ;;  %v2107_v7 = vadd.f32 %v2106_v52, %v1589_v22  ;;  %v5581_v0 = vld [vmem:[#allocation2 + $0x9f8] sm:$0xff]  ;;  %v5582_v52 = vld [vmem:[#allocation2 + $0xf80] sm:$0xff] }
 0x1bf   :  { %v1424_v61 = vmul.f32 %v5581_v0, %v5581_v0  ;;  %v1601_v26 = vmul.f32 %v5582_v52, %v5582_v52 }
 0x1c0   :  { %v1928_v20 = vadd.f32 %v1927_v2, %v1413_v40  ;;  %v2108_v60 = vadd.f32 %v2107_v7, %v1590_v49 }
 0x1c2   :  { %v1929_v35 = vadd.f32 %v1928_v20, %v1414_v38  ;;  %v2109_v19 = vadd.f32 %v2108_v60, %v1591_v36  ;;  %v1602_v36 = vmul.f32 %v5583_v6, %v5583_v6 }
 0x1c4   :  { %v1930_v11 = vadd.f32 %v1929_v35, %v1415_v30  ;;  %v2110_v10 = vadd.f32 %v2109_v19, %v1592_v28  ;;  %v5584_v30 = vld [vmem:[#allocation2 + $0xf90] sm:$0xff]  ;;  %v5585_v28 = vld [vmem:[#allocation2 + $0xf98] sm:$0xff] }
 0x1c5   :  { %v1603_v20 = vmul.f32 %v5584_v30, %v5584_v30  ;;  %v1604_v60 = vmul.f32 %v5585_v28, %v5585_v28 }
 0x1c6   :  { %v1931_v15 = vadd.f32 %v1930_v11, %v1416_v4  ;;  %v2111_v21 = vadd.f32 %v2110_v10, %v1593_v58  ;;  %v5586_v4 = vld [vmem:[#allocation2 + $0xfa0] sm:$0xff]  ;;  %v5587_v58 = vld [vmem:[#allocation2 + $0xfa8] sm:$0xff] }
 0x1c7   :  { %v1605_v35 = vmul.f32 %v5586_v4, %v5586_v4  ;;  %v1606_v19 = vmul.f32 %v5587_v58, %v5587_v58  ;;  %v6600_v4 = vld [vmem:[#allocation2 + $0x8] sm:$0xff]  ;;  %v6604_v58 = vld [vmem:[#allocation2 + $0x10] sm:$0xff] }
 0x1c8   :  { %v1932_v34 = vadd.f32 %v1931_v15, %v1417_v56  ;;  %v2112_v24 = vadd.f32 %v2111_v21, %v1594_v63  ;;  %v5588_v56 = vld [vmem:[#allocation2 + $0xfb0] sm:$0xff]  ;;  %v5589_v63 = vld [vmem:[#allocation2 + $0xfb8] sm:$0xff] }
 0x1c9   :  { %v1607_v11 = vmul.f32 %v5588_v56, %v5588_v56  ;;  %v1608_v10 = vmul.f32 %v5589_v63, %v5589_v63  ;;  %v6616_v63 = vld [vmem:[#allocation2 + $0x28] sm:$0xff] }
 0x1ca   :  { %v1933_v39 = vadd.f32 %v1932_v34, %v1418_v47  ;;  %v2113_v53 = vadd.f32 %v2112_v24, %v1595_v32  ;;  %v5590_v47 = vld [vmem:[#allocation2 + $0xfc0] sm:$0xff]  ;;  %v5591_v32 = vld [vmem:[#allocation2 + $0xfc8] sm:$0xff] }
 0x1cb   :  { %v1609_v15 = vmul.f32 %v5590_v47, %v5590_v47  ;;  %v1610_v21 = vmul.f32 %v5591_v32, %v5591_v32  ;;  %v6628_v32 = vld [vmem:[#allocation2 + $0x40] sm:$0xff]  ;;  %v6778_v47 = vld [vmem:[#allocation2 + $0x138] sm:$0xff] }
 0x1cc   :  { %v1934_v59 = vadd.f32 %v1933_v39, %v1419_v29  ;;  %v2114_v16 = vadd.f32 %v2113_v53, %v1596_v5  ;;  %v5592_v29 = vld [vmem:[#allocation2 + $0xfd0] sm:$0xff]  ;;  %v5593_v5 = vld [vmem:[#allocation2 + $0xfd8] sm:$0xff]  ;;  %10942 = vst [vmem:[#allocation20_spill] sm:$0xff] %v6778_v47 }
 0x1cd   :  { %v1611_v34 = vmul.f32 %v5592_v29, %v5592_v29  ;;  %v1612_v24 = vmul.f32 %v5593_v5, %v5593_v5  ;;  %v6632_v29 = vld [vmem:[#allocation2 + $0x48] sm:$0xff]  ;;  %v6880_v47 = vld [vmem:[#allocation2 + $0x1d0] sm:$0xff] }
 0x1ce   :  { %v1935_v23 = vadd.f32 %v1934_v59, %v1420_v46  ;;  %v2115_v50 = vadd.f32 %v2114_v16, %v1597_v17  ;;  %v5594_v46 = vld [vmem:[#allocation2 + $0xfe0] sm:$0xff]  ;;  %v5595_v17 = vld [vmem:[#allocation2 + $0xfe8] sm:$0xff]  ;;  %10965 = vst [vmem:[#allocation43_spill] sm:$0xff] %v6880_v47  ;;  %v6908_v47 = vld [vmem:[#allocation2 + $0x1f8] sm:$0xff] }
 0x1cf   :  { %v1613_v39 = vmul.f32 %v5594_v46, %v5594_v46  ;;  %v1614_v53 = vmul.f32 %v5595_v17, %v5595_v17  ;;  %v6648_v17 = vld [vmem:[#allocation2 + $0x68] sm:$0xff]  ;;  %10971 = vst [vmem:[#allocation49_spill] sm:$0xff] %v6908_v47  ;;  %v6931_v47 = vld [vmem:[#allocation2 + $0x220] sm:$0xff] }
 0x1d0   :  { %v1936_v22 = vadd.f32 %v1935_v23, %v1421_v3  ;;  %v2116_v40 = vadd.f32 %v2115_v50, %v1598_v31  ;;  %v5596_v3 = vld [vmem:[#allocation2 + $0xff0] sm:$0xff]  ;;  %v5597_v31 = vld [vmem:[#allocation2 + $0xff8] sm:$0xff]  ;;  %10976 = vst [vmem:[#allocation54_spill] sm:$0xff] %v6931_v47  ;;  %v6953_v47 = vld [vmem:[#allocation2 + $0x240] sm:$0xff] }
 0x1d1   :  { %v1615_v59 = vmul.f32 %v5596_v3, %v5596_v3  ;;  %v1616_v16 = vmul.f32 %v5597_v31, %v5597_v31  ;;  %10981 = vst [vmem:[#allocation59_spill] sm:$0xff] %v6953_v47  ;;  %v7000_v47 = vld [vmem:[#allocation2 + $0x290] sm:$0xff] }
 0x1d2   :  { %v1937_v49 = vadd.f32 %v1936_v22, %v1422_v51  ;;  %v2117_v38 = vadd.f32 %v2116_v40, %v1599_v55  ;;  %v6217_v55 = vmov 8192.0   ;;  %v699_v22 = vpop.xlane.xlu0 %698  ;;  %v6576_v40 = vpop.xlane.xlu2 %958  ;;  %10993 = vst [vmem:[#allocation71_spill] sm:$0xff] %v7000_v47  ;;  %v7056_v47 = vld [vmem:[#allocation2 + $0x2e8] sm:$0xff] }
 0x1d3   :  { %5132 = vrcp.f32 %v6217_v55  ;;  %v6728_v55 = vld [vmem:[#allocation2 + $0xd8] sm:$0xff]  ;;  %11006 = vst [vmem:[#allocation84_spill] sm:$0xff] %v7056_v47 }
 0x1d4   :  { %v1938_v2 = vadd.f32 %v1937_v49, %v1423_v13  ;;  %v2118_v7 = vadd.f32 %v2117_v38, %v1600_v27  ;;  %v764_v13 = vpop.xlane.xlu1 %763 }
 0x1d6   :  { %v1939_v9 = vadd.f32 %v1938_v2, %v1424_v61  ;;  %v2119_v54 = vadd.f32 %v2118_v7, %v1601_v26 }
 0x1d8   :  { %1940 = vadd.xlane.f32.xlu0 %v1939_v9  ;;  %v2120_v12 = vadd.f32 %v2119_v54, %v1602_v36 }
 0x1d9   :  { %v5133_v50 = vpop.eup %5132 }
 0x1da   :  { %v2121_v62 = vadd.f32 %v2120_v12, %v1603_v20  ;;  %v1091_v8 = vmul.f32 8192.0, %v5133_v50  ;;  %v6578_v49 = vpop.xlane.xlu0 %1023  ;;  %vm1095_vm0 = vweird.f32 %v5133_v50  ;;  %v1681_v38 = vpop.xlane.xlu2 %1680  ;;  %v6802_v12 = vld [vmem:[#allocation2 + $0x158] sm:$0xff] }
 0x1db   :  { %10948 = vst [vmem:[#allocation26_spill] sm:$0xff] %v6802_v12  ;;  %v6824_v12 = vld [vmem:[#allocation2 + $0x180] sm:$0xff] }
 0x1dc   :  { %v2122_v18 = vadd.f32 %v2121_v62, %v1604_v60  ;;  %v1092_v27 = vsub.f32 1.0, %v1091_v8  ;;  %v829_v61 = vpop.xlane.xlu1 %828  ;;  %v6596_v60 = vld [vmem:[#allocation2] sm:$0xff]  ;;  %10953 = vst [vmem:[#allocation31_spill] sm:$0xff] %v6824_v12 }
 0x1de   :  { %v2123_v42 = vadd.f32 %v2122_v18, %v1605_v35  ;;  %v1093_v0 = vmul.f32 %v5133_v50, %v1092_v27  ;;  %v6608_v18 = vld [vmem:[#allocation2 + $0x18] sm:$0xff]  ;;  %v6798_v35 = vld [vmem:[#allocation2 + $0x150] sm:$0xff] }
 0x1df   :  { %v6682_v27 = vld [vmem:[#allocation2 + $0x98] sm:$0xff]  ;;  %10947 = vst [vmem:[#allocation25_spill] sm:$0xff] %v6798_v35 }
 0x1e0   :  { %v2124_v25 = vadd.f32 %v2123_v42, %v1606_v19  ;;  %v1094_v52 = vadd.f32 %v5133_v50, %v1093_v0  ;;  %v6718_v0 = vld [vmem:[#allocation2 + $0xd0] sm:$0xff] }
 0x1e1   :  { %v6816_v19 = vld [vmem:[#allocation2 + $0x170] sm:$0xff] }
 0x1e2   :  { %v2125_v37 = vadd.f32 %v2124_v25, %v1607_v11  ;;  %v6580_v26 = vsel %vm1095_vm0, %v5133_v50, %v1094_v52  ;;  %v6612_v11 = vld [vmem:[#allocation2 + $0x20] sm:$0xff]  ;;  %v6620_v25 = vld [vmem:[#allocation2 + $0x30] sm:$0xff]  ;;  %v1876_v31 = vpop.xlane.xlu2 %1875  ;;  %10951 = vst [vmem:[#allocation29_spill] sm:$0xff] %v6816_v19  ;;  %v6836_v19 = vld [vmem:[#allocation2 + $0x198] sm:$0xff] }
 0x1e3   :  { %10934 = vst [vmem:[#allocation12_spill] sm:$0xff] %v6580_v26  ;;  %v6583_v2 = vmul.f32 %v6580_v26, %v634_v43  ;;  %v6588_v7 = vmul.f32 %v6580_v26, %v699_v22  ;;  %v2137_v9 = vmul.f32 %v1681_v38, %v6580_v26  ;;  %v6667_v43 = vld [vmem:[#allocation2 + $0x88] sm:$0xff]  ;;  %v6672_v50 = vmul.f32 %v6580_v26, %v829_v61  ;;  %v6689_v61 = vld [vmem:[#allocation2 + $0xa0] sm:$0xff] }
 0x1e4   :  { %v2126_v14 = vadd.f32 %v2125_v37, %v1608_v10  ;;  %v6585_v6 = vpop.xlane.xlu1 %1088  ;;  %v6676_v22 = vmul.f32 %v6580_v26, %v6574_v57  ;;  %v6774_v37 = vld [vmem:[#allocation2 + $0x130] sm:$0xff]  ;;  %v6782_v10 = vld [vmem:[#allocation2 + $0x140] sm:$0xff]  ;;  %v6788_v42 = vmul.f32 %v6580_v26, %v6576_v40  ;;  %v6792_v3 = vmul.f32 %v6580_v26, %v6578_v49  ;;  %10956 = vst [vmem:[#allocation34_spill] sm:$0xff] %v6836_v19  ;;  %v6876_v40 = vld [vmem:[#allocation2 + $0x1c8] sm:$0xff] }
 0x1e5   :  { %10935 = vst [vmem:[#allocation13_spill] sm:$0xff] %v6588_v7  ;;  %v2145_v20 = vmul.f32 %v6583_v2, %v6583_v2  ;;  %v2146_v54 = vmul.f32 %v6588_v7, %v6588_v7  ;;  %v2148_v8 = vmul.f32 %v6672_v50, %v6672_v50 }
 0x1e6   :  { %v2127_v1 = vadd.f32 %v2126_v14, %v1609_v15  ;;  %v6624_v15 = vld [vmem:[#allocation2 + $0x38] sm:$0xff]  ;;  %10937 = vst [vmem:[#allocation15_spill] sm:$0xff] %v6672_v50  ;;  %v6812_v50 = vld [vmem:[#allocation2 + $0x168] sm:$0xff] }
 0x1e7   :  { %v2153_v28 = vsub.f32 %v2137_v9, %v2145_v20  ;;  %10938 = vst [vmem:[#allocation16_spill] sm:$0xff] %v6676_v22  ;;  %v6698_v20 = vld [vmem:[#allocation2 + $0xb0] sm:$0xff] }
 0x1e8   :  { %v2128_v33 = vadd.f32 %v2127_v1, %v1610_v21  ;;  %v6636_v1 = vld [vmem:[#allocation2 + $0x50] sm:$0xff]  ;;  %v6770_v21 = vld [vmem:[#allocation2 + $0x128] sm:$0xff]  ;;  %10941 = vst [vmem:[#allocation19_spill] sm:$0xff] %v6774_v37  ;;  %v6890_v37 = vld [vmem:[#allocation2 + $0x1e0] sm:$0xff] }
 0x1e9   :  { %v2161_v14 = vmax.f32 %v2153_v28, 0.0  ;;  %v6702_v28 = vld [vmem:[#allocation2 + $0xb8] sm:$0xff]  ;;  %10940 = vst [vmem:[#allocation18_spill] sm:$0xff] %v6770_v21  ;;  %v6936_v21 = vld [vmem:[#allocation2 + $0x228] sm:$0xff] }
 0x1ea   :  { %v2129_v48 = vadd.f32 %v2128_v33, %v1611_v34  ;;  %v6758_v34 = vld [vmem:[#allocation2 + $0x110] sm:$0xff]  ;;  %10943 = vst [vmem:[#allocation21_spill] sm:$0xff] %v6782_v10  ;;  %v6872_v10 = vld [vmem:[#allocation2 + $0x1c0] sm:$0xff] }
 0x1eb   :  { %v1746_v36 = vpop.xlane.xlu0 %1745  ;;  %v6687_v38 = vadd.f32 1e-05, %v2161_v14  ;;  %v6706_v14 = vld [vmem:[#allocation2 + $0xc0] sm:$0xff]  ;;  %10944 = vst [vmem:[#allocation22_spill] sm:$0xff] %v6788_v42 }
 0x1ec   :  { %v2130_v41 = vadd.f32 %v2129_v48, %v1612_v24  ;;  %v2138_v30 = vmul.f32 %v1746_v36, %v6580_v26  ;;  %v6640_v24 = vld [vmem:[#allocation2 + $0x58] sm:$0xff]  ;;  %v1811_v46 = vpop.xlane.xlu1 %1810  ;;  %v6693_v36 = vld [vmem:[#allocation2 + $0xa8] sm:$0xff]  ;;  %v6766_v48 = vld [vmem:[#allocation2 + $0x120] sm:$0xff]  ;;  %10945 = vst [vmem:[#allocation23_spill] sm:$0xff] %v6792_v3 }
 0x1ed   :  { %v2139_v52 = vmul.f32 %v1811_v46, %v6580_v26  ;;  %v6726_v46 = vmul.f32 %v6676_v22, %v6676_v22  ;;  %5134 = vrsqrt.f32 %v6687_v38  ;;  %10939 = vst [vmem:[#allocation17_spill] sm:$0xff] %v6766_v48  ;;  %v6806_v22 = vld [vmem:[#allocation2 + $0x160] sm:$0xff]  ;;  %vm2183_vm1 = vweird.f32 %v6687_v38  ;;  %v7012_v48 = vld [vmem:[#allocation2 + $0x2a8] sm:$0xff] }
 0x1ee   :  { %v2131_v44 = vadd.f32 %v2130_v41, %v1613_v39  ;;  %v2154_v62 = vsub.f32 %v2138_v30, %v2146_v54  ;;  %v6644_v39 = vld [vmem:[#allocation2 + $0x60] sm:$0xff]  ;;  %v6652_v41 = vld [vmem:[#allocation2 + $0x70] sm:$0xff]  ;;  %v2140_v30 = vmul.f32 %v1876_v31, %v6580_v26  ;;  %v6714_v31 = vld [vmem:[#allocation2 + $0xc8] sm:$0xff]  ;;  %10949 = vst [vmem:[#allocation27_spill] sm:$0xff] %v6806_v22 }
 0x1ef   :  { %v6749_v54 = vld [vmem:[#allocation2 + $0x100] sm:$0xff]  ;;  %10950 = vst [vmem:[#allocation28_spill] sm:$0xff] %v6812_v50  ;;  %v6828_v22 = vld [vmem:[#allocation2 + $0x188] sm:$0xff]  ;;  %v6832_v50 = vld [vmem:[#allocation2 + $0x190] sm:$0xff] }
 0x1f0   :  { %v2132_v45 = vadd.f32 %v2131_v44, %v1614_v53  ;;  %v6741_v53 = vld [vmem:[#allocation2 + $0xf0] sm:$0xff]  ;;  %v2156_v33 = vsub.f32 %v2140_v30, %v2148_v8  ;;  %v6762_v30 = vld [vmem:[#allocation2 + $0x118] sm:$0xff]  ;;  %v6794_v8 = vld [vmem:[#allocation2 + $0x148] sm:$0xff]  ;;  %10954 = vst [vmem:[#allocation32_spill] sm:$0xff] %v6828_v22  ;;  %v6852_v22 = vmul.f32 %v6792_v3, %v6792_v3 }
 0x1f1   :  { %10946 = vst [vmem:[#allocation24_spill] sm:$0xff] %v6794_v8  ;;  %v6868_v3 = vld [vmem:[#allocation2 + $0x1b8] sm:$0xff] }
 0x1f2   :  { %v2133_v51 = vadd.f32 %v2132_v45, %v1615_v59  ;;  %v6656_v59 = vld [vmem:[#allocation2 + $0x78] sm:$0xff]  ;;  %v2162_v45 = vmax.f32 %v2154_v62, 0.0  ;;  %v6737_v62 = vld [vmem:[#allocation2 + $0xe8] sm:$0xff]  ;;  %v2164_v5 = vmax.f32 %v2156_v33, 0.0  ;;  %10955 = vst [vmem:[#allocation33_spill] sm:$0xff] %v6832_v50  ;;  %v6848_v33 = vmul.f32 %v6788_v42, %v6788_v42  ;;  %v6915_v42 = vld [vmem:[#allocation2 + $0x200] sm:$0xff] }
 0x1f3   :  { %v6856_v50 = vld [vmem:[#allocation2 + $0x1a8] sm:$0xff]  ;;  %10962 = vst [vmem:[#allocation40_spill] sm:$0xff] %v6868_v3 }
 0x1f4   :  { %v2134_v23 = vadd.f32 %v2133_v51, %v1616_v16  ;;  %v6661_v16 = vmul.f32 %v6580_v26, %v764_v13  ;;  %v6663_v51 = vld [vmem:[#allocation2 + $0x80] sm:$0xff]  ;;  %v6678_v13 = vld [vmem:[#allocation2 + $0x90] sm:$0xff]  ;;  %v6712_v57 = vadd.f32 1e-05, %v2162_v45  ;;  %v6745_v45 = vld [vmem:[#allocation2 + $0xf8] sm:$0xff]  ;;  %10959 = vst [vmem:[#allocation37_spill] sm:$0xff] %v6856_v50 }
 0x1f5   :  { %v6860_v35 = vadd.f32 1e-05, %v2164_v5  ;;  %10963 = vst [vmem:[#allocation41_spill] sm:$0xff] %v6872_v10  ;;  %v6894_v10 = vld [vmem:[#allocation2 + $0x1e8] sm:$0xff] }
 0x1f6   :  { %2135 = vadd.xlane.f32.xlu0 %v2134_v23  ;;  %10936 = vst [vmem:[#allocation14_spill] sm:$0xff] %v6661_v16  ;;  %v2147_v9 = vmul.f32 %v6661_v16, %v6661_v16  ;;  %v6732_v23 = vld [vmem:[#allocation2 + $0xe0] sm:$0xff]  ;;  %5136 = vrsqrt.f32 %v6712_v57  ;;  %v6820_v16 = vld [vmem:[#allocation2 + $0x178] sm:$0xff]  ;;  %vm2193_vm3 = vweird.f32 %v6712_v57 }
 0x1f7   :  { %10952 = vst [vmem:[#allocation30_spill] sm:$0xff] %v6820_v16  ;;  %v6840_v16 = vld [vmem:[#allocation2 + $0x1a0] sm:$0xff] }
 0x1f8   :  { %v2155_v44 = vsub.f32 %v2139_v52, %v2147_v9  ;;  %v6753_v9 = vld [vmem:[#allocation2 + $0x108] sm:$0xff]  ;;  %10957 = vst [vmem:[#allocation35_spill] sm:$0xff] %v6840_v16  ;;  %v6864_v16 = vld [vmem:[#allocation2 + $0x1b0] sm:$0xff] }
 0x1f9   :  { %10960 = vst [vmem:[#allocation38_spill] sm:$0xff] %v6860_v35 }
 0x1fa   :  { %v2163_v56 = vmax.f32 %v2155_v44, 0.0  ;;  %v6810_v44 = vpop.eup %5134  ;;  %10961 = vst [vmem:[#allocation39_spill] sm:$0xff] %v6864_v16  ;;  %v6884_v16 = vld [vmem:[#allocation2 + $0x1d8] sm:$0xff] }
 0x1fb   :  { %v2178_v49 = vmul.f32 %v6810_v44, %v6687_v38  ;;  %10964 = vst [vmem:[#allocation42_spill] sm:$0xff] %v6876_v40  ;;  %v6898_v40 = vld [vmem:[#allocation2 + $0x1f0] sm:$0xff]  ;;  %vm2184_vm2 = vweird.f32 %v6810_v44 }
 0x1fc   :  { %v6844_v12 = vpop.eup %5136  ;;  %v6854_v52 = vadd.f32 1e-05, %v2163_v56  ;;  %10966 = vst [vmem:[#allocation44_spill] sm:$0xff] %v6884_v16  ;;  %v6904_v56 = vmul.f32 %v6580_v26, %v6585_v6  ;;  %vm2185_vm5 = vmor %vm2183_vm1, %vm2184_vm2 }
 0x1fd   :  { %v2188_v3 = vmul.f32 %v6844_v12, %v6712_v57  ;;  %10967 = vst [vmem:[#allocation45_spill] sm:$0xff] %v6890_v37  ;;  %v6923_v37 = vld [vmem:[#allocation2 + $0x210] sm:$0xff]  ;;  %vm2194_vm4 = vweird.f32 %v6844_v12  ;;  %v7126_v57 = vld [vmem:[#allocation2 + $0x340] sm:$0xff] }
 0x1fe   :  { %10958 = vst [vmem:[#allocation36_spill] sm:$0xff] %v6854_v52  ;;  %5138 = vrsqrt.f32 %v6854_v52  ;;  %v6950_v6 = vmul.f32 %v6904_v56, %v6904_v56  ;;  %vm2195_vm6 = vmor %vm2193_vm3, %vm2194_vm4 }
 0x1ff   :  { %10968 = vst [vmem:[#allocation46_spill] sm:$0xff] %v6894_v10  ;;  %v2179_v10 = vmul.f32 %v6810_v44, %v2178_v49  ;;  %5140 = vrsqrt.f32 %v6860_v35 }
 0x200   :  { %10969 = vst [vmem:[#allocation47_spill] sm:$0xff] %v6898_v40  ;;  %v6919_v40 = vld [vmem:[#allocation2 + $0x208] sm:$0xff] }
 0x201   :  { %10970 = vst [vmem:[#allocation48_spill] sm:$0xff] %v6904_v56  ;;  %v2180_v49 = vmul.f32 0.5, %v2179_v10  ;;  %v6984_v56 = vld [vmem:[#allocation2 + $0x278] sm:$0xff] }
 0x202   :  { %10972 = vst [vmem:[#allocation50_spill] sm:$0xff] %v6915_v42  ;;  %v2189_v42 = vmul.f32 %v6844_v12, %v2188_v3 }
 0x203   :  { %10973 = vst [vmem:[#allocation51_spill] sm:$0xff] %v6919_v40  ;;  %v6940_v40 = vld [vmem:[#allocation2 + $0x230] sm:$0xff] }
 0x204   :  { %10974 = vst [vmem:[#allocation52_spill] sm:$0xff] %v6923_v37  ;;  %v6944_v37 = vld [vmem:[#allocation2 + $0x238] sm:$0xff]  ;;  %v2190_v5 = vmul.f32 0.5, %v2189_v42 }
 0x205   :  { %10977 = vst [vmem:[#allocation55_spill] sm:$0xff] %v6936_v21  ;;  %v6957_v21 = vld [vmem:[#allocation2 + $0x248] sm:$0xff] }
 0x206   :  { %10978 = vst [vmem:[#allocation56_spill] sm:$0xff] %v6940_v40  ;;  %v2191_v10 = vsub.f32 1.5, %v2190_v5 }
 0x207   :  { %10979 = vst [vmem:[#allocation57_spill] sm:$0xff] %v6944_v37  ;;  %v6962_v37 = vld [vmem:[#allocation2 + $0x250] sm:$0xff] }
 0x208   :  { %v2006_v19 = vpop.xlane.xlu1 %2005  ;;  %10980 = vst [vmem:[#allocation58_spill] sm:$0xff] %v6950_v6  ;;  %v6966_v6 = vld [vmem:[#allocation2 + $0x258] sm:$0xff] }
 0x209   :  { %v2142_v16 = vmul.f32 %v2006_v19, %v6580_v26  ;;  %10982 = vst [vmem:[#allocation60_spill] sm:$0xff] %v6957_v21  ;;  %v6972_v19 = vld [vmem:[#allocation2 + $0x260] sm:$0xff]  ;;  %v6976_v21 = vld [vmem:[#allocation2 + $0x268] sm:$0xff] }
 0x20a   :  { %10983 = vst [vmem:[#allocation61_spill] sm:$0xff] %v6962_v37 }
 0x20b   :  { %v2158_v3 = vsub.f32 %v2142_v16, %v6848_v33  ;;  %10984 = vst [vmem:[#allocation62_spill] sm:$0xff] %v6966_v6  ;;  %v6970_v33 = vpop.eup %5138  ;;  %v7052_v16 = vld [vmem:[#allocation2 + $0x2e0] sm:$0xff] }
 0x20c   :  { %10985 = vst [vmem:[#allocation63_spill] sm:$0xff] %v6970_v33  ;;  %v6988_v6 = vpop.eup %5140  ;;  %v2198_v42 = vmul.f32 %v6970_v33, %v6854_v52 }
 0x20d   :  { %10986 = vst [vmem:[#allocation64_spill] sm:$0xff] %v6972_v19  ;;  %v6992_v19 = vld [vmem:[#allocation2 + $0x280] sm:$0xff] }
 0x20e   :  { %10987 = vst [vmem:[#allocation65_spill] sm:$0xff] %v6976_v21  ;;  %v6996_v21 = vld [vmem:[#allocation2 + $0x288] sm:$0xff] }
 0x20f   :  { %10989 = vst [vmem:[#allocation67_spill] sm:$0xff] %v6984_v56  ;;  %v2181_v56 = vsub.f32 1.5, %v2180_v49 }
 0x210   :  { %10990 = vst [vmem:[#allocation68_spill] sm:$0xff] %v6988_v6 }
 0x211   :  { %10991 = vst [vmem:[#allocation69_spill] sm:$0xff] %v6992_v19 }
 0x212   :  { %10992 = vst [vmem:[#allocation70_spill] sm:$0xff] %v6996_v21  ;;  %v7041_v21 = vld [vmem:[#allocation2 + $0x2d0] sm:$0xff] }
 0x213   :  { %10996 = vst [vmem:[#allocation74_spill] sm:$0xff] %v7012_v48  ;;  %v7031_v48 = vld [vmem:[#allocation2 + $0x2c0] sm:$0xff] }
 0x214   :  { %10999 = vst [vmem:[#allocation77_spill] sm:$0xff] %v7031_v48 }
 0x215   :  { %11002 = vst [vmem:[#allocation80_spill] sm:$0xff] %v7041_v21 }
 0x216   :  { %11005 = vst [vmem:[#allocation83_spill] sm:$0xff] %v7052_v16  ;;  %v2192_v16 = vmul.f32 %v6844_v12, %v2191_v10  ;;  %v7085_v10 = vld [vmem:[#allocation2 + $0x310] sm:$0xff] }
 0x217   :  { %11011 = vst [vmem:[#allocation89_spill] sm:$0xff] %v7085_v10 }
 0x218   :  { %11021 = vst [vmem:[#allocation99_spill] sm:$0xff] %v7126_v57 }
 0x22d   :  { %v2071_v8 = vpop.xlane.xlu2 %2070 }
 0x22e   :  { %v2143_v50 = vmul.f32 %v2071_v8, %v6580_v26  ;;  %v6927_v8 = vld [vmem:[#allocation2 + $0x218] sm:$0xff] }
 0x22f   :  { %10975 = vst [vmem:[#allocation53_spill] sm:$0xff] %v6927_v8 }
 0x230   :  { %v2159_v40 = vsub.f32 %v2143_v50, %v6852_v22  ;;  %v6980_v50 = vld [vmem:[#allocation2 + $0x270] sm:$0xff] }
 0x231   :  { %10988 = vst [vmem:[#allocation66_spill] sm:$0xff] %v6980_v50  ;;  %v2166_v50 = vmax.f32 %v2158_v3, 0.0  ;;  %v7016_v22 = vld [vmem:[#allocation2 + $0x2b0] sm:$0xff] }
 0x232   :  { %v2167_v19 = vmax.f32 %v2159_v40, 0.0  ;;  %10997 = vst [vmem:[#allocation75_spill] sm:$0xff] %v7016_v22  ;;  %v2208_v40 = vmul.f32 %v6988_v6, %v6860_v35 }
 0x233   :  { %v7035_v22 = vadd.f32 1e-05, %v2166_v50  ;;  %v2182_v50 = vmul.f32 %v6810_v44, %v2181_v56  ;;  %v7066_v56 = vld [vmem:[#allocation2 + $0x2f8] sm:$0xff] }
 0x234   :  { %v7049_v3 = vadd.f32 1e-05, %v2167_v19  ;;  %v2209_v21 = vmul.f32 %v6988_v6, %v2208_v40  ;;  %11008 = vst [vmem:[#allocation86_spill] sm:$0xff] %v7066_v56  ;;  %v7081_v40 = vld [vmem:[#allocation2 + $0x308] sm:$0xff]  ;;  %v7089_v19 = vld [vmem:[#allocation2 + $0x318] sm:$0xff] }
 0x235   :  { %11000 = vst [vmem:[#allocation78_spill] sm:$0xff] %v7035_v22  ;;  %5142 = vrsqrt.f32 %v7035_v22  ;;  %v7094_v38 = vsel %vm2185_vm5, %v6810_v44, %v2182_v50  ;;  %v7113_v50 = vld [vmem:[#allocation2 + $0x330] sm:$0xff] }
 0x236   :  { %11004 = vst [vmem:[#allocation82_spill] sm:$0xff] %v7049_v3  ;;  %5144 = vrsqrt.f32 %v7049_v3  ;;  %v7111_v44 = vmul.f32 0.5, %v2209_v21 }
 0x237   :  { %11010 = vst [vmem:[#allocation88_spill] sm:$0xff] %v7081_v40  ;;  %v7101_v40 = vld [vmem:[#allocation2 + $0x328] sm:$0xff] }
 0x238   :  { %11012 = vst [vmem:[#allocation90_spill] sm:$0xff] %v7089_v19  ;;  %v11026_v19 = vsub.f32 %v6608_v18, %v6583_v2  ;;  %v11030_v18 = vsub.f32 %v6624_v15, %v6583_v2  ;;  %v11034_v15 = vsub.f32 %v6636_v1, %v6583_v2  ;;  %v11038_v1 = vsub.f32 %v6648_v17, %v6583_v2 }
 0x239   :  { %11014 = vst [vmem:[#allocation92_spill] sm:$0xff] %v7101_v40  ;;  %v7124_v40 = vsel %vm2195_vm6, %v6844_v12, %v2192_v16  ;;  %v11024_v12 = vsub.f32 %v6600_v4, %v6583_v2  ;;  %v11025_v16 = vsub.f32 %v6604_v58, %v6583_v2  ;;  %v11028_v4 = vsub.f32 %v6616_v63, %v6583_v2 }
 0x23a   :  { %11016 = vst [vmem:[#allocation94_spill] sm:$0xff] %v7111_v44  ;;  %v11029_v58 = vsub.f32 %v6620_v25, %v6583_v2  ;;  %v11032_v63 = vsub.f32 %v6628_v32, %v6583_v2  ;;  %v11033_v25 = vsub.f32 %v6632_v29, %v6583_v2  ;;  %v11037_v29 = vsub.f32 %v6644_v39, %v6583_v2 }
 0x23b   :  { %11017 = vst [vmem:[#allocation95_spill] sm:$0xff] %v7113_v50  ;;  %v11023_v50 = vsub.f32 %v6596_v60, %v6583_v2  ;;  %v7150_v21 = vmul.f32 %v11025_v16, %v7094_v38  ;;  %v11027_v60 = vsub.f32 %v6612_v11, %v6583_v2  ;;  %v7182_v11 = vpop.eup %5142  ;;  %v11041_v39 = vsub.f32 %v6663_v51, %v6583_v2 }
 0x23c   :  { %11020 = vst [vmem:[#allocation98_spill] sm:$0xff] %v7124_v40  ;;  %v7174_v16 = vmul.f32 %v11029_v58, %v7094_v38  ;;  %v7200_v58 = vmul.f32 %v11034_v15, %v7094_v38  ;;  %v7208_v32 = vpop.eup %5144  ;;  %v11042_v17 = vsub.f32 %v6667_v43, %v6583_v2  ;;  %v11045_v51 = vsub.f32 %v6689_v61, %v6583_v2 }
 0x23d   :  { %11031 = vst [vmem:[#allocation101_spill] sm:$0xff] %v7182_v11  ;;  %v11046_v43 = vsub.f32 %v6693_v36, %v6583_v2  ;;  %v11049_v61 = vsub.f32 %v6706_v14, %v6583_v2  ;;  %v11050_v36 = vsub.f32 %v6714_v31, %v6583_v2  ;;  %v11053_v14 = vsub.f32 %v6732_v23, %v6583_v2 }
 0x23e   :  { %11036 = vst [vmem:[#allocation102_spill] sm:$0xff] %v7208_v32  ;;  %v11054_v31 = vsub.f32 %v6737_v62, %v6583_v2  ;;  %v11057_v23 = vsub.f32 %v6749_v54, %v6583_v2  ;;  %v11058_v62 = vsub.f32 %v6753_v9, %v6583_v2  ;;  %v11061_v54 = vld [vmem:[#allocation17_spill] sm:$0xff]  ;;  %v11063_v9 = vld [vmem:[#allocation18_spill] sm:$0xff] }
 0x24b   :  { %v1941_v8 = vpop.xlane.xlu0 %1940 }
 0x24c   :  { %v2141_v37 = vmul.f32 %v1941_v8, %v6580_v26  ;;  %v7004_v8 = vld [vmem:[#allocation2 + $0x298] sm:$0xff]  ;;  %v7008_v26 = vld [vmem:[#allocation2 + $0x2a0] sm:$0xff] }
 0x24d   :  { %10994 = vst [vmem:[#allocation72_spill] sm:$0xff] %v7004_v8  ;;  %v7037_v8 = vld [vmem:[#allocation2 + $0x2c8] sm:$0xff] }
 0x24e   :  { %10995 = vst [vmem:[#allocation73_spill] sm:$0xff] %v7008_v26  ;;  %v2157_v49 = vsub.f32 %v2141_v37, %v6726_v46  ;;  %v7027_v26 = vld [vmem:[#allocation2 + $0x2b8] sm:$0xff]  ;;  %v2199_v37 = vmul.f32 %v6970_v33, %v2198_v42 }
 0x24f   :  { %10998 = vst [vmem:[#allocation76_spill] sm:$0xff] %v7027_v26  ;;  %v7045_v46 = vld [vmem:[#allocation2 + $0x2d8] sm:$0xff]  ;;  %v7062_v26 = vld [vmem:[#allocation2 + $0x2f0] sm:$0xff] }
 0x250   :  { %11001 = vst [vmem:[#allocation79_spill] sm:$0xff] %v7037_v8  ;;  %v2165_v48 = vmax.f32 %v2157_v49, 0.0  ;;  %v7072_v8 = vld [vmem:[#allocation2 + $0x300] sm:$0xff]  ;;  %v7109_v42 = vmul.f32 0.5, %v2199_v37  ;;  %v7117_v49 = vld [vmem:[#allocation2 + $0x338] sm:$0xff]  ;;  %v7130_v37 = vld [vmem:[#allocation2 + $0x348] sm:$0xff] }
 0x251   :  { %11003 = vst [vmem:[#allocation81_spill] sm:$0xff] %v7045_v46 }
 0x252   :  { %11007 = vst [vmem:[#allocation85_spill] sm:$0xff] %v7062_v26  ;;  %v7121_v5 = vadd.f32 1e-05, %v2165_v48  ;;  %v7144_v48 = vmul.f32 %v11024_v12, %v7094_v38  ;;  %v7168_v12 = vmul.f32 %v11028_v4, %v7094_v38  ;;  %v7194_v4 = vmul.f32 %v11033_v25, %v7094_v38 }
 0x253   :  { %11009 = vst [vmem:[#allocation87_spill] sm:$0xff] %v7072_v8  ;;  %v7097_v8 = vld [vmem:[#allocation2 + $0x320] sm:$0xff]  ;;  %v7220_v25 = vmul.f32 %v11038_v1, %v7094_v38  ;;  %v7244_v1 = vmul.f32 %v11042_v17, %v7094_v38  ;;  %v7268_v17 = vmul.f32 %v11046_v43, %v7094_v38  ;;  %v7292_v43 = vmul.f32 %v11050_v36, %v7094_v38 }
 0x254   :  { %11013 = vst [vmem:[#allocation91_spill] sm:$0xff] %v7097_v8  ;;  %v7138_v8 = vmul.f32 %v11023_v50, %v7094_v38  ;;  %v7162_v50 = vmul.f32 %v11027_v60, %v7094_v38  ;;  %v7188_v60 = vmul.f32 %v11032_v63, %v7094_v38  ;;  %v7214_v63 = vmul.f32 %v11037_v29, %v7094_v38 }
 0x255   :  { %11015 = vst [vmem:[#allocation93_spill] sm:$0xff] %v7109_v42  ;;  %v7238_v29 = vmul.f32 %v11041_v39, %v7094_v38  ;;  %v7262_v39 = vmul.f32 %v11045_v51, %v7094_v38  ;;  %v7286_v51 = vmul.f32 %v11049_v61, %v7094_v38  ;;  %v7310_v61 = vmul.f32 %v11053_v14, %v7094_v38 }
 0x256   :  { %11018 = vst [vmem:[#allocation96_spill] sm:$0xff] %v7117_v49  ;;  %v7316_v36 = vmul.f32 %v11054_v31, %v7094_v38  ;;  %v7334_v14 = vmul.f32 %v11057_v23, %v7094_v38  ;;  %v7340_v31 = vmul.f32 %v11058_v62, %v7094_v38  ;;  %v11062_v23 = vsub.f32 %v11061_v54, %v6583_v2  ;;  %v11069_v54 = vld [vmem:[#allocation21_spill] sm:$0xff] }
 0x257   :  { %11019 = vst [vmem:[#allocation97_spill] sm:$0xff] %v7121_v5  ;;  %v11064_v62 = vsub.f32 %v11063_v9, %v6583_v2  ;;  %v11072_v9 = vld [vmem:[#allocation24_spill] sm:$0xff] }
 0x258   :  { %11022 = vst [vmem:[#allocation100_spill] sm:$0xff] %v7130_v37  ;;  %v7156_v37 = vmul.f32 %v11026_v19, %v7094_v38  ;;  %v7180_v19 = vmul.f32 %v11030_v18, %v7094_v38  ;;  %v11035_v18 = vsub.f32 %v6640_v24, %v6583_v2  ;;  %v11039_v24 = vsub.f32 %v6652_v41, %v6583_v2 }
 0x259   :  { %v11043_v41 = vsub.f32 %v6678_v13, %v6583_v2  ;;  %v11047_v13 = vsub.f32 %v6698_v20, %v6583_v2  ;;  %v11051_v20 = vsub.f32 %v6718_v0, %v6583_v2  ;;  %v11055_v0 = vsub.f32 %v6741_v53, %v6583_v2 }
 0x25a   :  { %v7206_v57 = vmul.f32 %v11035_v18, %v7094_v38  ;;  %v7226_v15 = vmul.f32 %v11039_v24, %v7094_v38  ;;  %v11040_v18 = vsub.f32 %v6656_v59, %v6583_v2  ;;  %v11044_v59 = vsub.f32 %v6682_v27, %v6583_v2 }
 0x25b   :  { %v7250_v24 = vmul.f32 %v11043_v41, %v7094_v38  ;;  %v7274_v41 = vmul.f32 %v11047_v13, %v7094_v38  ;;  %v11048_v27 = vsub.f32 %v6702_v28, %v6583_v2  ;;  %v7298_v13 = vmul.f32 %v11051_v20, %v7094_v38 }
 0x25c   :  { %v7232_v49 = vmul.f32 %v11040_v18, %v7094_v38  ;;  %v7256_v18 = vmul.f32 %v11044_v59, %v7094_v38  ;;  %v11052_v28 = vsub.f32 %v6728_v55, %v6583_v2  ;;  %v7322_v20 = vmul.f32 %v11055_v0, %v7094_v38 }
 0x25d   :  { %v7280_v59 = vmul.f32 %v11048_v27, %v7094_v38  ;;  %v11056_v55 = vsub.f32 %v6745_v45, %v6583_v2  ;;  %v11059_v53 = vsub.f32 %v6758_v34, %v6583_v2  ;;  %v11060_v45 = vsub.f32 %v6762_v30, %v6583_v2  ;;  %v11065_v34 = vld [vmem:[#allocation19_spill] sm:$0xff]  ;;  %v11067_v30 = vld [vmem:[#allocation20_spill] sm:$0xff] }
 0x25e   :  { %v7304_v27 = vmul.f32 %v11052_v28, %v7094_v38  ;;  %v7358_v10 = vmul.f32 %v11062_v23, %v7094_v38  ;;  %v7364_v56 = vmul.f32 %v11064_v62, %v7094_v38  ;;  %v11070_v23 = vsub.f32 %v11069_v54, %v6583_v2  ;;  %v11081_v54 = vld [vmem:[#allocation27_spill] sm:$0xff] }
 0x25f   :  { %v7328_v28 = vmul.f32 %v11056_v55, %v7094_v38  ;;  %v7346_v0 = vmul.f32 %v11059_v53, %v7094_v38  ;;  %v7352_v55 = vmul.f32 %v11060_v45, %v7094_v38  ;;  %v11066_v53 = vsub.f32 %v11065_v34, %v6583_v2  ;;  %v11075_v34 = vld [vmem:[#allocation25_spill] sm:$0xff] }
 0x260   :  { %v11068_v45 = vsub.f32 %v11067_v30, %v6583_v2  ;;  %v7382_v46 = vmul.f32 %v11070_v23, %v7094_v38  ;;  %v11073_v62 = vsub.f32 %v11072_v9, %v6583_v2  ;;  %v11078_v30 = vld [vmem:[#allocation26_spill] sm:$0xff]  ;;  %v11082_v23 = vsub.f32 %v11081_v54, %v6583_v2  ;;  %v11084_v9 = vld [vmem:[#allocation28_spill] sm:$0xff] }
 0x261   :  { %v7370_v26 = vmul.f32 %v11066_v53, %v7094_v38  ;;  %v11076_v53 = vsub.f32 %v11075_v34, %v6583_v2  ;;  %v11087_v34 = vld [vmem:[#allocation29_spill] sm:$0xff]  ;;  %v3281_v54 = vld [vmem:[#allocation5] sm:$0xff] }
 0x262   :  { %v7376_v47 = vmul.f32 %v11068_v45, %v7094_v38  ;;  %11071 = vst [vmem:[#allocation17_spill] sm:$0xff] %v7382_v46  ;;  %v7388_v32 = vmul.f32 %v11073_v62, %v7094_v38  ;;  %v11079_v45 = vsub.f32 %v11078_v30, %v6583_v2  ;;  %v7406_v35 = vmul.f32 %v11082_v23, %v7094_v38  ;;  %v11090_v30 = vld [vmem:[#allocation30_spill] sm:$0xff]  ;;  %v11093_v23 = vld [vmem:[#allocation31_spill] sm:$0xff] }
 0x263   :  { %v7394_v3 = vmul.f32 %v11076_v53, %v7094_v38  ;;  %v11085_v62 = vsub.f32 %v11084_v9, %v6583_v2  ;;  %v11088_v53 = vsub.f32 %v11087_v34, %v6583_v2  ;;  %v11094_v22 = vsub.f32 %v11093_v23, %v6583_v2 }
 0x264   :  { %11074 = vst [vmem:[#allocation18_spill] sm:$0xff] %v7388_v32  ;;  %v7400_v5 = vmul.f32 %v11079_v45, %v7094_v38  ;;  %v11091_v45 = vsub.f32 %v11090_v30, %v6583_v2 }
 0x265   :  { %11077 = vst [vmem:[#allocation19_spill] sm:$0xff] %v7394_v3  ;;  %v7412_v6 = vmul.f32 %v11085_v62, %v7094_v38  ;;  %v7418_v44 = vmul.f32 %v11088_v53, %v7094_v38  ;;  %v7430_v9 = vmul.f32 %v11094_v22, %v7094_v38  ;;  %v11096_v62 = vld [vmem:[#allocation32_spill] sm:$0xff]  ;;  %v11099_v53 = vld [vmem:[#allocation33_spill] sm:$0xff]  ;;  %v11105_v22 = vld [vmem:[#allocation35_spill] sm:$0xff] }
 0x266   :  { %11080 = vst [vmem:[#allocation20_spill] sm:$0xff] %v7400_v5  ;;  %v7424_v11 = vmul.f32 %v11091_v45, %v7094_v38  ;;  %v11097_v52 = vsub.f32 %v11096_v62, %v6583_v2  ;;  %v11100_v42 = vsub.f32 %v11099_v53, %v6583_v2  ;;  %v11102_v45 = vld [vmem:[#allocation34_spill] sm:$0xff]  ;;  %v11106_v23 = vsub.f32 %v11105_v22, %v6583_v2  ;;  %v11117_v22 = vld [vmem:[#allocation41_spill] sm:$0xff] }
 0x267   :  { %11083 = vst [vmem:[#allocation21_spill] sm:$0xff] %v7406_v35  ;;  %v11103_v33 = vsub.f32 %v11102_v45, %v6583_v2  ;;  %v7532_v35 = vperm.slane %v3281_v54, 5 }
 0x268   :  { %11086 = vst [vmem:[#allocation24_spill] sm:$0xff] %v7412_v6  ;;  %v7436_v34 = vmul.f32 %v11097_v52, %v7094_v38  ;;  %v7442_v30 = vmul.f32 %v11100_v42, %v7094_v38  ;;  %v7454_v40 = vmul.f32 %v11106_v23, %v7094_v38  ;;  %v11108_v52 = vld [vmem:[#allocation37_spill] sm:$0xff]  ;;  %v11111_v42 = vld [vmem:[#allocation39_spill] sm:$0xff]  ;;  %v11118_v23 = vsub.f32 %v11117_v22, %v6583_v2  ;;  %v11129_v22 = vld [vmem:[#allocation44_spill] sm:$0xff] }
 0x269   :  { %11089 = vst [vmem:[#allocation25_spill] sm:$0xff] %v7418_v44  ;;  %v7448_v7 = vmul.f32 %v11103_v33, %v7094_v38  ;;  %v11109_v62 = vsub.f32 %v11108_v52, %v6583_v2  ;;  %v11112_v53 = vsub.f32 %v11111_v42, %v6583_v2  ;;  %v11114_v33 = vld [vmem:[#allocation40_spill] sm:$0xff]  ;;  %v7480_v52 = vperm.slane %v3281_v54, 0  ;;  %v11123_v42 = vld [vmem:[#allocation42_spill] sm:$0xff]  ;;  %v11133_v44 = vld [vmem:[#allocation45_spill] sm:$0xff] }
 0x26a   :  { %11092 = vst [vmem:[#allocation26_spill] sm:$0xff] %v7424_v11  ;;  %v11115_v45 = vsub.f32 %v11114_v33, %v6583_v2  ;;  %v11126_v33 = vld [vmem:[#allocation43_spill] sm:$0xff]  ;;  %v3937_v11 = vld [vmem:[#allocation7] sm:$0xff]  ;;  %v11143_v6 = vld [vmem:[#allocation49_spill] sm:$0xff] }
 0x26b   :  { %11095 = vst [vmem:[#allocation27_spill] sm:$0xff] %v7430_v9  ;;  %v7504_v9 = vperm.slane %v3281_v54, 3  ;;  %v7574_v3 = vperm.slane %v3937_v11, 6 }
 0x26c   :  { %11098 = vst [vmem:[#allocation28_spill] sm:$0xff] %v7436_v34  ;;  %v7460_v34 = vmul.f32 %v11109_v62, %v7094_v38  ;;  %v7482_v62 = vperm.slane %v3281_v54, 1 }
 0x26d   :  { %11101 = vst [vmem:[#allocation29_spill] sm:$0xff] %v7442_v30  ;;  %v7466_v30 = vmul.f32 %v11112_v53, %v7094_v38  ;;  %v11124_v53 = vsub.f32 %v11123_v42, %v6583_v2  ;;  %v11134_v42 = vsub.f32 %v11133_v44, %v6583_v2  ;;  %v11144_v44 = vsub.f32 %v11143_v6, %v6583_v2 }
 0x26e   :  { %11104 = vst [vmem:[#allocation30_spill] sm:$0xff] %v7448_v7  ;;  %v7472_v7 = vmul.f32 %v11115_v45, %v7094_v38  ;;  %v11127_v45 = vsub.f32 %v11126_v33, %v6583_v2  ;;  %v7548_v6 = vperm.slane %v3937_v11, 1 }
 0x26f   :  { %11107 = vst [vmem:[#allocation31_spill] sm:$0xff] %v7454_v40  ;;  %v7478_v40 = vmul.f32 %v11118_v23, %v7094_v38  ;;  %v11130_v23 = vsub.f32 %v11129_v22, %v6583_v2 }
 0x270   :  { %11110 = vst [vmem:[#allocation32_spill] sm:$0xff] %v7460_v34  ;;  %v7484_v34 = vperm.slane %v3281_v54, 2 }
 0x271   :  { %11113 = vst [vmem:[#allocation33_spill] sm:$0xff] %v7466_v30  ;;  %v7490_v30 = vmul.f32 %v11124_v53, %v7094_v38  ;;  %v7510_v53 = vmul.f32 %v11134_v42, %v7094_v38  ;;  %v7530_v42 = vmul.f32 %v11144_v44, %v7094_v38 }
 0x272   :  { %11116 = vst [vmem:[#allocation34_spill] sm:$0xff] %v7472_v7  ;;  %v7496_v7 = vmul.f32 %v11127_v45, %v7094_v38 }
 0x273   :  { %11119 = vst [vmem:[#allocation35_spill] sm:$0xff] %v7478_v40  ;;  %v7502_v40 = vmul.f32 %v11130_v23, %v7094_v38 }
 0x274   :  { %11120 = vst [vmem:[#allocation37_spill] sm:$0xff] %v7480_v52 }
 0x275   :  { %11121 = vst [vmem:[#allocation39_spill] sm:$0xff] %v7482_v62 }
 0x276   :  { %11122 = vst [vmem:[#allocation40_spill] sm:$0xff] %v7484_v34 }
 0x277   :  { %11125 = vst [vmem:[#allocation41_spill] sm:$0xff] %v7490_v30  ;;  %v11136_v30 = vld [vmem:[#allocation46_spill] sm:$0xff] }
 0x278   :  { %11128 = vst [vmem:[#allocation42_spill] sm:$0xff] %v7496_v7  ;;  %v11137_v33 = vsub.f32 %v11136_v30, %v6583_v2  ;;  %v11139_v7 = vld [vmem:[#allocation47_spill] sm:$0xff]  ;;  %v7534_v30 = vperm.slane %v3281_v54, 6 }
 0x279   :  { %11131 = vst [vmem:[#allocation43_spill] sm:$0xff] %v7502_v40  ;;  %v11140_v22 = vsub.f32 %v11139_v7, %v6583_v2  ;;  %v7524_v40 = vperm.slane %v3281_v54, 4  ;;  %v3425_v7 = vmul.f32 %v7480_v52, %v7138_v8  ;;  %v3428_v2 = vmul.f32 %v7504_v9, %v7156_v37 }
 0x27a   :  { %11132 = vst [vmem:[#allocation44_spill] sm:$0xff] %v7504_v9  ;;  %v7516_v45 = vmul.f32 %v11137_v33, %v7094_v38  ;;  %v7536_v33 = vperm.slane %v3281_v54, 7  ;;  %v7552_v54 = vperm.slane %v3937_v11, 3  ;;  %v3430_v37 = vmul.f32 %v7532_v35, %v7168_v12  ;;  %v3938_v9 = vld [vmem:[#allocation7 + $0x8] sm:$0xff] }
 0x27b   :  { %11135 = vst [vmem:[#allocation45_spill] sm:$0xff] %v7510_v53  ;;  %v7522_v23 = vmul.f32 %v11140_v22, %v7094_v38  ;;  %v3282_v53 = vld [vmem:[#allocation5 + $0x8] sm:$0xff]  ;;  %v3426_v22 = vmul.f32 %v7482_v62, %v7144_v48  ;;  %v7550_v38 = vperm.slane %v3937_v11, 2  ;;  %v3429_v48 = vmul.f32 %v7524_v40, %v7162_v50 }
 0x27c   :  { %11138 = vst [vmem:[#allocation46_spill] sm:$0xff] %v7516_v45  ;;  %v7544_v45 = vperm.slane %v3937_v11, 0  ;;  %v7554_v44 = vperm.slane %v3282_v53, 0  ;;  %v7556_v8 = vperm.slane %v3282_v53, 1  ;;  %v7560_v62 = vperm.slane %v3937_v11, 4 }
 0x27d   :  { %11141 = vst [vmem:[#allocation47_spill] sm:$0xff] %v7522_v23  ;;  %v3427_v23 = vmul.f32 %v7484_v34, %v7150_v21  ;;  %v7562_v21 = vperm.slane %v3282_v53, 2  ;;  %v7564_v34 = vperm.slane %v3282_v53, 3  ;;  %v7568_v52 = vperm.slane %v3937_v11, 5 }
 0x27e   :  { %11142 = vst [vmem:[#allocation103_spill] sm:$0xff] %v7524_v40  ;;  %v3432_v5 = vmul.f32 %v7536_v33, %v7180_v19  ;;  %v4081_v50 = vadd.f32 %v7544_v45, %v3425_v7  ;;  %v7577_v40 = vperm.slane %v3937_v11, 7  ;;  %v4082_v32 = vadd.f32 %v7548_v6, %v3426_v22 }
 0x27f   :  { %11145 = vst [vmem:[#allocation49_spill] sm:$0xff] %v7530_v42  ;;  %v3431_v42 = vmul.f32 %v7534_v30, %v7174_v16  ;;  %v4083_v46 = vadd.f32 %v7550_v38, %v3427_v23  ;;  %v4084_v12 = vadd.f32 %v7552_v54, %v3428_v2  ;;  %v3433_v16 = vmul.f32 %v7554_v44, %v7188_v60 }
 0x280   :  { %11146 = vst [vmem:[#allocation104_spill] sm:$0xff] %v7532_v35  ;;  %v7582_v35 = vperm.slane %v3282_v53, 4  ;;  %v4085_v19 = vadd.f32 %v7560_v62, %v3429_v48  ;;  %v7589_v7 = vperm.slane %v3282_v53, 5  ;;  %v3434_v11 = vmul.f32 %v7556_v8, %v7194_v4 }
 0x281   :  { %11147 = vst [vmem:[#allocation105_spill] sm:$0xff] %v7534_v30  ;;  %v7586_v30 = vperm.slane %v3938_v9, 0  ;;  %v7593_v22 = vperm.slane %v3938_v9, 1  ;;  %v4086_v23 = vadd.f32 %v7568_v52, %v3430_v37  ;;  %v7596_v2 = vperm.slane %v3282_v53, 6 }
 0x282   :  { %11148 = vst [vmem:[#allocation106_spill] sm:$0xff] %v7536_v33  ;;  %v3283_v33 = vld [vmem:[#allocation5 + $0x10] sm:$0xff]  ;;  %v3435_v60 = vmul.f32 %v7562_v21, %v7200_v58  ;;  %v4087_v48 = vadd.f32 %v7574_v3, %v3431_v42  ;;  %v3436_v4 = vmul.f32 %v7564_v34, %v7206_v57  ;;  %v4088_v37 = vadd.f32 %v7577_v40, %v3432_v5 }
 0x283   :  { %11149 = vst [vmem:[#allocation107_spill] sm:$0xff] %v7544_v45  ;;  %v3437_v58 = vmul.f32 %v7582_v35, %v7214_v63  ;;  %v4089_v42 = vadd.f32 %v7586_v30, %v3433_v16  ;;  %v3438_v57 = vmul.f32 %v7589_v7, %v7220_v25  ;;  %v4090_v5 = vadd.f32 %v7593_v22, %v3434_v11 }
 0x284   :  { %11150 = vst [vmem:[#allocation108_spill] sm:$0xff] %v7548_v6  ;;  %v3439_v63 = vmul.f32 %v7596_v2, %v7226_v15 }
 0x285   :  { %11151 = vst [vmem:[#allocation109_spill] sm:$0xff] %v7550_v38 }
 0x286   :  { %11152 = vst [vmem:[#allocation110_spill] sm:$0xff] %v7552_v54 }
 0x287   :  { %11153 = vst [vmem:[#allocation111_spill] sm:$0xff] %v7554_v44  ;;  %v7600_v44 = vperm.slane %v3938_v9, 2 }
 0x288   :  { %11154 = vst [vmem:[#allocation112_spill] sm:$0xff] %v7556_v8  ;;  %v7607_v8 = vperm.slane %v3938_v9, 3 }
 0x289   :  { %11155 = vst [vmem:[#allocation113_spill] sm:$0xff] %v7560_v62  ;;  %v4091_v16 = vadd.f32 %v7600_v44, %v3435_v60 }
 0x28a   :  { %11156 = vst [vmem:[#allocation114_spill] sm:$0xff] %v7562_v21  ;;  %v7614_v21 = vperm.slane %v3938_v9, 4  ;;  %v4092_v11 = vadd.f32 %v7607_v8, %v3436_v4 }
 0x28b   :  { %11157 = vst [vmem:[#allocation115_spill] sm:$0xff] %v7564_v34  ;;  %v7621_v34 = vperm.slane %v3938_v9, 5 }
 0x28c   :  { %11158 = vst [vmem:[#allocation116_spill] sm:$0xff] %v7568_v52  ;;  %v4093_v60 = vadd.f32 %v7614_v21, %v3437_v58 }
 0x28d   :  { %11159 = vst [vmem:[#allocation117_spill] sm:$0xff] %v7574_v3  ;;  %v4094_v4 = vadd.f32 %v7621_v34, %v3438_v57 }
 0x28e   :  { %11160 = vst [vmem:[#allocation118_spill] sm:$0xff] %v7577_v40 }
 0x28f   :  { %11161 = vst [vmem:[#allocation119_spill] sm:$0xff] %v7582_v35  ;;  %v7628_v35 = vperm.slane %v3938_v9, 6 }
 0x290   :  { %11162 = vst [vmem:[#allocation120_spill] sm:$0xff] %v7586_v30 }
 0x291   :  { %4593 = vst [vmem:[#allocation8] sm:$0xff] %v4081_v50  ;;  %v7603_v50 = vperm.slane %v3282_v53, 7  ;;  %v3939_v53 = vld [vmem:[#allocation7 + $0x10] sm:$0xff]  ;;  %v4095_v58 = vadd.f32 %v7628_v35, %v3439_v63 }
 0x292   :  { %11163 = vst [vmem:[#allocation121_spill] sm:$0xff] %v7589_v7  ;;  %v7635_v7 = vperm.slane %v3938_v9, 7  ;;  %v7649_v9 = vperm.slane %v3939_v53, 1 }
 0x293   :  { %11164 = vst [vmem:[#allocation122_spill] sm:$0xff] %v7593_v22  ;;  %v3440_v25 = vmul.f32 %v7603_v50, %v7232_v49 }
 0x294   :  { %4594 = vst [vmem:[#allocation8 + $0x8] sm:$0xff] %v4082_v32  ;;  %v7610_v32 = vperm.slane %v3283_v33, 0 }
 0x295   :  { %11165 = vst [vmem:[#allocation123_spill] sm:$0xff] %v7596_v2  ;;  %v7642_v2 = vperm.slane %v3939_v53, 0  ;;  %v4096_v57 = vadd.f32 %v7635_v7, %v3440_v25 }
 0x296   :  { %11166 = vst [vmem:[#allocation124_spill] sm:$0xff] %v7600_v44  ;;  %v3441_v15 = vmul.f32 %v7610_v32, %v7238_v29  ;;  %v7645_v44 = vperm.slane %v3283_v33, 5 }
 0x297   :  { %4595 = vst [vmem:[#allocation8 + $0x10] sm:$0xff] %v4083_v46  ;;  %v7617_v46 = vperm.slane %v3283_v33, 1 }
 0x298   :  { %11167 = vst [vmem:[#allocation125_spill] sm:$0xff] %v7603_v50  ;;  %v4097_v63 = vadd.f32 %v7642_v2, %v3441_v15 }
 0x299   :  { %11168 = vst [vmem:[#allocation126_spill] sm:$0xff] %v7607_v8  ;;  %v3442_v49 = vmul.f32 %v7617_v46, %v7244_v1 }
 0x29a   :  { %4596 = vst [vmem:[#allocation8 + $0x18] sm:$0xff] %v4084_v12  ;;  %v7624_v12 = vperm.slane %v3283_v33, 2 }
 0x29b   :  { %11169 = vst [vmem:[#allocation127_spill] sm:$0xff] %v7610_v32  ;;  %v7656_v32 = vperm.slane %v3939_v53, 2  ;;  %v4098_v25 = vadd.f32 %v7649_v9, %v3442_v49 }
 0x29c   :  { %11170 = vst [vmem:[#allocation128_spill] sm:$0xff] %v7614_v21  ;;  %v3443_v29 = vmul.f32 %v7624_v12, %v7250_v24 }
 0x29d   :  { %4597 = vst [vmem:[#allocation8 + $0x20] sm:$0xff] %v4085_v19  ;;  %v7631_v19 = vperm.slane %v3283_v33, 3 }
 0x29e   :  { %11171 = vst [vmem:[#allocation129_spill] sm:$0xff] %v7617_v46  ;;  %v7663_v46 = vperm.slane %v3939_v53, 3  ;;  %v4099_v15 = vadd.f32 %v7656_v32, %v3443_v29 }
 0x29f   :  { %11172 = vst [vmem:[#allocation130_spill] sm:$0xff] %v7621_v34  ;;  %v3444_v1 = vmul.f32 %v7631_v19, %v7256_v18  ;;  %v3446_v18 = vmul.f32 %v7645_v44, %v7268_v17 }
 0x2a0   :  { %4598 = vst [vmem:[#allocation8 + $0x28] sm:$0xff] %v4086_v23  ;;  %v7638_v23 = vperm.slane %v3283_v33, 4 }
 0x2a1   :  { %11173 = vst [vmem:[#allocation131_spill] sm:$0xff] %v7624_v12  ;;  %v7670_v12 = vperm.slane %v3939_v53, 4  ;;  %v4100_v49 = vadd.f32 %v7663_v46, %v3444_v1 }
 0x2a2   :  { %11174 = vst [vmem:[#allocation132_spill] sm:$0xff] %v7628_v35  ;;  %v3445_v24 = vmul.f32 %v7638_v23, %v7262_v39 }
 0x2a3   :  { %4599 = vst [vmem:[#allocation8 + $0x30] sm:$0xff] %v4087_v48  ;;  %v3284_v48 = vld [vmem:[#allocation5 + $0x18] sm:$0xff] }
 0x2a4   :  { %11175 = vst [vmem:[#allocation133_spill] sm:$0xff] %v7631_v19  ;;  %v7677_v19 = vperm.slane %v3939_v53, 5  ;;  %v4101_v29 = vadd.f32 %v7670_v12, %v3445_v24 }
 0x2a5   :  { %11176 = vst [vmem:[#allocation134_spill] sm:$0xff] %v7635_v7 }
 0x2a6   :  { %4600 = vst [vmem:[#allocation8 + $0x38] sm:$0xff] %v4088_v37  ;;  %v7652_v37 = vperm.slane %v3283_v33, 6  ;;  %v4102_v1 = vadd.f32 %v7677_v19, %v3446_v18 }
 0x2a7   :  { %11177 = vst [vmem:[#allocation135_spill] sm:$0xff] %v7638_v23  ;;  %v7684_v23 = vperm.slane %v3939_v53, 6 }
 0x2a8   :  { %11178 = vst [vmem:[#allocation136_spill] sm:$0xff] %v7642_v2  ;;  %v3447_v39 = vmul.f32 %v7652_v37, %v7274_v41 }
 0x2a9   :  { %4601 = vst [vmem:[#allocation8 + $0x40] sm:$0xff] %v4089_v42  ;;  %v7659_v42 = vperm.slane %v3283_v33, 7  ;;  %v7673_v33 = vperm.slane %v3284_v48, 1 }
 0x2aa   :  { %11179 = vst [vmem:[#allocation137_spill] sm:$0xff] %v7645_v44  ;;  %v7691_v44 = vperm.slane %v3939_v53, 7  ;;  %v4103_v24 = vadd.f32 %v7684_v23, %v3447_v39 }
 0x2ab   :  { %11180 = vst [vmem:[#allocation138_spill] sm:$0xff] %v7649_v9  ;;  %v3448_v17 = vmul.f32 %v7659_v42, %v7280_v59  ;;  %v3450_v59 = vmul.f32 %v7673_v33, %v7292_v43 }
 0x2ac   :  { %4602 = vst [vmem:[#allocation8 + $0x48] sm:$0xff] %v4090_v5  ;;  %v7666_v5 = vperm.slane %v3284_v48, 0 }
 0x2ad   :  { %11181 = vst [vmem:[#allocation139_spill] sm:$0xff] %v7652_v37  ;;  %v4104_v18 = vadd.f32 %v7691_v44, %v3448_v17 }
 0x2ae   :  { %11182 = vst [vmem:[#allocation140_spill] sm:$0xff] %v7656_v32  ;;  %v3449_v41 = vmul.f32 %v7666_v5, %v7286_v51  ;;  %v7701_v32 = vperm.slane %v3284_v48, 5 }
 0x2af   :  { %4603 = vst [vmem:[#allocation8 + $0x50] sm:$0xff] %v4091_v16  ;;  %v3940_v16 = vld [vmem:[#allocation7 + $0x18] sm:$0xff] }
 0x2b0   :  { %11183 = vst [vmem:[#allocation141_spill] sm:$0xff] %v7659_v42  ;;  %v7698_v37 = vperm.slane %v3940_v16, 0  ;;  %v7705_v53 = vperm.slane %v3940_v16, 1 }
 0x2b1   :  { %11184 = vst [vmem:[#allocation142_spill] sm:$0xff] %v7663_v46 }
 0x2b2   :  { %4604 = vst [vmem:[#allocation8 + $0x58] sm:$0xff] %v4092_v11  ;;  %v7680_v11 = vperm.slane %v3284_v48, 2  ;;  %v4105_v39 = vadd.f32 %v7698_v37, %v3449_v41  ;;  %v4106_v17 = vadd.f32 %v7705_v53, %v3450_v59 }
 0x2b3   :  { %11185 = vst [vmem:[#allocation143_spill] sm:$0xff] %v7666_v5  ;;  %v7712_v5 = vperm.slane %v3940_v16, 2 }
 0x2b4   :  { %11186 = vst [vmem:[#allocation144_spill] sm:$0xff] %v7670_v12  ;;  %v3451_v51 = vmul.f32 %v7680_v11, %v7298_v13 }
 0x2b5   :  { %4605 = vst [vmem:[#allocation8 + $0x60] sm:$0xff] %v4093_v60  ;;  %v7687_v60 = vperm.slane %v3284_v48, 3 }
 0x2b6   :  { %11187 = vst [vmem:[#allocation145_spill] sm:$0xff] %v7673_v33  ;;  %v7719_v33 = vperm.slane %v3940_v16, 3  ;;  %v4107_v41 = vadd.f32 %v7712_v5, %v3451_v51 }
 0x2b7   :  { %11188 = vst [vmem:[#allocation146_spill] sm:$0xff] %v7677_v19  ;;  %v3452_v43 = vmul.f32 %v7687_v60, %v7304_v27  ;;  %v3454_v27 = vmul.f32 %v7701_v32, %v7316_v36 }
 0x2b8   :  { %4606 = vst [vmem:[#allocation8 + $0x68] sm:$0xff] %v4094_v4  ;;  %v7694_v4 = vperm.slane %v3284_v48, 4 }
 0x2b9   :  { %11189 = vst [vmem:[#allocation147_spill] sm:$0xff] %v7680_v11  ;;  %v7726_v11 = vperm.slane %v3940_v16, 4  ;;  %v4108_v59 = vadd.f32 %v7719_v33, %v3452_v43 }
 0x2ba   :  { %11190 = vst [vmem:[#allocation148_spill] sm:$0xff] %v7684_v23  ;;  %v3453_v13 = vmul.f32 %v7694_v4, %v7310_v61 }
 0x2bb   :  { %4607 = vst [vmem:[#allocation8 + $0x70] sm:$0xff] %v4095_v58  ;;  %v3285_v58 = vld [vmem:[#allocation5 + $0x20] sm:$0xff] }
 0x2bc   :  { %11191 = vst [vmem:[#allocation149_spill] sm:$0xff] %v7687_v60  ;;  %v7733_v60 = vperm.slane %v3940_v16, 5  ;;  %v4109_v51 = vadd.f32 %v7726_v11, %v3453_v13 }
 0x2bd   :  { %11192 = vst [vmem:[#allocation150_spill] sm:$0xff] %v7691_v44 }
 0x2be   :  { %4608 = vst [vmem:[#allocation8 + $0x78] sm:$0xff] %v4096_v57  ;;  %v7708_v57 = vperm.slane %v3284_v48, 6  ;;  %v4110_v43 = vadd.f32 %v7733_v60, %v3454_v27 }
 0x2bf   :  { %11193 = vst [vmem:[#allocation151_spill] sm:$0xff] %v7694_v4  ;;  %v7740_v4 = vperm.slane %v3940_v16, 6 }
 0x2c0   :  { %11194 = vst [vmem:[#allocation152_spill] sm:$0xff] %v7698_v37  ;;  %v3455_v61 = vmul.f32 %v7708_v57, %v7322_v20 }
 0x2c1   :  { %4609 = vst [vmem:[#allocation8 + $0x80] sm:$0xff] %v4097_v63  ;;  %v7715_v63 = vperm.slane %v3284_v48, 7  ;;  %v7729_v48 = vperm.slane %v3285_v58, 1 }
 0x2c2   :  { %11195 = vst [vmem:[#allocation153_spill] sm:$0xff] %v7701_v32  ;;  %v7747_v32 = vperm.slane %v3940_v16, 7  ;;  %v4111_v13 = vadd.f32 %v7740_v4, %v3455_v61 }
 0x2c3   :  { %11196 = vst [vmem:[#allocation154_spill] sm:$0xff] %v7705_v53  ;;  %v3456_v36 = vmul.f32 %v7715_v63, %v7328_v28  ;;  %v3458_v28 = vmul.f32 %v7729_v48, %v7340_v31 }
 0x2c4   :  { %4610 = vst [vmem:[#allocation8 + $0x88] sm:$0xff] %v4098_v25  ;;  %v7722_v25 = vperm.slane %v3285_v58, 0 }
 0x2c5   :  { %11197 = vst [vmem:[#allocation155_spill] sm:$0xff] %v7708_v57  ;;  %v4112_v27 = vadd.f32 %v7747_v32, %v3456_v36 }
 0x2c6   :  { %11198 = vst [vmem:[#allocation156_spill] sm:$0xff] %v7712_v5  ;;  %v3457_v20 = vmul.f32 %v7722_v25, %v7334_v14  ;;  %v7757_v5 = vperm.slane %v3285_v58, 5 }
 0x2c7   :  { %4611 = vst [vmem:[#allocation8 + $0x90] sm:$0xff] %v4099_v15  ;;  %v3941_v15 = vld [vmem:[#allocation7 + $0x20] sm:$0xff] }
 0x2c8   :  { %11199 = vst [vmem:[#allocation157_spill] sm:$0xff] %v7715_v63  ;;  %v7754_v57 = vperm.slane %v3941_v15, 0  ;;  %v7761_v16 = vperm.slane %v3941_v15, 1 }
 0x2c9   :  { %11200 = vst [vmem:[#allocation158_spill] sm:$0xff] %v7719_v33  ;;  %v11315_v33 = vld [vmem:[#allocation68_spill] sm:$0xff] }
 0x2ca   :  { %4612 = vst [vmem:[#allocation8 + $0x98] sm:$0xff] %v4100_v49  ;;  %v7736_v49 = vperm.slane %v3285_v58, 2  ;;  %v4113_v61 = vadd.f32 %v7754_v57, %v3457_v20  ;;  %v4114_v36 = vadd.f32 %v7761_v16, %v3458_v28  ;;  %vm2214_vm9 = vweird.f32 %v11315_v33 }
 0x2cb   :  { %11201 = vst [vmem:[#allocation159_spill] sm:$0xff] %v7722_v25  ;;  %v7768_v25 = vperm.slane %v3941_v15, 2 }
 0x2cc   :  { %11202 = vst [vmem:[#allocation160_spill] sm:$0xff] %v7726_v11  ;;  %v3459_v14 = vmul.f32 %v7736_v49, %v7346_v0 }
 0x2cd   :  { %4613 = vst [vmem:[#allocation8 + $0xa0] sm:$0xff] %v4101_v29  ;;  %v7743_v29 = vperm.slane %v3285_v58, 3 }
 0x2ce   :  { %11203 = vst [vmem:[#allocation161_spill] sm:$0xff] %v7729_v48  ;;  %v7775_v48 = vperm.slane %v3941_v15, 3  ;;  %v4115_v20 = vadd.f32 %v7768_v25, %v3459_v14 }
 0x2cf   :  { %11204 = vst [vmem:[#allocation162_spill] sm:$0xff] %v7733_v60  ;;  %v3460_v31 = vmul.f32 %v7743_v29, %v7352_v55  ;;  %v3462_v55 = vmul.f32 %v7757_v5, %v7364_v56 }
 0x2d0   :  { %4614 = vst [vmem:[#allocation8 + $0xa8] sm:$0xff] %v4102_v1  ;;  %v7750_v1 = vperm.slane %v3285_v58, 4 }
 0x2d1   :  { %11205 = vst [vmem:[#allocation163_spill] sm:$0xff] %v7736_v49  ;;  %v7782_v49 = vperm.slane %v3941_v15, 4  ;;  %v4116_v28 = vadd.f32 %v7775_v48, %v3460_v31 }
 0x2d2   :  { %11206 = vst [vmem:[#allocation164_spill] sm:$0xff] %v7740_v4  ;;  %v3461_v0 = vmul.f32 %v7750_v1, %v7358_v10  ;;  %v11308_v4 = vld [vmem:[#allocation37_spill] sm:$0xff] }
 0x2d3   :  { %4615 = vst [vmem:[#allocation8 + $0xb0] sm:$0xff] %v4103_v24  ;;  %v3286_v24 = vld [vmem:[#allocation5 + $0x28] sm:$0xff] }
 0x2d4   :  { %11207 = vst [vmem:[#allocation165_spill] sm:$0xff] %v7743_v29  ;;  %v7789_v29 = vperm.slane %v3941_v15, 5  ;;  %v4117_v14 = vadd.f32 %v7782_v49, %v3461_v0 }
 0x2d5   :  { %11208 = vst [vmem:[#allocation166_spill] sm:$0xff] %v7747_v32 }
 0x2d6   :  { %4616 = vst [vmem:[#allocation8 + $0xb8] sm:$0xff] %v4104_v18  ;;  %v7764_v18 = vperm.slane %v3285_v58, 6  ;;  %v4118_v31 = vadd.f32 %v7789_v29, %v3462_v55 }
 0x2d7   :  { %11209 = vst [vmem:[#allocation167_spill] sm:$0xff] %v7750_v1  ;;  %v7796_v1 = vperm.slane %v3941_v15, 6 }
 0x2d8   :  { %11210 = vst [vmem:[#allocation168_spill] sm:$0xff] %v7754_v57  ;;  %v3463_v10 = vmul.f32 %v7764_v18, %v7370_v26  ;;  %v11229_v57 = vld [vmem:[#allocation18_spill] sm:$0xff] }
 0x2d9   :  { %4617 = vst [vmem:[#allocation8 + $0xc0] sm:$0xff] %v4105_v39  ;;  %v7771_v39 = vperm.slane %v3285_v58, 7  ;;  %v7785_v58 = vperm.slane %v3286_v24, 1 }
 0x2da   :  { %11211 = vst [vmem:[#allocation169_spill] sm:$0xff] %v7757_v5  ;;  %v7803_v5 = vperm.slane %v3941_v15, 7  ;;  %v4119_v0 = vadd.f32 %v7796_v1, %v3463_v10 }
 0x2db   :  { %11212 = vst [vmem:[#allocation170_spill] sm:$0xff] %v7761_v16  ;;  %v3464_v56 = vmul.f32 %v7771_v39, %v7376_v47  ;;  %v11226_v16 = vld [vmem:[#allocation17_spill] sm:$0xff]  ;;  %v3466_v47 = vmul.f32 %v7785_v58, %v11229_v57 }
 0x2dc   :  { %4618 = vst [vmem:[#allocation8 + $0xc8] sm:$0xff] %v4106_v17  ;;  %v7778_v17 = vperm.slane %v3286_v24, 0 }
 0x2dd   :  { %11213 = vst [vmem:[#allocation171_spill] sm:$0xff] %v7764_v18  ;;  %v4120_v55 = vadd.f32 %v7803_v5, %v3464_v56 }
 0x2de   :  { %11214 = vst [vmem:[#allocation172_spill] sm:$0xff] %v7768_v25  ;;  %v3465_v26 = vmul.f32 %v7778_v17, %v11226_v16  ;;  %v7813_v25 = vperm.slane %v3286_v24, 5 }
 0x2df   :  { %4619 = vst [vmem:[#allocation8 + $0xd0] sm:$0xff] %v4107_v41  ;;  %v3942_v41 = vld [vmem:[#allocation7 + $0x28] sm:$0xff] }
 0x2e0   :  { %11215 = vst [vmem:[#allocation173_spill] sm:$0xff] %v7771_v39  ;;  %v7810_v18 = vperm.slane %v3942_v41, 0  ;;  %v7817_v15 = vperm.slane %v3942_v41, 1  ;;  %v11253_v39 = vld [vmem:[#allocation28_spill] sm:$0xff] }
 0x2e1   :  { %11216 = vst [vmem:[#allocation174_spill] sm:$0xff] %v7775_v48  ;;  %v11232_v48 = vld [vmem:[#allocation19_spill] sm:$0xff] }
 0x2e2   :  { %4620 = vst [vmem:[#allocation8 + $0xd8] sm:$0xff] %v4108_v59  ;;  %v7792_v59 = vperm.slane %v3286_v24, 2  ;;  %v4121_v10 = vadd.f32 %v7810_v18, %v3465_v26  ;;  %v4122_v56 = vadd.f32 %v7817_v15, %v3466_v47 }
 0x2e3   :  { %11217 = vst [vmem:[#allocation175_spill] sm:$0xff] %v7778_v17  ;;  %v7824_v17 = vperm.slane %v3942_v41, 2 }
 0x2e4   :  { %11218 = vst [vmem:[#allocation176_spill] sm:$0xff] %v7782_v49  ;;  %v3467_v16 = vmul.f32 %v7792_v59, %v11232_v48  ;;  %v11235_v49 = vld [vmem:[#allocation20_spill] sm:$0xff] }
 0x2e5   :  { %4621 = vst [vmem:[#allocation8 + $0xe0] sm:$0xff] %v4109_v51  ;;  %v7799_v51 = vperm.slane %v3286_v24, 3 }
 0x2e6   :  { %11219 = vst [vmem:[#allocation177_spill] sm:$0xff] %v7785_v58  ;;  %v7831_v58 = vperm.slane %v3942_v41, 3  ;;  %v4123_v26 = vadd.f32 %v7824_v17, %v3467_v16 }
 0x2e7   :  { %11220 = vst [vmem:[#allocation178_spill] sm:$0xff] %v7789_v29  ;;  %v3468_v57 = vmul.f32 %v7799_v51, %v11235_v49  ;;  %v11238_v29 = vld [vmem:[#allocation21_spill] sm:$0xff] }
 0x2e8   :  { %4622 = vst [vmem:[#allocation8 + $0xe8] sm:$0xff] %v4110_v43  ;;  %v7806_v43 = vperm.slane %v3286_v24, 4 }
 0x2e9   :  { %11221 = vst [vmem:[#allocation179_spill] sm:$0xff] %v7792_v59  ;;  %v7838_v59 = vperm.slane %v3942_v41, 4  ;;  %v4124_v47 = vadd.f32 %v7831_v58, %v3468_v57 }
 0x2ea   :  { %11222 = vst [vmem:[#allocation180_spill] sm:$0xff] %v7796_v1  ;;  %v3469_v48 = vmul.f32 %v7806_v43, %v11238_v29  ;;  %v7845_v1 = vperm.slane %v3942_v41, 5 }
 0x2eb   :  { %4623 = vst [vmem:[#allocation8 + $0xf0] sm:$0xff] %v4111_v13  ;;  %v3287_v13 = vld [vmem:[#allocation5 + $0x30] sm:$0xff] }
 0x2ec   :  { %11223 = vst [vmem:[#allocation181_spill] sm:$0xff] %v7799_v51  ;;  %v3943_v51 = vld [vmem:[#allocation7 + $0x30] sm:$0xff]  ;;  %v4125_v16 = vadd.f32 %v7838_v59, %v3469_v48 }
 0x2ed   :  { %11224 = vst [vmem:[#allocation182_spill] sm:$0xff] %v7803_v5  ;;  %v11244_v5 = vld [vmem:[#allocation25_spill] sm:$0xff] }
 0x2ee   :  { %4624 = vst [vmem:[#allocation8 + $0xf8] sm:$0xff] %v4112_v27  ;;  %v7820_v27 = vperm.slane %v3286_v24, 6 }
 0x2ef   :  { %11225 = vst [vmem:[#allocation183_spill] sm:$0xff] %v7806_v43  ;;  %v7852_v43 = vperm.slane %v3942_v41, 6 }
 0x2f0   :  { %11227 = vst [vmem:[#allocation17_spill] sm:$0xff] %v7810_v18  ;;  %v3471_v29 = vmul.f32 %v7820_v27, %v11244_v5  ;;  %v11247_v18 = vld [vmem:[#allocation26_spill] sm:$0xff] }
 0x2f1   :  { %4625 = vst [vmem:[#allocation8 + $0x100] sm:$0xff] %v4113_v61  ;;  %v7827_v61 = vperm.slane %v3286_v24, 7  ;;  %v7841_v24 = vperm.slane %v3287_v13, 1 }
 0x2f2   :  { %11228 = vst [vmem:[#allocation184_spill] sm:$0xff] %v7813_v25  ;;  %v4127_v48 = vadd.f32 %v7852_v43, %v3471_v29 }
 0x2f3   :  { %11230 = vst [vmem:[#allocation18_spill] sm:$0xff] %v7817_v15  ;;  %v11250_v15 = vld [vmem:[#allocation27_spill] sm:$0xff] }
 0x2f4   :  { %4626 = vst [vmem:[#allocation8 + $0x108] sm:$0xff] %v4114_v36  ;;  %v7834_v36 = vperm.slane %v3287_v13, 0 }
 0x2f5   :  { %11231 = vst [vmem:[#allocation185_spill] sm:$0xff] %v7820_v27  ;;  %v7866_v27 = vperm.slane %v3943_v51, 0 }
 0x2f6   :  { %11233 = vst [vmem:[#allocation19_spill] sm:$0xff] %v7824_v17  ;;  %v3473_v5 = vmul.f32 %v7834_v36, %v11250_v15  ;;  %v7869_v17 = vperm.slane %v3287_v13, 5 }
 0x2f7   :  { %4627 = vst [vmem:[#allocation8 + $0x110] sm:$0xff] %v4115_v20  ;;  %v11241_v20 = vld [vmem:[#allocation24_spill] sm:$0xff] }
 0x2f8   :  { %11234 = vst [vmem:[#allocation186_spill] sm:$0xff] %v7827_v61  ;;  %v3470_v49 = vmul.f32 %v7813_v25, %v11241_v20  ;;  %v3472_v20 = vmul.f32 %v7827_v61, %v11247_v18  ;;  %v7859_v25 = vperm.slane %v3942_v41, 7  ;;  %v3474_v18 = vmul.f32 %v7841_v24, %v11253_v39 }
 0x2f9   :  { %11236 = vst [vmem:[#allocation20_spill] sm:$0xff] %v7831_v58  ;;  %v7873_v41 = vperm.slane %v3943_v51, 1  ;;  %v11256_v58 = vld [vmem:[#allocation29_spill] sm:$0xff]  ;;  %v4129_v29 = vadd.f32 %v7866_v27, %v3473_v5 }
 0x2fa   :  { %4628 = vst [vmem:[#allocation8 + $0x118] sm:$0xff] %v4116_v28  ;;  %v7848_v28 = vperm.slane %v3287_v13, 2  ;;  %v4126_v57 = vadd.f32 %v7845_v1, %v3470_v49  ;;  %v4128_v49 = vadd.f32 %v7859_v25, %v3472_v20 }
 0x2fb   :  { %11237 = vst [vmem:[#allocation187_spill] sm:$0xff] %v7834_v36  ;;  %v7880_v36 = vperm.slane %v3943_v51, 2  ;;  %v4130_v20 = vadd.f32 %v7873_v41, %v3474_v18 }
 0x2fc   :  { %11239 = vst [vmem:[#allocation21_spill] sm:$0xff] %v7838_v59  ;;  %v3475_v15 = vmul.f32 %v7848_v28, %v11256_v58  ;;  %v11259_v59 = vld [vmem:[#allocation30_spill] sm:$0xff] }
 0x2fd   :  { %4629 = vst [vmem:[#allocation8 + $0x120] sm:$0xff] %v4117_v14  ;;  %v7855_v14 = vperm.slane %v3287_v13, 3 }
 0x2fe   :  { %11240 = vst [vmem:[#allocation188_spill] sm:$0xff] %v7841_v24  ;;  %v7887_v24 = vperm.slane %v3943_v51, 3  ;;  %v4131_v5 = vadd.f32 %v7880_v36, %v3475_v15 }
 0x2ff   :  { %11242 = vst [vmem:[#allocation24_spill] sm:$0xff] %v7845_v1  ;;  %v3476_v39 = vmul.f32 %v7855_v14, %v11259_v59  ;;  %v11262_v1 = vld [vmem:[#allocation31_spill] sm:$0xff] }
 0x300   :  { %4630 = vst [vmem:[#allocation8 + $0x128] sm:$0xff] %v4118_v31  ;;  %v7862_v31 = vperm.slane %v3287_v13, 4 }
 0x301   :  { %11243 = vst [vmem:[#allocation189_spill] sm:$0xff] %v7848_v28  ;;  %v7894_v28 = vperm.slane %v3943_v51, 4  ;;  %v4132_v18 = vadd.f32 %v7887_v24, %v3476_v39 }
 0x302   :  { %11245 = vst [vmem:[#allocation25_spill] sm:$0xff] %v7852_v43  ;;  %v3477_v58 = vmul.f32 %v7862_v31, %v11262_v1  ;;  %v7901_v43 = vperm.slane %v3943_v51, 5 }
 0x303   :  { %4631 = vst [vmem:[#allocation8 + $0x130] sm:$0xff] %v4119_v0  ;;  %v3288_v0 = vld [vmem:[#allocation5 + $0x38] sm:$0xff] }
 0x304   :  { %11246 = vst [vmem:[#allocation190_spill] sm:$0xff] %v7855_v14  ;;  %v3944_v14 = vld [vmem:[#allocation7 + $0x38] sm:$0xff]  ;;  %v4133_v15 = vadd.f32 %v7894_v28, %v3477_v58 }
 0x305   :  { %11248 = vst [vmem:[#allocation26_spill] sm:$0xff] %v7859_v25  ;;  %v11268_v25 = vld [vmem:[#allocation33_spill] sm:$0xff] }
 0x306   :  { %4632 = vst [vmem:[#allocation8 + $0x138] sm:$0xff] %v4120_v55  ;;  %v7876_v55 = vperm.slane %v3287_v13, 6 }
 0x307   :  { %11249 = vst [vmem:[#allocation191_spill] sm:$0xff] %v7862_v31  ;;  %v7908_v31 = vperm.slane %v3943_v51, 6 }
 0x308   :  { %11251 = vst [vmem:[#allocation27_spill] sm:$0xff] %v7866_v27  ;;  %v3479_v1 = vmul.f32 %v7876_v55, %v11268_v25  ;;  %v11271_v27 = vld [vmem:[#allocation34_spill] sm:$0xff] }
 0x309   :  { %4633 = vst [vmem:[#allocation8 + $0x140] sm:$0xff] %v4121_v10  ;;  %v7883_v10 = vperm.slane %v3287_v13, 7  ;;  %v7897_v13 = vperm.slane %v3288_v0, 1 }
 0x30a   :  { %11252 = vst [vmem:[#allocation192_spill] sm:$0xff] %v7869_v17  ;;  %v4135_v58 = vadd.f32 %v7908_v31, %v3479_v1  ;;  %v7952_v1 = vperm.slane %v3944_v14, 4 }
 0x30b   :  { %11254 = vst [vmem:[#allocation28_spill] sm:$0xff] %v7873_v41  ;;  %v11274_v41 = vld [vmem:[#allocation35_spill] sm:$0xff] }
 0x30c   :  { %4634 = vst [vmem:[#allocation8 + $0x148] sm:$0xff] %v4122_v56  ;;  %v7890_v56 = vperm.slane %v3288_v0, 0 }
 0x30d   :  { %11255 = vst [vmem:[#allocation193_spill] sm:$0xff] %v7876_v55  ;;  %v7922_v55 = vperm.slane %v3944_v14, 0 }
 0x30e   :  { %11257 = vst [vmem:[#allocation29_spill] sm:$0xff] %v7880_v36  ;;  %v3481_v25 = vmul.f32 %v7890_v56, %v11274_v41  ;;  %v11277_v36 = vld [vmem:[#allocation41_spill] sm:$0xff] }
 0x30f   :  { %4635 = vst [vmem:[#allocation8 + $0x150] sm:$0xff] %v4123_v26  ;;  %v11265_v26 = vld [vmem:[#allocation32_spill] sm:$0xff] }
 0x310   :  { %11258 = vst [vmem:[#allocation194_spill] sm:$0xff] %v7883_v10  ;;  %v3478_v59 = vmul.f32 %v7869_v17, %v11265_v26  ;;  %v3480_v26 = vmul.f32 %v7883_v10, %v11271_v27  ;;  %v7915_v17 = vperm.slane %v3943_v51, 7  ;;  %v3482_v27 = vmul.f32 %v7897_v13, %v11277_v36  ;;  %v11287_v10 = vld [vmem:[#allocation13_spill] sm:$0xff] }
 0x311   :  { %11260 = vst [vmem:[#allocation30_spill] sm:$0xff] %v7887_v24  ;;  %v7929_v51 = vperm.slane %v3944_v14, 1  ;;  %v11280_v24 = vld [vmem:[#allocation42_spill] sm:$0xff] }
 0x312   :  { %4636 = vst [vmem:[#allocation8 + $0x158] sm:$0xff] %v4124_v47  ;;  %v7904_v47 = vperm.slane %v3288_v0, 2  ;;  %v4134_v39 = vadd.f32 %v7901_v43, %v3478_v59  ;;  %v4136_v59 = vadd.f32 %v7915_v17, %v3480_v26  ;;  %v11293_v26 = vld [vmem:[#allocation46_spill] sm:$0xff] }
 0x313   :  { %11261 = vst [vmem:[#allocation195_spill] sm:$0xff] %v7890_v56  ;;  %v7936_v56 = vperm.slane %v3944_v14, 2 }
 0x314   :  { %11263 = vst [vmem:[#allocation31_spill] sm:$0xff] %v7894_v28  ;;  %v3483_v41 = vmul.f32 %v7904_v47, %v11280_v24  ;;  %v11283_v28 = vld [vmem:[#allocation43_spill] sm:$0xff] }
 0x315   :  { %4637 = vst [vmem:[#allocation8 + $0x160] sm:$0xff] %v4125_v16  ;;  %v7911_v16 = vperm.slane %v3288_v0, 3 }
 0x316   :  { %11264 = vst [vmem:[#allocation196_spill] sm:$0xff] %v7897_v13  ;;  %v7943_v13 = vperm.slane %v3944_v14, 3 }
 0x317   :  { %11266 = vst [vmem:[#allocation32_spill] sm:$0xff] %v7901_v43  ;;  %v3484_v36 = vmul.f32 %v7911_v16, %v11283_v28  ;;  %v11286_v43 = vld [vmem:[#allocation50_spill] sm:$0xff]  ;;  %v11291_v28 = vld [vmem:[#allocation51_spill] sm:$0xff] }
 0x318   :  { %4638 = vst [vmem:[#allocation8 + $0x168] sm:$0xff] %v4126_v57  ;;  %v7918_v57 = vperm.slane %v3288_v0, 4  ;;  %v11288_v61 = vsub.f32 %v11286_v43, %v11287_v10  ;;  %v4138_v43 = vadd.f32 %v7929_v51, %v3482_v27 }
 0x319   :  { %11267 = vst [vmem:[#allocation197_spill] sm:$0xff] %v7904_v47  ;;  %v11289_v47 = vld [vmem:[#allocation45_spill] sm:$0xff] }
 0x31a   :  { %11269 = vst [vmem:[#allocation33_spill] sm:$0xff] %v7908_v31  ;;  %v3485_v32 = vmul.f32 %v7918_v57, %v11289_v47  ;;  %v11296_v47 = vld [vmem:[#allocation52_spill] sm:$0xff]  ;;  %v7980_v31 = vperm.slane %v3944_v14, 7 }
 0x31b   :  { %4639 = vst [vmem:[#allocation8 + $0x170] sm:$0xff] %v4127_v48  ;;  %v7925_v48 = vperm.slane %v3288_v0, 5 }
 0x31c   :  { %11270 = vst [vmem:[#allocation198_spill] sm:$0xff] %v7911_v16 }
 0x31d   :  { %11272 = vst [vmem:[#allocation34_spill] sm:$0xff] %v7915_v17  ;;  %v7961_v17 = vperm.slane %v3944_v14, 5 }
 0x31e   :  { %4640 = vst [vmem:[#allocation8 + $0x178] sm:$0xff] %v4128_v49  ;;  %v7932_v49 = vperm.slane %v3288_v0, 6 }
 0x31f   :  { %11273 = vst [vmem:[#allocation199_spill] sm:$0xff] %v7918_v57 }
 0x320   :  { %11275 = vst [vmem:[#allocation35_spill] sm:$0xff] %v7922_v55 }
 0x321   :  { %4641 = vst [vmem:[#allocation8 + $0x180] sm:$0xff] %v4129_v29  ;;  %v7939_v29 = vperm.slane %v3288_v0, 7  ;;  %v4137_v0 = vadd.f32 %v7922_v55, %v3481_v25  ;;  %v11297_v25 = vsub.f32 %v11296_v47, %v11287_v10  ;;  %v11298_v55 = vld [vmem:[#allocation47_spill] sm:$0xff]  ;;  %v4140_v47 = vadd.f32 %v7943_v13, %v3484_v36 }
 0x322   :  { %11276 = vst [vmem:[#allocation200_spill] sm:$0xff] %v7925_v48  ;;  %v3487_v57 = vmul.f32 %v7932_v49, %v11298_v55  ;;  %v11311_v36 = vld [vmem:[#allocation55_spill] sm:$0xff] }
 0x323   :  { %11278 = vst [vmem:[#allocation41_spill] sm:$0xff] %v7929_v51  ;;  %v11302_v51 = vld [vmem:[#allocation49_spill] sm:$0xff] }
 0x324   :  { %4642 = vst [vmem:[#allocation8 + $0x188] sm:$0xff] %v4130_v20  ;;  %v11285_v20 = vld [vmem:[#allocation98_spill] sm:$0xff] }
 0x325   :  { %11279 = vst [vmem:[#allocation201_spill] sm:$0xff] %v7932_v49  ;;  %v2833_v24 = vmul.f32 %v11288_v61, %v11285_v20  ;;  %v11295_v61 = vld [vmem:[#allocation63_spill] sm:$0xff]  ;;  %v11305_v49 = vld [vmem:[#allocation36_spill] sm:$0xff] }
 0x326   :  { %11281 = vst [vmem:[#allocation42_spill] sm:$0xff] %v7936_v56  ;;  %vm2204_vm7 = vweird.f32 %v11295_v61  ;;  %vm2203_vm8 = vweird.f32 %v11305_v49 }
 0x327   :  { %4643 = vst [vmem:[#allocation8 + $0x190] sm:$0xff] %v4131_v5  ;;  %v11292_v5 = vsub.f32 %v11291_v28, %v11287_v10  ;;  %v7971_v28 = vperm.slane %v3944_v14, 6  ;;  %v11310_v14 = vld [vmem:[#allocation101_spill] sm:$0xff]  ;;  %vm2205_vm11 = vmor %vm2203_vm8, %vm2204_vm7 }
 0x328   :  { %11282 = vst [vmem:[#allocation202_spill] sm:$0xff] %v7939_v29  ;;  %vm2234_vm13 = vweird.f32 %v11310_v14 }
 0x329   :  { %11284 = vst [vmem:[#allocation43_spill] sm:$0xff] %v7943_v13  ;;  %v2834_v16 = vmul.f32 %v11292_v5, %v11285_v20  ;;  %v4139_v5 = vadd.f32 %v7936_v56, %v3483_v41  ;;  %v11306_v41 = vld [vmem:[#allocation54_spill] sm:$0xff]  ;;  %v11313_v13 = vld [vmem:[#allocation39_spill] sm:$0xff]  ;;  %v4143_v63 = vadd.f32 %v7971_v28, %v3487_v57 }
 0x32a   :  { %4644 = vst [vmem:[#allocation8 + $0x198] sm:$0xff] %v4132_v18  ;;  %v3486_v18 = vmul.f32 %v7925_v48, %v11293_v26  ;;  %v11300_v26 = vld [vmem:[#allocation53_spill] sm:$0xff]  ;;  %v3488_v48 = vmul.f32 %v7939_v29, %v11302_v51  ;;  %v11309_v51 = vld [vmem:[#allocation78_spill] sm:$0xff] }
 0x32b   :  { %11290 = vst [vmem:[#allocation98_spill] sm:$0xff] %v7952_v1  ;;  %v11301_v27 = vsub.f32 %v11300_v26, %v11287_v10  ;;  %v3489_v26 = vmul.f32 %v11308_v4, %v2833_v24  ;;  %v2228_v29 = vmul.f32 %v11310_v14, %v11309_v51  ;;  %v3490_v60 = vmul.f32 %v11313_v13, %v2834_v16 }
 0x32c   :  { %4645 = vst [vmem:[#allocation8 + $0x1a0] sm:$0xff] %v4133_v15  ;;  %v2835_v15 = vmul.f32 %v11297_v25, %v11285_v20  ;;  %v11304_v25 = vld [vmem:[#allocation93_spill] sm:$0xff]  ;;  %v4142_v11 = vadd.f32 %v7961_v17, %v3486_v18  ;;  %vm2233_vm14 = vweird.f32 %v11309_v51  ;;  %v11419_v51 = vld [vmem:[#allocation92_spill] sm:$0xff] }
 0x32d   :  { %11294 = vst [vmem:[#allocation50_spill] sm:$0xff] %v7961_v17  ;;  %v2201_v55 = vsub.f32 1.5, %v11304_v25  ;;  %v11319_v18 = vld [vmem:[#allocation57_spill] sm:$0xff]  ;;  %v4146_v57 = vadd.f32 %v7548_v6, %v3490_v60  ;;  %vm2235_vm15 = vmor %vm2233_vm14, %vm2234_vm13 }
 0x32e   :  { %4646 = vst [vmem:[#allocation8 + $0x1a8] sm:$0xff] %v4134_v39  ;;  %v2836_v39 = vmul.f32 %v11301_v27, %v11285_v20  ;;  %v4141_v27 = vadd.f32 %v7952_v1, %v3485_v32  ;;  %v11316_v32 = vld [vmem:[#allocation56_spill] sm:$0xff] }
 0x32f   :  { %11299 = vst [vmem:[#allocation13_spill] sm:$0xff] %v7971_v28  ;;  %v11317_v24 = vsub.f32 %v11316_v32, %v11287_v10  ;;  %v11318_v1 = vld [vmem:[#allocation40_spill] sm:$0xff]  ;;  %v4144_v32 = vadd.f32 %v7980_v31, %v3488_v48  ;;  %v2202_v48 = vmul.f32 %v11295_v61, %v2201_v55 }
 0x330   :  { %4647 = vst [vmem:[#allocation8 + $0x1b0] sm:$0xff] %v4135_v58  ;;  %v11307_v58 = vsub.f32 %v11306_v41, %v11287_v10  ;;  %v11314_v41 = vld [vmem:[#allocation94_spill] sm:$0xff]  ;;  %v3491_v4 = vmul.f32 %v11318_v1, %v2835_v15  ;;  %v8018_v15 = vld [vmem:[#allocation2 + $0x358] sm:$0xff] }
 0x331   :  { %11303 = vst [vmem:[#allocation45_spill] sm:$0xff] %v7980_v31  ;;  %v11326_v1 = vld [vmem:[#allocation103_spill] sm:$0xff] }
 0x332   :  { %4648 = vst [vmem:[#allocation8 + $0x1b8] sm:$0xff] %v4136_v59  ;;  %v2837_v56 = vmul.f32 %v11307_v58, %v11285_v20  ;;  %v11312_v59 = vsub.f32 %v11311_v36, %v11287_v10  ;;  %v2211_v58 = vsub.f32 1.5, %v11314_v41  ;;  %v8007_v36 = vld [vmem:[#allocation2 + $0x350] sm:$0xff]  ;;  %v11321_v41 = vld [vmem:[#allocation44_spill] sm:$0xff]  ;;  %v4147_v55 = vadd.f32 %v7550_v38, %v3491_v4 }
 0x333   :  { %4649 = vst [vmem:[#allocation8 + $0x1c0] sm:$0xff] %v4137_v0  ;;  %v2839_v0 = vmul.f32 %v11317_v24, %v11285_v20  ;;  %v3492_v17 = vmul.f32 %v11321_v41, %v2836_v39  ;;  %v11322_v24 = vld [vmem:[#allocation38_spill] sm:$0xff]  ;;  %v11327_v39 = vld [vmem:[#allocation60_spill] sm:$0xff] }
 0x334   :  { %v2838_v25 = vmul.f32 %v11312_v59, %v11285_v20  ;;  %4650 = vst [vmem:[#allocation8 + $0x1c8] sm:$0xff] %v4138_v43  ;;  %v11320_v43 = vsub.f32 %v11319_v18, %v11287_v10  ;;  %vm2213_vm10 = vweird.f32 %v11322_v24  ;;  %v3493_v18 = vmul.f32 %v11326_v1, %v2837_v56  ;;  %v11329_v41 = vld [vmem:[#allocation104_spill] sm:$0xff]  ;;  %v11358_v24 = vld [vmem:[#allocation71_spill] sm:$0xff] }
 0x335   :  { %4651 = vst [vmem:[#allocation8 + $0x1d0] sm:$0xff] %v4139_v5  ;;  %v11324_v5 = vld [vmem:[#allocation59_spill] sm:$0xff]  ;;  %vm2215_vm12 = vmor %vm2213_vm10, %vm2214_vm9 }
 0x336   :  { %v2840_v59 = vmul.f32 %v11320_v43, %v11285_v20  ;;  %4652 = vst [vmem:[#allocation8 + $0x1d8] sm:$0xff] %v4140_v47  ;;  %v11325_v16 = vsub.f32 %v11324_v5, %v11287_v10  ;;  %v4145_v43 = vadd.f32 %v7544_v45, %v3489_v26  ;;  %v11328_v47 = vsub.f32 %v11327_v39, %v11287_v10 }
 0x337   :  { %11323 = vst [vmem:[#allocation51_spill] sm:$0xff] %v8018_v15  ;;  %v3494_v13 = vmul.f32 %v11329_v41, %v2838_v25  ;;  %v11330_v15 = vld [vmem:[#allocation97_spill] sm:$0xff]  ;;  %v2229_v39 = vmul.f32 %v11310_v14, %v2228_v29  ;;  %v4148_v41 = vadd.f32 %v7552_v54, %v3492_v17  ;;  %v4149_v29 = vadd.f32 %v7560_v62, %v3493_v18  ;;  %v11341_v17 = vld [vmem:[#allocation102_spill] sm:$0xff] }
 0x338   :  { %v2841_v28 = vmul.f32 %v11325_v16, %v11285_v20  ;;  %4653 = vst [vmem:[#allocation8 + $0x1e0] sm:$0xff] %v4141_v27  ;;  %v2842_v31 = vmul.f32 %v11328_v47, %v11285_v20  ;;  %5146 = vrsqrt.f32 %v11330_v15  ;;  %v11331_v16 = vld [vmem:[#allocation61_spill] sm:$0xff]  ;;  %v11334_v47 = vld [vmem:[#allocation62_spill] sm:$0xff]  ;;  %v8069_v18 = vsel %vm2205_vm11, %v11295_v61, %v2202_v48 }
 0x339   :  { %4654 = vst [vmem:[#allocation8 + $0x1e8] sm:$0xff] %v4142_v11  ;;  %v11332_v56 = vsub.f32 %v11331_v16, %v11287_v10  ;;  %v11333_v27 = vld [vmem:[#allocation105_spill] sm:$0xff]  ;;  %v11335_v25 = vsub.f32 %v11334_v47, %v11287_v10  ;;  %v11336_v11 = vld [vmem:[#allocation106_spill] sm:$0xff]  ;;  %v2212_v16 = vmul.f32 %v11315_v33, %v2211_v58  ;;  %vm2244_vm0 = vweird.f32 %v11341_v17 }
 0x33a   :  { %v3495_v5 = vmul.f32 %v11333_v27, %v2839_v0  ;;  %4655 = vst [vmem:[#allocation8 + $0x1f0] sm:$0xff] %v4143_v63  ;;  %v3496_v6 = vmul.f32 %v11336_v11, %v2840_v59  ;;  %v11339_v63 = vld [vmem:[#allocation111_spill] sm:$0xff]  ;;  %v11340_v59 = vld [vmem:[#allocation82_spill] sm:$0xff]  ;;  %v11342_v58 = vld [vmem:[#allocation65_spill] sm:$0xff]  ;;  %vm2223_vm4 = vweird.f32 %v11330_v15 }
 0x33b   :  { %v2843_v26 = vmul.f32 %v11332_v56, %v11285_v20  ;;  %v2844_v60 = vmul.f32 %v11335_v25, %v11285_v20  ;;  %4656 = vst [vmem:[#allocation8 + $0x1f8] sm:$0xff] %v4144_v32  ;;  %v11337_v56 = vld [vmem:[#allocation64_spill] sm:$0xff]  ;;  %v3497_v38 = vmul.f32 %v11339_v63, %v2841_v28  ;;  %v2238_v32 = vmul.f32 %v11341_v17, %v11340_v59  ;;  %v11347_v63 = vld [vmem:[#allocation114_spill] sm:$0xff] }
 0x33c   :  { %v11338_v0 = vsub.f32 %v11337_v56, %v11287_v10  ;;  %4657 = vst [vmem:[#allocation8 + $0x200] sm:$0xff] %v4145_v43  ;;  %v11343_v47 = vsub.f32 %v11342_v58, %v11287_v10  ;;  %v11344_v56 = vld [vmem:[#allocation112_spill] sm:$0xff]  ;;  %v4150_v28 = vadd.f32 %v7568_v52, %v3494_v13  ;;  %v11345_v43 = vld [vmem:[#allocation66_spill] sm:$0xff]  ;;  %v4151_v11 = vadd.f32 %v7574_v3, %v3495_v5  ;;  %v11351_v5 = vld [vmem:[#allocation69_spill] sm:$0xff] }
 0x33d   :  { %4658 = vst [vmem:[#allocation8 + $0x208] sm:$0xff] %v4146_v57  ;;  %v11346_v49 = vsub.f32 %v11345_v43, %v11287_v10  ;;  %v3499_v54 = vmul.f32 %v11347_v63, %v2843_v26  ;;  %v8077_v58 = vmul.f32 0.5, %v2229_v39  ;;  %v4152_v48 = vadd.f32 %v7577_v40, %v3496_v6  ;;  %v8087_v43 = vld [vmem:[#allocation2 + $0x360] sm:$0xff]  ;;  %v8101_v6 = vld [vmem:[#allocation2 + $0x368] sm:$0xff]  ;;  %v11360_v40 = vld [vmem:[#allocation123_spill] sm:$0xff] }
 0x33e   :  { %v2845_v4 = vmul.f32 %v11338_v0, %v11285_v20  ;;  %v2846_v25 = vmul.f32 %v11343_v47, %v11285_v20  ;;  %v3498_v0 = vmul.f32 %v11344_v56, %v2842_v31  ;;  %4659 = vst [vmem:[#allocation8 + $0x210] sm:$0xff] %v4147_v55  ;;  %v11348_v31 = vld [vmem:[#allocation67_spill] sm:$0xff]  ;;  %v8085_v52 = vpop.eup %5146  ;;  %v11352_v55 = vsub.f32 %v11351_v5, %v11287_v10  ;;  %v11356_v26 = vld [vmem:[#allocation121_spill] sm:$0xff] }
 0x33f   :  { %v2847_v62 = vmul.f32 %v11346_v49, %v11285_v20  ;;  %v11349_v13 = vsub.f32 %v11348_v31, %v11287_v10  ;;  %v11350_v47 = vld [vmem:[#allocation115_spill] sm:$0xff]  ;;  %4660 = vst [vmem:[#allocation8 + $0x218] sm:$0xff] %v4148_v41  ;;  %vm2243_vm1 = vweird.f32 %v11340_v59  ;;  %v11467_v59 = vld [vmem:[#allocation185_spill] sm:$0xff]  ;;  %vm2224_vm3 = vweird.f32 %v8085_v52 }
 0x340   :  { %v3500_v61 = vmul.f32 %v11350_v47, %v2844_v60  ;;  %v2849_v39 = vmul.f32 %v11352_v55, %v11285_v20  ;;  %v11353_v49 = vld [vmem:[#allocation119_spill] sm:$0xff]  ;;  %4661 = vst [vmem:[#allocation8 + $0x220] sm:$0xff] %v4149_v29  ;;  %v11354_v60 = vld [vmem:[#allocation70_spill] sm:$0xff]  ;;  %v8112_v29 = vsel %vm2215_vm12, %v11315_v33, %v2212_v16  ;;  %v11361_v47 = vld [vmem:[#allocation124_spill] sm:$0xff] }
 0x341   :  { %v2848_v57 = vmul.f32 %v11349_v13, %v11285_v20  ;;  %v3501_v31 = vmul.f32 %v11353_v49, %v2845_v4  ;;  %v4153_v13 = vadd.f32 %v7586_v30, %v3497_v38  ;;  %v11355_v5 = vsub.f32 %v11354_v60, %v11287_v10  ;;  %4662 = vst [vmem:[#allocation8 + $0x228] sm:$0xff] %v4150_v28  ;;  %vm2245_vm2 = vmor %vm2243_vm1, %vm2244_vm0 }
 0x342   :  { %v3502_v4 = vmul.f32 %v11356_v26, %v2846_v25  ;;  %v4154_v38 = vadd.f32 %v7593_v22, %v3498_v0  ;;  %11357 = vst [vmem:[#allocation46_spill] sm:$0xff] %v8112_v29  ;;  %v11359_v30 = vsub.f32 %v11358_v24, %v11287_v10  ;;  %v3503_v41 = vmul.f32 %v11360_v40, %v2847_v62  ;;  %v11362_v25 = vld [vmem:[#allocation72_spill] sm:$0xff]  ;;  %v11369_v29 = vld [vmem:[#allocation129_spill] sm:$0xff]  ;;  %vm2225_vm5 = vmor %vm2223_vm4, %vm2224_vm3 }
 0x343   :  { %v2850_v55 = vmul.f32 %v11355_v5, %v11285_v20  ;;  %v4155_v3 = vadd.f32 %v11361_v47, %v3499_v54  ;;  %4663 = vst [vmem:[#allocation8 + $0x230] sm:$0xff] %v4151_v11  ;;  %v2239_v60 = vmul.f32 %v11341_v17, %v2238_v32  ;;  %v11363_v0 = vsub.f32 %v11362_v25, %v11287_v10  ;;  %v8127_v5 = vld [vmem:[#allocation2 + $0x370] sm:$0xff]  ;;  %v11366_v32 = vld [vmem:[#allocation127_spill] sm:$0xff] }
 0x344   :  { %v2851_v49 = vmul.f32 %v11359_v30, %v11285_v20  ;;  %v3504_v33 = vmul.f32 %v7603_v50, %v2848_v57  ;;  %v4156_v16 = vadd.f32 %v7607_v8, %v3500_v61  ;;  %4664 = vst [vmem:[#allocation8 + $0x238] sm:$0xff] %v4152_v48  ;;  %v11364_v30 = vld [vmem:[#allocation73_spill] sm:$0xff]  ;;  %v3505_v24 = vmul.f32 %v11366_v32, %v2849_v39  ;;  %v11367_v61 = vld [vmem:[#allocation74_spill] sm:$0xff]  ;;  %v8154_v50 = vld [vmem:[#allocation2 + $0x380] sm:$0xff] }
 0x345   :  { %v2852_v28 = vmul.f32 %v11363_v0, %v11285_v20  ;;  %v11365_v54 = vsub.f32 %v11364_v30, %v11287_v10  ;;  %v4157_v25 = vadd.f32 %v7614_v21, %v3501_v31  ;;  %4665 = vst [vmem:[#allocation8 + $0x240] sm:$0xff] %v4153_v13  ;;  %v8137_v0 = vld [vmem:[#allocation2 + $0x378] sm:$0xff]  ;;  %v11368_v48 = vsub.f32 %v11367_v61, %v11287_v10  ;;  %v11375_v61 = vld [vmem:[#allocation133_spill] sm:$0xff] }
 0x346   :  { %v3506_v8 = vmul.f32 %v11369_v29, %v2850_v55  ;;  %v4158_v30 = vadd.f32 %v7621_v34, %v3502_v4  ;;  %4666 = vst [vmem:[#allocation8 + $0x248] sm:$0xff] %v4154_v38  ;;  %v2231_v39 = vsub.f32 1.5, %v8077_v58  ;;  %v11370_v31 = vld [vmem:[#allocation75_spill] sm:$0xff]  ;;  %v4159_v57 = vadd.f32 %v7628_v35, %v3503_v41  ;;  %v11373_v4 = vld [vmem:[#allocation76_spill] sm:$0xff] }
 0x347   :  { %v2853_v11 = vmul.f32 %v11365_v54, %v11285_v20  ;;  %v2854_v62 = vmul.f32 %v11368_v48, %v11285_v20  ;;  %v11371_v13 = vsub.f32 %v11370_v31, %v11287_v10  ;;  %v11372_v21 = vld [vmem:[#allocation131_spill] sm:$0xff]  ;;  %4667 = vst [vmem:[#allocation8 + $0x250] sm:$0xff] %v4155_v3  ;;  %v11374_v38 = vsub.f32 %v11373_v4, %v11287_v10 }
 0x348   :  { %v3507_v32 = vmul.f32 %v11372_v21, %v2851_v49  ;;  %v3508_v48 = vmul.f32 %v11375_v61, %v2852_v28  ;;  %v4160_v31 = vadd.f32 %v7635_v7, %v3504_v33  ;;  %4668 = vst [vmem:[#allocation8 + $0x258] sm:$0xff] %v4156_v16  ;;  %v11376_v49 = vld [vmem:[#allocation77_spill] sm:$0xff]  ;;  %v11378_v35 = vld [vmem:[#allocation135_spill] sm:$0xff]  ;;  %v4161_v4 = vadd.f32 %v7642_v2, %v3505_v24  ;;  %v8175_v28 = vld [vmem:[#allocation2 + $0x390] sm:$0xff] }
 0x349   :  { %v2855_v54 = vmul.f32 %v11371_v13, %v11285_v20  ;;  %v2856_v58 = vmul.f32 %v11374_v38, %v11285_v20  ;;  %v8164_v13 = vld [vmem:[#allocation2 + $0x388] sm:$0xff]  ;;  %v11377_v41 = vsub.f32 %v11376_v49, %v11287_v10  ;;  %v3509_v21 = vmul.f32 %v11378_v35, %v2853_v11  ;;  %4669 = vst [vmem:[#allocation8 + $0x260] sm:$0xff] %v4157_v25  ;;  %v11379_v16 = vld [vmem:[#allocation79_spill] sm:$0xff]  ;;  %v11382_v24 = vld [vmem:[#allocation80_spill] sm:$0xff] }
 0x34a   :  { %v11380_v38 = vsub.f32 %v11379_v16, %v11287_v10  ;;  %v11381_v7 = vld [vmem:[#allocation137_spill] sm:$0xff]  ;;  %4670 = vst [vmem:[#allocation8 + $0x268] sm:$0xff] %v4158_v30  ;;  %v8185_v11 = vmul.f32 0.5, %v2239_v60  ;;  %v11383_v25 = vsub.f32 %v11382_v24, %v11287_v10  ;;  %v11384_v35 = vld [vmem:[#allocation139_spill] sm:$0xff]  ;;  %v11385_v33 = vld [vmem:[#allocation140_spill] sm:$0xff]  ;;  %v4164_v24 = vadd.f32 %v7663_v46, %v3508_v48 }
 0x34b   :  { %v2857_v55 = vmul.f32 %v11377_v41, %v11285_v20  ;;  %v3510_v49 = vmul.f32 %v11381_v7, %v2854_v62  ;;  %v4162_v41 = vadd.f32 %v7649_v9, %v3506_v8  ;;  %v3511_v61 = vmul.f32 %v11384_v35, %v2855_v54  ;;  %4671 = vst [vmem:[#allocation8 + $0x270] sm:$0xff] %v4159_v57  ;;  %v8194_v16 = vld [vmem:[#allocation2 + $0x398] sm:$0xff]  ;;  %v11386_v60 = vld [vmem:[#allocation81_spill] sm:$0xff]  ;;  %v8204_v54 = vld [vmem:[#allocation2 + $0x3a0] sm:$0xff] }
 0x34c   :  { %v2858_v3 = vmul.f32 %v11380_v38, %v11285_v20  ;;  %v2859_v2 = vmul.f32 %v11383_v25, %v11285_v20  ;;  %v4163_v34 = vadd.f32 %v11385_v33, %v3507_v32  ;;  %v11387_v62 = vsub.f32 %v11386_v60, %v11287_v10  ;;  %4672 = vst [vmem:[#allocation8 + $0x278] sm:$0xff] %v4160_v31  ;;  %v11388_v57 = vld [vmem:[#allocation83_spill] sm:$0xff]  ;;  %v11391_v48 = vld [vmem:[#allocation84_spill] sm:$0xff]  ;;  %v11393_v46 = vld [vmem:[#allocation145_spill] sm:$0xff] }
 0x34d   :  { %v3512_v38 = vmul.f32 %v7659_v42, %v2856_v58  ;;  %v11389_v25 = vsub.f32 %v11388_v57, %v11287_v10  ;;  %v11390_v33 = vld [vmem:[#allocation143_spill] sm:$0xff]  ;;  %v4165_v60 = vadd.f32 %v7670_v12, %v3509_v21  ;;  %4673 = vst [vmem:[#allocation8 + $0x280] sm:$0xff] %v4161_v4  ;;  %v11392_v31 = vsub.f32 %v11391_v48, %v11287_v10  ;;  %v11394_v21 = vld [vmem:[#allocation85_spill] sm:$0xff]  ;;  %v8231_v9 = vld [vmem:[#allocation2 + $0x3b0] sm:$0xff] }
 0x34e   :  { %v2860_v30 = vmul.f32 %v11387_v62, %v11285_v20  ;;  %v3513_v35 = vmul.f32 %v11390_v33, %v2857_v55  ;;  %v8214_v62 = vld [vmem:[#allocation2 + $0x3a8] sm:$0xff]  ;;  %v3514_v42 = vmul.f32 %v11393_v46, %v2858_v3  ;;  %v4166_v57 = vadd.f32 %v7677_v19, %v3510_v49  ;;  %4674 = vst [vmem:[#allocation8 + $0x288] sm:$0xff] %v4162_v41  ;;  %v11396_v12 = vld [vmem:[#allocation147_spill] sm:$0xff]  ;;  %v11397_v49 = vld [vmem:[#allocation86_spill] sm:$0xff] }
 0x34f   :  { %v2861_v8 = vmul.f32 %v11389_v25, %v11285_v20  ;;  %v2862_v32 = vmul.f32 %v11392_v31, %v11285_v20  ;;  %v2232_v55 = vmul.f32 %v11310_v14, %v2231_v39  ;;  %v11395_v4 = vsub.f32 %v11394_v21, %v11287_v10  ;;  %4675 = vst [vmem:[#allocation8 + $0x290] sm:$0xff] %v4163_v34  ;;  %v11399_v48 = vld [vmem:[#allocation149_spill] sm:$0xff] }
 0x350   :  { %v3515_v33 = vmul.f32 %v11396_v12, %v2859_v2  ;;  %v4167_v58 = vadd.f32 %v7684_v23, %v3511_v61  ;;  %v11398_v41 = vsub.f32 %v11397_v49, %v11287_v10  ;;  %v3516_v31 = vmul.f32 %v11399_v48, %v2860_v30  ;;  %4676 = vst [vmem:[#allocation8 + $0x298] sm:$0xff] %v4164_v24  ;;  %v11400_v2 = vld [vmem:[#allocation87_spill] sm:$0xff] }
 0x351   :  { %v2863_v25 = vmul.f32 %v11395_v4, %v11285_v20  ;;  %v4168_v21 = vadd.f32 %v7691_v44, %v3512_v38  ;;  %v8241_v4 = vld [vmem:[#allocation2 + $0x3b8] sm:$0xff]  ;;  %v11401_v61 = vsub.f32 %v11400_v2, %v11287_v10  ;;  %v4169_v49 = vadd.f32 %v7698_v37, %v3513_v35  ;;  %4677 = vst [vmem:[#allocation8 + $0x2a0] sm:$0xff] %v4165_v60  ;;  %v11403_v38 = vld [vmem:[#allocation88_spill] sm:$0xff]  ;;  %v11405_v44 = vld [vmem:[#allocation153_spill] sm:$0xff] }
 0x352   :  { %v2864_v39 = vmul.f32 %v11398_v41, %v11285_v20  ;;  %v11402_v23 = vld [vmem:[#allocation151_spill] sm:$0xff]  ;;  %v8251_v41 = vld [vmem:[#allocation2 + $0x3c0] sm:$0xff]  ;;  %v11404_v24 = vsub.f32 %v11403_v38, %v11287_v10  ;;  %v3518_v48 = vmul.f32 %v11405_v44, %v2862_v32  ;;  %v4170_v2 = vadd.f32 %v7705_v53, %v3514_v42  ;;  %4678 = vst [vmem:[#allocation8 + $0x2a8] sm:$0xff] %v4166_v57  ;;  %v11406_v35 = vld [vmem:[#allocation89_spill] sm:$0xff] }
 0x353   :  { %v2865_v3 = vmul.f32 %v11401_v61, %v11285_v20  ;;  %v3517_v12 = vmul.f32 %v11402_v23, %v2861_v8  ;;  %v2218_v8 = vmul.f32 %v8085_v52, %v11330_v15  ;;  %v11407_v60 = vsub.f32 %v11406_v35, %v11287_v10  ;;  %v11408_v37 = vld [vmem:[#allocation155_spill] sm:$0xff]  ;;  %v11409_v23 = vld [vmem:[#allocation156_spill] sm:$0xff]  ;;  %4679 = vst [vmem:[#allocation8 + $0x2b0] sm:$0xff] %v4167_v58  ;;  %v11410_v32 = vld [vmem:[#allocation90_spill] sm:$0xff] }
 0x354   :  { %v2866_v34 = vmul.f32 %v11404_v24, %v11285_v20  ;;  %v3519_v30 = vmul.f32 %v11408_v37, %v2863_v25  ;;  %v4171_v19 = vadd.f32 %v11409_v23, %v3515_v33  ;;  %v2241_v38 = vsub.f32 1.5, %v8185_v11  ;;  %v11412_v24 = vld [vmem:[#allocation157_spill] sm:$0xff]  ;;  %v11413_v44 = vld [vmem:[#allocation158_spill] sm:$0xff]  ;;  %4680 = vst [vmem:[#allocation8 + $0x2b8] sm:$0xff] %v4168_v21  ;;  %v11414_v11 = vld [vmem:[#allocation91_spill] sm:$0xff] }
 0x355   :  { %v2867_v61 = vmul.f32 %v11407_v60, %v11285_v20  ;;  %v11411_v42 = vsub.f32 %v11410_v32, %v11287_v10  ;;  %v3520_v53 = vmul.f32 %v11412_v24, %v2864_v39  ;;  %v4172_v46 = vadd.f32 %v11413_v44, %v3516_v31  ;;  %v8280_v25 = vld [vmem:[#allocation2 + $0x3c8] sm:$0xff]  ;;  %v11416_v60 = vld [vmem:[#allocation159_spill] sm:$0xff]  ;;  %v11417_v32 = vld [vmem:[#allocation160_spill] sm:$0xff]  ;;  %4681 = vst [vmem:[#allocation8 + $0x2c0] sm:$0xff] %v4169_v49 }
 0x356   :  { %v11415_v58 = vsub.f32 %v11414_v11, %v11287_v10  ;;  %v3521_v39 = vmul.f32 %v11416_v60, %v2865_v3  ;;  %v4173_v31 = vadd.f32 %v11417_v32, %v3517_v12  ;;  %v8291_v21 = vsel %vm2235_vm15, %v11310_v14, %v2232_v55  ;;  %v11421_v24 = vld [vmem:[#allocation161_spill] sm:$0xff]  ;;  %v11422_v23 = vld [vmem:[#allocation162_spill] sm:$0xff]  ;;  %4682 = vst [vmem:[#allocation8 + $0x2c8] sm:$0xff] %v4170_v2  ;;  %v11423_v14 = vld [vmem:[#allocation95_spill] sm:$0xff] }
 0x357   :  { %v2868_v57 = vmul.f32 %v11411_v42, %v11285_v20  ;;  %11418 = vst [vmem:[#allocation63_spill] sm:$0xff] %v8291_v21  ;;  %v11420_v42 = vsub.f32 %v11419_v51, %v11287_v10  ;;  %v3522_v33 = vmul.f32 %v11421_v24, %v2866_v34  ;;  %v4174_v37 = vadd.f32 %v11422_v23, %v3518_v48  ;;  %v8300_v11 = vld [vmem:[#allocation2 + $0x3d0] sm:$0xff]  ;;  %v11425_v49 = vld [vmem:[#allocation163_spill] sm:$0xff]  ;;  %v11426_v51 = vld [vmem:[#allocation164_spill] sm:$0xff] }
 0x358   :  { %v2869_v35 = vmul.f32 %v11415_v58, %v11285_v20  ;;  %v11424_v55 = vsub.f32 %v11423_v14, %v11287_v10  ;;  %v3523_v58 = vmul.f32 %v11425_v49, %v2867_v61  ;;  %4683 = vst [vmem:[#allocation8 + $0x2d0] sm:$0xff] %v4171_v19  ;;  %v8310_v34 = vld [vmem:[#allocation2 + $0x3d8] sm:$0xff]  ;;  %v11427_v2 = vld [vmem:[#allocation96_spill] sm:$0xff]  ;;  %v11429_v23 = vld [vmem:[#allocation165_spill] sm:$0xff] }
 0x359   :  { %v2870_v44 = vmul.f32 %v11420_v42, %v11285_v20  ;;  %v4175_v42 = vadd.f32 %v11426_v51, %v3519_v30  ;;  %v11428_v21 = vsub.f32 %v11427_v2, %v11287_v10  ;;  %v3524_v24 = vmul.f32 %v11429_v23, %v2868_v57  ;;  %v11430_v32 = vld [vmem:[#allocation166_spill] sm:$0xff]  ;;  %4684 = vst [vmem:[#allocation8 + $0x2d8] sm:$0xff] %v4172_v46  ;;  %v8321_v61 = vld [vmem:[#allocation2 + $0x3e0] sm:$0xff]  ;;  %v11431_v30 = vld [vmem:[#allocation99_spill] sm:$0xff] }
 0x35a   :  { %v2871_v3 = vmul.f32 %v11424_v55, %v11285_v20  ;;  %v4176_v14 = vadd.f32 %v11430_v32, %v3520_v53  ;;  %v11432_v55 = vsub.f32 %v11431_v30, %v11287_v10  ;;  %v11433_v51 = vld [vmem:[#allocation167_spill] sm:$0xff]  ;;  %4685 = vst [vmem:[#allocation8 + $0x2e0] sm:$0xff] %v4173_v31  ;;  %v2219_v53 = vmul.f32 %v8085_v52, %v2218_v8  ;;  %v11435_v46 = vld [vmem:[#allocation100_spill] sm:$0xff]  ;;  %v11437_v23 = vld [vmem:[#allocation169_spill] sm:$0xff] }
 0x35b   :  { %v2872_v12 = vmul.f32 %v11428_v21, %v11285_v20  ;;  %v3525_v2 = vmul.f32 %v11433_v51, %v2869_v35  ;;  %v11434_v21 = vld [vmem:[#allocation168_spill] sm:$0xff]  ;;  %v11436_v57 = vsub.f32 %v11435_v46, %v11287_v10  ;;  %v3526_v60 = vmul.f32 %v11437_v23, %v2870_v44  ;;  %v11438_v19 = vld [vmem:[#allocation170_spill] sm:$0xff]  ;;  %4686 = vst [vmem:[#allocation8 + $0x2e8] sm:$0xff] %v4174_v37  ;;  %v11440_v31 = vld [vmem:[#allocation171_spill] sm:$0xff] }
 0x35c   :  { %v2873_v48 = vmul.f32 %v11432_v55, %v11285_v20  ;;  %v4177_v49 = vadd.f32 %v11434_v21, %v3521_v39  ;;  %v4178_v7 = vadd.f32 %v11438_v19, %v3522_v33  ;;  %v2242_v30 = vmul.f32 %v11341_v17, %v2241_v38  ;;  %v11441_v8 = vld [vmem:[#allocation172_spill] sm:$0xff]  ;;  %4687 = vst [vmem:[#allocation8 + $0x2f0] sm:$0xff] %v4175_v42  ;;  %v8345_v51 = vld [vmem:[#allocation2 + $0x3e8] sm:$0xff]  ;;  %v11442_v33 = vld [vmem:[#allocation51_spill] sm:$0xff] }
 0x35d   :  { %v2874_v32 = vmul.f32 %v11436_v57, %v11285_v20  ;;  %v11439_v35 = vsub.f32 %v8007_v36, %v11287_v10  ;;  %v3527_v55 = vmul.f32 %v11440_v31, %v2871_v3  ;;  %v4179_v21 = vadd.f32 %v11441_v8, %v3523_v58  ;;  %v11444_v46 = vld [vmem:[#allocation173_spill] sm:$0xff]  ;;  %v11445_v19 = vld [vmem:[#allocation174_spill] sm:$0xff]  ;;  %4688 = vst [vmem:[#allocation8 + $0x2f8] sm:$0xff] %v4176_v14  ;;  %v11447_v44 = vld [vmem:[#allocation175_spill] sm:$0xff] }
 0x35e   :  { %v11443_v37 = vsub.f32 %v11442_v33, %v11287_v10  ;;  %v3528_v57 = vmul.f32 %v11444_v46, %v2872_v12  ;;  %v4180_v36 = vadd.f32 %v11445_v19, %v3524_v24  ;;  %v11446_v58 = vsub.f32 %v8087_v43, %v11287_v10  ;;  %v11448_v31 = vld [vmem:[#allocation176_spill] sm:$0xff]  ;;  %4689 = vst [vmem:[#allocation8 + $0x300] sm:$0xff] %v4177_v49  ;;  %v11450_v3 = vld [vmem:[#allocation177_spill] sm:$0xff]  ;;  %v11451_v46 = vld [vmem:[#allocation178_spill] sm:$0xff] }
 0x35f   :  { %v2875_v39 = vmul.f32 %v11439_v35, %v11285_v20  ;;  %v8355_v35 = vld [vmem:[#allocation2 + $0x3f0] sm:$0xff]  ;;  %v3529_v8 = vmul.f32 %v11447_v44, %v2873_v48  ;;  %v4181_v33 = vadd.f32 %v11448_v31, %v3525_v2  ;;  %v11449_v12 = vsub.f32 %v8101_v6, %v11287_v10  ;;  %4690 = vst [vmem:[#allocation8 + $0x308] sm:$0xff] %v4178_v7  ;;  %v11454_v31 = vld [vmem:[#allocation179_spill] sm:$0xff]  ;;  %v11455_v23 = vld [vmem:[#allocation180_spill] sm:$0xff] }
 0x360   :  { %v2876_v38 = vmul.f32 %v11443_v37, %v11285_v20  ;;  %v2877_v42 = vmul.f32 %v11446_v58, %v11285_v20  ;;  %v8365_v37 = vld [vmem:[#allocation2 + $0x3f8] sm:$0xff]  ;;  %v3530_v19 = vmul.f32 %v11450_v3, %v2874_v32  ;;  %v4182_v43 = vadd.f32 %v11451_v46, %v3526_v60  ;;  %v8375_v58 = vld [vmem:[#allocation2 + $0x400] sm:$0xff]  ;;  %v11452_v48 = vld [vmem:[#allocation14_spill] sm:$0xff]  ;;  %4691 = vst [vmem:[#allocation8 + $0x310] sm:$0xff] %v4179_v21 }
 0x361   :  { %v2878_v14 = vmul.f32 %v11449_v12, %v11285_v20  ;;  %v11453_v2 = vsub.f32 %v8127_v5, %v11287_v10  ;;  %v3531_v44 = vmul.f32 %v11454_v31, %v2875_v39  ;;  %v4183_v6 = vadd.f32 %v11455_v23, %v3527_v55  ;;  %v8385_v12 = vld [vmem:[#allocation2 + $0x408] sm:$0xff]  ;;  %v11458_v3 = vld [vmem:[#allocation182_spill] sm:$0xff]  ;;  %4692 = vst [vmem:[#allocation8 + $0x318] sm:$0xff] %v4180_v36  ;;  %v11460_v7 = vld [vmem:[#allocation183_spill] sm:$0xff] }
 0x362   :  { %v11456_v60 = vsub.f32 %v8137_v0, %v11287_v10  ;;  %v11457_v49 = vld [vmem:[#allocation181_spill] sm:$0xff]  ;;  %v4184_v5 = vadd.f32 %v11458_v3, %v3528_v57  ;;  %v11459_v39 = vsub.f32 %v8154_v50, %v11287_v10  ;;  %v3533_v23 = vmul.f32 %v11460_v7, %v2877_v42  ;;  %4693 = vst [vmem:[#allocation8 + $0x320] sm:$0xff] %v4181_v33  ;;  %v11463_v36 = vld [vmem:[#allocation184_spill] sm:$0xff] }
 0x363   :  { %v2879_v24 = vmul.f32 %v11453_v2, %v11285_v20  ;;  %v3532_v46 = vmul.f32 %v11457_v49, %v2876_v38  ;;  %v8395_v2 = vld [vmem:[#allocation2 + $0x410] sm:$0xff]  ;;  %v11461_v31 = vld [vmem:[#allocation17_spill] sm:$0xff]  ;;  %v11462_v38 = vsub.f32 %v8164_v13, %v11287_v10  ;;  %v3534_v50 = vmul.f32 %v11463_v36, %v2878_v14  ;;  %4694 = vst [vmem:[#allocation8 + $0x328] sm:$0xff] %v4182_v43  ;;  %v8426_v13 = vld [vmem:[#allocation2 + $0x418] sm:$0xff] }
 0x364   :  { %v2880_v32 = vmul.f32 %v11456_v60, %v11285_v20  ;;  %v2881_v55 = vmul.f32 %v11459_v39, %v11285_v20  ;;  %v4185_v0 = vadd.f32 %v11461_v31, %v3529_v8  ;;  %v8405_v60 = vmul.f32 0.5, %v2219_v53  ;;  %v11464_v39 = vld [vmem:[#allocation18_spill] sm:$0xff]  ;;  %v11468_v31 = vld [vmem:[#allocation19_spill] sm:$0xff]  ;;  %4695 = vst [vmem:[#allocation8 + $0x330] sm:$0xff] %v4183_v6 }
 0x365   :  { %v2882_v57 = vmul.f32 %v11462_v38, %v11285_v20  ;;  %v4186_v21 = vadd.f32 %v11464_v39, %v3530_v19  ;;  %v8418_v8 = vsel %vm2245_vm2, %v11341_v17, %v2242_v30  ;;  %v11466_v53 = vsub.f32 %v8175_v28, %v11287_v10  ;;  %v11470_v30 = vld [vmem:[#allocation186_spill] sm:$0xff]  ;;  %v11471_v38 = vld [vmem:[#allocation20_spill] sm:$0xff]  ;;  %4696 = vst [vmem:[#allocation8 + $0x338] sm:$0xff] %v4184_v5  ;;  %v11473_v14 = vld [vmem:[#allocation187_spill] sm:$0xff] }
 0x366   :  { %11465 = vst [vmem:[#allocation52_spill] sm:$0xff] %v8418_v8  ;;  %v3535_v33 = vmul.f32 %v11467_v59, %v2879_v24  ;;  %v4187_v7 = vadd.f32 %v11468_v31, %v3531_v44  ;;  %v11469_v17 = vsub.f32 %v8194_v16, %v11287_v10  ;;  %v3536_v43 = vmul.f32 %v11470_v30, %v2880_v32  ;;  %v11474_v31 = vld [vmem:[#allocation21_spill] sm:$0xff]  ;;  %v11476_v44 = vld [vmem:[#allocation188_spill] sm:$0xff] }
 0x367   :  { %v2883_v42 = vmul.f32 %v11466_v53, %v11285_v20  ;;  %v4188_v28 = vadd.f32 %v11471_v38, %v3532_v46  ;;  %v8436_v53 = vld [vmem:[#allocation2 + $0x420] sm:$0xff]  ;;  %v11472_v24 = vsub.f32 %v8204_v54, %v11287_v10  ;;  %v3537_v8 = vmul.f32 %v11473_v14, %v2881_v55  ;;  %4697 = vst [vmem:[#allocation8 + $0x340] sm:$0xff] %v4185_v0  ;;  %v11479_v46 = vld [vmem:[#allocation189_spill] sm:$0xff] }
 0x368   :  { %v2884_v19 = vmul.f32 %v11469_v17, %v11285_v20  ;;  %v4189_v16 = vadd.f32 %v11474_v31, %v3533_v23  ;;  %v8446_v17 = vld [vmem:[#allocation2 + $0x428] sm:$0xff]  ;;  %v11475_v32 = vsub.f32 %v8214_v62, %v11287_v10  ;;  %v3538_v38 = vmul.f32 %v11476_v44, %v2882_v57  ;;  %v11477_v30 = vld [vmem:[#allocation24_spill] sm:$0xff]  ;;  %4698 = vst [vmem:[#allocation8 + $0x348] sm:$0xff] %v4186_v21  ;;  %v11482_v23 = vld [vmem:[#allocation190_spill] sm:$0xff] }
 0x369   :  { %v2885_v6 = vmul.f32 %v11472_v24, %v11285_v20  ;;  %v4190_v54 = vadd.f32 %v11477_v30, %v3534_v50  ;;  %v8456_v24 = vld [vmem:[#allocation2 + $0x430] sm:$0xff]  ;;  %v11478_v55 = vsub.f32 %v8231_v9, %v11287_v10  ;;  %v3539_v31 = vmul.f32 %v11479_v46, %v2883_v42  ;;  %v11480_v14 = vld [vmem:[#allocation25_spill] sm:$0xff]  ;;  %4699 = vst [vmem:[#allocation8 + $0x350] sm:$0xff] %v4187_v7  ;;  %v11485_v21 = vld [vmem:[#allocation191_spill] sm:$0xff] }
 0x36a   :  { %v2886_v5 = vmul.f32 %v11475_v32, %v11285_v20  ;;  %v4191_v62 = vadd.f32 %v11480_v14, %v3535_v33  ;;  %v8466_v32 = vld [vmem:[#allocation2 + $0x438] sm:$0xff]  ;;  %v11481_v57 = vsub.f32 %v8241_v4, %v11287_v10  ;;  %v3540_v30 = vmul.f32 %v11482_v23, %v2884_v19  ;;  %v11483_v44 = vld [vmem:[#allocation26_spill] sm:$0xff]  ;;  %4700 = vst [vmem:[#allocation8 + $0x358] sm:$0xff] %v4188_v28  ;;  %v11489_v7 = vld [vmem:[#allocation28_spill] sm:$0xff] }
 0x36b   :  { %v2887_v0 = vmul.f32 %v11478_v55, %v11285_v20  ;;  %v4192_v9 = vadd.f32 %v11483_v44, %v3536_v43  ;;  %v8476_v55 = vld [vmem:[#allocation2 + $0x440] sm:$0xff]  ;;  %v11484_v42 = vsub.f32 %v8251_v41, %v11287_v10  ;;  %v3541_v14 = vmul.f32 %v11485_v21, %v2885_v6  ;;  %v11486_v46 = vld [vmem:[#allocation27_spill] sm:$0xff]  ;;  %4701 = vst [vmem:[#allocation8 + $0x360] sm:$0xff] %v4189_v16  ;;  %v8493_v59 = vld [vmem:[#allocation2 + $0x448] sm:$0xff] }
 0x36c   :  { %v2888_v50 = vmul.f32 %v11481_v57, %v11285_v20  ;;  %v4193_v4 = vadd.f32 %v11486_v46, %v3537_v8  ;;  %v2221_v19 = vsub.f32 1.5, %v8405_v60  ;;  %v11487_v43 = vsub.f32 %v8280_v25, %v11287_v10  ;;  %v11488_v57 = vld [vmem:[#allocation192_spill] sm:$0xff]  ;;  %4702 = vst [vmem:[#allocation8 + $0x368] sm:$0xff] %v4190_v54  ;;  %v11491_v6 = vld [vmem:[#allocation193_spill] sm:$0xff]  ;;  %v11494_v41 = vld [vmem:[#allocation194_spill] sm:$0xff] }
 0x36d   :  { %v2889_v33 = vmul.f32 %v11484_v42, %v11285_v20  ;;  %v3542_v44 = vmul.f32 %v11488_v57, %v2886_v5  ;;  %v4194_v23 = vadd.f32 %v11489_v7, %v3538_v38  ;;  %v11490_v8 = vsub.f32 %v8300_v11, %v11287_v10  ;;  %v11492_v42 = vld [vmem:[#allocation29_spill] sm:$0xff]  ;;  %4703 = vst [vmem:[#allocation8 + $0x370] sm:$0xff] %v4191_v62  ;;  %v11495_v57 = vld [vmem:[#allocation30_spill] sm:$0xff]  ;;  %v11497_v38 = vld [vmem:[#allocation195_spill] sm:$0xff] }
 0x36e   :  { %v2890_v28 = vmul.f32 %v11487_v43, %v11285_v20  ;;  %v3543_v16 = vmul.f32 %v11491_v6, %v2887_v0  ;;  %v4195_v25 = vadd.f32 %v11492_v42, %v3539_v31  ;;  %v8503_v43 = vld [vmem:[#allocation2 + $0x450] sm:$0xff]  ;;  %v11493_v5 = vsub.f32 %v8310_v34, %v11287_v10  ;;  %4704 = vst [vmem:[#allocation8 + $0x378] sm:$0xff] %v4192_v9  ;;  %v11498_v6 = vld [vmem:[#allocation31_spill] sm:$0xff]  ;;  %v11500_v31 = vld [vmem:[#allocation196_spill] sm:$0xff] }
 0x36f   :  { %v2891_v60 = vmul.f32 %v11490_v8, %v11285_v20  ;;  %v3544_v7 = vmul.f32 %v11494_v41, %v2888_v50  ;;  %v4196_v11 = vadd.f32 %v11495_v57, %v3540_v30  ;;  %v8513_v8 = vld [vmem:[#allocation2 + $0x458] sm:$0xff]  ;;  %v11496_v0 = vsub.f32 %v8321_v61, %v11287_v10  ;;  %4705 = vst [vmem:[#allocation8 + $0x380] sm:$0xff] %v4193_v4  ;;  %v8524_v50 = vld [vmem:[#allocation2 + $0x460] sm:$0xff]  ;;  %v11504_v41 = vld [vmem:[#allocation33_spill] sm:$0xff] }
 0x370   :  { %v2892_v54 = vmul.f32 %v11493_v5, %v11285_v20  ;;  %v3545_v42 = vmul.f32 %v11497_v38, %v2889_v33  ;;  %v4197_v34 = vadd.f32 %v11498_v6, %v3541_v14  ;;  %v11499_v9 = vsub.f32 %v8345_v51, %v11287_v10  ;;  %4706 = vst [vmem:[#allocation8 + $0x388] sm:$0xff] %v4194_v23  ;;  %v8534_v33 = vld [vmem:[#allocation2 + $0x468] sm:$0xff]  ;;  %v11506_v14 = vld [vmem:[#allocation198_spill] sm:$0xff] }
 0x371   :  { %v2893_v62 = vmul.f32 %v11496_v0, %v11285_v20  ;;  %v3546_v61 = vmul.f32 %v11500_v31, %v2890_v28  ;;  %v11501_v0 = vld [vmem:[#allocation32_spill] sm:$0xff]  ;;  %v11502_v4 = vsub.f32 %v8355_v35, %v11287_v10  ;;  %v11503_v6 = vld [vmem:[#allocation197_spill] sm:$0xff]  ;;  %v4199_v51 = vadd.f32 %v11504_v41, %v3543_v16  ;;  %4707 = vst [vmem:[#allocation8 + $0x390] sm:$0xff] %v4195_v25  ;;  %v8545_v28 = vld [vmem:[#allocation2 + $0x470] sm:$0xff] }
 0x372   :  { %v2894_v5 = vmul.f32 %v11499_v9, %v11285_v20  ;;  %v4198_v57 = vadd.f32 %v11501_v0, %v3542_v44  ;;  %v3547_v38 = vmul.f32 %v11503_v6, %v2891_v60  ;;  %v11505_v23 = vsub.f32 %v8365_v37, %v11287_v10  ;;  %4708 = vst [vmem:[#allocation8 + $0x398] sm:$0xff] %v4196_v11  ;;  %v8555_v60 = vld [vmem:[#allocation2 + $0x478] sm:$0xff] }
 0x373   :  { %v2895_v30 = vmul.f32 %v11502_v4, %v11285_v20  ;;  %v3548_v35 = vmul.f32 %v11506_v14, %v2892_v54  ;;  %v11507_v4 = vld [vmem:[#allocation34_spill] sm:$0xff]  ;;  %v11508_v25 = vsub.f32 %v8375_v58, %v11452_v48  ;;  %v11509_v41 = vld [vmem:[#allocation199_spill] sm:$0xff]  ;;  %4709 = vst [vmem:[#allocation8 + $0x3a0] sm:$0xff] %v4197_v34  ;;  %v11511_v37 = vsub.f32 %v8385_v12, %v11452_v48  ;;  %v11512_v54 = vld [vmem:[#allocation200_spill] sm:$0xff] }
 0x374   :  { %v2896_v9 = vmul.f32 %v11505_v23, %v11285_v20  ;;  %v4200_v0 = vadd.f32 %v11507_v4, %v3544_v7  ;;  %v3549_v6 = vmul.f32 %v11509_v41, %v2893_v62  ;;  %v11510_v31 = vld [vmem:[#allocation35_spill] sm:$0xff]  ;;  %v2222_v20 = vmul.f32 %v8085_v52, %v2221_v19  ;;  %v11513_v23 = vld [vmem:[#allocation41_spill] sm:$0xff]  ;;  %4710 = vst [vmem:[#allocation8 + $0x3a8] sm:$0xff] %v4198_v57  ;;  %v8572_v4 = vld [vmem:[#allocation2 + $0x480] sm:$0xff] }
 0x375   :  { %v2897_v44 = vmul.f32 %v11508_v25, %v8069_v18  ;;  %v4201_v10 = vadd.f32 %v11510_v31, %v3545_v42  ;;  %v2898_v7 = vmul.f32 %v11511_v37, %v8069_v18  ;;  %v3550_v11 = vmul.f32 %v11512_v54, %v2894_v5  ;;  %v11515_v62 = vld [vmem:[#allocation201_spill] sm:$0xff]  ;;  %v11516_v25 = vld [vmem:[#allocation42_spill] sm:$0xff]  ;;  %4711 = vst [vmem:[#allocation8 + $0x3b0] sm:$0xff] %v4199_v51  ;;  %v11519_v54 = vld [vmem:[#allocation43_spill] sm:$0xff] }
 0x376   :  { %v4202_v16 = vadd.f32 %v11513_v23, %v3546_v61  ;;  %v11514_v42 = vsub.f32 %v8395_v2, %v11452_v48  ;;  %v3551_v34 = vmul.f32 %v11515_v62, %v2895_v30  ;;  %v4203_v12 = vadd.f32 %v11516_v25, %v3547_v38  ;;  %v8582_v37 = vld [vmem:[#allocation2 + $0x488] sm:$0xff]  ;;  %v11518_v58 = vld [vmem:[#allocation202_spill] sm:$0xff]  ;;  %4712 = vst [vmem:[#allocation8 + $0x3b8] sm:$0xff] %v4200_v0  ;;  %v11524_v38 = vld [vmem:[#allocation39_spill] sm:$0xff] }
 0x377   :  { %v11517_v5 = vsub.f32 %v8426_v13, %v11452_v48  ;;  %v3552_v23 = vmul.f32 %v11518_v58, %v2896_v9  ;;  %v4204_v2 = vadd.f32 %v11519_v54, %v3548_v35  ;;  %v11520_v30 = vsub.f32 %v8436_v53, %v11452_v48  ;;  %v11521_v57 = vld [vmem:[#allocation37_spill] sm:$0xff]  ;;  %v11522_v62 = vld [vmem:[#allocation98_spill] sm:$0xff]  ;;  %4713 = vst [vmem:[#allocation8 + $0x3c0] sm:$0xff] %v4201_v10  ;;  %v11527_v0 = vld [vmem:[#allocation40_spill] sm:$0xff] }
 0x378   :  { %v2899_v19 = vmul.f32 %v11514_v42, %v8069_v18  ;;  %v8592_v42 = vld [vmem:[#allocation2 + $0x490] sm:$0xff]  ;;  %v3553_v25 = vmul.f32 %v11521_v57, %v2897_v44  ;;  %v4205_v13 = vadd.f32 %v11522_v62, %v3549_v6  ;;  %v11523_v9 = vsub.f32 %v8446_v17, %v11452_v48  ;;  %4714 = vst [vmem:[#allocation8 + $0x3c8] sm:$0xff] %v4202_v16  ;;  %v11528_v57 = vld [vmem:[#allocation13_spill] sm:$0xff]  ;;  %v11530_v6 = vld [vmem:[#allocation44_spill] sm:$0xff] }
 0x379   :  { %v2900_v61 = vmul.f32 %v11517_v5, %v8069_v18  ;;  %v2901_v51 = vmul.f32 %v11520_v30, %v8069_v18  ;;  %v8602_v5 = vld [vmem:[#allocation2 + $0x498] sm:$0xff]  ;;  %v3554_v54 = vmul.f32 %v11524_v38, %v2898_v7  ;;  %v11525_v58 = vld [vmem:[#allocation50_spill] sm:$0xff]  ;;  %v8612_v30 = vld [vmem:[#allocation2 + $0x4a0] sm:$0xff]  ;;  %v11526_v44 = vsub.f32 %v8456_v24, %v11452_v48  ;;  %4715 = vst [vmem:[#allocation8 + $0x3d0] sm:$0xff] %v4203_v12 }
 0x37a   :  { %v2902_v35 = vmul.f32 %v11523_v9, %v8069_v18  ;;  %v4206_v53 = vadd.f32 %v11525_v58, %v3550_v11  ;;  %v3555_v62 = vmul.f32 %v11527_v0, %v2899_v19  ;;  %v4207_v17 = vadd.f32 %v11528_v57, %v3551_v34  ;;  %v8622_v9 = vld [vmem:[#allocation2 + $0x4a8] sm:$0xff]  ;;  %4716 = vst [vmem:[#allocation8 + $0x3d8] sm:$0xff] %v4204_v2  ;;  %v8636_v19 = vld [vmem:[#allocation2 + $0x4b0] sm:$0xff]  ;;  %v11536_v16 = vld [vmem:[#allocation108_spill] sm:$0xff] }
 0x37b   :  { %v2903_v10 = vmul.f32 %v11526_v44, %v8069_v18  ;;  %v11529_v7 = vsub.f32 %v8466_v32, %v11452_v48  ;;  %v3556_v58 = vmul.f32 %v11530_v6, %v2900_v61  ;;  %v11531_v38 = vld [vmem:[#allocation45_spill] sm:$0xff]  ;;  %v11532_v32 = vsub.f32 %v8476_v55, %v11452_v48  ;;  %4717 = vst [vmem:[#allocation8 + $0x3e0] sm:$0xff] %v4205_v13  ;;  %v8655_v55 = vld [vmem:[#allocation2 + $0x4b8] sm:$0xff] }
 0x37c   :  { %v4208_v24 = vadd.f32 %v11531_v38, %v3552_v23  ;;  %v3557_v61 = vmul.f32 %v11326_v1, %v2901_v51  ;;  %v4209_v23 = vadd.f32 %v7544_v45, %v3553_v25  ;;  %v8647_v2 = vsel %vm2225_vm5, %v8085_v52, %v2222_v20  ;;  %4718 = vst [vmem:[#allocation8 + $0x3e8] sm:$0xff] %v4206_v53  ;;  %v11538_v13 = vld [vmem:[#allocation109_spill] sm:$0xff] }
 0x37d   :  { %v2904_v11 = vmul.f32 %v11529_v7, %v8069_v18  ;;  %v2905_v12 = vmul.f32 %v11532_v32, %v8069_v18  ;;  %11533 = vst [vmem:[#allocation47_spill] sm:$0xff] %v8647_v2  ;;  %v11534_v15 = vsub.f32 %v8493_v59, %v11452_v48  ;;  %v11535_v7 = vld [vmem:[#allocation104_spill] sm:$0xff]  ;;  %v4210_v38 = vadd.f32 %v11536_v16, %v3554_v54  ;;  %v11541_v2 = vld [vmem:[#allocation110_spill] sm:$0xff]  ;;  %v11543_v54 = vld [vmem:[#allocation111_spill] sm:$0xff] }
 0x37e   :  { %v3558_v34 = vmul.f32 %v11535_v7, %v2902_v35  ;;  %v11537_v52 = vsub.f32 %v8503_v43, %v11452_v48  ;;  %v3559_v25 = vmul.f32 %v11333_v27, %v2903_v10  ;;  %v4211_v59 = vadd.f32 %v11538_v13, %v3555_v62  ;;  %4719 = vst [vmem:[#allocation8 + $0x3f0] sm:$0xff] %v4207_v17  ;;  %v8665_v32 = vld [vmem:[#allocation2 + $0x4c0] sm:$0xff]  ;;  %v11544_v27 = vld [vmem:[#allocation113_spill] sm:$0xff] }
 0x37f   :  { %v2906_v44 = vmul.f32 %v11534_v15, %v8069_v18  ;;  %v11539_v35 = vsub.f32 %v8513_v8, %v11452_v48  ;;  %v11540_v15 = vld [vmem:[#allocation106_spill] sm:$0xff]  ;;  %v4212_v43 = vadd.f32 %v11541_v2, %v3556_v58  ;;  %4720 = vst [vmem:[#allocation8 + $0x3f8] sm:$0xff] %v4208_v24  ;;  %v11542_v10 = vsub.f32 %v8524_v50, %v11452_v48  ;;  %v11546_v2 = vld [vmem:[#allocation116_spill] sm:$0xff] }
 0x380   :  { %v2907_v20 = vmul.f32 %v11537_v52, %v8069_v18  ;;  %v3560_v51 = vmul.f32 %v11540_v15, %v2904_v11  ;;  %v8675_v52 = vld [vmem:[#allocation2 + $0x4c8] sm:$0xff]  ;;  %v3561_v13 = vmul.f32 %v11543_v54, %v2905_v12  ;;  %v4213_v8 = vadd.f32 %v11544_v27, %v3557_v61  ;;  %4721 = vst [vmem:[#allocation8 + $0x400] sm:$0xff] %v4209_v23  ;;  %v11550_v12 = vld [vmem:[#allocation115_spill] sm:$0xff] }
 0x381   :  { %v2908_v53 = vmul.f32 %v11539_v35, %v8069_v18  ;;  %v2909_v17 = vmul.f32 %v11542_v10, %v8069_v18  ;;  %v8685_v35 = vld [vmem:[#allocation2 + $0x4d0] sm:$0xff]  ;;  %v11545_v11 = vsub.f32 %v8534_v33, %v11452_v48  ;;  %v3562_v62 = vmul.f32 %v11344_v56, %v2906_v44  ;;  %4722 = vst [vmem:[#allocation8 + $0x408] sm:$0xff] %v4210_v38  ;;  %v8695_v10 = vld [vmem:[#allocation2 + $0x4d8] sm:$0xff]  ;;  %v11548_v27 = vld [vmem:[#allocation117_spill] sm:$0xff] }
 0x382   :  { %v4214_v50 = vadd.f32 %v11546_v2, %v3558_v34  ;;  %v11547_v61 = vsub.f32 %v8545_v28, %v11452_v48  ;;  %v3563_v58 = vmul.f32 %v11347_v63, %v2907_v20  ;;  %v4215_v33 = vadd.f32 %v11548_v27, %v3559_v25  ;;  %4723 = vst [vmem:[#allocation8 + $0x410] sm:$0xff] %v4211_v59  ;;  %v11551_v56 = vld [vmem:[#allocation118_spill] sm:$0xff]  ;;  %v11553_v38 = vld [vmem:[#allocation119_spill] sm:$0xff]  ;;  %v11554_v63 = vld [vmem:[#allocation120_spill] sm:$0xff] }
 0x383   :  { %v2910_v24 = vmul.f32 %v11545_v11, %v8069_v18  ;;  %v8705_v11 = vld [vmem:[#allocation2 + $0x4e0] sm:$0xff]  ;;  %v11549_v34 = vsub.f32 %v8555_v60, %v11452_v48  ;;  %v3564_v2 = vmul.f32 %v11550_v12, %v2908_v53  ;;  %v4216_v28 = vadd.f32 %v11551_v56, %v3560_v51  ;;  %4724 = vst [vmem:[#allocation8 + $0x418] sm:$0xff] %v4212_v43 }
 0x384   :  { %v2911_v23 = vmul.f32 %v11547_v61, %v8069_v18  ;;  %v8715_v61 = vld [vmem:[#allocation2 + $0x4e8] sm:$0xff]  ;;  %v11552_v25 = vsub.f32 %v8572_v4, %v11452_v48  ;;  %v3565_v27 = vmul.f32 %v11553_v38, %v2909_v17  ;;  %v4217_v60 = vadd.f32 %v11554_v63, %v3561_v13  ;;  %4725 = vst [vmem:[#allocation8 + $0x420] sm:$0xff] %v4213_v8 }
 0x385   :  { %v2912_v44 = vmul.f32 %v11549_v34, %v8069_v18  ;;  %v8725_v34 = vld [vmem:[#allocation2 + $0x4f0] sm:$0xff]  ;;  %v11555_v53 = vsub.f32 %v8582_v37, %v11452_v48  ;;  %v3566_v20 = vmul.f32 %v11356_v26, %v2910_v24  ;;  %v4218_v4 = vadd.f32 %v7593_v22, %v3562_v62  ;;  %4726 = vst [vmem:[#allocation8 + $0x428] sm:$0xff] %v4214_v50  ;;  %v11558_v13 = vld [vmem:[#allocation125_spill] sm:$0xff]  ;;  %v11561_v62 = vld [vmem:[#allocation127_spill] sm:$0xff] }
 0x386   :  { %v2913_v59 = vmul.f32 %v11552_v25, %v8069_v18  ;;  %v8735_v25 = vld [vmem:[#allocation2 + $0x4f8] sm:$0xff]  ;;  %v11556_v17 = vsub.f32 %v8592_v42, %v11452_v48  ;;  %v3567_v51 = vmul.f32 %v11360_v40, %v2911_v23  ;;  %v4219_v37 = vadd.f32 %v11361_v47, %v3563_v58  ;;  %4727 = vst [vmem:[#allocation8 + $0x430] sm:$0xff] %v4215_v33  ;;  %v11559_v26 = vld [vmem:[#allocation126_spill] sm:$0xff]  ;;  %v11562_v40 = vld [vmem:[#allocation128_spill] sm:$0xff] }
 0x387   :  { %v2914_v43 = vmul.f32 %v11555_v53, %v8069_v18  ;;  %v8745_v53 = vld [vmem:[#allocation2 + $0x500] sm:$0xff]  ;;  %v11557_v24 = vsub.f32 %v8602_v5, %v11452_v48  ;;  %v3568_v22 = vmul.f32 %v11558_v13, %v2912_v44  ;;  %v4220_v42 = vadd.f32 %v11559_v26, %v3564_v2  ;;  %4728 = vst [vmem:[#allocation8 + $0x438] sm:$0xff] %v4216_v28  ;;  %v11564_v26 = vld [vmem:[#allocation130_spill] sm:$0xff]  ;;  %v11566_v2 = vld [vmem:[#allocation131_spill] sm:$0xff] }
 0x388   :  { %v2915_v8 = vmul.f32 %v11556_v17, %v8069_v18  ;;  %v8755_v17 = vld [vmem:[#allocation2 + $0x508] sm:$0xff]  ;;  %v11560_v23 = vsub.f32 %v8612_v30, %v11452_v48  ;;  %v3569_v47 = vmul.f32 %v11561_v62, %v2913_v59  ;;  %v4221_v5 = vadd.f32 %v11562_v40, %v3565_v27  ;;  %4729 = vst [vmem:[#allocation8 + $0x440] sm:$0xff] %v4217_v60  ;;  %v11567_v62 = vld [vmem:[#allocation132_spill] sm:$0xff]  ;;  %v11594_v13 = vld [vmem:[#allocation150_spill] sm:$0xff] }
 0x389   :  { %v2916_v50 = vmul.f32 %v11557_v24, %v8069_v18  ;;  %v8765_v24 = vld [vmem:[#allocation2 + $0x510] sm:$0xff]  ;;  %v11563_v44 = vsub.f32 %v8622_v9, %v11452_v48  ;;  %v3570_v58 = vmul.f32 %v11369_v29, %v2914_v43  ;;  %v4222_v30 = vadd.f32 %v11564_v26, %v3566_v20  ;;  %4730 = vst [vmem:[#allocation8 + $0x448] sm:$0xff] %v4218_v4  ;;  %v11569_v27 = vld [vmem:[#allocation133_spill] sm:$0xff]  ;;  %v11572_v20 = vld [vmem:[#allocation135_spill] sm:$0xff] }
 0x38a   :  { %v2917_v33 = vmul.f32 %v11560_v23, %v8069_v18  ;;  %v8775_v23 = vld [vmem:[#allocation2 + $0x518] sm:$0xff]  ;;  %v11565_v59 = vsub.f32 %v8636_v19, %v11452_v48  ;;  %v3571_v40 = vmul.f32 %v11566_v2, %v2915_v8  ;;  %v4223_v9 = vadd.f32 %v11567_v62, %v3567_v51  ;;  %4731 = vst [vmem:[#allocation8 + $0x450] sm:$0xff] %v4219_v37  ;;  %v11570_v29 = vld [vmem:[#allocation134_spill] sm:$0xff]  ;;  %v11573_v2 = vld [vmem:[#allocation136_spill] sm:$0xff] }
 0x38b   :  { %v2918_v28 = vmul.f32 %v11563_v44, %v8069_v18  ;;  %v8785_v44 = vld [vmem:[#allocation2 + $0x520] sm:$0xff]  ;;  %v11568_v43 = vsub.f32 %v8655_v55, %v11452_v48  ;;  %v3572_v26 = vmul.f32 %v11569_v27, %v2916_v50  ;;  %v4224_v19 = vadd.f32 %v11570_v29, %v3568_v22  ;;  %4732 = vst [vmem:[#allocation8 + $0x458] sm:$0xff] %v4220_v42  ;;  %v11575_v51 = vld [vmem:[#allocation137_spill] sm:$0xff]  ;;  %v11576_v27 = vld [vmem:[#allocation138_spill] sm:$0xff] }
 0x38c   :  { %v2919_v60 = vmul.f32 %v11565_v59, %v8069_v18  ;;  %v8795_v59 = vld [vmem:[#allocation2 + $0x528] sm:$0xff]  ;;  %v11571_v8 = vsub.f32 %v8665_v32, %v11452_v48  ;;  %v3573_v62 = vmul.f32 %v11572_v20, %v2917_v33  ;;  %v4225_v55 = vadd.f32 %v11573_v2, %v3569_v47  ;;  %4733 = vst [vmem:[#allocation8 + $0x460] sm:$0xff] %v4221_v5  ;;  %v11578_v22 = vld [vmem:[#allocation139_spill] sm:$0xff]  ;;  %v11579_v20 = vld [vmem:[#allocation140_spill] sm:$0xff] }
 0x38d   :  { %v2920_v4 = vmul.f32 %v11568_v43, %v8069_v18  ;;  %v8805_v43 = vld [vmem:[#allocation2 + $0x530] sm:$0xff]  ;;  %v11574_v50 = vsub.f32 %v8675_v52, %v11452_v48  ;;  %v3574_v29 = vmul.f32 %v11575_v51, %v2918_v28  ;;  %v4226_v32 = vadd.f32 %v11576_v27, %v3570_v58  ;;  %4734 = vst [vmem:[#allocation8 + $0x468] sm:$0xff] %v4222_v30  ;;  %v11581_v47 = vld [vmem:[#allocation141_spill] sm:$0xff]  ;;  %v11584_v58 = vld [vmem:[#allocation143_spill] sm:$0xff] }
 0x38e   :  { %v2921_v37 = vmul.f32 %v11571_v8, %v8069_v18  ;;  %v8815_v8 = vld [vmem:[#allocation2 + $0x538] sm:$0xff]  ;;  %v11577_v33 = vsub.f32 %v8685_v35, %v11452_v48  ;;  %v3575_v2 = vmul.f32 %v11578_v22, %v2919_v60  ;;  %v4227_v52 = vadd.f32 %v11579_v20, %v3571_v40  ;;  %4735 = vst [vmem:[#allocation8 + $0x470] sm:$0xff] %v4223_v9  ;;  %v11582_v51 = vld [vmem:[#allocation142_spill] sm:$0xff]  ;;  %v11585_v22 = vld [vmem:[#allocation144_spill] sm:$0xff] }
 0x38f   :  { %v2922_v42 = vmul.f32 %v11574_v50, %v8069_v18  ;;  %v8825_v50 = vld [vmem:[#allocation2 + $0x540] sm:$0xff]  ;;  %v11580_v28 = vsub.f32 %v8695_v10, %v11452_v48  ;;  %v3576_v27 = vmul.f32 %v11581_v47, %v2920_v4  ;;  %v4228_v35 = vadd.f32 %v11582_v51, %v3572_v26  ;;  %4736 = vst [vmem:[#allocation8 + $0x478] sm:$0xff] %v4224_v19  ;;  %v11587_v40 = vld [vmem:[#allocation145_spill] sm:$0xff]  ;;  %v11588_v47 = vld [vmem:[#allocation146_spill] sm:$0xff] }
 0x390   :  { %v2923_v5 = vmul.f32 %v11577_v33, %v8069_v18  ;;  %v8835_v33 = vld [vmem:[#allocation2 + $0x548] sm:$0xff]  ;;  %v11583_v60 = vsub.f32 %v8705_v11, %v11452_v48  ;;  %v3577_v20 = vmul.f32 %v11584_v58, %v2921_v37  ;;  %v4229_v10 = vadd.f32 %v11585_v22, %v3573_v62  ;;  %4737 = vst [vmem:[#allocation8 + $0x480] sm:$0xff] %v4225_v55  ;;  %v8855_v37 = vld [vmem:[#allocation2 + $0x558] sm:$0xff] }
 0x391   :  { %v2924_v30 = vmul.f32 %v11580_v28, %v8069_v18  ;;  %v8845_v28 = vld [vmem:[#allocation2 + $0x550] sm:$0xff]  ;;  %v11586_v4 = vsub.f32 %v8715_v61, %v11452_v48  ;;  %v3578_v51 = vmul.f32 %v11587_v40, %v2922_v42  ;;  %v4230_v11 = vadd.f32 %v11588_v47, %v3574_v29  ;;  %4738 = vst [vmem:[#allocation8 + $0x488] sm:$0xff] %v4226_v32  ;;  %v11590_v22 = vld [vmem:[#allocation147_spill] sm:$0xff]  ;;  %v11591_v61 = vld [vmem:[#allocation148_spill] sm:$0xff] }
 0x392   :  { %v2925_v9 = vmul.f32 %v11583_v60, %v8069_v18  ;;  %v2136_v60 = vpop.xlane.xlu0 %2135  ;;  %v11589_v55 = vsub.f32 %v8725_v34, %v11452_v48  ;;  %v3579_v58 = vmul.f32 %v11590_v22, %v2923_v5  ;;  %4739 = vst [vmem:[#allocation8 + $0x490] sm:$0xff] %v4227_v52  ;;  %v8865_v42 = vld [vmem:[#allocation2 + $0x560] sm:$0xff]  ;;  %v11592_v32 = vsub.f32 %v8735_v25, %v11452_v48  ;;  %v11593_v47 = vld [vmem:[#allocation149_spill] sm:$0xff]  ;;  %v11596_v29 = vld [vmem:[#allocation151_spill] sm:$0xff] }
 0x393   :  { %v2926_v19 = vmul.f32 %v11586_v4, %v8069_v18  ;;  %v4231_v4 = vadd.f32 %v11591_v61, %v3575_v2  ;;  %v3580_v40 = vmul.f32 %v11593_v47, %v2924_v30  ;;  %v4232_v34 = vadd.f32 %v11594_v13, %v3576_v27  ;;  %4740 = vst [vmem:[#allocation8 + $0x498] sm:$0xff] %v4228_v35  ;;  %v11597_v22 = vld [vmem:[#allocation152_spill] sm:$0xff]  ;;  %v11600_v13 = vld [vmem:[#allocation153_spill] sm:$0xff]  ;;  %v11601_v47 = vld [vmem:[#allocation154_spill] sm:$0xff] }
 0x394   :  { %v2927_v26 = vmul.f32 %v11589_v55, %v8069_v18  ;;  %v2928_v62 = vmul.f32 %v11592_v32, %v8069_v18  ;;  %v8875_v55 = vld [vmem:[#allocation2 + $0x568] sm:$0xff]  ;;  %v11595_v5 = vsub.f32 %v8745_v53, %v11452_v48  ;;  %v3581_v61 = vmul.f32 %v11596_v29, %v2925_v9  ;;  %4741 = vst [vmem:[#allocation8 + $0x4a0] sm:$0xff] %v4229_v10  ;;  %v11598_v32 = vld [vmem:[#allocation12_spill] sm:$0xff]  ;;  %v8894_v53 = vld [vmem:[#allocation2 + $0x570] sm:$0xff] }
 0x395   :  { %v4233_v25 = vadd.f32 %v11597_v22, %v3577_v20  ;;  %v8886_v30 = vmul.f32 %v2136_v60, %v11598_v32  ;;  %v11599_v27 = vsub.f32 %v8755_v17, %v11452_v48  ;;  %v3582_v2 = vmul.f32 %v11600_v13, %v2926_v19  ;;  %4742 = vst [vmem:[#allocation8 + $0x4a8] sm:$0xff] %v4230_v11  ;;  %v11603_v60 = vld [vmem:[#allocation155_spill] sm:$0xff]  ;;  %v11604_v32 = vld [vmem:[#allocation156_spill] sm:$0xff]  ;;  %v11606_v9 = vld [vmem:[#allocation157_spill] sm:$0xff] }
 0x396   :  { %v2929_v52 = vmul.f32 %v11595_v5, %v8069_v18  ;;  %v4234_v63 = vadd.f32 %v11601_v47, %v3578_v51  ;;  %v11602_v20 = vsub.f32 %v8765_v24, %v11452_v48  ;;  %v3583_v5 = vmul.f32 %v11603_v60, %v2927_v26  ;;  %4743 = vst [vmem:[#allocation8 + $0x4b0] sm:$0xff] %v4231_v4  ;;  %v11607_v13 = vld [vmem:[#allocation158_spill] sm:$0xff]  ;;  %v11609_v51 = vld [vmem:[#allocation159_spill] sm:$0xff]  ;;  %v11610_v60 = vld [vmem:[#allocation160_spill] sm:$0xff] }
 0x397   :  { %v2930_v35 = vmul.f32 %v11599_v27, %v8069_v18  ;;  %v4235_v17 = vadd.f32 %v11604_v32, %v3579_v58  ;;  %v8904_v27 = vld [vmem:[#allocation2 + $0x578] sm:$0xff]  ;;  %v11605_v19 = vsub.f32 %v8775_v23, %v11452_v48  ;;  %v3584_v47 = vmul.f32 %v11606_v9, %v2928_v62  ;;  %4744 = vst [vmem:[#allocation8 + $0x4b8] sm:$0xff] %v4232_v34  ;;  %v11612_v58 = vld [vmem:[#allocation161_spill] sm:$0xff]  ;;  %v11613_v9 = vld [vmem:[#allocation162_spill] sm:$0xff] }
 0x398   :  { %v2931_v10 = vmul.f32 %v11602_v20, %v8069_v18  ;;  %v4236_v24 = vadd.f32 %v11607_v13, %v3580_v40  ;;  %v8914_v20 = vld [vmem:[#allocation2 + $0x580] sm:$0xff]  ;;  %v11608_v26 = vsub.f32 %v8785_v44, %v11452_v48  ;;  %v3585_v32 = vmul.f32 %v11609_v51, %v2929_v52  ;;  %4745 = vst [vmem:[#allocation8 + $0x4c0] sm:$0xff] %v4233_v25  ;;  %v11615_v40 = vld [vmem:[#allocation163_spill] sm:$0xff] }
 0x399   :  { %v2932_v11 = vmul.f32 %v11605_v19, %v8069_v18  ;;  %v4237_v23 = vadd.f32 %v11610_v60, %v3581_v61  ;;  %v8924_v19 = vld [vmem:[#allocation2 + $0x588] sm:$0xff]  ;;  %v11611_v62 = vsub.f32 %v8795_v59, %v11452_v48  ;;  %v3586_v13 = vmul.f32 %v11612_v58, %v2930_v35  ;;  %4746 = vst [vmem:[#allocation8 + $0x4c8] sm:$0xff] %v4234_v63  ;;  %v11616_v51 = vld [vmem:[#allocation164_spill] sm:$0xff]  ;;  %v11619_v58 = vld [vmem:[#allocation166_spill] sm:$0xff] }
 0x39a   :  { %v2933_v4 = vmul.f32 %v11608_v26, %v8069_v18  ;;  %v4238_v44 = vadd.f32 %v11613_v9, %v3582_v2  ;;  %v8934_v26 = vld [vmem:[#allocation2 + $0x590] sm:$0xff]  ;;  %v11614_v52 = vsub.f32 %v8805_v43, %v11452_v48  ;;  %v3587_v60 = vmul.f32 %v11615_v40, %v2931_v10  ;;  %4747 = vst [vmem:[#allocation8 + $0x4d0] sm:$0xff] %v4235_v17  ;;  %v11618_v61 = vld [vmem:[#allocation165_spill] sm:$0xff]  ;;  %v11621_v63 = vld [vmem:[#allocation167_spill] sm:$0xff] }
 0x39b   :  { %v2934_v34 = vmul.f32 %v11611_v62, %v8069_v18  ;;  %v4239_v59 = vadd.f32 %v11616_v51, %v3583_v5  ;;  %v8944_v62 = vld [vmem:[#allocation2 + $0x598] sm:$0xff]  ;;  %v11617_v2 = vsub.f32 %v8815_v8, %v11452_v48  ;;  %v3588_v9 = vmul.f32 %v11618_v61, %v2932_v11  ;;  %4748 = vst [vmem:[#allocation8 + $0x4d8] sm:$0xff] %v4236_v24  ;;  %v11622_v40 = vld [vmem:[#allocation168_spill] sm:$0xff]  ;;  %v11626_v61 = vld [vmem:[#allocation170_spill] sm:$0xff] }
 0x39c   :  { %v2935_v25 = vmul.f32 %v11614_v52, %v8069_v18  ;;  %v4240_v43 = vadd.f32 %v11619_v58, %v3584_v47  ;;  %v8954_v52 = vld [vmem:[#allocation2 + $0x5a0] sm:$0xff]  ;;  %v11620_v5 = vsub.f32 %v8825_v50, %v11452_v48  ;;  %v3589_v51 = vmul.f32 %v11621_v63, %v2933_v4  ;;  %4749 = vst [vmem:[#allocation8 + $0x4e0] sm:$0xff] %v4237_v23  ;;  %v11625_v58 = vld [vmem:[#allocation169_spill] sm:$0xff]  ;;  %v11628_v23 = vld [vmem:[#allocation171_spill] sm:$0xff] }
 0x39d   :  { %v2936_v35 = vmul.f32 %v11617_v2, %v8069_v18  ;;  %v4241_v8 = vadd.f32 %v11622_v40, %v3585_v32  ;;  %v11623_v2 = vld [vmem:[#allocation58_spill] sm:$0xff]  ;;  %v11624_v47 = vsub.f32 %v8835_v33, %v11452_v48  ;;  %v3590_v10 = vmul.f32 %v11625_v58, %v2934_v34  ;;  %4750 = vst [vmem:[#allocation8 + $0x4e8] sm:$0xff] %v4238_v44  ;;  %v8972_v50 = vld [vmem:[#allocation2 + $0x5a8] sm:$0xff] }
 0x39e   :  { %v2937_v17 = vmul.f32 %v11620_v5, %v8069_v18  ;;  %v2160_v11 = vsub.f32 %v8886_v30, %v11623_v2  ;;  %v4242_v22 = vadd.f32 %v11626_v61, %v3586_v13  ;;  %v11627_v32 = vsub.f32 %v8845_v28, %v11452_v48  ;;  %v11629_v2 = vld [vmem:[#allocation172_spill] sm:$0xff]  ;;  %4751 = vst [vmem:[#allocation8 + $0x4f0] sm:$0xff] %v4239_v59  ;;  %v11631_v4 = vld [vmem:[#allocation173_spill] sm:$0xff]  ;;  %v11632_v58 = vld [vmem:[#allocation174_spill] sm:$0xff] }
 0x39f   :  { %v2938_v24 = vmul.f32 %v11624_v47, %v8069_v18  ;;  %v3591_v5 = vmul.f32 %v11628_v23, %v2935_v25  ;;  %v4243_v33 = vadd.f32 %v11629_v2, %v3587_v60  ;;  %v8982_v47 = vld [vmem:[#allocation2 + $0x5b0] sm:$0xff]  ;;  %v11630_v34 = vsub.f32 %v8855_v37, %v11452_v48  ;;  %4752 = vst [vmem:[#allocation8 + $0x4f8] sm:$0xff] %v4240_v43  ;;  %v11634_v13 = vld [vmem:[#allocation175_spill] sm:$0xff]  ;;  %v11635_v23 = vld [vmem:[#allocation176_spill] sm:$0xff] }
 0x3a0   :  { %v2939_v30 = vmul.f32 %v11627_v32, %v8069_v18  ;;  %v3592_v61 = vmul.f32 %v11631_v4, %v2936_v35  ;;  %v4244_v28 = vadd.f32 %v11632_v58, %v3588_v9  ;;  %v8992_v32 = vld [vmem:[#allocation2 + $0x5b8] sm:$0xff]  ;;  %v11633_v25 = vsub.f32 %v8865_v42, %v11452_v48  ;;  %4753 = vst [vmem:[#allocation8 + $0x500] sm:$0xff] %v4241_v8  ;;  %v11637_v60 = vld [vmem:[#allocation177_spill] sm:$0xff]  ;;  %v11638_v4 = vld [vmem:[#allocation178_spill] sm:$0xff] }
 0x3a1   :  { %v2940_v44 = vmul.f32 %v11630_v34, %v8069_v18  ;;  %v3593_v2 = vmul.f32 %v11634_v13, %v2937_v17  ;;  %v4245_v37 = vadd.f32 %v11635_v23, %v3589_v51  ;;  %v9002_v34 = vld [vmem:[#allocation2 + $0x5c0] sm:$0xff]  ;;  %v11636_v35 = vsub.f32 %v8875_v55, %v11452_v48  ;;  %4754 = vst [vmem:[#allocation8 + $0x508] sm:$0xff] %v4242_v22  ;;  %v11640_v9 = vld [vmem:[#allocation179_spill] sm:$0xff] }
 0x3a2   :  { %v2941_v59 = vmul.f32 %v11633_v25, %v8069_v18  ;;  %v3594_v58 = vmul.f32 %v11637_v60, %v2938_v24  ;;  %v4246_v42 = vadd.f32 %v11638_v4, %v3590_v10  ;;  %v9012_v25 = vld [vmem:[#allocation2 + $0x5c8] sm:$0xff]  ;;  %v11639_v17 = vsub.f32 %v8894_v53, %v11452_v48  ;;  %v11641_v13 = vld [vmem:[#allocation180_spill] sm:$0xff]  ;;  %4755 = vst [vmem:[#allocation8 + $0x510] sm:$0xff] %v4243_v33  ;;  %v11644_v22 = vld [vmem:[#allocation183_spill] sm:$0xff] }
 0x3a3   :  { %v2942_v43 = vmul.f32 %v11636_v35, %v8069_v18  ;;  %v3595_v23 = vmul.f32 %v11640_v9, %v2939_v30  ;;  %v4247_v55 = vadd.f32 %v11641_v13, %v3591_v5  ;;  %v9022_v35 = vld [vmem:[#allocation2 + $0x5d0] sm:$0xff]  ;;  %v11642_v10 = vsub.f32 %v8904_v27, %v11452_v48  ;;  %4756 = vst [vmem:[#allocation8 + $0x518] sm:$0xff] %v4244_v28  ;;  %v11645_v9 = vld [vmem:[#allocation17_spill] sm:$0xff] }
 0x3a4   :  { %v2943_v8 = vmul.f32 %v11639_v17, %v8069_v18  ;;  %v3596_v51 = vmul.f32 %v11457_v49, %v2940_v44  ;;  %v4248_v53 = vadd.f32 %v11458_v3, %v3592_v61  ;;  %v9032_v17 = vld [vmem:[#allocation2 + $0x5d8] sm:$0xff]  ;;  %v11643_v5 = vsub.f32 %v8914_v20, %v11452_v48  ;;  %4757 = vst [vmem:[#allocation8 + $0x520] sm:$0xff] %v4245_v37  ;;  %v5786_v3 = vld [vmem:[#allocation2 + $0x5e0] sm:$0xff]  ;;  %v11648_v37 = vld [vmem:[#allocation185_spill] sm:$0xff] }
 0x3a5   :  { %v2944_v24 = vmul.f32 %v11642_v10, %v8069_v18  ;;  %v3597_v13 = vmul.f32 %v11644_v22, %v2941_v59  ;;  %v4249_v27 = vadd.f32 %v11645_v9, %v3593_v2  ;;  %v2168_v10 = vmax.f32 %v2160_v11, 0.0  ;;  %4758 = vst [vmem:[#allocation8 + $0x528] sm:$0xff] %v4246_v42  ;;  %v11651_v42 = vld [vmem:[#allocation186_spill] sm:$0xff] }
 0x3a6   :  { %v2945_v33 = vmul.f32 %v11643_v5, %v8069_v18  ;;  %v11646_v61 = vsub.f32 %v8924_v19, %v11452_v48  ;;  %v3598_v28 = vmul.f32 %v11463_v36, %v2942_v43  ;;  %v4250_v30 = vadd.f32 %v11464_v39, %v3594_v58  ;;  %v11649_v5 = vld [vmem:[#allocation19_spill] sm:$0xff]  ;;  %4759 = vst [vmem:[#allocation8 + $0x530] sm:$0xff] %v4247_v55  ;;  %v5787_v19 = vld [vmem:[#allocation2 + $0x5e8] sm:$0xff]  ;;  %v11652_v39 = vld [vmem:[#allocation20_spill] sm:$0xff] }
 0x3a7   :  { %v2445_v20 = vsub.f32 %v5786_v3, %v11452_v48  ;;  %v11647_v59 = vsub.f32 %v8934_v26, %v11452_v48  ;;  %v3599_v11 = vmul.f32 %v11648_v37, %v2943_v8  ;;  %v4251_v9 = vadd.f32 %v11649_v5, %v3595_v23  ;;  %4760 = vst [vmem:[#allocation8 + $0x538] sm:$0xff] %v4248_v53  ;;  %v5788_v26 = vld [vmem:[#allocation2 + $0x5f0] sm:$0xff]  ;;  %v11654_v55 = vld [vmem:[#allocation187_spill] sm:$0xff]  ;;  %v11655_v5 = vld [vmem:[#allocation21_spill] sm:$0xff] }
 0x3a8   :  { %v2946_v44 = vmul.f32 %v11646_v61, %v8069_v18  ;;  %v2446_v61 = vsub.f32 %v5787_v19, %v11452_v48  ;;  %v11650_v58 = vsub.f32 %v8944_v62, %v11452_v48  ;;  %v3600_v3 = vmul.f32 %v11651_v42, %v2944_v24  ;;  %4761 = vst [vmem:[#allocation8 + $0x540] sm:$0xff] %v4249_v27  ;;  %v5789_v62 = vld [vmem:[#allocation2 + $0x5f8] sm:$0xff]  ;;  %v11657_v53 = vld [vmem:[#allocation188_spill] sm:$0xff]  ;;  %v11661_v27 = vld [vmem:[#allocation189_spill] sm:$0xff] }
 0x3a9   :  { %v2947_v2 = vmul.f32 %v11647_v59, %v8069_v18  ;;  %v4252_v36 = vadd.f32 %v11652_v39, %v3596_v51  ;;  %v2447_v59 = vsub.f32 %v5788_v26, %v11452_v48  ;;  %v11653_v23 = vsub.f32 %v8954_v52, %v11452_v48  ;;  %v11658_v39 = vld [vmem:[#allocation24_spill] sm:$0xff]  ;;  %4762 = vst [vmem:[#allocation8 + $0x548] sm:$0xff] %v4250_v30 }
 0x3aa   :  { %v2948_v43 = vmul.f32 %v11650_v58, %v8069_v18  ;;  %v3601_v19 = vmul.f32 %v11654_v55, %v2945_v33  ;;  %v4253_v37 = vadd.f32 %v11655_v5, %v3597_v13  ;;  %v2448_v58 = vsub.f32 %v5789_v62, %v11452_v48  ;;  %v5790_v52 = vld [vmem:[#allocation2 + $0x600] sm:$0xff]  ;;  %v11662_v5 = vld [vmem:[#allocation25_spill] sm:$0xff]  ;;  %4763 = vst [vmem:[#allocation8 + $0x550] sm:$0xff] %v4251_v9 }
 0x3ab   :  { %v2949_v8 = vmul.f32 %v11653_v23, %v8069_v18  ;;  %v11656_v51 = vsub.f32 %v8972_v50, %v11452_v48  ;;  %v3602_v26 = vmul.f32 %v11657_v53, %v2946_v44  ;;  %v4254_v42 = vadd.f32 %v11658_v39, %v3598_v28  ;;  %v11659_v23 = vld [vmem:[#allocation15_spill] sm:$0xff]  ;;  %v5791_v50 = vld [vmem:[#allocation2 + $0x608] sm:$0xff]  ;;  %v11664_v28 = vld [vmem:[#allocation190_spill] sm:$0xff]  ;;  %4764 = vst [vmem:[#allocation8 + $0x558] sm:$0xff] %v4252_v36 }
 0x3ac   :  { %v2449_v22 = vsub.f32 %v5790_v52, %v11659_v23  ;;  %v11660_v13 = vsub.f32 %v8982_v47, %v11452_v48  ;;  %v3603_v62 = vmul.f32 %v11661_v27, %v2947_v2  ;;  %v4255_v55 = vadd.f32 %v11662_v5, %v3599_v11  ;;  %v11665_v39 = vld [vmem:[#allocation26_spill] sm:$0xff]  ;;  %4765 = vst [vmem:[#allocation8 + $0x560] sm:$0xff] %v4253_v37 }
 0x3ad   :  { %v2950_v24 = vmul.f32 %v11656_v51, %v8069_v18  ;;  %v2450_v51 = vsub.f32 %v5791_v50, %v11659_v23  ;;  %v11663_v30 = vsub.f32 %v8992_v32, %v11452_v48  ;;  %v3604_v52 = vmul.f32 %v11664_v28, %v2948_v43  ;;  %v5792_v47 = vld [vmem:[#allocation2 + $0x610] sm:$0xff]  ;;  %4766 = vst [vmem:[#allocation8 + $0x568] sm:$0xff] %v4254_v42  ;;  %v5793_v28 = vld [vmem:[#allocation2 + $0x618] sm:$0xff] }
 0x3ae   :  { %v2951_v33 = vmul.f32 %v11660_v13, %v8069_v18  ;;  %v4256_v53 = vadd.f32 %v11665_v39, %v3600_v3  ;;  %v2451_v13 = vsub.f32 %v5792_v47, %v11659_v23  ;;  %v11666_v9 = vsub.f32 %v9002_v34, %v11452_v48  ;;  %v11668_v3 = vld [vmem:[#allocation192_spill] sm:$0xff]  ;;  %4767 = vst [vmem:[#allocation8 + $0x570] sm:$0xff] %v4255_v55 }
 0x3af   :  { %v2952_v44 = vmul.f32 %v11663_v30, %v8069_v18  ;;  %v3605_v11 = vmul.f32 %v11485_v21, %v2949_v8  ;;  %v4257_v50 = vadd.f32 %v11486_v46, %v3601_v19  ;;  %v9097_v32 = vadd.f32 1e-05, %v2168_v10  ;;  %v11669_v47 = vld [vmem:[#allocation28_spill] sm:$0xff]  ;;  %v11671_v10 = vld [vmem:[#allocation193_spill] sm:$0xff] }
 0x3b0   :  { %v2953_v2 = vmul.f32 %v11666_v9, %v8069_v18  ;;  %v11667_v43 = vsub.f32 %v9012_v25, %v11452_v48  ;;  %v3606_v30 = vmul.f32 %v11668_v3, %v2950_v24  ;;  %v4258_v39 = vadd.f32 %v11669_v47, %v3602_v26  ;;  %v11672_v9 = vld [vmem:[#allocation29_spill] sm:$0xff]  ;;  %v5794_v25 = vld [vmem:[#allocation2 + $0x620] sm:$0xff]  ;;  %v11674_v26 = vld [vmem:[#allocation194_spill] sm:$0xff]  ;;  %4768 = vst [vmem:[#allocation8 + $0x578] sm:$0xff] %v4256_v53 }
 0x3b1   :  { %v2452_v34 = vsub.f32 %v5793_v28, %v11659_v23  ;;  %v11670_v8 = vsub.f32 %v9022_v35, %v11452_v48  ;;  %v3607_v19 = vmul.f32 %v11671_v10, %v2951_v33  ;;  %v4259_v46 = vadd.f32 %v11672_v9, %v3603_v62  ;;  %v11675_v47 = vld [vmem:[#allocation30_spill] sm:$0xff]  ;;  %v5795_v35 = vld [vmem:[#allocation2 + $0x628] sm:$0xff]  ;;  %v11676_v62 = vld [vmem:[#allocation195_spill] sm:$0xff]  ;;  %4769 = vst [vmem:[#allocation8 + $0x580] sm:$0xff] %v4257_v50 }
 0x3b2   :  { %v2954_v36 = vmul.f32 %v11667_v43, %v8069_v18  ;;  %v2453_v43 = vsub.f32 %v5794_v25, %v11659_v23  ;;  %v11673_v42 = vsub.f32 %v9032_v17, %v11452_v48  ;;  %v3608_v28 = vmul.f32 %v11674_v26, %v2952_v44  ;;  %v11677_v9 = vld [vmem:[#allocation31_spill] sm:$0xff]  ;;  %v5796_v25 = vld [vmem:[#allocation2 + $0x630] sm:$0xff]  ;;  %v11678_v17 = vld [vmem:[#allocation196_spill] sm:$0xff]  ;;  %4770 = vst [vmem:[#allocation8 + $0x588] sm:$0xff] %v4258_v39 }
 0x3b3   :  { %v2955_v37 = vmul.f32 %v11670_v8, %v8069_v18  ;;  %v4260_v3 = vadd.f32 %v11675_v47, %v3604_v52  ;;  %v2454_v8 = vsub.f32 %v5795_v35, %v11659_v23  ;;  %v2957_v33 = vmul.f32 %v2445_v20, %v8069_v18  ;;  %v5797_v53 = vld [vmem:[#allocation2 + $0x638] sm:$0xff]  ;;  %v11680_v47 = vld [vmem:[#allocation197_spill] sm:$0xff]  ;;  %4771 = vst [vmem:[#allocation8 + $0x590] sm:$0xff] %v4259_v46  ;;  %v5798_v50 = vld [vmem:[#allocation2 + $0x640] sm:$0xff] }
 0x3b4   :  { %v2956_v24 = vmul.f32 %v11673_v42, %v8069_v18  ;;  %v3609_v55 = vmul.f32 %v11676_v62, %v2953_v2  ;;  %v4261_v10 = vadd.f32 %v11677_v9, %v3605_v11  ;;  %v2455_v21 = vsub.f32 %v5796_v25, %v11659_v23  ;;  %v11679_v42 = vld [vmem:[#allocation32_spill] sm:$0xff]  ;;  %v11681_v62 = vld [vmem:[#allocation33_spill] sm:$0xff] }
 0x3b5   :  { %v2958_v48 = vmul.f32 %v2446_v61, %v8069_v18  ;;  %v3610_v44 = vmul.f32 %v11678_v17, %v2954_v36  ;;  %v4262_v52 = vadd.f32 %v11679_v42, %v3606_v30  ;;  %v2456_v35 = vsub.f32 %v5797_v53, %v11659_v23  ;;  %v11682_v17 = vld [vmem:[#allocation34_spill] sm:$0xff]  ;;  %4772 = vst [vmem:[#allocation8 + $0x598] sm:$0xff] %v4260_v3  ;;  %v5799_v39 = vld [vmem:[#allocation2 + $0x648] sm:$0xff] }
 0x3b6   :  { %v2959_v20 = vmul.f32 %v2447_v59, %v8069_v18  ;;  %v3611_v2 = vmul.f32 %v11680_v47, %v2955_v37  ;;  %v4263_v11 = vadd.f32 %v11681_v62, %v3607_v19  ;;  %v2457_v25 = vsub.f32 %v5798_v50, %v11659_v23  ;;  %v11683_v42 = vld [vmem:[#allocation46_spill] sm:$0xff]  ;;  %4773 = vst [vmem:[#allocation8 + $0x5a0] sm:$0xff] %v4261_v10  ;;  %v5801_v10 = vld [vmem:[#allocation2 + $0x658] sm:$0xff] }
 0x3b7   :  { %v2960_v61 = vmul.f32 %v2448_v58, %v8069_v18  ;;  %v3612_v36 = vmul.f32 %v11506_v14, %v2956_v24  ;;  %v4264_v30 = vadd.f32 %v11682_v17, %v3608_v28  ;;  %v2458_v53 = vsub.f32 %v5799_v39, %v11659_v23  ;;  %v11684_v18 = vld [vmem:[#allocation200_spill] sm:$0xff]  ;;  %v11685_v24 = vld [vmem:[#allocation41_spill] sm:$0xff]  ;;  %4774 = vst [vmem:[#allocation8 + $0x5a8] sm:$0xff] %v4262_v52  ;;  %v5800_v3 = vld [vmem:[#allocation2 + $0x650] sm:$0xff] }
 0x3b8   :  { %v2961_v59 = vmul.f32 %v2449_v22, %v11683_v42  ;;  %v3613_v37 = vmul.f32 %v11509_v41, %v2957_v33  ;;  %v4265_v19 = vadd.f32 %v11510_v31, %v3609_v55  ;;  %5148 = vrsqrt.f32 %v9097_v32  ;;  %v11686_v22 = vld [vmem:[#allocation201_spill] sm:$0xff]  ;;  %v11687_v33 = vld [vmem:[#allocation42_spill] sm:$0xff]  ;;  %4775 = vst [vmem:[#allocation8 + $0x5b0] sm:$0xff] %v4263_v11  ;;  %v5802_v52 = vld [vmem:[#allocation2 + $0x660] sm:$0xff] }
 0x3b9   :  { %v2962_v46 = vmul.f32 %v2450_v51, %v11683_v42  ;;  %v3614_v58 = vmul.f32 %v11684_v18, %v2958_v48  ;;  %v4266_v50 = vadd.f32 %v11685_v24, %v3610_v44  ;;  %v2459_v28 = vsub.f32 %v5800_v3, %v11659_v23  ;;  %v11688_v31 = vld [vmem:[#allocation202_spill] sm:$0xff]  ;;  %v11689_v18 = vld [vmem:[#allocation43_spill] sm:$0xff]  ;;  %4776 = vst [vmem:[#allocation8 + $0x5b8] sm:$0xff] %v4264_v30  ;;  %v11690_v24 = vld [vmem:[#allocation37_spill] sm:$0xff] }
 0x3ba   :  { %v2963_v39 = vmul.f32 %v2451_v13, %v11683_v42  ;;  %v3615_v17 = vmul.f32 %v11686_v22, %v2959_v20  ;;  %v4267_v41 = vadd.f32 %v11687_v33, %v3611_v2  ;;  %v2460_v55 = vsub.f32 %v5801_v10, %v11659_v23  ;;  %v11691_v22 = vld [vmem:[#allocation98_spill] sm:$0xff]  ;;  %4777 = vst [vmem:[#allocation8 + $0x5c0] sm:$0xff] %v4265_v19  ;;  %v5803_v11 = vld [vmem:[#allocation2 + $0x668] sm:$0xff]  ;;  %v11692_v33 = vld [vmem:[#allocation39_spill] sm:$0xff] }
 0x3bb   :  { %v2964_v51 = vmul.f32 %v2452_v34, %v11683_v42  ;;  %v3616_v48 = vmul.f32 %v11688_v31, %v2960_v61  ;;  %v4268_v44 = vadd.f32 %v11689_v18, %v3612_v36  ;;  %v2461_v3 = vsub.f32 %v5802_v52, %v11659_v23  ;;  %v11693_v31 = vld [vmem:[#allocation50_spill] sm:$0xff]  ;;  %4778 = vst [vmem:[#allocation8 + $0x5c8] sm:$0xff] %v4266_v50  ;;  %v11694_v50 = vld [vmem:[#allocation45_spill] sm:$0xff] }
 0x3bc   :  { %v2965_v13 = vmul.f32 %v2453_v43, %v11683_v42  ;;  %v3617_v20 = vmul.f32 %v11690_v24, %v2961_v59  ;;  %v4269_v2 = vadd.f32 %v11691_v22, %v3613_v37  ;;  %v2462_v10 = vsub.f32 %v5803_v11, %v11659_v23  ;;  %v5804_v30 = vld [vmem:[#allocation2 + $0x670] sm:$0xff]  ;;  %4779 = vst [vmem:[#allocation8 + $0x5d0] sm:$0xff] %v4267_v41  ;;  %v5805_v11 = vld [vmem:[#allocation2 + $0x678] sm:$0xff] }
 0x3bd   :  { %v2966_v34 = vmul.f32 %v2454_v8, %v11683_v42  ;;  %v3618_v61 = vmul.f32 %v11692_v33, %v2962_v46  ;;  %v4270_v36 = vadd.f32 %v11693_v31, %v3614_v58  ;;  %v2463_v52 = vsub.f32 %v5804_v30, %v11659_v23  ;;  %4780 = vst [vmem:[#allocation8 + $0x5d8] sm:$0xff] %v4268_v44  ;;  %v5806_v30 = vld [vmem:[#allocation2 + $0x680] sm:$0xff]  ;;  %v5808_v44 = vld [vmem:[#allocation2 + $0x690] sm:$0xff] }
 0x3be   :  { %v2967_v43 = vmul.f32 %v2455_v21, %v11683_v42  ;;  %v3619_v59 = vmul.f32 %v11527_v0, %v2963_v39  ;;  %v4271_v37 = vadd.f32 %v11528_v57, %v3615_v17  ;;  %v9163_v19 = vpop.eup %5148  ;;  %v2464_v8 = vsub.f32 %v5805_v11, %v11659_v23  ;;  %4781 = vst [vmem:[#allocation8 + $0x5e0] sm:$0xff] %v4269_v2  ;;  %v5807_v57 = vld [vmem:[#allocation2 + $0x688] sm:$0xff]  ;;  %v5809_v2 = vld [vmem:[#allocation2 + $0x698] sm:$0xff] }
 0x3bf   :  { %v2968_v46 = vmul.f32 %v2456_v35, %v11683_v42  ;;  %v3620_v58 = vmul.f32 %v11530_v6, %v2964_v51  ;;  %v4272_v31 = vadd.f32 %v11694_v50, %v3616_v48  ;;  %v2465_v21 = vsub.f32 %v5806_v30, %v11659_v23  ;;  %4782 = vst [vmem:[#allocation8 + $0x5e8] sm:$0xff] %v4270_v36  ;;  %v11695_v50 = vld [vmem:[#allocation105_spill] sm:$0xff]  ;;  %v5810_v36 = vld [vmem:[#allocation2 + $0x6a0] sm:$0xff] }
 0x3c0   :  { %v2969_v39 = vmul.f32 %v2457_v25, %v11683_v42  ;;  %v3621_v17 = vmul.f32 %v11326_v1, %v2965_v13  ;;  %v4273_v41 = vadd.f32 %v7544_v45, %v3617_v20  ;;  %v2466_v11 = vsub.f32 %v5807_v57, %v11659_v23  ;;  %v11696_v1 = vld [vmem:[#allocation109_spill] sm:$0xff]  ;;  %4783 = vst [vmem:[#allocation8 + $0x5f0] sm:$0xff] %v4271_v37 }
 0x3c1   :  { %v2970_v35 = vmul.f32 %v2458_v53, %v11683_v42  ;;  %v3622_v51 = vmul.f32 %v11535_v7, %v2966_v34  ;;  %v4274_v48 = vadd.f32 %v11536_v16, %v3618_v61  ;;  %v2467_v30 = vsub.f32 %v5808_v44, %v11659_v23  ;;  %v11697_v7 = vld [vmem:[#allocation110_spill] sm:$0xff]  ;;  %4784 = vst [vmem:[#allocation8 + $0x5f8] sm:$0xff] %v4272_v31  ;;  %v5811_v37 = vld [vmem:[#allocation2 + $0x6a8] sm:$0xff] }
 0x3c2   :  { %v2971_v25 = vmul.f32 %v2459_v28, %v11683_v42  ;;  %v3623_v13 = vmul.f32 %v11695_v50, %v2967_v43  ;;  %v4275_v20 = vadd.f32 %v11696_v1, %v3619_v59  ;;  %v2468_v57 = vsub.f32 %v5809_v2, %v11659_v23  ;;  %v11698_v50 = vld [vmem:[#allocation113_spill] sm:$0xff]  ;;  %4785 = vst [vmem:[#allocation8 + $0x600] sm:$0xff] %v4273_v41  ;;  %v11699_v1 = vld [vmem:[#allocation112_spill] sm:$0xff]  ;;  %v5812_v31 = vld [vmem:[#allocation2 + $0x6b0] sm:$0xff] }
 0x3c3   :  { %v2972_v53 = vmul.f32 %v2460_v55, %v11683_v42  ;;  %v3624_v34 = vmul.f32 %v11540_v15, %v2968_v46  ;;  %v4276_v61 = vadd.f32 %v11697_v7, %v3620_v58  ;;  %v2469_v44 = vsub.f32 %v5810_v36, %v11659_v23  ;;  %v11700_v15 = vld [vmem:[#allocation116_spill] sm:$0xff]  ;;  %4786 = vst [vmem:[#allocation8 + $0x608] sm:$0xff] %v4274_v48  ;;  %v11701_v7 = vld [vmem:[#allocation114_spill] sm:$0xff]  ;;  %v5813_v41 = vld [vmem:[#allocation2 + $0x6b8] sm:$0xff] }
 0x3c4   :  { %v2973_v28 = vmul.f32 %v2461_v3, %v11683_v42  ;;  %v3625_v43 = vmul.f32 %v11543_v54, %v2969_v39  ;;  %v4277_v59 = vadd.f32 %v11698_v50, %v3621_v17  ;;  %v2470_v2 = vsub.f32 %v5811_v37, %v11659_v23  ;;  %v11702_v54 = vld [vmem:[#allocation117_spill] sm:$0xff]  ;;  %4787 = vst [vmem:[#allocation8 + $0x610] sm:$0xff] %v4275_v20  ;;  %v5814_v48 = vld [vmem:[#allocation2 + $0x6c0] sm:$0xff] }
 0x3c5   :  { %v2974_v55 = vmul.f32 %v2462_v10, %v11683_v42  ;;  %v3626_v46 = vmul.f32 %v11699_v1, %v2970_v35  ;;  %v4278_v58 = vadd.f32 %v11700_v15, %v3622_v51  ;;  %v2471_v36 = vsub.f32 %v5812_v31, %v11659_v23  ;;  %4788 = vst [vmem:[#allocation8 + $0x618] sm:$0xff] %v4276_v61  ;;  %v5815_v20 = vld [vmem:[#allocation2 + $0x6c8] sm:$0xff]  ;;  %v5816_v61 = vld [vmem:[#allocation2 + $0x6d0] sm:$0xff] }
 0x3c6   :  { %v2975_v3 = vmul.f32 %v2463_v52, %v11683_v42  ;;  %v3627_v39 = vmul.f32 %v11701_v7, %v2971_v25  ;;  %v4279_v17 = vadd.f32 %v11702_v54, %v3623_v13  ;;  %v2472_v37 = vsub.f32 %v5813_v41, %v11659_v23  ;;  %v11703_v7 = vld [vmem:[#allocation120_spill] sm:$0xff]  ;;  %4789 = vst [vmem:[#allocation8 + $0x620] sm:$0xff] %v4277_v59  ;;  %v11704_v54 = vld [vmem:[#allocation121_spill] sm:$0xff]  ;;  %v5817_v59 = vld [vmem:[#allocation2 + $0x6d8] sm:$0xff] }
 0x3c7   :  { %v2976_v10 = vmul.f32 %v2464_v8, %v11683_v42  ;;  %v3628_v35 = vmul.f32 %v11550_v12, %v2972_v53  ;;  %v4280_v51 = vadd.f32 %v11551_v56, %v3624_v34  ;;  %v2473_v31 = vsub.f32 %v5814_v48, %v11659_v23  ;;  %v11705_v12 = vld [vmem:[#allocation122_spill] sm:$0xff]  ;;  %4790 = vst [vmem:[#allocation8 + $0x628] sm:$0xff] %v4278_v58  ;;  %v11706_v56 = vld [vmem:[#allocation123_spill] sm:$0xff]  ;;  %v5818_v58 = vld [vmem:[#allocation2 + $0x6e0] sm:$0xff] }
 0x3c8   :  { %v2977_v52 = vmul.f32 %v2465_v21, %v11683_v42  ;;  %v3629_v25 = vmul.f32 %v11553_v38, %v2973_v28  ;;  %v4281_v13 = vadd.f32 %v11703_v7, %v3625_v43  ;;  %v2474_v41 = vsub.f32 %v5815_v20, %v11659_v23  ;;  %v11707_v38 = vld [vmem:[#allocation124_spill] sm:$0xff]  ;;  %4791 = vst [vmem:[#allocation8 + $0x630] sm:$0xff] %v4279_v17  ;;  %v11708_v7 = vld [vmem:[#allocation125_spill] sm:$0xff] }
 0x3c9   :  { %v2978_v8 = vmul.f32 %v2466_v11, %v11683_v42  ;;  %v3630_v53 = vmul.f32 %v11704_v54, %v2974_v55  ;;  %v4282_v34 = vadd.f32 %v11705_v12, %v3626_v46  ;;  %v2475_v48 = vsub.f32 %v5816_v61, %v11659_v23  ;;  %v11709_v54 = vld [vmem:[#allocation126_spill] sm:$0xff]  ;;  %4792 = vst [vmem:[#allocation8 + $0x638] sm:$0xff] %v4280_v51  ;;  %v11710_v12 = vld [vmem:[#allocation127_spill] sm:$0xff]  ;;  %v5819_v17 = vld [vmem:[#allocation2 + $0x6e8] sm:$0xff] }
 0x3ca   :  { %v2979_v21 = vmul.f32 %v2467_v30, %v11683_v42  ;;  %v3631_v28 = vmul.f32 %v11706_v56, %v2975_v3  ;;  %v4283_v43 = vadd.f32 %v11707_v38, %v3627_v39  ;;  %v2476_v20 = vsub.f32 %v5817_v59, %v11659_v23  ;;  %v11711_v56 = vld [vmem:[#allocation128_spill] sm:$0xff]  ;;  %4793 = vst [vmem:[#allocation8 + $0x640] sm:$0xff] %v4281_v13  ;;  %v11712_v38 = vld [vmem:[#allocation129_spill] sm:$0xff]  ;;  %v5820_v51 = vld [vmem:[#allocation2 + $0x6f0] sm:$0xff] }
 0x3cb   :  { %v2980_v11 = vmul.f32 %v2468_v57, %v11683_v42  ;;  %v3632_v55 = vmul.f32 %v11708_v7, %v2976_v10  ;;  %v4284_v46 = vadd.f32 %v11709_v54, %v3628_v35  ;;  %v2477_v61 = vsub.f32 %v5818_v58, %v11659_v23  ;;  %v11713_v7 = vld [vmem:[#allocation130_spill] sm:$0xff]  ;;  %4794 = vst [vmem:[#allocation8 + $0x648] sm:$0xff] %v4282_v34  ;;  %v11714_v54 = vld [vmem:[#allocation131_spill] sm:$0xff]  ;;  %v5822_v34 = vld [vmem:[#allocation2 + $0x700] sm:$0xff] }
 0x3cc   :  { %v2981_v30 = vmul.f32 %v2469_v44, %v11683_v42  ;;  %v3633_v3 = vmul.f32 %v11710_v12, %v2977_v52  ;;  %v4285_v39 = vadd.f32 %v11711_v56, %v3629_v25  ;;  %v2478_v59 = vsub.f32 %v5819_v17, %v11659_v23  ;;  %v11715_v12 = vld [vmem:[#allocation132_spill] sm:$0xff]  ;;  %4795 = vst [vmem:[#allocation8 + $0x650] sm:$0xff] %v4283_v43  ;;  %v5821_v13 = vld [vmem:[#allocation2 + $0x6f8] sm:$0xff]  ;;  %v11716_v56 = vld [vmem:[#allocation133_spill] sm:$0xff] }
 0x3cd   :  { %v2982_v57 = vmul.f32 %v2470_v2, %v11683_v42  ;;  %v3634_v10 = vmul.f32 %v11712_v38, %v2978_v8  ;;  %v4286_v35 = vadd.f32 %v11713_v7, %v3630_v53  ;;  %v2479_v58 = vsub.f32 %v5820_v51, %v11659_v23  ;;  %v11717_v38 = vld [vmem:[#allocation134_spill] sm:$0xff]  ;;  %4796 = vst [vmem:[#allocation8 + $0x658] sm:$0xff] %v4284_v46  ;;  %v11718_v7 = vld [vmem:[#allocation135_spill] sm:$0xff]  ;;  %v5823_v43 = vld [vmem:[#allocation2 + $0x708] sm:$0xff] }
 0x3ce   :  { %v2983_v44 = vmul.f32 %v2471_v36, %v11683_v42  ;;  %v3635_v52 = vmul.f32 %v11714_v54, %v2979_v21  ;;  %v4287_v25 = vadd.f32 %v11715_v12, %v3631_v28  ;;  %v2480_v17 = vsub.f32 %v5821_v13, %v11659_v23  ;;  %v11719_v54 = vld [vmem:[#allocation136_spill] sm:$0xff]  ;;  %4797 = vst [vmem:[#allocation8 + $0x660] sm:$0xff] %v4285_v39  ;;  %v11720_v12 = vld [vmem:[#allocation137_spill] sm:$0xff]  ;;  %v5824_v46 = vld [vmem:[#allocation2 + $0x710] sm:$0xff] }
 0x3cf   :  { %v2984_v2 = vmul.f32 %v2472_v37, %v11683_v42  ;;  %v3636_v8 = vmul.f32 %v11716_v56, %v2980_v11  ;;  %v4288_v53 = vadd.f32 %v11717_v38, %v3632_v55  ;;  %v2481_v51 = vsub.f32 %v5822_v34, %v11659_v23  ;;  %v11721_v56 = vld [vmem:[#allocation138_spill] sm:$0xff]  ;;  %4798 = vst [vmem:[#allocation8 + $0x668] sm:$0xff] %v4286_v35  ;;  %v11722_v38 = vld [vmem:[#allocation139_spill] sm:$0xff] }
 0x3d0   :  { %v2985_v36 = vmul.f32 %v2473_v31, %v11683_v42  ;;  %v3637_v21 = vmul.f32 %v11718_v7, %v2981_v30  ;;  %v4289_v28 = vadd.f32 %v11719_v54, %v3633_v3  ;;  %v2482_v13 = vsub.f32 %v5823_v43, %v11659_v23  ;;  %v11723_v7 = vld [vmem:[#allocation140_spill] sm:$0xff]  ;;  %4799 = vst [vmem:[#allocation8 + $0x670] sm:$0xff] %v4287_v25  ;;  %v5825_v39 = vld [vmem:[#allocation2 + $0x718] sm:$0xff]  ;;  %v11724_v54 = vld [vmem:[#allocation141_spill] sm:$0xff] }
 0x3d1   :  { %v2986_v37 = vmul.f32 %v2474_v41, %v11683_v42  ;;  %v3638_v11 = vmul.f32 %v11720_v12, %v2982_v57  ;;  %v4290_v55 = vadd.f32 %v11721_v56, %v3634_v10  ;;  %v2483_v34 = vsub.f32 %v5824_v46, %v11659_v23  ;;  %v11725_v12 = vld [vmem:[#allocation142_spill] sm:$0xff]  ;;  %4800 = vst [vmem:[#allocation8 + $0x678] sm:$0xff] %v4288_v53  ;;  %v11726_v46 = vld [vmem:[#allocation143_spill] sm:$0xff]  ;;  %v5826_v25 = vld [vmem:[#allocation2 + $0x720] sm:$0xff] }
 0x3d2   :  { %v2987_v31 = vmul.f32 %v2475_v48, %v11683_v42  ;;  %v3639_v30 = vmul.f32 %v11722_v38, %v2983_v44  ;;  %v4291_v3 = vadd.f32 %v11723_v7, %v3635_v52  ;;  %v2484_v43 = vsub.f32 %v5825_v39, %v11659_v23  ;;  %v11727_v38 = vld [vmem:[#allocation144_spill] sm:$0xff]  ;;  %4801 = vst [vmem:[#allocation8 + $0x680] sm:$0xff] %v4289_v28  ;;  %v11728_v7 = vld [vmem:[#allocation145_spill] sm:$0xff]  ;;  %v11730_v56 = vld [vmem:[#allocation147_spill] sm:$0xff] }
 0x3d3   :  { %v2988_v41 = vmul.f32 %v2476_v20, %v11683_v42  ;;  %v3640_v57 = vmul.f32 %v11724_v54, %v2984_v2  ;;  %v4292_v10 = vadd.f32 %v11725_v12, %v3636_v8  ;;  %v2248_v35 = vmul.f32 %v9163_v19, %v9097_v32  ;;  %v11729_v54 = vld [vmem:[#allocation146_spill] sm:$0xff]  ;;  %4802 = vst [vmem:[#allocation8 + $0x688] sm:$0xff] %v4290_v55  ;;  %v5827_v53 = vld [vmem:[#allocation2 + $0x728] sm:$0xff]  ;;  %v5829_v55 = vld [vmem:[#allocation2 + $0x738] sm:$0xff] }
 0x3d4   :  { %v2989_v48 = vmul.f32 %v2477_v61, %v11683_v42  ;;  %v3641_v44 = vmul.f32 %v11726_v46, %v2985_v36  ;;  %v4293_v52 = vadd.f32 %v11727_v38, %v3637_v21  ;;  %v2485_v39 = vsub.f32 %v5826_v25, %v11659_v23  ;;  %v11731_v46 = vld [vmem:[#allocation148_spill] sm:$0xff]  ;;  %4803 = vst [vmem:[#allocation8 + $0x690] sm:$0xff] %v4291_v3  ;;  %v5828_v28 = vld [vmem:[#allocation2 + $0x730] sm:$0xff]  ;;  %v11732_v38 = vld [vmem:[#allocation149_spill] sm:$0xff] }
 0x3d5   :  { %v2990_v20 = vmul.f32 %v2478_v59, %v11683_v42  ;;  %v3642_v2 = vmul.f32 %v11728_v7, %v2986_v37  ;;  %v4294_v8 = vadd.f32 %v11729_v54, %v3638_v11  ;;  %v2486_v12 = vsub.f32 %v5827_v53, %v11659_v23  ;;  %v11733_v7 = vld [vmem:[#allocation150_spill] sm:$0xff]  ;;  %4804 = vst [vmem:[#allocation8 + $0x698] sm:$0xff] %v4292_v10  ;;  %v5830_v3 = vld [vmem:[#allocation2 + $0x740] sm:$0xff]  ;;  %v5831_v10 = vld [vmem:[#allocation2 + $0x748] sm:$0xff] }
 0x3d6   :  { %v2991_v61 = vmul.f32 %v2479_v58, %v11683_v42  ;;  %v3643_v36 = vmul.f32 %v11730_v56, %v2987_v31  ;;  %v4295_v21 = vadd.f32 %v11731_v46, %v3639_v30  ;;  %v2487_v25 = vsub.f32 %v5828_v28, %v11659_v23  ;;  %v11734_v56 = vld [vmem:[#allocation152_spill] sm:$0xff]  ;;  %4805 = vst [vmem:[#allocation8 + $0x6a0] sm:$0xff] %v4293_v52  ;;  %v11735_v46 = vld [vmem:[#allocation153_spill] sm:$0xff] }
 0x3d7   :  { %v2992_v59 = vmul.f32 %v2480_v17, %v11683_v42  ;;  %v3644_v37 = vmul.f32 %v11732_v38, %v2988_v41  ;;  %v4296_v11 = vadd.f32 %v11733_v7, %v3640_v57  ;;  %v2488_v53 = vsub.f32 %v5829_v55, %v11659_v23  ;;  %v11736_v38 = vld [vmem:[#allocation154_spill] sm:$0xff]  ;;  %4806 = vst [vmem:[#allocation8 + $0x6a8] sm:$0xff] %v4294_v8  ;;  %v11737_v7 = vld [vmem:[#allocation155_spill] sm:$0xff] }
 0x3d8   :  { %v2993_v58 = vmul.f32 %v2481_v51, %v11683_v42  ;;  %v3645_v31 = vmul.f32 %v11596_v29, %v2989_v48  ;;  %v4297_v30 = vadd.f32 %v11734_v56, %v3641_v44  ;;  %v2489_v28 = vsub.f32 %v5830_v3, %v11659_v23  ;;  %v11738_v29 = vld [vmem:[#allocation156_spill] sm:$0xff]  ;;  %4807 = vst [vmem:[#allocation8 + $0x6b0] sm:$0xff] %v4295_v21  ;;  %v11743_v21 = vld [vmem:[#allocation161_spill] sm:$0xff] }
 0x3d9   :  { %v2994_v17 = vmul.f32 %v2482_v13, %v11683_v42  ;;  %v3646_v41 = vmul.f32 %v11735_v46, %v2990_v20  ;;  %v4298_v57 = vadd.f32 %v11736_v38, %v3642_v2  ;;  %v2490_v55 = vsub.f32 %v5831_v10, %v11659_v23  ;;  %v11739_v13 = vld [vmem:[#allocation157_spill] sm:$0xff]  ;;  %v11740_v20 = vld [vmem:[#allocation158_spill] sm:$0xff]  ;;  %4808 = vst [vmem:[#allocation8 + $0x6b8] sm:$0xff] %v4296_v11  ;;  %v5834_v11 = vld [vmem:[#allocation2 + $0x760] sm:$0xff] }
 0x3da   :  { %v2995_v51 = vmul.f32 %v2483_v34, %v11683_v42  ;;  %v3647_v48 = vmul.f32 %v11737_v7, %v2991_v61  ;;  %v4299_v44 = vadd.f32 %v11738_v29, %v3643_v36  ;;  %v2249_v52 = vmul.f32 %v9163_v19, %v2248_v35  ;;  %v5832_v2 = vld [vmem:[#allocation2 + $0x750] sm:$0xff]  ;;  %v11741_v34 = vld [vmem:[#allocation159_spill] sm:$0xff]  ;;  %v11742_v61 = vld [vmem:[#allocation160_spill] sm:$0xff]  ;;  %4809 = vst [vmem:[#allocation8 + $0x6c0] sm:$0xff] %v4297_v30 }
 0x3db   :  { %v2996_v3 = vmul.f32 %v2484_v43, %v11683_v42  ;;  %v3648_v56 = vmul.f32 %v11739_v13, %v2992_v59  ;;  %v4300_v46 = vadd.f32 %v11740_v20, %v3644_v37  ;;  %v2491_v8 = vsub.f32 %v5832_v2, %v11659_v23  ;;  %v5833_v36 = vld [vmem:[#allocation2 + $0x758] sm:$0xff]  ;;  %v11744_v13 = vld [vmem:[#allocation162_spill] sm:$0xff]  ;;  %4810 = vst [vmem:[#allocation8 + $0x6c8] sm:$0xff] %v4298_v57  ;;  %v5835_v30 = vld [vmem:[#allocation2 + $0x768] sm:$0xff] }
 0x3dc   :  { %v2997_v10 = vmul.f32 %v2485_v39, %v11683_v42  ;;  %v3649_v38 = vmul.f32 %v11741_v34, %v2993_v58  ;;  %v4301_v7 = vadd.f32 %v11742_v61, %v3645_v31  ;;  %v2492_v35 = vsub.f32 %v5833_v36, %v11659_v23  ;;  %v11745_v20 = vld [vmem:[#allocation163_spill] sm:$0xff]  ;;  %v11746_v34 = vld [vmem:[#allocation164_spill] sm:$0xff]  ;;  %4811 = vst [vmem:[#allocation8 + $0x6d0] sm:$0xff] %v4299_v44  ;;  %v11747_v61 = vld [vmem:[#allocation165_spill] sm:$0xff] }
 0x3dd   :  { %v2998_v43 = vmul.f32 %v2486_v12, %v11683_v42  ;;  %v3650_v59 = vmul.f32 %v11743_v21, %v2994_v17  ;;  %v4302_v37 = vadd.f32 %v11744_v13, %v3646_v41  ;;  %v2493_v2 = vsub.f32 %v5834_v11, %v11659_v23  ;;  %v11748_v21 = vld [vmem:[#allocation166_spill] sm:$0xff]  ;;  %4812 = vst [vmem:[#allocation8 + $0x6d8] sm:$0xff] %v4300_v46  ;;  %v5837_v44 = vld [vmem:[#allocation2 + $0x778] sm:$0xff]  ;;  %v5838_v46 = vld [vmem:[#allocation2 + $0x780] sm:$0xff] }
 0x3de   :  { %v2999_v39 = vmul.f32 %v2487_v25, %v11683_v42  ;;  %v3651_v58 = vmul.f32 %v11745_v20, %v2995_v51  ;;  %v4303_v31 = vadd.f32 %v11746_v34, %v3647_v48  ;;  %v2494_v36 = vsub.f32 %v5835_v30, %v11659_v23  ;;  %v5836_v57 = vld [vmem:[#allocation2 + $0x770] sm:$0xff]  ;;  %4813 = vst [vmem:[#allocation8 + $0x6e0] sm:$0xff] %v4301_v7  ;;  %v11749_v34 = vld [vmem:[#allocation169_spill] sm:$0xff] }
 0x3df   :  { %v3000_v12 = vmul.f32 %v2488_v53, %v11683_v42  ;;  %v3652_v17 = vmul.f32 %v11747_v61, %v2996_v3  ;;  %v4304_v41 = vadd.f32 %v11748_v21, %v3648_v56  ;;  %v2495_v11 = vsub.f32 %v5836_v57, %v11659_v23  ;;  %v11750_v61 = vld [vmem:[#allocation170_spill] sm:$0xff]  ;;  %4814 = vst [vmem:[#allocation8 + $0x6e8] sm:$0xff] %v4302_v37  ;;  %v11751_v21 = vld [vmem:[#allocation171_spill] sm:$0xff] }
 0x3e0   :  { %v3001_v25 = vmul.f32 %v2489_v28, %v11683_v42  ;;  %v3653_v51 = vmul.f32 %v11621_v63, %v2997_v10  ;;  %v4305_v48 = vadd.f32 %v11622_v40, %v3649_v38  ;;  %v2496_v30 = vsub.f32 %v5837_v44, %v11659_v23  ;;  %v11752_v63 = vld [vmem:[#allocation172_spill] sm:$0xff]  ;;  %4815 = vst [vmem:[#allocation8 + $0x6f0] sm:$0xff] %v4303_v31 }
 0x3e1   :  { %v3002_v53 = vmul.f32 %v2490_v55, %v11683_v42  ;;  %v3654_v3 = vmul.f32 %v11749_v34, %v2998_v43  ;;  %v4306_v56 = vadd.f32 %v11750_v61, %v3650_v59  ;;  %v2497_v57 = vsub.f32 %v5838_v46, %v11659_v23  ;;  %v11753_v55 = vld [vmem:[#allocation173_spill] sm:$0xff]  ;;  %v11754_v43 = vld [vmem:[#allocation174_spill] sm:$0xff]  ;;  %4816 = vst [vmem:[#allocation8 + $0x6f8] sm:$0xff] %v4304_v41 }
 0x3e2   :  { %v3003_v28 = vmul.f32 %v2491_v8, %v11683_v42  ;;  %v3655_v10 = vmul.f32 %v11751_v21, %v2999_v39  ;;  %v4307_v38 = vadd.f32 %v11752_v63, %v3651_v58  ;;  %v9310_v7 = vmul.f32 0.5, %v2249_v52  ;;  %v5839_v59 = vld [vmem:[#allocation2 + $0x788] sm:$0xff]  ;;  %v11755_v8 = vld [vmem:[#allocation175_spill] sm:$0xff]  ;;  %v11756_v39 = vld [vmem:[#allocation176_spill] sm:$0xff]  ;;  %4817 = vst [vmem:[#allocation8 + $0x700] sm:$0xff] %v4305_v48 }
 0x3e3   :  { %v3004_v44 = vmul.f32 %v2492_v35, %v11683_v42  ;;  %v3656_v40 = vmul.f32 %v11753_v55, %v3000_v12  ;;  %v4308_v34 = vadd.f32 %v11754_v43, %v3652_v17  ;;  %v2498_v37 = vsub.f32 %v5839_v59, %v11659_v23  ;;  %v5840_v58 = vld [vmem:[#allocation2 + $0x790] sm:$0xff]  ;;  %4818 = vst [vmem:[#allocation8 + $0x708] sm:$0xff] %v4306_v56  ;;  %v5841_v17 = vld [vmem:[#allocation2 + $0x798] sm:$0xff]  ;;  %v5842_v48 = vld [vmem:[#allocation2 + $0x7a0] sm:$0xff] }
 0x3e4   :  { %v3005_v46 = vmul.f32 %v2493_v2, %v11683_v42  ;;  %v3657_v61 = vmul.f32 %v11755_v8, %v3001_v25  ;;  %v4309_v21 = vadd.f32 %v11756_v39, %v3653_v51  ;;  %v2499_v52 = vsub.f32 %v5840_v58, %v11659_v23  ;;  %v11757_v59 = vld [vmem:[#allocation179_spill] sm:$0xff]  ;;  %v11758_v8 = vld [vmem:[#allocation180_spill] sm:$0xff]  ;;  %4819 = vst [vmem:[#allocation8 + $0x710] sm:$0xff] %v4307_v38  ;;  %v5843_v56 = vld [vmem:[#allocation2 + $0x7a8] sm:$0xff] }
 0x3e5   :  { %v3006_v35 = vmul.f32 %v2494_v36, %v11683_v42  ;;  %v3658_v31 = vmul.f32 %v11637_v60, %v3002_v53  ;;  %v4310_v12 = vadd.f32 %v11638_v4, %v3654_v3  ;;  %v2500_v41 = vsub.f32 %v5841_v17, %v11659_v23  ;;  %v11759_v60 = vld [vmem:[#allocation182_spill] sm:$0xff]  ;;  %4820 = vst [vmem:[#allocation8 + $0x718] sm:$0xff] %v4308_v34  ;;  %v11760_v4 = vld [vmem:[#allocation183_spill] sm:$0xff] }
 0x3e6   :  { %v3007_v2 = vmul.f32 %v2495_v11, %v11683_v42  ;;  %v3659_v25 = vmul.f32 %v11757_v59, %v3003_v28  ;;  %v4311_v51 = vadd.f32 %v11758_v8, %v3655_v10  ;;  %v2501_v58 = vsub.f32 %v5842_v48, %v11659_v23  ;;  %v11761_v59 = vld [vmem:[#allocation17_spill] sm:$0xff]  ;;  %4821 = vst [vmem:[#allocation8 + $0x720] sm:$0xff] %v4309_v21  ;;  %v5844_v38 = vld [vmem:[#allocation2 + $0x7b0] sm:$0xff]  ;;  %v11762_v8 = vld [vmem:[#allocation184_spill] sm:$0xff] }
 0x3e7   :  { %v3008_v36 = vmul.f32 %v2496_v30, %v11683_v42  ;;  %v3660_v53 = vmul.f32 %v11457_v49, %v3004_v44  ;;  %v4312_v3 = vadd.f32 %v11759_v60, %v3656_v40  ;;  %v2502_v17 = vsub.f32 %v5843_v56, %v11659_v23  ;;  %v11763_v49 = vld [vmem:[#allocation18_spill] sm:$0xff]  ;;  %4822 = vst [vmem:[#allocation8 + $0x728] sm:$0xff] %v4310_v12  ;;  %v5845_v34 = vld [vmem:[#allocation2 + $0x7b8] sm:$0xff]  ;;  %v11764_v60 = vld [vmem:[#allocation185_spill] sm:$0xff] }
 0x3e8   :  { %v3009_v11 = vmul.f32 %v2497_v57, %v11683_v42  ;;  %v3661_v28 = vmul.f32 %v11760_v4, %v3005_v46  ;;  %v4313_v10 = vadd.f32 %v11761_v59, %v3657_v61  ;;  %v2503_v48 = vsub.f32 %v5844_v38, %v11659_v23  ;;  %v11765_v4 = vld [vmem:[#allocation19_spill] sm:$0xff]  ;;  %4823 = vst [vmem:[#allocation8 + $0x730] sm:$0xff] %v4311_v51  ;;  %v11770_v51 = vld [vmem:[#allocation188_spill] sm:$0xff] }
 0x3e9   :  { %v3010_v30 = vmul.f32 %v2498_v37, %v11683_v42  ;;  %v3662_v44 = vmul.f32 %v11762_v8, %v3006_v35  ;;  %v4314_v40 = vadd.f32 %v11763_v49, %v3658_v31  ;;  %v2504_v56 = vsub.f32 %v5845_v34, %v11659_v23  ;;  %v11766_v37 = vld [vmem:[#allocation186_spill] sm:$0xff]  ;;  %v11767_v35 = vld [vmem:[#allocation20_spill] sm:$0xff]  ;;  %4824 = vst [vmem:[#allocation8 + $0x738] sm:$0xff] %v4312_v3 }
 0x3ea   :  { %v3011_v57 = vmul.f32 %v2499_v52, %v11683_v42  ;;  %v3663_v46 = vmul.f32 %v11764_v60, %v3007_v2  ;;  %v4315_v61 = vadd.f32 %v11765_v4, %v3659_v25  ;;  %v2251_v21 = vsub.f32 1.5, %v9310_v7  ;;  %v5846_v31 = vld [vmem:[#allocation2 + $0x7c0] sm:$0xff]  ;;  %v11768_v52 = vld [vmem:[#allocation187_spill] sm:$0xff]  ;;  %v11769_v2 = vld [vmem:[#allocation21_spill] sm:$0xff]  ;;  %4825 = vst [vmem:[#allocation8 + $0x740] sm:$0xff] %v4313_v10 }
 0x3eb   :  { %v3012_v38 = vmul.f32 %v2500_v41, %v11683_v42  ;;  %v3664_v59 = vmul.f32 %v11766_v37, %v3008_v36  ;;  %v4316_v8 = vadd.f32 %v11767_v35, %v3660_v53  ;;  %v2505_v12 = vsub.f32 %v5846_v31, %v11659_v23  ;;  %v5847_v25 = vld [vmem:[#allocation2 + $0x7c8] sm:$0xff]  ;;  %v11771_v37 = vld [vmem:[#allocation24_spill] sm:$0xff]  ;;  %4826 = vst [vmem:[#allocation8 + $0x748] sm:$0xff] %v4314_v40  ;;  %v5848_v3 = vld [vmem:[#allocation2 + $0x7d0] sm:$0xff] }
 0x3ec   :  { %v3013_v34 = vmul.f32 %v2501_v58, %v11683_v42  ;;  %v3665_v49 = vmul.f32 %v11768_v52, %v3009_v11  ;;  %v4317_v60 = vadd.f32 %v11769_v2, %v3661_v28  ;;  %v2506_v7 = vsub.f32 %v5847_v25, %v11659_v23  ;;  %4827 = vst [vmem:[#allocation8 + $0x750] sm:$0xff] %v4315_v61  ;;  %v5849_v10 = vld [vmem:[#allocation2 + $0x7d8] sm:$0xff]  ;;  %v11772_v25 = vld [vmem:[#allocation190_spill] sm:$0xff] }
 0x3ed   :  { %v3014_v41 = vmul.f32 %v2502_v17, %v11683_v42  ;;  %v3666_v36 = vmul.f32 %v11770_v51, %v3010_v30  ;;  %v4318_v53 = vadd.f32 %v11771_v37, %v3662_v44  ;;  %v2507_v31 = vsub.f32 %v5848_v3, %v11659_v23  ;;  %v11773_v40 = vld [vmem:[#allocation26_spill] sm:$0xff]  ;;  %4828 = vst [vmem:[#allocation8 + $0x758] sm:$0xff] %v4316_v8  ;;  %v5850_v3 = vld [vmem:[#allocation2 + $0x7e0] sm:$0xff]  ;;  %v11775_v61 = vld [vmem:[#allocation27_spill] sm:$0xff] }
 0x3ee   :  { %v3015_v58 = vmul.f32 %v2503_v48, %v11683_v42  ;;  %v3667_v11 = vmul.f32 %v11661_v27, %v3011_v57  ;;  %v4319_v28 = vadd.f32 %v11662_v5, %v3663_v46  ;;  %vm2254_vm6 = vweird.f32 %v9163_v19  ;;  %v11774_v27 = vld [vmem:[#allocation191_spill] sm:$0xff]  ;;  %4829 = vst [vmem:[#allocation8 + $0x760] sm:$0xff] %v4317_v60  ;;  %v11777_v8 = vld [vmem:[#allocation28_spill] sm:$0xff]  ;;  %v11779_v60 = vld [vmem:[#allocation29_spill] sm:$0xff] }
 0x3ef   :  { %v2508_v17 = vsub.f32 %v5849_v10, %v11659_v23  ;;  %v3016_v30 = vmul.f32 %v2504_v56, %v11683_v42  ;;  %v3668_v44 = vmul.f32 %v11772_v25, %v3012_v38  ;;  %v4320_v37 = vadd.f32 %v11773_v40, %v3664_v59  ;;  %v5851_v10 = vld [vmem:[#allocation2 + $0x7e8] sm:$0xff]  ;;  %v11776_v25 = vld [vmem:[#allocation192_spill] sm:$0xff]  ;;  %4830 = vst [vmem:[#allocation8 + $0x768] sm:$0xff] %v4318_v53 }
 0x3f0   :  { %v2509_v48 = vsub.f32 %v5850_v3, %v11659_v23  ;;  %v3017_v57 = vmul.f32 %v2505_v12, %v11683_v42  ;;  %v3669_v46 = vmul.f32 %v11774_v27, %v3013_v34  ;;  %v4321_v5 = vadd.f32 %v11775_v61, %v3665_v49  ;;  %v5852_v3 = vld [vmem:[#allocation2 + $0x7f0] sm:$0xff]  ;;  %v11778_v27 = vld [vmem:[#allocation193_spill] sm:$0xff]  ;;  %4831 = vst [vmem:[#allocation8 + $0x770] sm:$0xff] %v4319_v28  ;;  %v11782_v28 = vld [vmem:[#allocation16_spill] sm:$0xff] }
 0x3f1   :  { %vm2253_vm7 = vweird.f32 %v9097_v32  ;;  %v2510_v56 = vsub.f32 %v5851_v10, %v11659_v23  ;;  %v3018_v38 = vmul.f32 %v2506_v7, %v11683_v42  ;;  %v3670_v59 = vmul.f32 %v11776_v25, %v3014_v41  ;;  %v11780_v41 = vld [vmem:[#allocation30_spill] sm:$0xff]  ;;  %4832 = vst [vmem:[#allocation8 + $0x778] sm:$0xff] %v4320_v37  ;;  %v5855_v37 = vld [vmem:[#allocation2 + $0x808] sm:$0xff] }
 0x3f2   :  { %v4322_v40 = vadd.f32 %v11777_v8, %v3666_v36  ;;  %v2511_v12 = vsub.f32 %v5852_v3, %v11659_v23  ;;  %v3019_v34 = vmul.f32 %v2507_v31, %v11683_v42  ;;  %v3671_v49 = vmul.f32 %v11778_v27, %v3015_v58  ;;  %v5853_v36 = vld [vmem:[#allocation2 + $0x7f8] sm:$0xff]  ;;  %4833 = vst [vmem:[#allocation8 + $0x780] sm:$0xff] %v4321_v5  ;;  %v5856_v5 = vld [vmem:[#allocation2 + $0x810] sm:$0xff]  ;;  %vm2255_vm8 = vmor %vm2253_vm7, %vm2254_vm6 }
 0x3f3   :  { %v4323_v61 = vadd.f32 %v11779_v60, %v3667_v11  ;;  %v2252_v51 = vmul.f32 %v9163_v19, %v2251_v21  ;;  %v3020_v10 = vmul.f32 %v2508_v17, %v11683_v42  ;;  %v3672_v7 = vmul.f32 %v11674_v26, %v3016_v30  ;;  %v11781_v31 = vld [vmem:[#allocation195_spill] sm:$0xff]  ;;  %v5854_v11 = vld [vmem:[#allocation2 + $0x800] sm:$0xff] }
 0x3f4   :  { %v4324_v25 = vadd.f32 %v11780_v41, %v3668_v44  ;;  %v2512_v53 = vsub.f32 %v5853_v36, %v11659_v23  ;;  %v3021_v3 = vmul.f32 %v2509_v48, %v11683_v42  ;;  %v3673_v8 = vmul.f32 %v11781_v31, %v3017_v57  ;;  %v11783_v60 = vld [vmem:[#allocation196_spill] sm:$0xff]  ;;  %4834 = vst [vmem:[#allocation8 + $0x788] sm:$0xff] %v4322_v40  ;;  %v5857_v40 = vld [vmem:[#allocation2 + $0x818] sm:$0xff] }
 0x3f5   :  { %v4325_v58 = vadd.f32 %v11677_v9, %v3669_v46  ;;  %v2513_v21 = vsub.f32 %v5854_v11, %v11782_v28  ;;  %v3022_v17 = vmul.f32 %v2510_v56, %v11683_v42  ;;  %v3674_v30 = vmul.f32 %v11783_v60, %v3018_v38  ;;  %v11784_v26 = vld [vmem:[#allocation32_spill] sm:$0xff]  ;;  %4835 = vst [vmem:[#allocation8 + $0x790] sm:$0xff] %v4323_v61  ;;  %v11785_v11 = vld [vmem:[#allocation34_spill] sm:$0xff]  ;;  %v11787_v60 = vld [vmem:[#allocation199_spill] sm:$0xff] }
 0x3f6   :  { %v4326_v44 = vadd.f32 %v11784_v26, %v3670_v59  ;;  %v2514_v23 = vsub.f32 %v5855_v37, %v11782_v28  ;;  %v3023_v48 = vmul.f32 %v2511_v12, %v11683_v42  ;;  %v3675_v57 = vmul.f32 %v11680_v47, %v3019_v34  ;;  %4836 = vst [vmem:[#allocation8 + $0x798] sm:$0xff] %v4324_v25  ;;  %v11786_v26 = vld [vmem:[#allocation47_spill] sm:$0xff]  ;;  %v5858_v61 = vld [vmem:[#allocation2 + $0x820] sm:$0xff]  ;;  %v5859_v25 = vld [vmem:[#allocation2 + $0x828] sm:$0xff] }
 0x3f7   :  { %v4327_v46 = vadd.f32 %v11681_v62, %v3671_v49  ;;  %v2515_v36 = vsub.f32 %v5856_v5, %v11782_v28  ;;  %v3024_v56 = vmul.f32 %v2512_v53, %v11683_v42  ;;  %v3676_v38 = vmul.f32 %v11506_v14, %v3020_v10  ;;  %v11788_v47 = vld [vmem:[#allocation35_spill] sm:$0xff]  ;;  %4837 = vst [vmem:[#allocation8 + $0x7a0] sm:$0xff] %v4325_v58  ;;  %v11789_v53 = vld [vmem:[#allocation200_spill] sm:$0xff]  ;;  %v11790_v14 = vld [vmem:[#allocation41_spill] sm:$0xff] }
 0x3f8   :  { %v4328_v59 = vadd.f32 %v11785_v11, %v3672_v7  ;;  %v2516_v37 = vsub.f32 %v5857_v40, %v11782_v28  ;;  %v3025_v12 = vmul.f32 %v2513_v21, %v11786_v26  ;;  %v3677_v34 = vmul.f32 %v11787_v60, %v3021_v3  ;;  %4838 = vst [vmem:[#allocation8 + $0x7a8] sm:$0xff] %v4326_v44  ;;  %v11791_v58 = vld [vmem:[#allocation201_spill] sm:$0xff]  ;;  %v11792_v40 = vld [vmem:[#allocation42_spill] sm:$0xff] }
 0x3f9   :  { %v4329_v49 = vadd.f32 %v11788_v47, %v3673_v8  ;;  %v2517_v5 = vsub.f32 %v5858_v61, %v11782_v28  ;;  %v3026_v42 = vmul.f32 %v2514_v23, %v11786_v26  ;;  %v3678_v10 = vmul.f32 %v11789_v53, %v3022_v17  ;;  %4839 = vst [vmem:[#allocation8 + $0x7b0] sm:$0xff] %v4327_v46  ;;  %v11794_v44 = vld [vmem:[#allocation202_spill] sm:$0xff]  ;;  %v5861_v46 = vld [vmem:[#allocation2 + $0x838] sm:$0xff] }
 0x3fa   :  { %v4330_v7 = vadd.f32 %v11790_v14, %v3674_v30  ;;  %v2518_v3 = vsub.f32 %v5859_v25, %v11782_v28  ;;  %v3027_v8 = vmul.f32 %v2515_v36, %v11786_v26  ;;  %v3679_v21 = vmul.f32 %v11791_v58, %v3023_v48  ;;  %4840 = vst [vmem:[#allocation8 + $0x7b8] sm:$0xff] %v4328_v59  ;;  %v5860_v14 = vld [vmem:[#allocation2 + $0x830] sm:$0xff]  ;;  %v5862_v59 = vld [vmem:[#allocation2 + $0x840] sm:$0xff] }
 0x3fb   :  { %v4331_v61 = vadd.f32 %v11792_v40, %v3675_v57  ;;  %v9414_v17 = vsel %vm2255_vm8, %v9163_v19, %v2252_v51  ;;  %v3028_v30 = vmul.f32 %v2516_v37, %v11786_v26  ;;  %v3680_v23 = vmul.f32 %v11794_v44, %v3024_v56  ;;  %4841 = vst [vmem:[#allocation8 + $0x7c0] sm:$0xff] %v4329_v49  ;;  %v11795_v37 = vld [vmem:[#allocation50_spill] sm:$0xff]  ;;  %v5863_v49 = vld [vmem:[#allocation2 + $0x848] sm:$0xff] }
 0x3fc   :  { %11793 = vst [vmem:[#allocation53_spill] sm:$0xff] %v9414_v17  ;;  %v4332_v32 = vadd.f32 %v11689_v18, %v3676_v38  ;;  %v2519_v25 = vsub.f32 %v5860_v14, %v11782_v28  ;;  %v3029_v36 = vmul.f32 %v2517_v5, %v11786_v26  ;;  %v3681_v48 = vmul.f32 %v11690_v24, %v3025_v12  ;;  %v11796_v17 = vld [vmem:[#allocation13_spill] sm:$0xff] }
 0x3fd   :  { %v4333_v57 = vadd.f32 %v11691_v22, %v3677_v34  ;;  %v2520_v19 = vsub.f32 %v5861_v46, %v11782_v28  ;;  %v3030_v51 = vmul.f32 %v2518_v3, %v11786_v26  ;;  %v3682_v56 = vmul.f32 %v11692_v33, %v3026_v42  ;;  %4842 = vst [vmem:[#allocation8 + $0x7c8] sm:$0xff] %v4330_v7  ;;  %v11797_v33 = vld [vmem:[#allocation45_spill] sm:$0xff]  ;;  %v5864_v7 = vld [vmem:[#allocation2 + $0x850] sm:$0xff] }
 0x3fe   :  { %v4334_v38 = vadd.f32 %v11795_v37, %v3678_v10  ;;  %v2521_v14 = vsub.f32 %v5862_v59, %v11782_v28  ;;  %v3031_v5 = vmul.f32 %v2519_v25, %v11786_v26  ;;  %v3683_v12 = vmul.f32 %v11527_v0, %v3027_v8  ;;  %4843 = vst [vmem:[#allocation8 + $0x7d0] sm:$0xff] %v4331_v61  ;;  %v11798_v37 = vld [vmem:[#allocation103_spill] sm:$0xff] }
 0x3ff   :  { %v4335_v34 = vadd.f32 %v11796_v17, %v3679_v21  ;;  %v2522_v46 = vsub.f32 %v5863_v49, %v11782_v28  ;;  %v3032_v3 = vmul.f32 %v2520_v19, %v11786_v26  ;;  %v3684_v42 = vmul.f32 %v11530_v6, %v3028_v30  ;;  %4844 = vst [vmem:[#allocation8 + $0x7d8] sm:$0xff] %v4332_v32  ;;  %v5865_v61 = vld [vmem:[#allocation2 + $0x858] sm:$0xff]  ;;  %v11799_v17 = vld [vmem:[#allocation104_spill] sm:$0xff] }
 0x400   :  { %v4336_v10 = vadd.f32 %v11797_v33, %v3680_v23  ;;  %v2523_v59 = vsub.f32 %v5864_v7, %v11782_v28  ;;  %v3033_v25 = vmul.f32 %v2521_v14, %v11786_v26  ;;  %v3685_v8 = vmul.f32 %v11798_v37, %v3029_v36  ;;  %4845 = vst [vmem:[#allocation8 + $0x7e0] sm:$0xff] %v4333_v57  ;;  %v5866_v32 = vld [vmem:[#allocation2 + $0x860] sm:$0xff]  ;;  %v11800_v33 = vld [vmem:[#allocation105_spill] sm:$0xff] }
 0x401   :  { %v4337_v21 = vadd.f32 %v7544_v45, %v3681_v48  ;;  %v2524_v49 = vsub.f32 %v5865_v61, %v11782_v28  ;;  %v3034_v19 = vmul.f32 %v2522_v46, %v11786_v26  ;;  %v3686_v30 = vmul.f32 %v11799_v17, %v3030_v51  ;;  %4846 = vst [vmem:[#allocation8 + $0x7e8] sm:$0xff] %v4334_v38  ;;  %v11801_v37 = vld [vmem:[#allocation109_spill] sm:$0xff]  ;;  %v11802_v45 = vld [vmem:[#allocation106_spill] sm:$0xff] }
 0x402   :  { %v4338_v23 = vadd.f32 %v11536_v16, %v3682_v56  ;;  %v2525_v7 = vsub.f32 %v5866_v32, %v11782_v28  ;;  %v3035_v14 = vmul.f32 %v2523_v59, %v11786_v26  ;;  %v3687_v36 = vmul.f32 %v11800_v33, %v3031_v5  ;;  %4847 = vst [vmem:[#allocation8 + $0x7f0] sm:$0xff] %v4335_v34  ;;  %v5867_v57 = vld [vmem:[#allocation2 + $0x868] sm:$0xff]  ;;  %v11803_v17 = vld [vmem:[#allocation110_spill] sm:$0xff]  ;;  %v11804_v16 = vld [vmem:[#allocation111_spill] sm:$0xff] }
 0x403   :  { %v4339_v48 = vadd.f32 %v11801_v37, %v3683_v12  ;;  %v2526_v61 = vsub.f32 %v5867_v57, %v11782_v28  ;;  %v3036_v46 = vmul.f32 %v2524_v49, %v11786_v26  ;;  %v3688_v51 = vmul.f32 %v11802_v45, %v3032_v3  ;;  %4848 = vst [vmem:[#allocation8 + $0x7f8] sm:$0xff] %v4336_v10  ;;  %v5868_v38 = vld [vmem:[#allocation2 + $0x870] sm:$0xff]  ;;  %v5869_v34 = vld [vmem:[#allocation2 + $0x878] sm:$0xff]  ;;  %v5870_v10 = vld [vmem:[#allocation2 + $0x880] sm:$0xff] }
 0x404   :  { %v4340_v56 = vadd.f32 %v11803_v17, %v3684_v42  ;;  %v2527_v32 = vsub.f32 %v5868_v38, %v11782_v28  ;;  %v3037_v59 = vmul.f32 %v2525_v7, %v11786_v26  ;;  %v3689_v5 = vmul.f32 %v11804_v16, %v3033_v25  ;;  %4849 = vst [vmem:[#allocation8 + $0x800] sm:$0xff] %v4337_v21  ;;  %v11805_v17 = vld [vmem:[#allocation114_spill] sm:$0xff]  ;;  %v11806_v16 = vld [vmem:[#allocation117_spill] sm:$0xff] }
 0x405   :  { %v4341_v12 = vadd.f32 %v11698_v50, %v3685_v8  ;;  %v2528_v57 = vsub.f32 %v5869_v34, %v11782_v28  ;;  %v3038_v49 = vmul.f32 %v2526_v61, %v11786_v26  ;;  %v3690_v3 = vmul.f32 %v11699_v1, %v3034_v19  ;;  %4850 = vst [vmem:[#allocation8 + $0x808] sm:$0xff] %v4338_v23  ;;  %v5871_v21 = vld [vmem:[#allocation2 + $0x888] sm:$0xff]  ;;  %v11807_v50 = vld [vmem:[#allocation115_spill] sm:$0xff]  ;;  %v11808_v1 = vld [vmem:[#allocation118_spill] sm:$0xff] }
 0x406   :  { %v4342_v42 = vadd.f32 %v11700_v15, %v3686_v30  ;;  %v2529_v38 = vsub.f32 %v5870_v10, %v11782_v28  ;;  %v3039_v7 = vmul.f32 %v2527_v32, %v11786_v26  ;;  %v3691_v25 = vmul.f32 %v11805_v17, %v3035_v14  ;;  %4851 = vst [vmem:[#allocation8 + $0x810] sm:$0xff] %v4339_v48  ;;  %v5872_v23 = vld [vmem:[#allocation2 + $0x890] sm:$0xff]  ;;  %v11809_v15 = vld [vmem:[#allocation119_spill] sm:$0xff]  ;;  %v11810_v17 = vld [vmem:[#allocation120_spill] sm:$0xff] }
 0x407   :  { %v4343_v8 = vadd.f32 %v11806_v16, %v3687_v36  ;;  %v2530_v34 = vsub.f32 %v5871_v21, %v11782_v28  ;;  %v3040_v61 = vmul.f32 %v2528_v57, %v11786_v26  ;;  %v3692_v19 = vmul.f32 %v11807_v50, %v3036_v46  ;;  %4852 = vst [vmem:[#allocation8 + $0x818] sm:$0xff] %v4340_v56  ;;  %v5873_v48 = vld [vmem:[#allocation2 + $0x898] sm:$0xff]  ;;  %v11811_v16 = vld [vmem:[#allocation121_spill] sm:$0xff]  ;;  %v11812_v50 = vld [vmem:[#allocation122_spill] sm:$0xff] }
 0x408   :  { %v4344_v30 = vadd.f32 %v11808_v1, %v3688_v51  ;;  %v2531_v10 = vsub.f32 %v5872_v23, %v11782_v28  ;;  %v3041_v32 = vmul.f32 %v2529_v38, %v11786_v26  ;;  %v3693_v14 = vmul.f32 %v11809_v15, %v3037_v59  ;;  %4853 = vst [vmem:[#allocation8 + $0x820] sm:$0xff] %v4341_v12  ;;  %v5874_v56 = vld [vmem:[#allocation2 + $0x8a0] sm:$0xff]  ;;  %v11813_v1 = vld [vmem:[#allocation123_spill] sm:$0xff]  ;;  %v5875_v12 = vld [vmem:[#allocation2 + $0x8a8] sm:$0xff] }
 0x409   :  { %v4345_v36 = vadd.f32 %v11810_v17, %v3689_v5  ;;  %v2532_v21 = vsub.f32 %v5873_v48, %v11782_v28  ;;  %v3042_v57 = vmul.f32 %v2530_v34, %v11786_v26  ;;  %v3694_v46 = vmul.f32 %v11811_v16, %v3038_v49  ;;  %4854 = vst [vmem:[#allocation8 + $0x828] sm:$0xff] %v4342_v42  ;;  %v11814_v15 = vld [vmem:[#allocation124_spill] sm:$0xff]  ;;  %v11815_v17 = vld [vmem:[#allocation125_spill] sm:$0xff]  ;;  %v11816_v16 = vld [vmem:[#allocation126_spill] sm:$0xff] }
 0x40a   :  { %v4346_v51 = vadd.f32 %v11812_v50, %v3690_v3  ;;  %v2533_v23 = vsub.f32 %v5874_v56, %v11782_v28  ;;  %v3043_v38 = vmul.f32 %v2531_v10, %v11786_v26  ;;  %v3695_v59 = vmul.f32 %v11813_v1, %v3039_v7  ;;  %4855 = vst [vmem:[#allocation8 + $0x830] sm:$0xff] %v4343_v8  ;;  %v5876_v42 = vld [vmem:[#allocation2 + $0x8b0] sm:$0xff]  ;;  %v11817_v50 = vld [vmem:[#allocation127_spill] sm:$0xff]  ;;  %v11818_v1 = vld [vmem:[#allocation128_spill] sm:$0xff] }
 0x40b   :  { %v4347_v5 = vadd.f32 %v11814_v15, %v3691_v25  ;;  %v2534_v48 = vsub.f32 %v5875_v12, %v11782_v28  ;;  %v3044_v34 = vmul.f32 %v2532_v21, %v11786_v26  ;;  %v3696_v49 = vmul.f32 %v11815_v17, %v3040_v61  ;;  %4856 = vst [vmem:[#allocation8 + $0x838] sm:$0xff] %v4344_v30  ;;  %v5877_v8 = vld [vmem:[#allocation2 + $0x8b8] sm:$0xff]  ;;  %v11819_v15 = vld [vmem:[#allocation129_spill] sm:$0xff]  ;;  %v11820_v17 = vld [vmem:[#allocation130_spill] sm:$0xff] }
 0x40c   :  { %v4348_v3 = vadd.f32 %v11816_v16, %v3692_v19  ;;  %v2535_v56 = vsub.f32 %v5876_v42, %v11782_v28  ;;  %v3045_v10 = vmul.f32 %v2533_v23, %v11786_v26  ;;  %v3697_v7 = vmul.f32 %v11817_v50, %v3041_v32  ;;  %4857 = vst [vmem:[#allocation8 + $0x840] sm:$0xff] %v4345_v36  ;;  %v5878_v30 = vld [vmem:[#allocation2 + $0x8c0] sm:$0xff]  ;;  %v11821_v16 = vld [vmem:[#allocation131_spill] sm:$0xff]  ;;  %v5879_v36 = vld [vmem:[#allocation2 + $0x8c8] sm:$0xff] }
 0x40d   :  { %v4349_v25 = vadd.f32 %v11818_v1, %v3693_v14  ;;  %v2536_v12 = vsub.f32 %v5877_v8, %v11782_v28  ;;  %v3046_v21 = vmul.f32 %v2534_v48, %v11786_v26  ;;  %v3698_v61 = vmul.f32 %v11819_v15, %v3042_v57  ;;  %4858 = vst [vmem:[#allocation8 + $0x848] sm:$0xff] %v4346_v51  ;;  %v11822_v50 = vld [vmem:[#allocation132_spill] sm:$0xff]  ;;  %v11823_v1 = vld [vmem:[#allocation133_spill] sm:$0xff]  ;;  %v11824_v15 = vld [vmem:[#allocation134_spill] sm:$0xff] }
 0x40e   :  { %v4350_v19 = vadd.f32 %v11820_v17, %v3694_v46  ;;  %v2537_v42 = vsub.f32 %v5878_v30, %v11782_v28  ;;  %v3047_v23 = vmul.f32 %v2535_v56, %v11786_v26  ;;  %v3699_v32 = vmul.f32 %v11821_v16, %v3043_v38  ;;  %4859 = vst [vmem:[#allocation8 + $0x850] sm:$0xff] %v4347_v5  ;;  %v5880_v51 = vld [vmem:[#allocation2 + $0x8d0] sm:$0xff]  ;;  %v11825_v17 = vld [vmem:[#allocation135_spill] sm:$0xff]  ;;  %v11826_v16 = vld [vmem:[#allocation136_spill] sm:$0xff] }
 0x40f   :  { %v4351_v14 = vadd.f32 %v11822_v50, %v3695_v59  ;;  %v2538_v8 = vsub.f32 %v5879_v36, %v11782_v28  ;;  %v3048_v48 = vmul.f32 %v2536_v12, %v11786_v26  ;;  %v3700_v57 = vmul.f32 %v11823_v1, %v3044_v34  ;;  %4860 = vst [vmem:[#allocation8 + $0x858] sm:$0xff] %v4348_v3  ;;  %v5881_v5 = vld [vmem:[#allocation2 + $0x8d8] sm:$0xff]  ;;  %v11827_v50 = vld [vmem:[#allocation137_spill] sm:$0xff]  ;;  %v11828_v1 = vld [vmem:[#allocation138_spill] sm:$0xff] }
 0x410   :  { %v4352_v46 = vadd.f32 %v11824_v15, %v3696_v49  ;;  %v2539_v30 = vsub.f32 %v5880_v51, %v11782_v28  ;;  %v3049_v56 = vmul.f32 %v2537_v42, %v11786_v26  ;;  %v3701_v38 = vmul.f32 %v11825_v17, %v3045_v10  ;;  %4861 = vst [vmem:[#allocation8 + $0x860] sm:$0xff] %v4349_v25  ;;  %v5882_v3 = vld [vmem:[#allocation2 + $0x8e0] sm:$0xff]  ;;  %v11829_v15 = vld [vmem:[#allocation139_spill] sm:$0xff]  ;;  %v5883_v25 = vld [vmem:[#allocation2 + $0x8e8] sm:$0xff] }
 0x411   :  { %v4353_v59 = vadd.f32 %v11826_v16, %v3697_v7  ;;  %v2540_v36 = vsub.f32 %v5881_v5, %v11782_v28  ;;  %v3050_v12 = vmul.f32 %v2538_v8, %v11786_v26  ;;  %v3702_v34 = vmul.f32 %v11827_v50, %v3046_v21  ;;  %4862 = vst [vmem:[#allocation8 + $0x868] sm:$0xff] %v4350_v19  ;;  %v11830_v17 = vld [vmem:[#allocation140_spill] sm:$0xff]  ;;  %v11831_v16 = vld [vmem:[#allocation141_spill] sm:$0xff]  ;;  %v11832_v50 = vld [vmem:[#allocation142_spill] sm:$0xff] }
 0x412   :  { %v4354_v49 = vadd.f32 %v11828_v1, %v3698_v61  ;;  %v2541_v51 = vsub.f32 %v5882_v3, %v11782_v28  ;;  %v3051_v42 = vmul.f32 %v2539_v30, %v11786_v26  ;;  %v3703_v10 = vmul.f32 %v11829_v15, %v3047_v23  ;;  %4863 = vst [vmem:[#allocation8 + $0x870] sm:$0xff] %v4351_v14  ;;  %v5884_v19 = vld [vmem:[#allocation2 + $0x8f0] sm:$0xff]  ;;  %v11833_v1 = vld [vmem:[#allocation143_spill] sm:$0xff]  ;;  %v11834_v15 = vld [vmem:[#allocation144_spill] sm:$0xff] }
 0x413   :  { %v4355_v7 = vadd.f32 %v11830_v17, %v3699_v32  ;;  %v2542_v5 = vsub.f32 %v5883_v25, %v11782_v28  ;;  %v3052_v8 = vmul.f32 %v2540_v36, %v11786_v26  ;;  %v3704_v21 = vmul.f32 %v11831_v16, %v3048_v48  ;;  %4864 = vst [vmem:[#allocation8 + $0x878] sm:$0xff] %v4352_v46  ;;  %v5885_v14 = vld [vmem:[#allocation2 + $0x8f8] sm:$0xff]  ;;  %v11835_v17 = vld [vmem:[#allocation145_spill] sm:$0xff]  ;;  %v5886_v46 = vld [vmem:[#allocation2 + $0x900] sm:$0xff] }
 0x414   :  { %v4356_v61 = vadd.f32 %v11832_v50, %v3700_v57  ;;  %v2543_v3 = vsub.f32 %v5884_v19, %v11782_v28  ;;  %v3053_v30 = vmul.f32 %v2541_v51, %v11786_v26  ;;  %v3705_v23 = vmul.f32 %v11833_v1, %v3049_v56  ;;  %4865 = vst [vmem:[#allocation8 + $0x880] sm:$0xff] %v4353_v59  ;;  %v11836_v50 = vld [vmem:[#allocation147_spill] sm:$0xff]  ;;  %v11837_v1 = vld [vmem:[#allocation148_spill] sm:$0xff]  ;;  %v5887_v59 = vld [vmem:[#allocation2 + $0x908] sm:$0xff] }
 0x415   :  { %v4357_v32 = vadd.f32 %v11834_v15, %v3701_v38  ;;  %v2544_v25 = vsub.f32 %v5885_v14, %v11782_v28  ;;  %v3054_v36 = vmul.f32 %v2542_v5, %v11786_v26  ;;  %v3706_v48 = vmul.f32 %v11835_v17, %v3050_v12  ;;  %4866 = vst [vmem:[#allocation8 + $0x888] sm:$0xff] %v4354_v49  ;;  %v11838_v15 = vld [vmem:[#allocation149_spill] sm:$0xff]  ;;  %v11839_v17 = vld [vmem:[#allocation150_spill] sm:$0xff] }
 0x416   :  { %v4358_v57 = vadd.f32 %v11729_v54, %v3702_v34  ;;  %v2545_v19 = vsub.f32 %v5886_v46, %v11782_v28  ;;  %v3055_v51 = vmul.f32 %v2543_v3, %v11786_v26  ;;  %v3707_v56 = vmul.f32 %v11836_v50, %v3051_v42  ;;  %4867 = vst [vmem:[#allocation8 + $0x890] sm:$0xff] %v4355_v7  ;;  %v5888_v49 = vld [vmem:[#allocation2 + $0x910] sm:$0xff]  ;;  %v11840_v54 = vld [vmem:[#allocation151_spill] sm:$0xff]  ;;  %v11841_v50 = vld [vmem:[#allocation152_spill] sm:$0xff] }
 0x417   :  { %v4359_v38 = vadd.f32 %v11837_v1, %v3703_v10  ;;  %v2546_v14 = vsub.f32 %v5887_v59, %v11782_v28  ;;  %v3056_v5 = vmul.f32 %v2544_v25, %v11786_v26  ;;  %v3708_v12 = vmul.f32 %v11838_v15, %v3052_v8  ;;  %4868 = vst [vmem:[#allocation8 + $0x898] sm:$0xff] %v4356_v61  ;;  %v5889_v7 = vld [vmem:[#allocation2 + $0x918] sm:$0xff]  ;;  %v11842_v1 = vld [vmem:[#allocation153_spill] sm:$0xff]  ;;  %v11843_v15 = vld [vmem:[#allocation154_spill] sm:$0xff] }
 0x418   :  { %v4360_v34 = vadd.f32 %v11839_v17, %v3704_v21  ;;  %v2547_v46 = vsub.f32 %v5888_v49, %v11782_v28  ;;  %v3057_v3 = vmul.f32 %v2545_v19, %v11786_v26  ;;  %v3709_v42 = vmul.f32 %v11840_v54, %v3053_v30  ;;  %4869 = vst [vmem:[#allocation8 + $0x8a0] sm:$0xff] %v4357_v32  ;;  %v5890_v61 = vld [vmem:[#allocation2 + $0x920] sm:$0xff]  ;;  %v11844_v17 = vld [vmem:[#allocation155_spill] sm:$0xff]  ;;  %v5891_v32 = vld [vmem:[#allocation2 + $0x928] sm:$0xff] }
 0x419   :  { %v4361_v10 = vadd.f32 %v11841_v50, %v3705_v23  ;;  %v2548_v59 = vsub.f32 %v5889_v7, %v11782_v28  ;;  %v3058_v25 = vmul.f32 %v2546_v14, %v11786_v26  ;;  %v3710_v8 = vmul.f32 %v11842_v1, %v3054_v36  ;;  %4870 = vst [vmem:[#allocation8 + $0x8a8] sm:$0xff] %v4358_v57  ;;  %v11845_v50 = vld [vmem:[#allocation157_spill] sm:$0xff]  ;;  %v11846_v1 = vld [vmem:[#allocation158_spill] sm:$0xff] }
 0x41a   :  { %v4362_v21 = vadd.f32 %v11843_v15, %v3706_v48  ;;  %v2549_v49 = vsub.f32 %v5890_v61, %v11782_v28  ;;  %v3059_v19 = vmul.f32 %v2547_v46, %v11786_v26  ;;  %v3711_v30 = vmul.f32 %v11844_v17, %v3055_v51  ;;  %4871 = vst [vmem:[#allocation8 + $0x8b0] sm:$0xff] %v4359_v38  ;;  %v5892_v57 = vld [vmem:[#allocation2 + $0x930] sm:$0xff]  ;;  %v11847_v15 = vld [vmem:[#allocation159_spill] sm:$0xff]  ;;  %v11848_v17 = vld [vmem:[#allocation160_spill] sm:$0xff] }
 0x41b   :  { %v4363_v23 = vadd.f32 %v11738_v29, %v3707_v56  ;;  %v2550_v7 = vsub.f32 %v5891_v32, %v11782_v28  ;;  %v3060_v14 = vmul.f32 %v2548_v59, %v11786_v26  ;;  %v3712_v36 = vmul.f32 %v11845_v50, %v3056_v5  ;;  %4872 = vst [vmem:[#allocation8 + $0x8b8] sm:$0xff] %v4360_v34  ;;  %v5893_v38 = vld [vmem:[#allocation2 + $0x938] sm:$0xff]  ;;  %v11849_v29 = vld [vmem:[#allocation161_spill] sm:$0xff]  ;;  %v5894_v34 = vld [vmem:[#allocation2 + $0x940] sm:$0xff] }
 0x41c   :  { %v4364_v48 = vadd.f32 %v11846_v1, %v3708_v12  ;;  %v2551_v61 = vsub.f32 %v5892_v57, %v11782_v28  ;;  %v3061_v46 = vmul.f32 %v2549_v49, %v11786_v26  ;;  %v3713_v51 = vmul.f32 %v11847_v15, %v3057_v3  ;;  %4873 = vst [vmem:[#allocation8 + $0x8c0] sm:$0xff] %v4361_v10  ;;  %v11850_v15 = vld [vmem:[#allocation164_spill] sm:$0xff]  ;;  %v5895_v10 = vld [vmem:[#allocation2 + $0x948] sm:$0xff] }
 0x41d   :  { %v4365_v56 = vadd.f32 %v11848_v17, %v3709_v42  ;;  %v2552_v32 = vsub.f32 %v5893_v38, %v11782_v28  ;;  %v3062_v59 = vmul.f32 %v2550_v7, %v11786_v26  ;;  %v3714_v5 = vmul.f32 %v11849_v29, %v3058_v25  ;;  %4874 = vst [vmem:[#allocation8 + $0x8c8] sm:$0xff] %v4362_v21  ;;  %v11851_v17 = vld [vmem:[#allocation165_spill] sm:$0xff]  ;;  %v11852_v29 = vld [vmem:[#allocation166_spill] sm:$0xff] }
 0x41e   :  { %v4366_v12 = vadd.f32 %v11744_v13, %v3710_v8  ;;  %v2553_v57 = vsub.f32 %v5894_v34, %v11782_v28  ;;  %v3063_v49 = vmul.f32 %v2551_v61, %v11786_v26  ;;  %v3715_v3 = vmul.f32 %v11745_v20, %v3059_v19  ;;  %4875 = vst [vmem:[#allocation8 + $0x8d0] sm:$0xff] %v4363_v23  ;;  %v5896_v21 = vld [vmem:[#allocation2 + $0x950] sm:$0xff]  ;;  %v11853_v13 = vld [vmem:[#allocation167_spill] sm:$0xff]  ;;  %v11854_v20 = vld [vmem:[#allocation168_spill] sm:$0xff] }
 0x41f   :  { %v4367_v42 = vadd.f32 %v11850_v15, %v3711_v30  ;;  %v2554_v38 = vsub.f32 %v5895_v10, %v11782_v28  ;;  %v3064_v7 = vmul.f32 %v2552_v32, %v11786_v26  ;;  %v3716_v25 = vmul.f32 %v11851_v17, %v3060_v14  ;;  %4876 = vst [vmem:[#allocation8 + $0x8d8] sm:$0xff] %v4364_v48  ;;  %v5897_v23 = vld [vmem:[#allocation2 + $0x958] sm:$0xff]  ;;  %v11855_v15 = vld [vmem:[#allocation169_spill] sm:$0xff]  ;;  %v11856_v17 = vld [vmem:[#allocation170_spill] sm:$0xff] }
 0x420   :  { %v4368_v8 = vadd.f32 %v11852_v29, %v3712_v36  ;;  %v2555_v34 = vsub.f32 %v5896_v21, %v11782_v28  ;;  %v3065_v61 = vmul.f32 %v2553_v57, %v11786_v26  ;;  %v3717_v19 = vmul.f32 %v11853_v13, %v3061_v46  ;;  %4877 = vst [vmem:[#allocation8 + $0x8e0] sm:$0xff] %v4365_v56  ;;  %v5898_v48 = vld [vmem:[#allocation2 + $0x960] sm:$0xff]  ;;  %v11857_v29 = vld [vmem:[#allocation171_spill] sm:$0xff]  ;;  %v5899_v56 = vld [vmem:[#allocation2 + $0x968] sm:$0xff] }
 0x421   :  { %v4369_v30 = vadd.f32 %v11854_v20, %v3713_v51  ;;  %v2556_v10 = vsub.f32 %v5897_v23, %v11782_v28  ;;  %v3066_v32 = vmul.f32 %v2554_v38, %v11786_v26  ;;  %v3718_v14 = vmul.f32 %v11855_v15, %v3062_v59  ;;  %4878 = vst [vmem:[#allocation8 + $0x8e8] sm:$0xff] %v4366_v12  ;;  %v5900_v12 = vld [vmem:[#allocation2 + $0x970] sm:$0xff] }
 0x422   :  { %v4370_v36 = vadd.f32 %v11856_v17, %v3714_v5  ;;  %v2557_v21 = vsub.f32 %v5898_v48, %v11782_v28  ;;  %v3067_v57 = vmul.f32 %v2555_v34, %v11786_v26  ;;  %v3719_v46 = vmul.f32 %v11857_v29, %v3063_v49  ;;  %4879 = vst [vmem:[#allocation8 + $0x8f0] sm:$0xff] %v4367_v42  ;;  %v11858_v17 = vld [vmem:[#allocation175_spill] sm:$0xff] }
 0x423   :  { %v4371_v51 = vadd.f32 %v11752_v63, %v3715_v3  ;;  %v2558_v23 = vsub.f32 %v5899_v56, %v11782_v28  ;;  %v3068_v38 = vmul.f32 %v2556_v10, %v11786_v26  ;;  %v3720_v59 = vmul.f32 %v11753_v55, %v3064_v7  ;;  %4880 = vst [vmem:[#allocation8 + $0x8f8] sm:$0xff] %v4368_v8  ;;  %v5901_v42 = vld [vmem:[#allocation2 + $0x978] sm:$0xff]  ;;  %v11859_v63 = vld [vmem:[#allocation177_spill] sm:$0xff]  ;;  %v11860_v55 = vld [vmem:[#allocation178_spill] sm:$0xff] }
 0x424   :  { %v4372_v5 = vadd.f32 %v11754_v43, %v3716_v25  ;;  %v2559_v48 = vsub.f32 %v5900_v12, %v11782_v28  ;;  %v3069_v34 = vmul.f32 %v2557_v21, %v11786_v26  ;;  %v3721_v49 = vmul.f32 %v11858_v17, %v3065_v61  ;;  %4881 = vst [vmem:[#allocation8 + $0x900] sm:$0xff] %v4369_v30  ;;  %v5902_v8 = vld [vmem:[#allocation2 + $0x980] sm:$0xff]  ;;  %v11861_v43 = vld [vmem:[#allocation179_spill] sm:$0xff]  ;;  %v5903_v30 = vld [vmem:[#allocation2 + $0x988] sm:$0xff] }
 0x425   :  { %v4373_v3 = vadd.f32 %v11756_v39, %v3717_v19  ;;  %v2560_v56 = vsub.f32 %v5901_v42, %v11782_v28  ;;  %v3070_v10 = vmul.f32 %v2558_v23, %v11786_v26  ;;  %v3722_v7 = vmul.f32 %v11859_v63, %v3066_v32  ;;  %4882 = vst [vmem:[#allocation8 + $0x908] sm:$0xff] %v4370_v36  ;;  %v11862_v17 = vld [vmem:[#allocation180_spill] sm:$0xff]  ;;  %v11863_v39 = vld [vmem:[#allocation181_spill] sm:$0xff]  ;;  %v11864_v63 = vld [vmem:[#allocation182_spill] sm:$0xff] }
 0x426   :  { %v4374_v25 = vadd.f32 %v11860_v55, %v3718_v14  ;;  %v2561_v12 = vsub.f32 %v5902_v8, %v11782_v28  ;;  %v3071_v21 = vmul.f32 %v2559_v48, %v11786_v26  ;;  %v3723_v61 = vmul.f32 %v11861_v43, %v3067_v57  ;;  %4883 = vst [vmem:[#allocation8 + $0x910] sm:$0xff] %v4371_v51  ;;  %v5904_v36 = vld [vmem:[#allocation2 + $0x990] sm:$0xff]  ;;  %v11865_v55 = vld [vmem:[#allocation183_spill] sm:$0xff]  ;;  %v11866_v43 = vld [vmem:[#allocation17_spill] sm:$0xff] }
 0x427   :  { %v4375_v19 = vadd.f32 %v11862_v17, %v3719_v46  ;;  %v2562_v42 = vsub.f32 %v5903_v30, %v11782_v28  ;;  %v3072_v23 = vmul.f32 %v2560_v56, %v11786_v26  ;;  %v3724_v32 = vmul.f32 %v11863_v39, %v3068_v38  ;;  %4884 = vst [vmem:[#allocation8 + $0x918] sm:$0xff] %v4372_v5  ;;  %v5905_v51 = vld [vmem:[#allocation2 + $0x998] sm:$0xff]  ;;  %v11867_v17 = vld [vmem:[#allocation184_spill] sm:$0xff]  ;;  %v11868_v39 = vld [vmem:[#allocation18_spill] sm:$0xff] }
 0x428   :  { %v4376_v14 = vadd.f32 %v11864_v63, %v3720_v59  ;;  %v2563_v8 = vsub.f32 %v5904_v36, %v11782_v28  ;;  %v3073_v48 = vmul.f32 %v2561_v12, %v11786_v26  ;;  %v3725_v57 = vmul.f32 %v11865_v55, %v3069_v34  ;;  %4885 = vst [vmem:[#allocation8 + $0x920] sm:$0xff] %v4373_v3  ;;  %v5906_v5 = vld [vmem:[#allocation2 + $0x9a0] sm:$0xff]  ;;  %v11869_v63 = vld [vmem:[#allocation185_spill] sm:$0xff] }
 0x429   :  { %v4377_v46 = vadd.f32 %v11866_v43, %v3721_v49  ;;  %v2564_v30 = vsub.f32 %v5905_v51, %v11782_v28  ;;  %v3074_v56 = vmul.f32 %v2562_v42, %v11786_v26  ;;  %v3726_v38 = vmul.f32 %v11867_v17, %v3070_v10  ;;  %4886 = vst [vmem:[#allocation8 + $0x928] sm:$0xff] %v4374_v25  ;;  %v5907_v3 = vld [vmem:[#allocation2 + $0x9a8] sm:$0xff]  ;;  %v11870_v43 = vld [vmem:[#allocation186_spill] sm:$0xff] }
 0x42a   :  { %v4378_v59 = vadd.f32 %v11868_v39, %v3722_v7  ;;  %v2565_v36 = vsub.f32 %v5906_v5, %v11782_v28  ;;  %v3075_v12 = vmul.f32 %v2563_v8, %v11786_v26  ;;  %v3727_v34 = vmul.f32 %v11869_v63, %v3071_v21  ;;  %4887 = vst [vmem:[#allocation8 + $0x930] sm:$0xff] %v4375_v19  ;;  %v5908_v25 = vld [vmem:[#allocation2 + $0x9b0] sm:$0xff]  ;;  %v5909_v19 = vld [vmem:[#allocation2 + $0x9b8] sm:$0xff] }
 0x42b   :  { %v4379_v49 = vadd.f32 %v11765_v4, %v3723_v61  ;;  %v2566_v51 = vsub.f32 %v5907_v3, %v11782_v28  ;;  %v3076_v42 = vmul.f32 %v2564_v30, %v11786_v26  ;;  %v3728_v10 = vmul.f32 %v11870_v43, %v3072_v23  ;;  %4888 = vst [vmem:[#allocation8 + $0x938] sm:$0xff] %v4376_v14  ;;  %v11871_v4 = vld [vmem:[#allocation188_spill] sm:$0xff] }
 0x42c   :  { %v4380_v7 = vadd.f32 %v11767_v35, %v3724_v32  ;;  %v2567_v5 = vsub.f32 %v5908_v25, %v11782_v28  ;;  %v3077_v8 = vmul.f32 %v2565_v36, %v11786_v26  ;;  %v3729_v21 = vmul.f32 %v11768_v52, %v3073_v48  ;;  %4889 = vst [vmem:[#allocation8 + $0x940] sm:$0xff] %v4377_v46  ;;  %v11872_v43 = vld [vmem:[#allocation24_spill] sm:$0xff]  ;;  %v11873_v35 = vld [vmem:[#allocation189_spill] sm:$0xff] }
 0x42d   :  { %v4381_v61 = vadd.f32 %v11769_v2, %v3725_v57  ;;  %v2568_v3 = vsub.f32 %v5909_v19, %v11782_v28  ;;  %v3078_v30 = vmul.f32 %v2566_v51, %v11786_v26  ;;  %v3730_v23 = vmul.f32 %v11871_v4, %v3074_v56  ;;  %4890 = vst [vmem:[#allocation8 + $0x948] sm:$0xff] %v4378_v59  ;;  %v5910_v14 = vld [vmem:[#allocation2 + $0x9c0] sm:$0xff]  ;;  %v11874_v52 = vld [vmem:[#allocation25_spill] sm:$0xff]  ;;  %v11875_v2 = vld [vmem:[#allocation190_spill] sm:$0xff] }
 0x42e   :  { %v4382_v32 = vadd.f32 %v11872_v43, %v3726_v38  ;;  %v2569_v25 = vsub.f32 %v5910_v14, %v11782_v28  ;;  %v3079_v36 = vmul.f32 %v2567_v5, %v11786_v26  ;;  %v3731_v48 = vmul.f32 %v11873_v35, %v3075_v12  ;;  %4891 = vst [vmem:[#allocation8 + $0x950] sm:$0xff] %v4379_v49  ;;  %v5911_v46 = vld [vmem:[#allocation2 + $0x9c8] sm:$0xff]  ;;  %v11876_v4 = vld [vmem:[#allocation26_spill] sm:$0xff]  ;;  %v11877_v43 = vld [vmem:[#allocation191_spill] sm:$0xff] }
 0x42f   :  { %v4383_v57 = vadd.f32 %v11874_v52, %v3727_v34  ;;  %v2570_v19 = vsub.f32 %v5911_v46, %v11782_v28  ;;  %v3080_v51 = vmul.f32 %v2568_v3, %v11786_v26  ;;  %v3732_v56 = vmul.f32 %v11875_v2, %v3076_v42  ;;  %4892 = vst [vmem:[#allocation8 + $0x958] sm:$0xff] %v4380_v7  ;;  %v5912_v59 = vld [vmem:[#allocation2 + $0x9d0] sm:$0xff]  ;;  %v11878_v35 = vld [vmem:[#allocation27_spill] sm:$0xff]  ;;  %v11879_v52 = vld [vmem:[#allocation192_spill] sm:$0xff] }
 0x430   :  { %v4384_v38 = vadd.f32 %v11876_v4, %v3728_v10  ;;  %v2571_v14 = vsub.f32 %v5912_v59, %v11782_v28  ;;  %v3081_v5 = vmul.f32 %v2569_v25, %v11786_v26  ;;  %v3733_v12 = vmul.f32 %v11877_v43, %v3077_v8  ;;  %4893 = vst [vmem:[#allocation8 + $0x960] sm:$0xff] %v4381_v61  ;;  %v5913_v49 = vld [vmem:[#allocation2 + $0x9d8] sm:$0xff]  ;;  %v11880_v2 = vld [vmem:[#allocation28_spill] sm:$0xff]  ;;  %v11881_v43 = vld [vmem:[#allocation29_spill] sm:$0xff] }
 0x431   :  { %v4385_v34 = vadd.f32 %v11878_v35, %v3729_v21  ;;  %v2572_v46 = vsub.f32 %v5913_v49, %v11782_v28  ;;  %v3082_v3 = vmul.f32 %v2570_v19, %v11786_v26  ;;  %v3734_v42 = vmul.f32 %v11879_v52, %v3078_v30  ;;  %4894 = vst [vmem:[#allocation8 + $0x968] sm:$0xff] %v4382_v32  ;;  %v5914_v7 = vld [vmem:[#allocation2 + $0x9e0] sm:$0xff]  ;;  %v5915_v61 = vld [vmem:[#allocation2 + $0x9e8] sm:$0xff]  ;;  %v11882_v35 = vld [vmem:[#allocation194_spill] sm:$0xff] }
 0x432   :  { %v4386_v10 = vadd.f32 %v11880_v2, %v3730_v23  ;;  %v2573_v59 = vsub.f32 %v5914_v7, %v11782_v28  ;;  %v3083_v25 = vmul.f32 %v2571_v14, %v11786_v26  ;;  %v3735_v8 = vmul.f32 %v11778_v27, %v3079_v36  ;;  %4895 = vst [vmem:[#allocation8 + $0x970] sm:$0xff] %v4383_v57  ;;  %v5916_v32 = vld [vmem:[#allocation2 + $0x9f0] sm:$0xff]  ;;  %v5917_v57 = vld [vmem:[#allocation2 + $0x9f8] sm:$0xff]  ;;  %v11886_v27 = vld [vmem:[#allocation197_spill] sm:$0xff] }
 0x433   :  { %v4387_v21 = vadd.f32 %v11881_v43, %v3731_v48  ;;  %v2574_v49 = vsub.f32 %v5915_v61, %v11782_v28  ;;  %v3084_v19 = vmul.f32 %v2572_v46, %v11786_v26  ;;  %v3736_v30 = vmul.f32 %v11882_v35, %v3080_v51  ;;  %4896 = vst [vmem:[#allocation8 + $0x978] sm:$0xff] %v4384_v38  ;;  %v11883_v43 = vld [vmem:[#allocation196_spill] sm:$0xff] }
 0x434   :  { %v4388_v23 = vadd.f32 %v11780_v41, %v3732_v56  ;;  %v2575_v7 = vsub.f32 %v5916_v32, %v11782_v28  ;;  %v3085_v14 = vmul.f32 %v2573_v59, %v11786_v26  ;;  %v3737_v36 = vmul.f32 %v11781_v31, %v3081_v5  ;;  %4897 = vst [vmem:[#allocation8 + $0x980] sm:$0xff] %v4385_v34  ;;  %v11884_v35 = vld [vmem:[#allocation32_spill] sm:$0xff]  ;;  %v11885_v41 = vld [vmem:[#allocation22_spill] sm:$0xff]  ;;  %v5919_v34 = vld [vmem:[#allocation2 + $0xa08] sm:$0xff] }
 0x435   :  { %v4389_v48 = vadd.f32 %v11677_v9, %v3733_v12  ;;  %v2576_v61 = vsub.f32 %v5917_v57, %v11782_v28  ;;  %v3086_v46 = vmul.f32 %v2574_v49, %v11786_v26  ;;  %v3738_v51 = vmul.f32 %v11883_v43, %v3082_v3  ;;  %4898 = vst [vmem:[#allocation8 + $0x988] sm:$0xff] %v4386_v10  ;;  %v5918_v38 = vld [vmem:[#allocation2 + $0xa00] sm:$0xff]  ;;  %v11887_v57 = vld [vmem:[#allocation198_spill] sm:$0xff] }
 0x436   :  { %v4390_v56 = vadd.f32 %v11884_v35, %v3734_v42  ;;  %v2577_v32 = vsub.f32 %v5918_v38, %v11885_v41  ;;  %v3087_v59 = vmul.f32 %v2575_v7, %v11786_v26  ;;  %v3739_v5 = vmul.f32 %v11886_v27, %v3083_v25  ;;  %4899 = vst [vmem:[#allocation8 + $0x990] sm:$0xff] %v4387_v21  ;;  %v5920_v10 = vld [vmem:[#allocation2 + $0xa10] sm:$0xff]  ;;  %v11888_v35 = vld [vmem:[#allocation63_spill] sm:$0xff] }
 0x437   :  { %v4391_v12 = vadd.f32 %v11681_v62, %v3735_v8  ;;  %v2578_v28 = vsub.f32 %v5919_v34, %v11885_v41  ;;  %v3088_v49 = vmul.f32 %v2576_v61, %v11786_v26  ;;  %v3740_v3 = vmul.f32 %v11887_v57, %v3084_v19  ;;  %4900 = vst [vmem:[#allocation8 + $0x998] sm:$0xff] %v4388_v23  ;;  %v5921_v21 = vld [vmem:[#allocation2 + $0xa18] sm:$0xff]  ;;  %v11889_v61 = vld [vmem:[#allocation41_spill] sm:$0xff]  ;;  %v5922_v23 = vld [vmem:[#allocation2 + $0xa20] sm:$0xff] }
 0x438   :  { %v4392_v42 = vadd.f32 %v11785_v11, %v3736_v30  ;;  %v2579_v38 = vsub.f32 %v5920_v10, %v11885_v41  ;;  %v3089_v7 = vmul.f32 %v2577_v32, %v11888_v35  ;;  %v3741_v25 = vmul.f32 %v11787_v60, %v3085_v14  ;;  %4901 = vst [vmem:[#allocation8 + $0x9a0] sm:$0xff] %v4389_v48  ;;  %v5923_v48 = vld [vmem:[#allocation2 + $0xa28] sm:$0xff] }
 0x439   :  { %v4393_v8 = vadd.f32 %v11788_v47, %v3737_v36  ;;  %v2580_v34 = vsub.f32 %v5921_v21, %v11885_v41  ;;  %v3090_v26 = vmul.f32 %v2578_v28, %v11888_v35  ;;  %v3742_v19 = vmul.f32 %v11789_v53, %v3086_v46  ;;  %4902 = vst [vmem:[#allocation8 + $0x9a8] sm:$0xff] %v4390_v56  ;;  %v5924_v56 = vld [vmem:[#allocation2 + $0xa30] sm:$0xff] }
 0x43a   :  { %v4394_v30 = vadd.f32 %v11889_v61, %v3738_v51  ;;  %v2581_v10 = vsub.f32 %v5922_v23, %v11885_v41  ;;  %v3091_v32 = vmul.f32 %v2579_v38, %v11888_v35  ;;  %v3743_v14 = vmul.f32 %v11791_v58, %v3087_v59  ;;  %4903 = vst [vmem:[#allocation8 + $0x9b0] sm:$0xff] %v4391_v12  ;;  %v5925_v12 = vld [vmem:[#allocation2 + $0xa38] sm:$0xff] }
 0x43b   :  { %v4395_v36 = vadd.f32 %v11792_v40, %v3739_v5  ;;  %v2582_v21 = vsub.f32 %v5923_v48, %v11885_v41  ;;  %v3092_v28 = vmul.f32 %v2580_v34, %v11888_v35  ;;  %v3744_v46 = vmul.f32 %v11794_v44, %v3088_v49  ;;  %4904 = vst [vmem:[#allocation8 + $0x9b8] sm:$0xff] %v4392_v42  ;;  %v11890_v40 = vld [vmem:[#allocation39_spill] sm:$0xff]  ;;  %v11891_v44 = vld [vmem:[#allocation50_spill] sm:$0xff]  ;;  %v5926_v42 = vld [vmem:[#allocation2 + $0xa40] sm:$0xff] }
 0x43c   :  { %v4396_v51 = vadd.f32 %v11689_v18, %v3740_v3  ;;  %v2583_v23 = vsub.f32 %v5924_v56, %v11885_v41  ;;  %v3093_v38 = vmul.f32 %v2581_v10, %v11888_v35  ;;  %v3745_v59 = vmul.f32 %v11690_v24, %v3089_v7  ;;  %4905 = vst [vmem:[#allocation8 + $0x9c0] sm:$0xff] %v4393_v8  ;;  %v11892_v24 = vld [vmem:[#allocation13_spill] sm:$0xff] }
 0x43d   :  { %v4397_v5 = vadd.f32 %v11691_v22, %v3741_v25  ;;  %v2584_v48 = vsub.f32 %v5925_v12, %v11885_v41  ;;  %v3094_v34 = vmul.f32 %v2582_v21, %v11888_v35  ;;  %v3746_v49 = vmul.f32 %v11890_v40, %v3090_v26  ;;  %4906 = vst [vmem:[#allocation8 + $0x9c8] sm:$0xff] %v4394_v30  ;;  %v5927_v8 = vld [vmem:[#allocation2 + $0xa48] sm:$0xff]  ;;  %v5928_v30 = vld [vmem:[#allocation2 + $0xa50] sm:$0xff] }
 0x43e   :  { %v4398_v3 = vadd.f32 %v11891_v44, %v3742_v19  ;;  %v2585_v56 = vsub.f32 %v5926_v42, %v11885_v41  ;;  %v3095_v10 = vmul.f32 %v2583_v23, %v11888_v35  ;;  %v3747_v7 = vmul.f32 %v11527_v0, %v3091_v32  ;;  %4907 = vst [vmem:[#allocation8 + $0x9d0] sm:$0xff] %v4395_v36  ;;  %v11893_v40 = vld [vmem:[#allocation45_spill] sm:$0xff]  ;;  %v11894_v44 = vld [vmem:[#allocation103_spill] sm:$0xff] }
 0x43f   :  { %v4399_v25 = vadd.f32 %v11892_v24, %v3743_v14  ;;  %v2586_v12 = vsub.f32 %v5927_v8, %v11885_v41  ;;  %v3096_v21 = vmul.f32 %v2584_v48, %v11888_v35  ;;  %v3748_v26 = vmul.f32 %v11530_v6, %v3092_v28  ;;  %4908 = vst [vmem:[#allocation8 + $0x9d8] sm:$0xff] %v4396_v51  ;;  %v11895_v0 = vld [vmem:[#allocation107_spill] sm:$0xff]  ;;  %v11896_v24 = vld [vmem:[#allocation104_spill] sm:$0xff] }
 0x440   :  { %v4400_v19 = vadd.f32 %v11893_v40, %v3744_v46  ;;  %v2587_v42 = vsub.f32 %v5928_v30, %v11885_v41  ;;  %v3097_v23 = vmul.f32 %v2585_v56, %v11888_v35  ;;  %v3749_v32 = vmul.f32 %v11894_v44, %v3093_v38  ;;  %4909 = vst [vmem:[#allocation8 + $0x9e0] sm:$0xff] %v4397_v5  ;;  %v5929_v36 = vld [vmem:[#allocation2 + $0xa58] sm:$0xff]  ;;  %v11897_v6 = vld [vmem:[#allocation108_spill] sm:$0xff]  ;;  %v5931_v5 = vld [vmem:[#allocation2 + $0xa68] sm:$0xff] }
 0x441   :  { %v4401_v14 = vadd.f32 %v11895_v0, %v3745_v59  ;;  %v2588_v8 = vsub.f32 %v5929_v36, %v11885_v41  ;;  %v3098_v48 = vmul.f32 %v2586_v12, %v11888_v35  ;;  %v3750_v28 = vmul.f32 %v11896_v24, %v3094_v34  ;;  %4910 = vst [vmem:[#allocation8 + $0x9e8] sm:$0xff] %v4398_v3  ;;  %v5930_v51 = vld [vmem:[#allocation2 + $0xa60] sm:$0xff]  ;;  %v11898_v24 = vld [vmem:[#allocation110_spill] sm:$0xff] }
 0x442   :  { %v4402_v46 = vadd.f32 %v11897_v6, %v3746_v49  ;;  %v2589_v30 = vsub.f32 %v5930_v51, %v11885_v41  ;;  %v3099_v56 = vmul.f32 %v2587_v42, %v11888_v35  ;;  %v3751_v38 = vmul.f32 %v11800_v33, %v3095_v10  ;;  %4911 = vst [vmem:[#allocation8 + $0x9f0] sm:$0xff] %v4399_v25  ;;  %v5932_v3 = vld [vmem:[#allocation2 + $0xa70] sm:$0xff]  ;;  %v11899_v6 = vld [vmem:[#allocation111_spill] sm:$0xff]  ;;  %v11900_v33 = vld [vmem:[#allocation113_spill] sm:$0xff] }
 0x443   :  { %v4403_v59 = vadd.f32 %v11801_v37, %v3747_v7  ;;  %v2590_v36 = vsub.f32 %v5931_v5, %v11885_v41  ;;  %v3100_v12 = vmul.f32 %v2588_v8, %v11888_v35  ;;  %v3752_v34 = vmul.f32 %v11802_v45, %v3096_v21  ;;  %4912 = vst [vmem:[#allocation8 + $0x9f8] sm:$0xff] %v4400_v19  ;;  %v5933_v25 = vld [vmem:[#allocation2 + $0xa78] sm:$0xff]  ;;  %v11901_v37 = vld [vmem:[#allocation112_spill] sm:$0xff] }
 0x444   :  { %v4404_v49 = vadd.f32 %v11898_v24, %v3748_v26  ;;  %v2591_v51 = vsub.f32 %v5932_v3, %v11885_v41  ;;  %v3101_v42 = vmul.f32 %v2589_v30, %v11888_v35  ;;  %v3753_v10 = vmul.f32 %v11899_v6, %v3097_v23  ;;  %4913 = vst [vmem:[#allocation8 + $0xa00] sm:$0xff] %v4401_v14  ;;  %v11902_v45 = vld [vmem:[#allocation116_spill] sm:$0xff]  ;;  %v11903_v24 = vld [vmem:[#allocation114_spill] sm:$0xff]  ;;  %v11904_v6 = vld [vmem:[#allocation117_spill] sm:$0xff] }
 0x445   :  { %v4405_v7 = vadd.f32 %v11900_v33, %v3749_v32  ;;  %v2592_v5 = vsub.f32 %v5933_v25, %v11885_v41  ;;  %v3102_v8 = vmul.f32 %v2590_v36, %v11888_v35  ;;  %v3754_v21 = vmul.f32 %v11901_v37, %v3098_v48  ;;  %4914 = vst [vmem:[#allocation8 + $0xa08] sm:$0xff] %v4402_v46  ;;  %v5934_v19 = vld [vmem:[#allocation2 + $0xa80] sm:$0xff]  ;;  %v5935_v14 = vld [vmem:[#allocation2 + $0xa88] sm:$0xff]  ;;  %v11905_v33 = vld [vmem:[#allocation115_spill] sm:$0xff] }
 0x446   :  { %v4406_v26 = vadd.f32 %v11902_v45, %v3750_v28  ;;  %v2593_v3 = vsub.f32 %v5934_v19, %v11885_v41  ;;  %v3103_v30 = vmul.f32 %v2591_v51, %v11888_v35  ;;  %v3755_v23 = vmul.f32 %v11903_v24, %v3099_v56  ;;  %4915 = vst [vmem:[#allocation8 + $0xa10] sm:$0xff] %v4403_v59  ;;  %v11906_v37 = vld [vmem:[#allocation118_spill] sm:$0xff]  ;;  %v11907_v45 = vld [vmem:[#allocation119_spill] sm:$0xff]  ;;  %v11908_v24 = vld [vmem:[#allocation120_spill] sm:$0xff] }
 0x447   :  { %v4407_v32 = vadd.f32 %v11904_v6, %v3751_v38  ;;  %v2594_v25 = vsub.f32 %v5935_v14, %v11885_v41  ;;  %v3104_v36 = vmul.f32 %v2592_v5, %v11888_v35  ;;  %v3756_v48 = vmul.f32 %v11905_v33, %v3100_v12  ;;  %4916 = vst [vmem:[#allocation8 + $0xa18] sm:$0xff] %v4404_v49  ;;  %v5936_v46 = vld [vmem:[#allocation2 + $0xa90] sm:$0xff]  ;;  %v5937_v59 = vld [vmem:[#allocation2 + $0xa98] sm:$0xff]  ;;  %v11909_v6 = vld [vmem:[#allocation121_spill] sm:$0xff] }
 0x448   :  { %v4408_v28 = vadd.f32 %v11906_v37, %v3752_v34  ;;  %v2595_v19 = vsub.f32 %v5936_v46, %v11885_v41  ;;  %v3105_v51 = vmul.f32 %v2593_v3, %v11888_v35  ;;  %v3757_v56 = vmul.f32 %v11907_v45, %v3101_v42  ;;  %4917 = vst [vmem:[#allocation8 + $0xa20] sm:$0xff] %v4405_v7  ;;  %v11910_v33 = vld [vmem:[#allocation122_spill] sm:$0xff]  ;;  %v5938_v49 = vld [vmem:[#allocation2 + $0xaa0] sm:$0xff]  ;;  %v11911_v37 = vld [vmem:[#allocation123_spill] sm:$0xff] }
 0x449   :  { %v4409_v38 = vadd.f32 %v11908_v24, %v3753_v10  ;;  %v2596_v14 = vsub.f32 %v5937_v59, %v11885_v41  ;;  %v3106_v5 = vmul.f32 %v2594_v25, %v11888_v35  ;;  %v3758_v12 = vmul.f32 %v11909_v6, %v3102_v8  ;;  %4918 = vst [vmem:[#allocation8 + $0xa28] sm:$0xff] %v4406_v26  ;;  %v11912_v45 = vld [vmem:[#allocation124_spill] sm:$0xff]  ;;  %v5939_v7 = vld [vmem:[#allocation2 + $0xaa8] sm:$0xff]  ;;  %v11914_v6 = vld [vmem:[#allocation126_spill] sm:$0xff] }
 0x44a   :  { %v4410_v34 = vadd.f32 %v11910_v33, %v3754_v21  ;;  %v2597_v46 = vsub.f32 %v5938_v49, %v11885_v41  ;;  %v3107_v3 = vmul.f32 %v2595_v19, %v11888_v35  ;;  %v3759_v42 = vmul.f32 %v11911_v37, %v3103_v30  ;;  %4919 = vst [vmem:[#allocation8 + $0xa30] sm:$0xff] %v4407_v32  ;;  %v11913_v24 = vld [vmem:[#allocation125_spill] sm:$0xff]  ;;  %v5940_v26 = vld [vmem:[#allocation2 + $0xab0] sm:$0xff]  ;;  %v11915_v33 = vld [vmem:[#allocation127_spill] sm:$0xff] }
 0x44b   :  { %v4411_v10 = vadd.f32 %v11912_v45, %v3755_v23  ;;  %v2598_v59 = vsub.f32 %v5939_v7, %v11885_v41  ;;  %v3108_v25 = vmul.f32 %v2596_v14, %v11888_v35  ;;  %v3760_v8 = vmul.f32 %v11913_v24, %v3104_v36  ;;  %4920 = vst [vmem:[#allocation8 + $0xa38] sm:$0xff] %v4408_v28  ;;  %v11916_v37 = vld [vmem:[#allocation128_spill] sm:$0xff]  ;;  %v5941_v32 = vld [vmem:[#allocation2 + $0xab8] sm:$0xff]  ;;  %v11917_v45 = vld [vmem:[#allocation129_spill] sm:$0xff] }
 0x44c   :  { %v4412_v21 = vadd.f32 %v11914_v6, %v3756_v48  ;;  %v2599_v49 = vsub.f32 %v5940_v26, %v11885_v41  ;;  %v3109_v19 = vmul.f32 %v2597_v46, %v11888_v35  ;;  %v3761_v30 = vmul.f32 %v11915_v33, %v3105_v51  ;;  %4921 = vst [vmem:[#allocation8 + $0xa40] sm:$0xff] %v4409_v38  ;;  %v11918_v24 = vld [vmem:[#allocation130_spill] sm:$0xff]  ;;  %v5942_v28 = vld [vmem:[#allocation2 + $0xac0] sm:$0xff]  ;;  %v11919_v6 = vld [vmem:[#allocation131_spill] sm:$0xff] }
 0x44d   :  { %v4413_v23 = vadd.f32 %v11916_v37, %v3757_v56  ;;  %v2600_v7 = vsub.f32 %v5941_v32, %v11885_v41  ;;  %v3110_v14 = vmul.f32 %v2598_v59, %v11888_v35  ;;  %v3762_v36 = vmul.f32 %v11917_v45, %v3106_v5  ;;  %4922 = vst [vmem:[#allocation8 + $0xa48] sm:$0xff] %v4410_v34  ;;  %v11920_v33 = vld [vmem:[#allocation132_spill] sm:$0xff]  ;;  %v5943_v38 = vld [vmem:[#allocation2 + $0xac8] sm:$0xff]  ;;  %v11922_v45 = vld [vmem:[#allocation134_spill] sm:$0xff] }
 0x44e   :  { %v4414_v48 = vadd.f32 %v11918_v24, %v3758_v12  ;;  %v2601_v26 = vsub.f32 %v5942_v28, %v11885_v41  ;;  %v3111_v46 = vmul.f32 %v2599_v49, %v11888_v35  ;;  %v3763_v51 = vmul.f32 %v11919_v6, %v3107_v3  ;;  %4923 = vst [vmem:[#allocation8 + $0xa50] sm:$0xff] %v4411_v10  ;;  %v11921_v37 = vld [vmem:[#allocation133_spill] sm:$0xff]  ;;  %v5944_v34 = vld [vmem:[#allocation2 + $0xad0] sm:$0xff]  ;;  %v11923_v24 = vld [vmem:[#allocation135_spill] sm:$0xff] }
 0x44f   :  { %v4415_v56 = vadd.f32 %v11920_v33, %v3759_v42  ;;  %v2602_v32 = vsub.f32 %v5943_v38, %v11885_v41  ;;  %v3112_v59 = vmul.f32 %v2600_v7, %v11888_v35  ;;  %v3764_v5 = vmul.f32 %v11921_v37, %v3108_v25  ;;  %4924 = vst [vmem:[#allocation8 + $0xa58] sm:$0xff] %v4412_v21  ;;  %v11924_v6 = vld [vmem:[#allocation136_spill] sm:$0xff]  ;;  %v5945_v10 = vld [vmem:[#allocation2 + $0xad8] sm:$0xff]  ;;  %v11925_v33 = vld [vmem:[#allocation137_spill] sm:$0xff] }
 0x450   :  { %v4416_v12 = vadd.f32 %v11922_v45, %v3760_v8  ;;  %v2603_v28 = vsub.f32 %v5944_v34, %v11885_v41  ;;  %v3113_v49 = vmul.f32 %v2601_v26, %v11888_v35  ;;  %v3765_v3 = vmul.f32 %v11923_v24, %v3109_v19  ;;  %4925 = vst [vmem:[#allocation8 + $0xa60] sm:$0xff] %v4413_v23  ;;  %v11926_v37 = vld [vmem:[#allocation138_spill] sm:$0xff]  ;;  %v5946_v21 = vld [vmem:[#allocation2 + $0xae0] sm:$0xff]  ;;  %v11927_v45 = vld [vmem:[#allocation139_spill] sm:$0xff] }
 0x451   :  { %v4417_v42 = vadd.f32 %v11924_v6, %v3761_v30  ;;  %v2604_v38 = vsub.f32 %v5945_v10, %v11885_v41  ;;  %v3114_v7 = vmul.f32 %v2602_v32, %v11888_v35  ;;  %v3766_v25 = vmul.f32 %v11925_v33, %v3110_v14  ;;  %4926 = vst [vmem:[#allocation8 + $0xa68] sm:$0xff] %v4414_v48  ;;  %v11928_v24 = vld [vmem:[#allocation140_spill] sm:$0xff]  ;;  %v5947_v23 = vld [vmem:[#allocation2 + $0xae8] sm:$0xff]  ;;  %v11929_v33 = vld [vmem:[#allocation142_spill] sm:$0xff] }
 0x452   :  { %v4418_v8 = vadd.f32 %v11926_v37, %v3762_v36  ;;  %v2605_v34 = vsub.f32 %v5946_v21, %v11885_v41  ;;  %v3115_v26 = vmul.f32 %v2603_v28, %v11888_v35  ;;  %v3767_v19 = vmul.f32 %v11927_v45, %v3111_v46  ;;  %4927 = vst [vmem:[#allocation8 + $0xa70] sm:$0xff] %v4415_v56  ;;  %v5948_v48 = vld [vmem:[#allocation2 + $0xaf0] sm:$0xff]  ;;  %v11930_v37 = vld [vmem:[#allocation143_spill] sm:$0xff]  ;;  %v11931_v45 = vld [vmem:[#allocation144_spill] sm:$0xff] }
 0x453   :  { %v4419_v30 = vadd.f32 %v11928_v24, %v3763_v51  ;;  %v2606_v10 = vsub.f32 %v5947_v23, %v11885_v41  ;;  %v3116_v32 = vmul.f32 %v2604_v38, %v11888_v35  ;;  %v3768_v14 = vmul.f32 %v11831_v16, %v3112_v59  ;;  %4928 = vst [vmem:[#allocation8 + $0xa78] sm:$0xff] %v4416_v12  ;;  %v5949_v56 = vld [vmem:[#allocation2 + $0xaf8] sm:$0xff]  ;;  %v11932_v24 = vld [vmem:[#allocation145_spill] sm:$0xff]  ;;  %v11933_v16 = vld [vmem:[#allocation146_spill] sm:$0xff] }
 0x454   :  { %v4420_v36 = vadd.f32 %v11929_v33, %v3764_v5  ;;  %v2607_v21 = vsub.f32 %v5948_v48, %v11885_v41  ;;  %v3117_v28 = vmul.f32 %v2605_v34, %v11888_v35  ;;  %v3769_v46 = vmul.f32 %v11930_v37, %v3113_v49  ;;  %4929 = vst [vmem:[#allocation8 + $0xa80] sm:$0xff] %v4417_v42  ;;  %v5950_v12 = vld [vmem:[#allocation2 + $0xb00] sm:$0xff]  ;;  %v11934_v33 = vld [vmem:[#allocation147_spill] sm:$0xff]  ;;  %v5951_v42 = vld [vmem:[#allocation2 + $0xb08] sm:$0xff] }
 0x455   :  { %v4421_v51 = vadd.f32 %v11931_v45, %v3765_v3  ;;  %v2608_v23 = vsub.f32 %v5949_v56, %v11885_v41  ;;  %v3118_v38 = vmul.f32 %v2606_v10, %v11888_v35  ;;  %v3770_v59 = vmul.f32 %v11932_v24, %v3114_v7  ;;  %4930 = vst [vmem:[#allocation8 + $0xa88] sm:$0xff] %v4418_v8  ;;  %v11935_v37 = vld [vmem:[#allocation148_spill] sm:$0xff]  ;;  %v11936_v45 = vld [vmem:[#allocation149_spill] sm:$0xff]  ;;  %v11937_v24 = vld [vmem:[#allocation150_spill] sm:$0xff] }
 0x456   :  { %v4422_v5 = vadd.f32 %v11933_v16, %v3766_v25  ;;  %v2609_v48 = vsub.f32 %v5950_v12, %v11885_v41  ;;  %v3119_v34 = vmul.f32 %v2607_v21, %v11888_v35  ;;  %v3771_v49 = vmul.f32 %v11934_v33, %v3115_v26  ;;  %4931 = vst [vmem:[#allocation8 + $0xa90] sm:$0xff] %v4419_v30  ;;  %v5952_v8 = vld [vmem:[#allocation2 + $0xb10] sm:$0xff]  ;;  %v11938_v33 = vld [vmem:[#allocation152_spill] sm:$0xff]  ;;  %v5953_v30 = vld [vmem:[#allocation2 + $0xb18] sm:$0xff] }
 0x457   :  { %v4423_v3 = vadd.f32 %v11935_v37, %v3767_v19  ;;  %v2610_v56 = vsub.f32 %v5951_v42, %v11885_v41  ;;  %v3120_v10 = vmul.f32 %v2608_v23, %v11888_v35  ;;  %v3772_v7 = vmul.f32 %v11936_v45, %v3116_v32  ;;  %4932 = vst [vmem:[#allocation8 + $0xa98] sm:$0xff] %v4420_v36  ;;  %v11939_v37 = vld [vmem:[#allocation153_spill] sm:$0xff]  ;;  %v11940_v45 = vld [vmem:[#allocation154_spill] sm:$0xff]  ;;  %v5954_v36 = vld [vmem:[#allocation2 + $0xb20] sm:$0xff] }
 0x458   :  { %v4424_v25 = vadd.f32 %v11937_v24, %v3768_v14  ;;  %v2611_v12 = vsub.f32 %v5952_v8, %v11885_v41  ;;  %v3121_v21 = vmul.f32 %v2609_v48, %v11888_v35  ;;  %v3773_v26 = vmul.f32 %v11840_v54, %v3117_v28  ;;  %4933 = vst [vmem:[#allocation8 + $0xaa0] sm:$0xff] %v4421_v51  ;;  %v11941_v24 = vld [vmem:[#allocation155_spill] sm:$0xff]  ;;  %v11942_v54 = vld [vmem:[#allocation156_spill] sm:$0xff]  ;;  %v5955_v51 = vld [vmem:[#allocation2 + $0xb28] sm:$0xff] }
 0x459   :  { %v4425_v19 = vadd.f32 %v11938_v33, %v3769_v46  ;;  %v2612_v42 = vsub.f32 %v5953_v30, %v11885_v41  ;;  %v3122_v23 = vmul.f32 %v2610_v56, %v11888_v35  ;;  %v3774_v32 = vmul.f32 %v11939_v37, %v3118_v38  ;;  %4934 = vst [vmem:[#allocation8 + $0xaa8] sm:$0xff] %v4422_v5  ;;  %v5956_v5 = vld [vmem:[#allocation2 + $0xb30] sm:$0xff] }
 0x45a   :  { %v4426_v14 = vadd.f32 %v11940_v45, %v3770_v59  ;;  %v2613_v8 = vsub.f32 %v5954_v36, %v11885_v41  ;;  %v3123_v48 = vmul.f32 %v2611_v12, %v11888_v35  ;;  %v3775_v28 = vmul.f32 %v11941_v24, %v3119_v34  ;;  %4935 = vst [vmem:[#allocation8 + $0xab0] sm:$0xff] %v4423_v3  ;;  %v11943_v45 = vld [vmem:[#allocation159_spill] sm:$0xff]  ;;  %v11944_v24 = vld [vmem:[#allocation160_spill] sm:$0xff] }
 0x45b   :  { %v4427_v46 = vadd.f32 %v11942_v54, %v3771_v49  ;;  %v2614_v30 = vsub.f32 %v5955_v51, %v11885_v41  ;;  %v3124_v56 = vmul.f32 %v2612_v42, %v11888_v35  ;;  %v3776_v38 = vmul.f32 %v11845_v50, %v3120_v10  ;;  %4936 = vst [vmem:[#allocation8 + $0xab8] sm:$0xff] %v4424_v25  ;;  %v5957_v3 = vld [vmem:[#allocation2 + $0xb38] sm:$0xff]  ;;  %v11945_v54 = vld [vmem:[#allocation161_spill] sm:$0xff]  ;;  %v11946_v50 = vld [vmem:[#allocation162_spill] sm:$0xff] }
 0x45c   :  { %v4428_v59 = vadd.f32 %v11846_v1, %v3772_v7  ;;  %v2615_v36 = vsub.f32 %v5956_v5, %v11885_v41  ;;  %v3125_v12 = vmul.f32 %v2613_v8, %v11888_v35  ;;  %v3777_v34 = vmul.f32 %v11943_v45, %v3121_v21  ;;  %4937 = vst [vmem:[#allocation8 + $0xac0] sm:$0xff] %v4425_v19  ;;  %v5958_v25 = vld [vmem:[#allocation2 + $0xb40] sm:$0xff]  ;;  %v11947_v1 = vld [vmem:[#allocation163_spill] sm:$0xff]  ;;  %v5959_v19 = vld [vmem:[#allocation2 + $0xb48] sm:$0xff] }
 0x45d   :  { %v4429_v49 = vadd.f32 %v11944_v24, %v3773_v26  ;;  %v2616_v51 = vsub.f32 %v5957_v3, %v11885_v41  ;;  %v3126_v42 = vmul.f32 %v2614_v30, %v11888_v35  ;;  %v3778_v10 = vmul.f32 %v11945_v54, %v3122_v23  ;;  %4938 = vst [vmem:[#allocation8 + $0xac8] sm:$0xff] %v4426_v14  ;;  %v11948_v45 = vld [vmem:[#allocation164_spill] sm:$0xff]  ;;  %v11949_v24 = vld [vmem:[#allocation165_spill] sm:$0xff]  ;;  %v11950_v54 = vld [vmem:[#allocation166_spill] sm:$0xff] }
 0x45e   :  { %v4430_v7 = vadd.f32 %v11946_v50, %v3774_v32  ;;  %v2617_v5 = vsub.f32 %v5958_v25, %v11885_v41  ;;  %v3127_v8 = vmul.f32 %v2615_v36, %v11888_v35  ;;  %v3779_v21 = vmul.f32 %v11947_v1, %v3123_v48  ;;  %4939 = vst [vmem:[#allocation8 + $0xad0] sm:$0xff] %v4427_v46  ;;  %v5960_v14 = vld [vmem:[#allocation2 + $0xb50] sm:$0xff]  ;;  %v5961_v46 = vld [vmem:[#allocation2 + $0xb58] sm:$0xff] }
 0x45f   :  { %v4431_v26 = vadd.f32 %v11948_v45, %v3775_v28  ;;  %v2618_v3 = vsub.f32 %v5959_v19, %v11885_v41  ;;  %v3128_v30 = vmul.f32 %v2616_v51, %v11888_v35  ;;  %v3780_v23 = vmul.f32 %v11949_v24, %v3124_v56  ;;  %4940 = vst [vmem:[#allocation8 + $0xad8] sm:$0xff] %v4428_v59  ;;  %v11951_v24 = vld [vmem:[#allocation170_spill] sm:$0xff]  ;;  %v5962_v59 = vld [vmem:[#allocation2 + $0xb60] sm:$0xff] }
 0x460   :  { %v4432_v32 = vadd.f32 %v11950_v54, %v3776_v38  ;;  %v2619_v25 = vsub.f32 %v5960_v14, %v11885_v41  ;;  %v3129_v36 = vmul.f32 %v2617_v5, %v11888_v35  ;;  %v3781_v48 = vmul.f32 %v11853_v13, %v3125_v12  ;;  %4941 = vst [vmem:[#allocation8 + $0xae0] sm:$0xff] %v4429_v49  ;;  %v11952_v13 = vld [vmem:[#allocation172_spill] sm:$0xff]  ;;  %v5963_v49 = vld [vmem:[#allocation2 + $0xb68] sm:$0xff] }
 0x461   :  { %v4433_v28 = vadd.f32 %v11854_v20, %v3777_v34  ;;  %v2620_v19 = vsub.f32 %v5961_v46, %v11885_v41  ;;  %v3130_v51 = vmul.f32 %v2618_v3, %v11888_v35  ;;  %v3782_v56 = vmul.f32 %v11855_v15, %v3126_v42  ;;  %4942 = vst [vmem:[#allocation8 + $0xae8] sm:$0xff] %v4430_v7  ;;  %v11953_v20 = vld [vmem:[#allocation173_spill] sm:$0xff]  ;;  %v11954_v15 = vld [vmem:[#allocation174_spill] sm:$0xff] }
 0x462   :  { %v4434_v38 = vadd.f32 %v11951_v24, %v3778_v10  ;;  %v2621_v14 = vsub.f32 %v5962_v59, %v11885_v41  ;;  %v3131_v5 = vmul.f32 %v2619_v25, %v11888_v35  ;;  %v3783_v12 = vmul.f32 %v11857_v29, %v3127_v8  ;;  %4943 = vst [vmem:[#allocation8 + $0xaf0] sm:$0xff] %v4431_v26  ;;  %v5964_v7 = vld [vmem:[#allocation2 + $0xb70] sm:$0xff]  ;;  %v11955_v24 = vld [vmem:[#allocation175_spill] sm:$0xff]  ;;  %v11956_v29 = vld [vmem:[#allocation176_spill] sm:$0xff] }
 0x463   :  { %v4435_v34 = vadd.f32 %v11952_v13, %v3779_v21  ;;  %v2622_v46 = vsub.f32 %v5963_v49, %v11885_v41  ;;  %v3132_v3 = vmul.f32 %v2620_v19, %v11888_v35  ;;  %v3784_v42 = vmul.f32 %v11953_v20, %v3128_v30  ;;  %4944 = vst [vmem:[#allocation8 + $0xaf8] sm:$0xff] %v4432_v32  ;;  %v5965_v26 = vld [vmem:[#allocation2 + $0xb78] sm:$0xff]  ;;  %v11957_v13 = vld [vmem:[#allocation177_spill] sm:$0xff]  ;;  %v11958_v20 = vld [vmem:[#allocation178_spill] sm:$0xff] }
 0x464   :  { %v4436_v10 = vadd.f32 %v11954_v15, %v3780_v23  ;;  %v2623_v59 = vsub.f32 %v5964_v7, %v11885_v41  ;;  %v3133_v25 = vmul.f32 %v2621_v14, %v11888_v35  ;;  %v3785_v8 = vmul.f32 %v11955_v24, %v3129_v36  ;;  %4945 = vst [vmem:[#allocation8 + $0xb00] sm:$0xff] %v4433_v28  ;;  %v5966_v32 = vld [vmem:[#allocation2 + $0xb80] sm:$0xff]  ;;  %v11959_v15 = vld [vmem:[#allocation179_spill] sm:$0xff]  ;;  %v5967_v28 = vld [vmem:[#allocation2 + $0xb88] sm:$0xff] }
 0x465   :  { %v4437_v21 = vadd.f32 %v11956_v29, %v3781_v48  ;;  %v2624_v49 = vsub.f32 %v5965_v26, %v11885_v41  ;;  %v3134_v19 = vmul.f32 %v2622_v46, %v11888_v35  ;;  %v3786_v30 = vmul.f32 %v11957_v13, %v3130_v51  ;;  %4946 = vst [vmem:[#allocation8 + $0xb08] sm:$0xff] %v4434_v38  ;;  %v11960_v24 = vld [vmem:[#allocation180_spill] sm:$0xff]  ;;  %v11961_v29 = vld [vmem:[#allocation181_spill] sm:$0xff]  ;;  %v11962_v13 = vld [vmem:[#allocation182_spill] sm:$0xff] }
 0x466   :  { %v4438_v23 = vadd.f32 %v11958_v20, %v3782_v56  ;;  %v2625_v7 = vsub.f32 %v5966_v32, %v11885_v41  ;;  %v3135_v14 = vmul.f32 %v2623_v59, %v11888_v35  ;;  %v3787_v36 = vmul.f32 %v11959_v15, %v3131_v5  ;;  %4947 = vst [vmem:[#allocation8 + $0xb10] sm:$0xff] %v4435_v34  ;;  %v5968_v38 = vld [vmem:[#allocation2 + $0xb90] sm:$0xff]  ;;  %v11963_v15 = vld [vmem:[#allocation17_spill] sm:$0xff]  ;;  %v5969_v34 = vld [vmem:[#allocation2 + $0xb98] sm:$0xff] }
 0x467   :  { %v4439_v48 = vadd.f32 %v11960_v24, %v3783_v12  ;;  %v2626_v26 = vsub.f32 %v5967_v28, %v11885_v41  ;;  %v3136_v46 = vmul.f32 %v2624_v49, %v11888_v35  ;;  %v3788_v51 = vmul.f32 %v11961_v29, %v3132_v3  ;;  %4948 = vst [vmem:[#allocation8 + $0xb18] sm:$0xff] %v4436_v10  ;;  %v5970_v10 = vld [vmem:[#allocation2 + $0xba0] sm:$0xff] }
 0x468   :  { %v4440_v56 = vadd.f32 %v11962_v13, %v3784_v42  ;;  %v2627_v32 = vsub.f32 %v5968_v38, %v11885_v41  ;;  %v3137_v59 = vmul.f32 %v2625_v7, %v11888_v35  ;;  %v3789_v5 = vmul.f32 %v11865_v55, %v3133_v25  ;;  %4949 = vst [vmem:[#allocation8 + $0xb20] sm:$0xff] %v4437_v21  ;;  %v11964_v55 = vld [vmem:[#allocation19_spill] sm:$0xff]  ;;  %v5971_v21 = vld [vmem:[#allocation2 + $0xba8] sm:$0xff] }
 0x469   :  { %v4441_v12 = vadd.f32 %v11963_v15, %v3785_v8  ;;  %v2628_v28 = vsub.f32 %v5969_v34, %v11885_v41  ;;  %v3138_v49 = vmul.f32 %v2626_v26, %v11888_v35  ;;  %v3790_v3 = vmul.f32 %v11867_v17, %v3134_v19  ;;  %4950 = vst [vmem:[#allocation8 + $0xb28] sm:$0xff] %v4438_v23  ;;  %v11965_v15 = vld [vmem:[#allocation186_spill] sm:$0xff]  ;;  %v11966_v17 = vld [vmem:[#allocation20_spill] sm:$0xff] }
 0x46a   :  { %v4442_v42 = vadd.f32 %v11868_v39, %v3786_v30  ;;  %v2629_v38 = vsub.f32 %v5970_v10, %v11885_v41  ;;  %v3139_v7 = vmul.f32 %v2627_v32, %v11888_v35  ;;  %v3791_v25 = vmul.f32 %v11869_v63, %v3135_v14  ;;  %4951 = vst [vmem:[#allocation8 + $0xb30] sm:$0xff] %v4439_v48  ;;  %v5972_v23 = vld [vmem:[#allocation2 + $0xbb0] sm:$0xff]  ;;  %v11967_v39 = vld [vmem:[#allocation187_spill] sm:$0xff]  ;;  %v11968_v63 = vld [vmem:[#allocation21_spill] sm:$0xff] }
 0x46b   :  { %v4443_v8 = vadd.f32 %v11964_v55, %v3787_v36  ;;  %v2630_v34 = vsub.f32 %v5971_v21, %v11885_v41  ;;  %v3140_v26 = vmul.f32 %v2628_v28, %v11888_v35  ;;  %v3792_v19 = vmul.f32 %v11965_v15, %v3136_v46  ;;  %4952 = vst [vmem:[#allocation8 + $0xb38] sm:$0xff] %v4440_v56  ;;  %v5973_v48 = vld [vmem:[#allocation2 + $0xbb8] sm:$0xff]  ;;  %v11969_v55 = vld [vmem:[#allocation188_spill] sm:$0xff] }
 0x46c   :  { %v4444_v30 = vadd.f32 %v11966_v17, %v3788_v51  ;;  %v2631_v10 = vsub.f32 %v5972_v23, %v11885_v41  ;;  %v3141_v32 = vmul.f32 %v2629_v38, %v11888_v35  ;;  %v3793_v14 = vmul.f32 %v11967_v39, %v3137_v59  ;;  %4953 = vst [vmem:[#allocation8 + $0xb40] sm:$0xff] %v4441_v12  ;;  %v11970_v15 = vld [vmem:[#allocation24_spill] sm:$0xff]  ;;  %v11971_v17 = vld [vmem:[#allocation189_spill] sm:$0xff] }
 0x46d   :  { %v4445_v36 = vadd.f32 %v11968_v63, %v3789_v5  ;;  %v2632_v21 = vsub.f32 %v5973_v48, %v11885_v41  ;;  %v3142_v28 = vmul.f32 %v2630_v34, %v11888_v35  ;;  %v3794_v46 = vmul.f32 %v11969_v55, %v3138_v49  ;;  %4954 = vst [vmem:[#allocation8 + $0xb48] sm:$0xff] %v4442_v42  ;;  %v5974_v56 = vld [vmem:[#allocation2 + $0xbc0] sm:$0xff]  ;;  %v11972_v39 = vld [vmem:[#allocation25_spill] sm:$0xff]  ;;  %v11973_v63 = vld [vmem:[#allocation190_spill] sm:$0xff] }
 0x46e   :  { %v4446_v51 = vadd.f32 %v11970_v15, %v3790_v3  ;;  %v2633_v23 = vsub.f32 %v5974_v56, %v11885_v41  ;;  %v3143_v38 = vmul.f32 %v2631_v10, %v11888_v35  ;;  %v3795_v59 = vmul.f32 %v11971_v17, %v3139_v7  ;;  %4955 = vst [vmem:[#allocation8 + $0xb50] sm:$0xff] %v4443_v8  ;;  %v5975_v12 = vld [vmem:[#allocation2 + $0xbc8] sm:$0xff]  ;;  %v5976_v42 = vld [vmem:[#allocation2 + $0xbd0] sm:$0xff]  ;;  %v11974_v15 = vld [vmem:[#allocation191_spill] sm:$0xff] }
 0x46f   :  { %v4447_v5 = vadd.f32 %v11972_v39, %v3791_v25  ;;  %v2634_v48 = vsub.f32 %v5975_v12, %v11885_v41  ;;  %v3144_v34 = vmul.f32 %v2632_v21, %v11888_v35  ;;  %v3796_v49 = vmul.f32 %v11973_v63, %v3140_v26  ;;  %4956 = vst [vmem:[#allocation8 + $0xb58] sm:$0xff] %v4444_v30  ;;  %v11975_v17 = vld [vmem:[#allocation27_spill] sm:$0xff]  ;;  %v5978_v30 = vld [vmem:[#allocation2 + $0xbe0] sm:$0xff] }
 0x470   :  { %v4448_v3 = vadd.f32 %v11876_v4, %v3792_v19  ;;  %v2635_v56 = vsub.f32 %v5976_v42, %v11885_v41  ;;  %v3145_v10 = vmul.f32 %v2633_v23, %v11888_v35  ;;  %v3797_v7 = vmul.f32 %v11974_v15, %v3141_v32  ;;  %4957 = vst [vmem:[#allocation8 + $0xb60] sm:$0xff] %v4445_v36  ;;  %v5977_v8 = vld [vmem:[#allocation2 + $0xbd8] sm:$0xff]  ;;  %v11976_v4 = vld [vmem:[#allocation193_spill] sm:$0xff] }
 0x471   :  { %v4449_v25 = vadd.f32 %v11975_v17, %v3793_v14  ;;  %v2636_v12 = vsub.f32 %v5977_v8, %v11885_v41  ;;  %v3146_v21 = vmul.f32 %v2634_v48, %v11888_v35  ;;  %v3798_v26 = vmul.f32 %v11879_v52, %v3142_v28  ;;  %4958 = vst [vmem:[#allocation8 + $0xb68] sm:$0xff] %v4446_v51  ;;  %v11977_v15 = vld [vmem:[#allocation29_spill] sm:$0xff]  ;;  %v11978_v17 = vld [vmem:[#allocation194_spill] sm:$0xff] }
 0x472   :  { %v4450_v19 = vadd.f32 %v11880_v2, %v3794_v46  ;;  %v2637_v42 = vsub.f32 %v5978_v30, %v11885_v41  ;;  %v3147_v23 = vmul.f32 %v2635_v56, %v11888_v35  ;;  %v3799_v32 = vmul.f32 %v11976_v4, %v3143_v38  ;;  %4959 = vst [vmem:[#allocation8 + $0xb70] sm:$0xff] %v4447_v5  ;;  %v5979_v36 = vld [vmem:[#allocation2 + $0xbe8] sm:$0xff]  ;;  %v11979_v52 = vld [vmem:[#allocation30_spill] sm:$0xff]  ;;  %v5981_v5 = vld [vmem:[#allocation2 + $0xbf8] sm:$0xff] }
 0x473   :  { %v4451_v14 = vadd.f32 %v11977_v15, %v3795_v59  ;;  %v2638_v8 = vsub.f32 %v5979_v36, %v11885_v41  ;;  %v3148_v48 = vmul.f32 %v2636_v12, %v11888_v35  ;;  %v3800_v28 = vmul.f32 %v11978_v17, %v3144_v34  ;;  %4960 = vst [vmem:[#allocation8 + $0xb78] sm:$0xff] %v4448_v3  ;;  %v5980_v51 = vld [vmem:[#allocation2 + $0xbf0] sm:$0xff]  ;;  %v11980_v17 = vld [vmem:[#allocation32_spill] sm:$0xff] }
 0x474   :  { %v4452_v46 = vadd.f32 %v11979_v52, %v3796_v49  ;;  %v2639_v30 = vsub.f32 %v5980_v51, %v11885_v41  ;;  %v3149_v56 = vmul.f32 %v2637_v42, %v11888_v35  ;;  %v3801_v38 = vmul.f32 %v11781_v31, %v3145_v10  ;;  %4961 = vst [vmem:[#allocation8 + $0xb80] sm:$0xff] %v4449_v25  ;;  %v5982_v3 = vld [vmem:[#allocation2 + $0xc00] sm:$0xff]  ;;  %v11981_v52 = vld [vmem:[#allocation23_spill] sm:$0xff]  ;;  %v5983_v25 = vld [vmem:[#allocation2 + $0xc08] sm:$0xff] }
 0x475   :  { %v4453_v59 = vadd.f32 %v11677_v9, %v3797_v7  ;;  %v2640_v36 = vsub.f32 %v5981_v5, %v11885_v41  ;;  %v3150_v12 = vmul.f32 %v2638_v8, %v11888_v35  ;;  %v3802_v34 = vmul.f32 %v11883_v43, %v3146_v21  ;;  %4962 = vst [vmem:[#allocation8 + $0xb88] sm:$0xff] %v4450_v19  ;;  %v5984_v19 = vld [vmem:[#allocation2 + $0xc10] sm:$0xff] }
 0x476   :  { %v4454_v49 = vadd.f32 %v11980_v17, %v3798_v26  ;;  %v2641_v51 = vsub.f32 %v5982_v3, %v11981_v52  ;;  %v3151_v42 = vmul.f32 %v2639_v30, %v11888_v35  ;;  %v3803_v10 = vmul.f32 %v11886_v27, %v3147_v23  ;;  %4963 = vst [vmem:[#allocation8 + $0xb90] sm:$0xff] %v4451_v14  ;;  %v11982_v3 = vld [vmem:[#allocation52_spill] sm:$0xff]  ;;  %v5985_v14 = vld [vmem:[#allocation2 + $0xc18] sm:$0xff] }
 0x477   :  { %v4455_v7 = vadd.f32 %v11681_v62, %v3799_v32  ;;  %v2642_v41 = vsub.f32 %v5983_v25, %v11981_v52  ;;  %v3152_v8 = vmul.f32 %v2640_v36, %v11888_v35  ;;  %v3804_v21 = vmul.f32 %v11887_v57, %v3148_v48  ;;  %4964 = vst [vmem:[#allocation8 + $0xb98] sm:$0xff] %v4452_v46  ;;  %v5986_v46 = vld [vmem:[#allocation2 + $0xc20] sm:$0xff] }
 0x478   :  { %v4456_v26 = vadd.f32 %v11785_v11, %v3800_v28  ;;  %v2643_v5 = vsub.f32 %v5984_v19, %v11981_v52  ;;  %v3153_v30 = vmul.f32 %v2641_v51, %v11982_v3  ;;  %v3805_v23 = vmul.f32 %v11787_v60, %v3149_v56  ;;  %4965 = vst [vmem:[#allocation8 + $0xba0] sm:$0xff] %v4453_v59  ;;  %v11983_v19 = vld [vmem:[#allocation42_spill] sm:$0xff]  ;;  %v5987_v59 = vld [vmem:[#allocation2 + $0xc28] sm:$0xff] }
 0x479   :  { %v4457_v32 = vadd.f32 %v11788_v47, %v3801_v38  ;;  %v2644_v25 = vsub.f32 %v5985_v14, %v11981_v52  ;;  %v3154_v35 = vmul.f32 %v2642_v41, %v11982_v3  ;;  %v3806_v48 = vmul.f32 %v11789_v53, %v3150_v12  ;;  %4966 = vst [vmem:[#allocation8 + $0xba8] sm:$0xff] %v4454_v49  ;;  %v11984_v47 = vld [vmem:[#allocation202_spill] sm:$0xff] }
 0x47a   :  { %v4458_v28 = vadd.f32 %v11889_v61, %v3802_v34  ;;  %v2645_v36 = vsub.f32 %v5986_v46, %v11981_v52  ;;  %v3155_v51 = vmul.f32 %v2643_v5, %v11982_v3  ;;  %v3807_v56 = vmul.f32 %v11791_v58, %v3151_v42  ;;  %4967 = vst [vmem:[#allocation8 + $0xbb0] sm:$0xff] %v4455_v7  ;;  %v5988_v49 = vld [vmem:[#allocation2 + $0xc30] sm:$0xff]  ;;  %v11985_v61 = vld [vmem:[#allocation37_spill] sm:$0xff]  ;;  %v5989_v7 = vld [vmem:[#allocation2 + $0xc38] sm:$0xff] }
 0x47b   :  { %v4459_v38 = vadd.f32 %v11983_v19, %v3803_v10  ;;  %v2646_v14 = vsub.f32 %v5987_v59, %v11981_v52  ;;  %v3156_v41 = vmul.f32 %v2644_v25, %v11982_v3  ;;  %v3808_v12 = vmul.f32 %v11984_v47, %v3152_v8  ;;  %4968 = vst [vmem:[#allocation8 + $0xbb8] sm:$0xff] %v4456_v26  ;;  %v11986_v19 = vld [vmem:[#allocation39_spill] sm:$0xff]  ;;  %v11987_v47 = vld [vmem:[#allocation50_spill] sm:$0xff]  ;;  %v5990_v26 = vld [vmem:[#allocation2 + $0xc40] sm:$0xff] }
 0x47c   :  { %v4460_v34 = vadd.f32 %v11689_v18, %v3804_v21  ;;  %v2647_v46 = vsub.f32 %v5988_v49, %v11981_v52  ;;  %v3157_v5 = vmul.f32 %v2645_v36, %v11982_v3  ;;  %v3809_v42 = vmul.f32 %v11985_v61, %v3153_v30  ;;  %4969 = vst [vmem:[#allocation8 + $0xbc0] sm:$0xff] %v4457_v32  ;;  %v11988_v18 = vld [vmem:[#allocation40_spill] sm:$0xff]  ;;  %v11989_v61 = vld [vmem:[#allocation13_spill] sm:$0xff] }
 0x47d   :  { %v4461_v10 = vadd.f32 %v11691_v22, %v3805_v23  ;;  %v2648_v59 = vsub.f32 %v5989_v7, %v11981_v52  ;;  %v3158_v25 = vmul.f32 %v2646_v14, %v11982_v3  ;;  %v3810_v8 = vmul.f32 %v11986_v19, %v3154_v35  ;;  %4970 = vst [vmem:[#allocation8 + $0xbc8] sm:$0xff] %v4458_v28  ;;  %v5991_v32 = vld [vmem:[#allocation2 + $0xc48] sm:$0xff]  ;;  %v11990_v22 = vld [vmem:[#allocation44_spill] sm:$0xff]  ;;  %v5992_v28 = vld [vmem:[#allocation2 + $0xc50] sm:$0xff] }
 0x47e   :  { %v4462_v21 = vadd.f32 %v11987_v47, %v3806_v48  ;;  %v2649_v49 = vsub.f32 %v5990_v26, %v11981_v52  ;;  %v3159_v36 = vmul.f32 %v2647_v46, %v11982_v3  ;;  %v3811_v30 = vmul.f32 %v11988_v18, %v3155_v51  ;;  %4971 = vst [vmem:[#allocation8 + $0xbd0] sm:$0xff] %v4459_v38  ;;  %v5993_v38 = vld [vmem:[#allocation2 + $0xc58] sm:$0xff] }
 0x47f   :  { %v4463_v23 = vadd.f32 %v11989_v61, %v3807_v56  ;;  %v2650_v7 = vsub.f32 %v5991_v32, %v11981_v52  ;;  %v3160_v14 = vmul.f32 %v2648_v59, %v11982_v3  ;;  %v3812_v35 = vmul.f32 %v11990_v22, %v3156_v41  ;;  %4972 = vst [vmem:[#allocation8 + $0xbd8] sm:$0xff] %v4460_v34  ;;  %v11991_v61 = vld [vmem:[#allocation104_spill] sm:$0xff] }
 0x480   :  { %v4464_v48 = vadd.f32 %v11893_v40, %v3808_v12  ;;  %v2651_v26 = vsub.f32 %v5992_v28, %v11981_v52  ;;  %v3161_v46 = vmul.f32 %v2649_v49, %v11982_v3  ;;  %v3813_v51 = vmul.f32 %v11894_v44, %v3157_v5  ;;  %4973 = vst [vmem:[#allocation8 + $0xbe0] sm:$0xff] %v4461_v10  ;;  %v11992_v22 = vld [vmem:[#allocation108_spill] sm:$0xff]  ;;  %v11993_v40 = vld [vmem:[#allocation105_spill] sm:$0xff] }
 0x481   :  { %v4465_v56 = vadd.f32 %v11895_v0, %v3809_v42  ;;  %v2652_v32 = vsub.f32 %v5993_v38, %v11981_v52  ;;  %v3162_v59 = vmul.f32 %v2650_v7, %v11982_v3  ;;  %v3814_v41 = vmul.f32 %v11991_v61, %v3158_v25  ;;  %4974 = vst [vmem:[#allocation8 + $0xbe8] sm:$0xff] %v4462_v21  ;;  %v5994_v34 = vld [vmem:[#allocation2 + $0xc60] sm:$0xff]  ;;  %v11994_v44 = vld [vmem:[#allocation109_spill] sm:$0xff]  ;;  %v11995_v0 = vld [vmem:[#allocation106_spill] sm:$0xff] }
 0x482   :  { %v4466_v12 = vadd.f32 %v11992_v22, %v3810_v8  ;;  %v2653_v28 = vsub.f32 %v5994_v34, %v11981_v52  ;;  %v3163_v49 = vmul.f32 %v2651_v26, %v11982_v3  ;;  %v3815_v5 = vmul.f32 %v11993_v40, %v3159_v36  ;;  %4975 = vst [vmem:[#allocation8 + $0xbf0] sm:$0xff] %v4463_v23  ;;  %v5995_v10 = vld [vmem:[#allocation2 + $0xc68] sm:$0xff]  ;;  %v11996_v61 = vld [vmem:[#allocation110_spill] sm:$0xff]  ;;  %v11997_v22 = vld [vmem:[#allocation111_spill] sm:$0xff] }
 0x483   :  { %v4467_v42 = vadd.f32 %v11994_v44, %v3811_v30  ;;  %v2654_v38 = vsub.f32 %v5995_v10, %v11981_v52  ;;  %v3164_v7 = vmul.f32 %v2652_v32, %v11982_v3  ;;  %v3816_v25 = vmul.f32 %v11995_v0, %v3160_v14  ;;  %4976 = vst [vmem:[#allocation8 + $0xbf8] sm:$0xff] %v4464_v48  ;;  %v5996_v21 = vld [vmem:[#allocation2 + $0xc70] sm:$0xff]  ;;  %v11998_v40 = vld [vmem:[#allocation113_spill] sm:$0xff]  ;;  %v5997_v23 = vld [vmem:[#allocation2 + $0xc78] sm:$0xff] }
 0x484   :  { %v4468_v8 = vadd.f32 %v11996_v61, %v3812_v35  ;;  %v2655_v34 = vsub.f32 %v5996_v21, %v11981_v52  ;;  %v3165_v26 = vmul.f32 %v2653_v28, %v11982_v3  ;;  %v3817_v36 = vmul.f32 %v11997_v22, %v3161_v46  ;;  %4977 = vst [vmem:[#allocation8 + $0xc00] sm:$0xff] %v4465_v56  ;;  %v11999_v44 = vld [vmem:[#allocation112_spill] sm:$0xff]  ;;  %v12001_v61 = vld [vmem:[#allocation114_spill] sm:$0xff]  ;;  %v12002_v22 = vld [vmem:[#allocation117_spill] sm:$0xff] }
 0x485   :  { %v4469_v30 = vadd.f32 %v11998_v40, %v3813_v51  ;;  %v2656_v10 = vsub.f32 %v5997_v23, %v11981_v52  ;;  %v3166_v32 = vmul.f32 %v2654_v38, %v11982_v3  ;;  %v3818_v14 = vmul.f32 %v11999_v44, %v3162_v59  ;;  %v12000_v0 = vld [vmem:[#allocation116_spill] sm:$0xff]  ;;  %4978 = vst [vmem:[#allocation8 + $0xc08] sm:$0xff] %v4466_v12  ;;  %v5999_v56 = vld [vmem:[#allocation2 + $0xc88] sm:$0xff]  ;;  %v12003_v40 = vld [vmem:[#allocation115_spill] sm:$0xff] }
 0x486   :  { %v4470_v35 = vadd.f32 %v12000_v0, %v3814_v41  ;;  %v5998_v48 = vld [vmem:[#allocation2 + $0xc80] sm:$0xff]  ;;  %v3167_v28 = vmul.f32 %v2655_v34, %v11982_v3  ;;  %v3819_v46 = vmul.f32 %v12001_v61, %v3163_v49  ;;  %v4471_v51 = vadd.f32 %v12002_v22, %v3815_v5  ;;  %4979 = vst [vmem:[#allocation8 + $0xc10] sm:$0xff] %v4467_v42  ;;  %v12004_v44 = vld [vmem:[#allocation118_spill] sm:$0xff]  ;;  %v12005_v0 = vld [vmem:[#allocation119_spill] sm:$0xff] }
 0x487   :  { %v2657_v21 = vsub.f32 %v5998_v48, %v11981_v52  ;;  %v2658_v23 = vsub.f32 %v5999_v56, %v11981_v52  ;;  %v3168_v38 = vmul.f32 %v2656_v10, %v11982_v3  ;;  %v3820_v59 = vmul.f32 %v12003_v40, %v3164_v7  ;;  %4980 = vst [vmem:[#allocation8 + $0xc18] sm:$0xff] %v4468_v8  ;;  %v6000_v12 = vld [vmem:[#allocation2 + $0xc90] sm:$0xff]  ;;  %v12006_v61 = vld [vmem:[#allocation120_spill] sm:$0xff]  ;;  %v6001_v42 = vld [vmem:[#allocation2 + $0xc98] sm:$0xff] }
 0x488   :  { %v4472_v41 = vadd.f32 %v12004_v44, %v3816_v25  ;;  %v2659_v48 = vsub.f32 %v6000_v12, %v11981_v52  ;;  %v3821_v49 = vmul.f32 %v12005_v0, %v3165_v26  ;;  %v4473_v5 = vadd.f32 %v12006_v61, %v3817_v36  ;;  %4981 = vst [vmem:[#allocation8 + $0xc20] sm:$0xff] %v4469_v30  ;;  %v12007_v22 = vld [vmem:[#allocation121_spill] sm:$0xff]  ;;  %v12008_v40 = vld [vmem:[#allocation122_spill] sm:$0xff]  ;;  %v6002_v8 = vld [vmem:[#allocation2 + $0xca0] sm:$0xff] }
 0x489   :  { %v3169_v34 = vmul.f32 %v2657_v21, %v11982_v3  ;;  %v2660_v56 = vsub.f32 %v6001_v42, %v11981_v52  ;;  %v3170_v10 = vmul.f32 %v2658_v23, %v11982_v3  ;;  %v3822_v7 = vmul.f32 %v12007_v22, %v3166_v32  ;;  %4982 = vst [vmem:[#allocation8 + $0xc28] sm:$0xff] %v4470_v35  ;;  %v12009_v44 = vld [vmem:[#allocation123_spill] sm:$0xff]  ;;  %v12010_v0 = vld [vmem:[#allocation124_spill] sm:$0xff]  ;;  %v6003_v30 = vld [vmem:[#allocation2 + $0xca8] sm:$0xff] }
 0x48a   :  { %v4474_v25 = vadd.f32 %v12008_v40, %v3818_v14  ;;  %v2661_v12 = vsub.f32 %v6002_v8, %v11981_v52  ;;  %v3171_v21 = vmul.f32 %v2659_v48, %v11982_v3  ;;  %v3823_v26 = vmul.f32 %v12009_v44, %v3167_v28  ;;  %4983 = vst [vmem:[#allocation8 + $0xc30] sm:$0xff] %v4471_v51  ;;  %v12011_v61 = vld [vmem:[#allocation125_spill] sm:$0xff]  ;;  %v12012_v22 = vld [vmem:[#allocation126_spill] sm:$0xff]  ;;  %v12013_v40 = vld [vmem:[#allocation127_spill] sm:$0xff] }
 0x48b   :  { %v4475_v36 = vadd.f32 %v12010_v0, %v3819_v46  ;;  %v2662_v42 = vsub.f32 %v6003_v30, %v11981_v52  ;;  %v3172_v23 = vmul.f32 %v2660_v56, %v11982_v3  ;;  %v3824_v32 = vmul.f32 %v12011_v61, %v3168_v38  ;;  %4984 = vst [vmem:[#allocation8 + $0xc38] sm:$0xff] %v4472_v41  ;;  %v6004_v35 = vld [vmem:[#allocation2 + $0xcb0] sm:$0xff]  ;;  %v12014_v44 = vld [vmem:[#allocation128_spill] sm:$0xff]  ;;  %v6005_v51 = vld [vmem:[#allocation2 + $0xcb8] sm:$0xff] }
 0x48c   :  { %v4476_v14 = vadd.f32 %v12012_v22, %v3820_v59  ;;  %v2663_v8 = vsub.f32 %v6004_v35, %v11981_v52  ;;  %v3173_v48 = vmul.f32 %v2661_v12, %v11982_v3  ;;  %v3825_v28 = vmul.f32 %v12013_v40, %v3169_v34  ;;  %4985 = vst [vmem:[#allocation8 + $0xc40] sm:$0xff] %v4473_v5  ;;  %v12015_v0 = vld [vmem:[#allocation129_spill] sm:$0xff]  ;;  %v12016_v61 = vld [vmem:[#allocation130_spill] sm:$0xff]  ;;  %v6006_v41 = vld [vmem:[#allocation2 + $0xcc0] sm:$0xff] }
 0x48d   :  { %v4477_v46 = vadd.f32 %v12014_v44, %v3821_v49  ;;  %v2664_v30 = vsub.f32 %v6005_v51, %v11981_v52  ;;  %v3174_v56 = vmul.f32 %v2662_v42, %v11982_v3  ;;  %v3826_v38 = vmul.f32 %v12015_v0, %v3170_v10  ;;  %4986 = vst [vmem:[#allocation8 + $0xc48] sm:$0xff] %v4474_v25  ;;  %v12017_v22 = vld [vmem:[#allocation131_spill] sm:$0xff]  ;;  %v12018_v40 = vld [vmem:[#allocation132_spill] sm:$0xff]  ;;  %v6007_v5 = vld [vmem:[#allocation2 + $0xcc8] sm:$0xff] }
 0x48e   :  { %v4478_v59 = vadd.f32 %v12016_v61, %v3822_v7  ;;  %v2665_v35 = vsub.f32 %v6006_v41, %v11981_v52  ;;  %v3175_v12 = vmul.f32 %v2663_v8, %v11982_v3  ;;  %v3827_v34 = vmul.f32 %v12017_v22, %v3171_v21  ;;  %4987 = vst [vmem:[#allocation8 + $0xc50] sm:$0xff] %v4475_v36  ;;  %v12019_v44 = vld [vmem:[#allocation133_spill] sm:$0xff]  ;;  %v12020_v0 = vld [vmem:[#allocation134_spill] sm:$0xff]  ;;  %v12021_v61 = vld [vmem:[#allocation135_spill] sm:$0xff] }
 0x48f   :  { %v4479_v49 = vadd.f32 %v12018_v40, %v3823_v26  ;;  %v2666_v51 = vsub.f32 %v6007_v5, %v11981_v52  ;;  %v3176_v42 = vmul.f32 %v2664_v30, %v11982_v3  ;;  %v3828_v10 = vmul.f32 %v12019_v44, %v3172_v23  ;;  %4988 = vst [vmem:[#allocation8 + $0xc58] sm:$0xff] %v4476_v14  ;;  %v6008_v25 = vld [vmem:[#allocation2 + $0xcd0] sm:$0xff]  ;;  %v6009_v36 = vld [vmem:[#allocation2 + $0xcd8] sm:$0xff]  ;;  %v12022_v40 = vld [vmem:[#allocation137_spill] sm:$0xff] }
 0x490   :  { %v4480_v7 = vadd.f32 %v12020_v0, %v3824_v32  ;;  %v2667_v41 = vsub.f32 %v6008_v25, %v11981_v52  ;;  %v3177_v8 = vmul.f32 %v2665_v35, %v11982_v3  ;;  %v3829_v21 = vmul.f32 %v12021_v61, %v3173_v48  ;;  %4989 = vst [vmem:[#allocation8 + $0xc60] sm:$0xff] %v4477_v46  ;;  %v12023_v44 = vld [vmem:[#allocation138_spill] sm:$0xff]  ;;  %v6010_v14 = vld [vmem:[#allocation2 + $0xce0] sm:$0xff]  ;;  %v12024_v0 = vld [vmem:[#allocation139_spill] sm:$0xff] }
 0x491   :  { %v4481_v26 = vadd.f32 %v11924_v6, %v3825_v28  ;;  %v2668_v5 = vsub.f32 %v6009_v36, %v11981_v52  ;;  %v3178_v30 = vmul.f32 %v2666_v51, %v11982_v3  ;;  %v3830_v23 = vmul.f32 %v12022_v40, %v3174_v56  ;;  %4990 = vst [vmem:[#allocation8 + $0xc68] sm:$0xff] %v4478_v59  ;;  %v12025_v61 = vld [vmem:[#allocation140_spill] sm:$0xff]  ;;  %v6011_v46 = vld [vmem:[#allocation2 + $0xce8] sm:$0xff]  ;;  %v12027_v40 = vld [vmem:[#allocation142_spill] sm:$0xff] }
 0x492   :  { %v4482_v32 = vadd.f32 %v12023_v44, %v3826_v38  ;;  %v2669_v25 = vsub.f32 %v6010_v14, %v11981_v52  ;;  %v3179_v35 = vmul.f32 %v2667_v41, %v11982_v3  ;;  %v3831_v48 = vmul.f32 %v12024_v0, %v3175_v12  ;;  %4991 = vst [vmem:[#allocation8 + $0xc70] sm:$0xff] %v4479_v49  ;;  %v12026_v6 = vld [vmem:[#allocation141_spill] sm:$0xff]  ;;  %v6012_v59 = vld [vmem:[#allocation2 + $0xcf0] sm:$0xff]  ;;  %v12028_v44 = vld [vmem:[#allocation143_spill] sm:$0xff] }
 0x493   :  { %v4483_v28 = vadd.f32 %v12025_v61, %v3827_v34  ;;  %v2670_v36 = vsub.f32 %v6011_v46, %v11981_v52  ;;  %v3180_v51 = vmul.f32 %v2668_v5, %v11982_v3  ;;  %v3832_v56 = vmul.f32 %v12026_v6, %v3176_v42  ;;  %4992 = vst [vmem:[#allocation8 + $0xc78] sm:$0xff] %v4480_v7  ;;  %v12029_v0 = vld [vmem:[#allocation144_spill] sm:$0xff]  ;;  %v6013_v49 = vld [vmem:[#allocation2 + $0xcf8] sm:$0xff]  ;;  %v12030_v61 = vld [vmem:[#allocation145_spill] sm:$0xff] }
 0x494   :  { %v4484_v38 = vadd.f32 %v12027_v40, %v3828_v10  ;;  %v2671_v14 = vsub.f32 %v6012_v59, %v11981_v52  ;;  %v3181_v41 = vmul.f32 %v2669_v25, %v11982_v3  ;;  %v3833_v12 = vmul.f32 %v12028_v44, %v3177_v8  ;;  %4993 = vst [vmem:[#allocation8 + $0xc80] sm:$0xff] %v4481_v26  ;;  %v6014_v7 = vld [vmem:[#allocation2 + $0xd00] sm:$0xff]  ;;  %v12031_v40 = vld [vmem:[#allocation147_spill] sm:$0xff]  ;;  %v6015_v26 = vld [vmem:[#allocation2 + $0xd08] sm:$0xff] }
 0x495   :  { %v4485_v34 = vadd.f32 %v12029_v0, %v3829_v21  ;;  %v2672_v46 = vsub.f32 %v6013_v49, %v11981_v52  ;;  %v3182_v5 = vmul.f32 %v2670_v36, %v11982_v3  ;;  %v3834_v42 = vmul.f32 %v12030_v61, %v3178_v30  ;;  %4994 = vst [vmem:[#allocation8 + $0xc88] sm:$0xff] %v4482_v32  ;;  %v12032_v44 = vld [vmem:[#allocation148_spill] sm:$0xff]  ;;  %v12033_v0 = vld [vmem:[#allocation149_spill] sm:$0xff]  ;;  %v12034_v61 = vld [vmem:[#allocation150_spill] sm:$0xff] }
 0x496   :  { %v4486_v10 = vadd.f32 %v11933_v16, %v3830_v23  ;;  %v2673_v59 = vsub.f32 %v6014_v7, %v11981_v52  ;;  %v3183_v25 = vmul.f32 %v2671_v14, %v11982_v3  ;;  %v3835_v8 = vmul.f32 %v12031_v40, %v3179_v35  ;;  %4995 = vst [vmem:[#allocation8 + $0xc90] sm:$0xff] %v4483_v28  ;;  %v6016_v32 = vld [vmem:[#allocation2 + $0xd10] sm:$0xff]  ;;  %v12035_v16 = vld [vmem:[#allocation151_spill] sm:$0xff] }
 0x497   :  { %v4487_v21 = vadd.f32 %v12032_v44, %v3831_v48  ;;  %v2674_v49 = vsub.f32 %v6015_v26, %v11981_v52  ;;  %v3184_v36 = vmul.f32 %v2672_v46, %v11982_v3  ;;  %v3836_v30 = vmul.f32 %v12033_v0, %v3180_v51  ;;  %4996 = vst [vmem:[#allocation8 + $0xc98] sm:$0xff] %v4484_v38  ;;  %v6017_v28 = vld [vmem:[#allocation2 + $0xd18] sm:$0xff]  ;;  %v12036_v0 = vld [vmem:[#allocation154_spill] sm:$0xff]  ;;  %v6018_v38 = vld [vmem:[#allocation2 + $0xd20] sm:$0xff] }
 0x498   :  { %v4488_v23 = vadd.f32 %v12034_v61, %v3832_v56  ;;  %v2675_v7 = vsub.f32 %v6016_v32, %v11981_v52  ;;  %v3185_v14 = vmul.f32 %v2673_v59, %v11982_v3  ;;  %v3837_v35 = vmul.f32 %v12035_v16, %v3181_v41  ;;  %4997 = vst [vmem:[#allocation8 + $0xca0] sm:$0xff] %v4485_v34  ;;  %v12037_v61 = vld [vmem:[#allocation155_spill] sm:$0xff]  ;;  %v12038_v16 = vld [vmem:[#allocation156_spill] sm:$0xff]  ;;  %v6019_v34 = vld [vmem:[#allocation2 + $0xd28] sm:$0xff] }
 0x499   :  { %v4489_v48 = vadd.f32 %v11938_v33, %v3833_v12  ;;  %v2676_v26 = vsub.f32 %v6017_v28, %v11981_v52  ;;  %v3186_v46 = vmul.f32 %v2674_v49, %v11982_v3  ;;  %v3838_v51 = vmul.f32 %v11939_v37, %v3182_v5  ;;  %4998 = vst [vmem:[#allocation8 + $0xca8] sm:$0xff] %v4486_v10  ;;  %v12039_v33 = vld [vmem:[#allocation157_spill] sm:$0xff]  ;;  %v12040_v37 = vld [vmem:[#allocation158_spill] sm:$0xff] }
 0x49a   :  { %v4490_v56 = vadd.f32 %v12036_v0, %v3834_v42  ;;  %v2677_v32 = vsub.f32 %v6018_v38, %v11981_v52  ;;  %v3187_v59 = vmul.f32 %v2675_v7, %v11982_v3  ;;  %v3839_v41 = vmul.f32 %v12037_v61, %v3183_v25  ;;  %4999 = vst [vmem:[#allocation8 + $0xcb0] sm:$0xff] %v4487_v21  ;;  %v6020_v10 = vld [vmem:[#allocation2 + $0xd30] sm:$0xff]  ;;  %v12041_v0 = vld [vmem:[#allocation159_spill] sm:$0xff]  ;;  %v12042_v61 = vld [vmem:[#allocation160_spill] sm:$0xff] }
 0x49b   :  { %v4491_v12 = vadd.f32 %v12038_v16, %v3835_v8  ;;  %v2678_v28 = vsub.f32 %v6019_v34, %v11981_v52  ;;  %v3188_v49 = vmul.f32 %v2676_v26, %v11982_v3  ;;  %v3840_v5 = vmul.f32 %v12039_v33, %v3184_v36  ;;  %5000 = vst [vmem:[#allocation8 + $0xcb8] sm:$0xff] %v4488_v23  ;;  %v6021_v21 = vld [vmem:[#allocation2 + $0xd38] sm:$0xff]  ;;  %v12043_v16 = vld [vmem:[#allocation161_spill] sm:$0xff]  ;;  %v6022_v23 = vld [vmem:[#allocation2 + $0xd40] sm:$0xff] }
 0x49c   :  { %v4492_v42 = vadd.f32 %v12040_v37, %v3836_v30  ;;  %v2679_v38 = vsub.f32 %v6020_v10, %v11981_v52  ;;  %v3189_v7 = vmul.f32 %v2677_v32, %v11982_v3  ;;  %v3841_v25 = vmul.f32 %v12041_v0, %v3185_v14  ;;  %5001 = vst [vmem:[#allocation8 + $0xcc0] sm:$0xff] %v4489_v48  ;;  %v6023_v48 = vld [vmem:[#allocation2 + $0xd48] sm:$0xff] }
 0x49d   :  { %v4493_v8 = vadd.f32 %v12042_v61, %v3837_v35  ;;  %v2680_v34 = vsub.f32 %v6021_v21, %v11981_v52  ;;  %v3190_v26 = vmul.f32 %v2678_v28, %v11982_v3  ;;  %v3842_v36 = vmul.f32 %v12043_v16, %v3186_v46  ;;  %5002 = vst [vmem:[#allocation8 + $0xcc8] sm:$0xff] %v4490_v56  ;;  %v12044_v61 = vld [vmem:[#allocation165_spill] sm:$0xff]  ;;  %v6024_v56 = vld [vmem:[#allocation2 + $0xd50] sm:$0xff] }
 0x49e   :  { %v4494_v30 = vadd.f32 %v11946_v50, %v3838_v51  ;;  %v2681_v10 = vsub.f32 %v6022_v23, %v11981_v52  ;;  %v3191_v32 = vmul.f32 %v2679_v38, %v11982_v3  ;;  %v3843_v14 = vmul.f32 %v11947_v1, %v3187_v59  ;;  %5003 = vst [vmem:[#allocation8 + $0xcd0] sm:$0xff] %v4491_v12  ;;  %v12045_v50 = vld [vmem:[#allocation167_spill] sm:$0xff]  ;;  %v12046_v1 = vld [vmem:[#allocation168_spill] sm:$0xff] }
 0x49f   :  { %v4495_v35 = vadd.f32 %v11948_v45, %v3839_v41  ;;  %v2682_v21 = vsub.f32 %v6023_v48, %v11981_v52  ;;  %v3192_v28 = vmul.f32 %v2680_v34, %v11982_v3  ;;  %v3844_v46 = vmul.f32 %v12044_v61, %v3188_v49  ;;  %5004 = vst [vmem:[#allocation8 + $0xcd8] sm:$0xff] %v4492_v42  ;;  %v6025_v12 = vld [vmem:[#allocation2 + $0xd58] sm:$0xff]  ;;  %v12047_v45 = vld [vmem:[#allocation169_spill] sm:$0xff]  ;;  %v12048_v61 = vld [vmem:[#allocation170_spill] sm:$0xff] }
 0x4a0   :  { %v4496_v51 = vadd.f32 %v11950_v54, %v3840_v5  ;;  %v2683_v23 = vsub.f32 %v6024_v56, %v11981_v52  ;;  %v3193_v38 = vmul.f32 %v2681_v10, %v11982_v3  ;;  %v3845_v59 = vmul.f32 %v12045_v50, %v3189_v7  ;;  %5005 = vst [vmem:[#allocation8 + $0xce0] sm:$0xff] %v4493_v8  ;;  %v6026_v42 = vld [vmem:[#allocation2 + $0xd60] sm:$0xff]  ;;  %v12049_v54 = vld [vmem:[#allocation171_spill] sm:$0xff]  ;;  %v6027_v8 = vld [vmem:[#allocation2 + $0xd68] sm:$0xff] }
 0x4a1   :  { %v4497_v41 = vadd.f32 %v12046_v1, %v3841_v25  ;;  %v2684_v48 = vsub.f32 %v6025_v12, %v11981_v52  ;;  %v3194_v34 = vmul.f32 %v2682_v21, %v11982_v3  ;;  %v3846_v49 = vmul.f32 %v12047_v45, %v3190_v26  ;;  %5006 = vst [vmem:[#allocation8 + $0xce8] sm:$0xff] %v4494_v30  ;;  %v12050_v50 = vld [vmem:[#allocation172_spill] sm:$0xff]  ;;  %v12051_v1 = vld [vmem:[#allocation173_spill] sm:$0xff]  ;;  %v12052_v45 = vld [vmem:[#allocation174_spill] sm:$0xff] }
 0x4a2   :  { %v4498_v5 = vadd.f32 %v12048_v61, %v3842_v36  ;;  %v2685_v56 = vsub.f32 %v6026_v42, %v11981_v52  ;;  %v3195_v10 = vmul.f32 %v2683_v23, %v11982_v3  ;;  %v3847_v7 = vmul.f32 %v12049_v54, %v3191_v32  ;;  %5007 = vst [vmem:[#allocation8 + $0xcf0] sm:$0xff] %v4495_v35  ;;  %v6028_v30 = vld [vmem:[#allocation2 + $0xd70] sm:$0xff]  ;;  %v12053_v61 = vld [vmem:[#allocation175_spill] sm:$0xff]  ;;  %v12054_v54 = vld [vmem:[#allocation176_spill] sm:$0xff] }
 0x4a3   :  { %v4499_v25 = vadd.f32 %v12050_v50, %v3843_v14  ;;  %v2686_v12 = vsub.f32 %v6027_v8, %v11981_v52  ;;  %v3196_v21 = vmul.f32 %v2684_v48, %v11982_v3  ;;  %v3848_v26 = vmul.f32 %v12051_v1, %v3192_v28  ;;  %5008 = vst [vmem:[#allocation8 + $0xcf8] sm:$0xff] %v4496_v51  ;;  %v6029_v35 = vld [vmem:[#allocation2 + $0xd78] sm:$0xff]  ;;  %v12055_v50 = vld [vmem:[#allocation177_spill] sm:$0xff]  ;;  %v6030_v51 = vld [vmem:[#allocation2 + $0xd80] sm:$0xff] }
 0x4a4   :  { %v4500_v36 = vadd.f32 %v12052_v45, %v3844_v46  ;;  %v2687_v42 = vsub.f32 %v6028_v30, %v11981_v52  ;;  %v3197_v23 = vmul.f32 %v2685_v56, %v11982_v3  ;;  %v3849_v32 = vmul.f32 %v12053_v61, %v3193_v38  ;;  %5009 = vst [vmem:[#allocation8 + $0xd00] sm:$0xff] %v4497_v41  ;;  %v12056_v45 = vld [vmem:[#allocation179_spill] sm:$0xff]  ;;  %v6031_v41 = vld [vmem:[#allocation2 + $0xd88] sm:$0xff] }
 0x4a5   :  { %v4501_v14 = vadd.f32 %v12054_v54, %v3845_v59  ;;  %v2688_v8 = vsub.f32 %v6029_v35, %v11981_v52  ;;  %v3198_v48 = vmul.f32 %v2686_v12, %v11982_v3  ;;  %v3850_v28 = vmul.f32 %v12055_v50, %v3194_v34  ;;  %5010 = vst [vmem:[#allocation8 + $0xd08] sm:$0xff] %v4498_v5  ;;  %v6032_v5 = vld [vmem:[#allocation2 + $0xd90] sm:$0xff] }
 0x4a6   :  { %v4502_v46 = vadd.f32 %v11958_v20, %v3846_v49  ;;  %v2689_v30 = vsub.f32 %v6030_v51, %v11981_v52  ;;  %v3199_v56 = vmul.f32 %v2687_v42, %v11982_v3  ;;  %v3851_v38 = vmul.f32 %v12056_v45, %v3195_v10  ;;  %5011 = vst [vmem:[#allocation8 + $0xd10] sm:$0xff] %v4499_v25  ;;  %v12057_v20 = vld [vmem:[#allocation183_spill] sm:$0xff]  ;;  %v12058_v45 = vld [vmem:[#allocation17_spill] sm:$0xff] }
 0x4a7   :  { %v4503_v59 = vadd.f32 %v11960_v24, %v3847_v7  ;;  %v2690_v35 = vsub.f32 %v6031_v41, %v11981_v52  ;;  %v3200_v12 = vmul.f32 %v2688_v8, %v11982_v3  ;;  %v3852_v34 = vmul.f32 %v11961_v29, %v3196_v21  ;;  %5012 = vst [vmem:[#allocation8 + $0xd18] sm:$0xff] %v4500_v36  ;;  %v6033_v25 = vld [vmem:[#allocation2 + $0xd98] sm:$0xff]  ;;  %v12059_v24 = vld [vmem:[#allocation184_spill] sm:$0xff]  ;;  %v12060_v29 = vld [vmem:[#allocation18_spill] sm:$0xff] }
 0x4a8   :  { %v4504_v49 = vadd.f32 %v11962_v13, %v3848_v26  ;;  %v2691_v51 = vsub.f32 %v6032_v5, %v11981_v52  ;;  %v3201_v42 = vmul.f32 %v2689_v30, %v11982_v3  ;;  %v3853_v10 = vmul.f32 %v12057_v20, %v3197_v23  ;;  %5013 = vst [vmem:[#allocation8 + $0xd20] sm:$0xff] %v4501_v14  ;;  %v6034_v36 = vld [vmem:[#allocation2 + $0xda0] sm:$0xff]  ;;  %v12061_v13 = vld [vmem:[#allocation185_spill] sm:$0xff]  ;;  %v12062_v20 = vld [vmem:[#allocation19_spill] sm:$0xff] }
 0x4a9   :  { %v4505_v7 = vadd.f32 %v12058_v45, %v3849_v32  ;;  %v2692_v41 = vsub.f32 %v6033_v25, %v11981_v52  ;;  %v3202_v8 = vmul.f32 %v2690_v35, %v11982_v3  ;;  %v3854_v21 = vmul.f32 %v12059_v24, %v3198_v48  ;;  %5014 = vst [vmem:[#allocation8 + $0xd28] sm:$0xff] %v4502_v46  ;;  %v6035_v14 = vld [vmem:[#allocation2 + $0xda8] sm:$0xff]  ;;  %v12063_v45 = vld [vmem:[#allocation186_spill] sm:$0xff]  ;;  %v12064_v24 = vld [vmem:[#allocation20_spill] sm:$0xff] }
 0x4aa   :  { %v4506_v26 = vadd.f32 %v12060_v29, %v3850_v28  ;;  %v2693_v5 = vsub.f32 %v6034_v36, %v11981_v52  ;;  %v3203_v30 = vmul.f32 %v2691_v51, %v11982_v3  ;;  %v3855_v23 = vmul.f32 %v12061_v13, %v3199_v56  ;;  %5015 = vst [vmem:[#allocation8 + $0xd30] sm:$0xff] %v4503_v59  ;;  %v6036_v46 = vld [vmem:[#allocation2 + $0xdb0] sm:$0xff]  ;;  %v12065_v29 = vld [vmem:[#allocation187_spill] sm:$0xff]  ;;  %v12066_v13 = vld [vmem:[#allocation21_spill] sm:$0xff] }
 0x4ab   :  { %v4507_v32 = vadd.f32 %v12062_v20, %v3851_v38  ;;  %v2694_v25 = vsub.f32 %v6035_v14, %v11981_v52  ;;  %v3204_v35 = vmul.f32 %v2692_v41, %v11982_v3  ;;  %v3856_v48 = vmul.f32 %v12063_v45, %v3200_v12  ;;  %5016 = vst [vmem:[#allocation8 + $0xd38] sm:$0xff] %v4504_v49  ;;  %v6037_v59 = vld [vmem:[#allocation2 + $0xdb8] sm:$0xff]  ;;  %v12067_v45 = vld [vmem:[#allocation24_spill] sm:$0xff] }
 0x4ac   :  { %v4508_v28 = vadd.f32 %v12064_v24, %v3852_v34  ;;  %v2695_v36 = vsub.f32 %v6036_v46, %v11981_v52  ;;  %v3205_v51 = vmul.f32 %v2693_v5, %v11982_v3  ;;  %v3857_v56 = vmul.f32 %v12065_v29, %v3201_v42  ;;  %5017 = vst [vmem:[#allocation8 + $0xd40] sm:$0xff] %v4505_v7  ;;  %v6038_v49 = vld [vmem:[#allocation2 + $0xdc0] sm:$0xff]  ;;  %v12068_v24 = vld [vmem:[#allocation189_spill] sm:$0xff] }
 0x4ad   :  { %v4509_v38 = vadd.f32 %v12066_v13, %v3853_v10  ;;  %v2696_v14 = vsub.f32 %v6037_v59, %v11981_v52  ;;  %v3206_v41 = vmul.f32 %v2694_v25, %v11982_v3  ;;  %v3858_v12 = vmul.f32 %v11969_v55, %v3202_v8  ;;  %5018 = vst [vmem:[#allocation8 + $0xd48] sm:$0xff] %v4506_v26  ;;  %v6039_v7 = vld [vmem:[#allocation2 + $0xdc8] sm:$0xff]  ;;  %v12069_v55 = vld [vmem:[#allocation26_spill] sm:$0xff] }
 0x4ae   :  { %v4510_v34 = vadd.f32 %v12067_v45, %v3854_v21  ;;  %v2697_v46 = vsub.f32 %v6038_v49, %v11981_v52  ;;  %v3207_v5 = vmul.f32 %v2695_v36, %v11982_v3  ;;  %v3859_v42 = vmul.f32 %v12068_v24, %v3203_v30  ;;  %5019 = vst [vmem:[#allocation8 + $0xd50] sm:$0xff] %v4507_v32  ;;  %v6040_v26 = vld [vmem:[#allocation2 + $0xdd0] sm:$0xff]  ;;  %v12070_v45 = vld [vmem:[#allocation191_spill] sm:$0xff] }
 0x4af   :  { %v4511_v10 = vadd.f32 %v11972_v39, %v3855_v23  ;;  %v2698_v59 = vsub.f32 %v6039_v7, %v11981_v52  ;;  %v3208_v25 = vmul.f32 %v2696_v14, %v11982_v3  ;;  %v3860_v8 = vmul.f32 %v11973_v63, %v3204_v35  ;;  %5020 = vst [vmem:[#allocation8 + $0xd58] sm:$0xff] %v4508_v28  ;;  %v12071_v24 = vld [vmem:[#allocation27_spill] sm:$0xff]  ;;  %v12072_v39 = vld [vmem:[#allocation192_spill] sm:$0xff] }
 0x4b0   :  { %v4512_v21 = vadd.f32 %v12069_v55, %v3856_v48  ;;  %v2699_v49 = vsub.f32 %v6040_v26, %v11981_v52  ;;  %v3209_v36 = vmul.f32 %v2697_v46, %v11982_v3  ;;  %v3861_v30 = vmul.f32 %v12070_v45, %v3205_v51  ;;  %5021 = vst [vmem:[#allocation8 + $0xd60] sm:$0xff] %v4509_v38  ;;  %v6041_v32 = vld [vmem:[#allocation2 + $0xdd8] sm:$0xff]  ;;  %v6042_v28 = vld [vmem:[#allocation2 + $0xde0] sm:$0xff]  ;;  %v6043_v38 = vld [vmem:[#allocation2 + $0xde8] sm:$0xff] }
 0x4b1   :  { %v4513_v23 = vadd.f32 %v12071_v24, %v3857_v56  ;;  %v2700_v7 = vsub.f32 %v6041_v32, %v11981_v52  ;;  %v3210_v14 = vmul.f32 %v2698_v59, %v11982_v3  ;;  %v3862_v35 = vmul.f32 %v12072_v39, %v3206_v41  ;;  %5022 = vst [vmem:[#allocation8 + $0xd68] sm:$0xff] %v4510_v34  ;;  %v12073_v24 = vld [vmem:[#allocation194_spill] sm:$0xff] }
 0x4b2   :  { %v4514_v48 = vadd.f32 %v11880_v2, %v3858_v12  ;;  %v2701_v26 = vsub.f32 %v6042_v28, %v11981_v52  ;;  %v3211_v46 = vmul.f32 %v2699_v49, %v11982_v3  ;;  %v3863_v51 = vmul.f32 %v11976_v4, %v3207_v5  ;;  %5023 = vst [vmem:[#allocation8 + $0xd70] sm:$0xff] %v4511_v10  ;;  %v12074_v39 = vld [vmem:[#allocation30_spill] sm:$0xff]  ;;  %v6045_v10 = vld [vmem:[#allocation2 + $0xdf8] sm:$0xff] }
 0x4b3   :  { %v4515_v56 = vadd.f32 %v11977_v15, %v3859_v42  ;;  %v2702_v32 = vsub.f32 %v6043_v38, %v11981_v52  ;;  %v3212_v59 = vmul.f32 %v2700_v7, %v11982_v3  ;;  %v3864_v41 = vmul.f32 %v12073_v24, %v3208_v25  ;;  %5024 = vst [vmem:[#allocation8 + $0xd78] sm:$0xff] %v4512_v21  ;;  %v6044_v34 = vld [vmem:[#allocation2 + $0xdf0] sm:$0xff]  ;;  %v6046_v21 = vld [vmem:[#allocation2 + $0xe00] sm:$0xff] }
 0x4b4   :  { %v4516_v12 = vadd.f32 %v12074_v39, %v3860_v8  ;;  %v2703_v28 = vsub.f32 %v6044_v34, %v11981_v52  ;;  %v3213_v49 = vmul.f32 %v2701_v26, %v11982_v3  ;;  %v3865_v5 = vmul.f32 %v11781_v31, %v3209_v36  ;;  %5025 = vst [vmem:[#allocation8 + $0xd80] sm:$0xff] %v4513_v23  ;;  %v12075_v39 = vld [vmem:[#allocation48_spill] sm:$0xff]  ;;  %v6047_v23 = vld [vmem:[#allocation2 + $0xe08] sm:$0xff] }
 0x4b5   :  { %v4517_v42 = vadd.f32 %v11677_v9, %v3861_v30  ;;  %v2704_v38 = vsub.f32 %v6045_v10, %v11981_v52  ;;  %v3214_v7 = vmul.f32 %v2702_v32, %v11982_v3  ;;  %v3866_v25 = vmul.f32 %v11883_v43, %v3210_v14  ;;  %5026 = vst [vmem:[#allocation8 + $0xd88] sm:$0xff] %v4514_v48  ;;  %v6048_v48 = vld [vmem:[#allocation2 + $0xe10] sm:$0xff] }
 0x4b6   :  { %v4518_v8 = vadd.f32 %v11980_v17, %v3862_v35  ;;  %v2705_v34 = vsub.f32 %v6046_v21, %v12075_v39  ;;  %v3215_v26 = vmul.f32 %v2703_v28, %v11982_v3  ;;  %v3867_v36 = vmul.f32 %v11886_v27, %v3211_v46  ;;  %5027 = vst [vmem:[#allocation8 + $0xd90] sm:$0xff] %v4515_v56  ;;  %v12076_v21 = vld [vmem:[#allocation53_spill] sm:$0xff]  ;;  %v12077_v27 = vld [vmem:[#allocation35_spill] sm:$0xff] }
 0x4b7   :  { %v4519_v30 = vadd.f32 %v11681_v62, %v3863_v51  ;;  %v2706_v52 = vsub.f32 %v6047_v23, %v12075_v39  ;;  %v3216_v32 = vmul.f32 %v2704_v38, %v11982_v3  ;;  %v3868_v14 = vmul.f32 %v11887_v57, %v3212_v59  ;;  %5028 = vst [vmem:[#allocation8 + $0xd98] sm:$0xff] %v4516_v12  ;;  %v6049_v56 = vld [vmem:[#allocation2 + $0xe18] sm:$0xff]  ;;  %v12078_v38 = vld [vmem:[#allocation41_spill] sm:$0xff]  ;;  %v6050_v12 = vld [vmem:[#allocation2 + $0xe20] sm:$0xff] }
 0x4b8   :  { %v4520_v35 = vadd.f32 %v11785_v11, %v3864_v41  ;;  %v2707_v10 = vsub.f32 %v6048_v48, %v12075_v39  ;;  %v3217_v28 = vmul.f32 %v2705_v34, %v12076_v21  ;;  %v3869_v46 = vmul.f32 %v11787_v60, %v3213_v49  ;;  %5029 = vst [vmem:[#allocation8 + $0xda0] sm:$0xff] %v4517_v42  ;;  %v12079_v60 = vld [vmem:[#allocation42_spill] sm:$0xff]  ;;  %v6051_v42 = vld [vmem:[#allocation2 + $0xe28] sm:$0xff] }
 0x4b9   :  { %v4521_v51 = vadd.f32 %v12077_v27, %v3865_v5  ;;  %v2708_v23 = vsub.f32 %v6049_v56, %v12075_v39  ;;  %v3218_v3 = vmul.f32 %v2706_v52, %v12076_v21  ;;  %v3870_v59 = vmul.f32 %v11789_v53, %v3214_v7  ;;  %5030 = vst [vmem:[#allocation8 + $0xda8] sm:$0xff] %v4518_v8  ;;  %v12080_v27 = vld [vmem:[#allocation202_spill] sm:$0xff]  ;;  %v12081_v53 = vld [vmem:[#allocation43_spill] sm:$0xff] }
 0x4ba   :  { %v4522_v41 = vadd.f32 %v12078_v38, %v3866_v25  ;;  %v2709_v48 = vsub.f32 %v6050_v12, %v12075_v39  ;;  %v3219_v34 = vmul.f32 %v2707_v10, %v12076_v21  ;;  %v3871_v49 = vmul.f32 %v11791_v58, %v3215_v26  ;;  %5031 = vst [vmem:[#allocation8 + $0xdb0] sm:$0xff] %v4519_v30  ;;  %v6052_v8 = vld [vmem:[#allocation2 + $0xe30] sm:$0xff]  ;;  %v12082_v38 = vld [vmem:[#allocation37_spill] sm:$0xff]  ;;  %v6053_v30 = vld [vmem:[#allocation2 + $0xe38] sm:$0xff] }
 0x4bb   :  { %v4523_v5 = vadd.f32 %v12079_v60, %v3867_v36  ;;  %v2710_v56 = vsub.f32 %v6051_v42, %v12075_v39  ;;  %v3220_v52 = vmul.f32 %v2708_v23, %v12076_v21  ;;  %v3872_v7 = vmul.f32 %v12080_v27, %v3216_v32  ;;  %5032 = vst [vmem:[#allocation8 + $0xdb8] sm:$0xff] %v4520_v35  ;;  %v12083_v58 = vld [vmem:[#allocation98_spill] sm:$0xff]  ;;  %v6054_v35 = vld [vmem:[#allocation2 + $0xe40] sm:$0xff] }
 0x4bc   :  { %v4524_v25 = vadd.f32 %v12081_v53, %v3868_v14  ;;  %v2711_v12 = vsub.f32 %v6052_v8, %v12075_v39  ;;  %v3221_v10 = vmul.f32 %v2709_v48, %v12076_v21  ;;  %v3873_v26 = vmul.f32 %v12082_v38, %v3217_v28  ;;  %5033 = vst [vmem:[#allocation8 + $0xdc0] sm:$0xff] %v4521_v51  ;;  %v12084_v38 = vld [vmem:[#allocation13_spill] sm:$0xff] }
 0x4bd   :  { %v4525_v36 = vadd.f32 %v12083_v58, %v3869_v46  ;;  %v2712_v42 = vsub.f32 %v6053_v30, %v12075_v39  ;;  %v3222_v23 = vmul.f32 %v2710_v56, %v12076_v21  ;;  %v3874_v32 = vmul.f32 %v11986_v19, %v3218_v3  ;;  %5034 = vst [vmem:[#allocation8 + $0xdc8] sm:$0xff] %v4522_v41  ;;  %v6055_v51 = vld [vmem:[#allocation2 + $0xe48] sm:$0xff]  ;;  %v12085_v58 = vld [vmem:[#allocation44_spill] sm:$0xff]  ;;  %v6056_v41 = vld [vmem:[#allocation2 + $0xe50] sm:$0xff] }
 0x4be   :  { %v4526_v14 = vadd.f32 %v11987_v47, %v3870_v59  ;;  %v2713_v8 = vsub.f32 %v6054_v35, %v12075_v39  ;;  %v3223_v48 = vmul.f32 %v2711_v12, %v12076_v21  ;;  %v3875_v28 = vmul.f32 %v11988_v18, %v3219_v34  ;;  %5035 = vst [vmem:[#allocation8 + $0xdd0] sm:$0xff] %v4523_v5  ;;  %v12086_v3 = vld [vmem:[#allocation45_spill] sm:$0xff]  ;;  %v12087_v47 = vld [vmem:[#allocation103_spill] sm:$0xff] }
 0x4bf   :  { %v4527_v46 = vadd.f32 %v12084_v38, %v3871_v49  ;;  %v2714_v30 = vsub.f32 %v6055_v51, %v12075_v39  ;;  %v3224_v56 = vmul.f32 %v2712_v42, %v12076_v21  ;;  %v3876_v19 = vmul.f32 %v12085_v58, %v3220_v52  ;;  %5036 = vst [vmem:[#allocation8 + $0xdd8] sm:$0xff] %v4524_v25  ;;  %v12088_v34 = vld [vmem:[#allocation107_spill] sm:$0xff]  ;;  %v12089_v38 = vld [vmem:[#allocation104_spill] sm:$0xff] }
 0x4c0   :  { %v4528_v59 = vadd.f32 %v12086_v3, %v3872_v7  ;;  %v2715_v35 = vsub.f32 %v6056_v41, %v12075_v39  ;;  %v3225_v12 = vmul.f32 %v2713_v8, %v12076_v21  ;;  %v3877_v18 = vmul.f32 %v12087_v47, %v3221_v10  ;;  %5037 = vst [vmem:[#allocation8 + $0xde0] sm:$0xff] %v4525_v36  ;;  %v6057_v5 = vld [vmem:[#allocation2 + $0xe58] sm:$0xff]  ;;  %v12090_v52 = vld [vmem:[#allocation108_spill] sm:$0xff]  ;;  %v12091_v3 = vld [vmem:[#allocation105_spill] sm:$0xff] }
 0x4c1   :  { %v4529_v49 = vadd.f32 %v12088_v34, %v3873_v26  ;;  %v2716_v51 = vsub.f32 %v6057_v5, %v12075_v39  ;;  %v3226_v42 = vmul.f32 %v2714_v30, %v12076_v21  ;;  %v3878_v58 = vmul.f32 %v12089_v38, %v3222_v23  ;;  %5038 = vst [vmem:[#allocation8 + $0xde8] sm:$0xff] %v4526_v14  ;;  %v6058_v25 = vld [vmem:[#allocation2 + $0xe60] sm:$0xff]  ;;  %v12092_v10 = vld [vmem:[#allocation109_spill] sm:$0xff]  ;;  %v12093_v5 = vld [vmem:[#allocation106_spill] sm:$0xff] }
 0x4c2   :  { %v4530_v7 = vadd.f32 %v12090_v52, %v3874_v32  ;;  %v2717_v41 = vsub.f32 %v6058_v25, %v12075_v39  ;;  %v3227_v8 = vmul.f32 %v2715_v35, %v12076_v21  ;;  %v3879_v47 = vmul.f32 %v12091_v3, %v3223_v48  ;;  %5039 = vst [vmem:[#allocation8 + $0xdf0] sm:$0xff] %v4527_v46  ;;  %v6059_v36 = vld [vmem:[#allocation2 + $0xe68] sm:$0xff]  ;;  %v12094_v38 = vld [vmem:[#allocation110_spill] sm:$0xff]  ;;  %v12095_v25 = vld [vmem:[#allocation111_spill] sm:$0xff] }
 0x4c3   :  { %v4531_v26 = vadd.f32 %v12092_v10, %v3875_v28  ;;  %v2718_v34 = vsub.f32 %v6059_v36, %v12075_v39  ;;  %v3228_v30 = vmul.f32 %v2716_v51, %v12076_v21  ;;  %v3880_v23 = vmul.f32 %v12093_v5, %v3224_v56  ;;  %5040 = vst [vmem:[#allocation8 + $0xdf8] sm:$0xff] %v4528_v59  ;;  %v6060_v14 = vld [vmem:[#allocation2 + $0xe70] sm:$0xff]  ;;  %v12096_v3 = vld [vmem:[#allocation113_spill] sm:$0xff]  ;;  %v6061_v46 = vld [vmem:[#allocation2 + $0xe78] sm:$0xff] }
 0x4c4   :  { %v4532_v32 = vadd.f32 %v12094_v38, %v3876_v19  ;;  %v2719_v52 = vsub.f32 %v6060_v14, %v12075_v39  ;;  %v3229_v35 = vmul.f32 %v2717_v41, %v12076_v21  ;;  %v3881_v48 = vmul.f32 %v12095_v25, %v3225_v12  ;;  %5041 = vst [vmem:[#allocation8 + $0xe00] sm:$0xff] %v4529_v49  ;;  %v12097_v36 = vld [vmem:[#allocation112_spill] sm:$0xff]  ;;  %v12099_v14 = vld [vmem:[#allocation114_spill] sm:$0xff]  ;;  %v12100_v25 = vld [vmem:[#allocation117_spill] sm:$0xff] }
 0x4c5   :  { %v4533_v28 = vadd.f32 %v12096_v3, %v3877_v18  ;;  %v2720_v10 = vsub.f32 %v6061_v46, %v12075_v39  ;;  %v3230_v51 = vmul.f32 %v2718_v34, %v12076_v21  ;;  %v3882_v56 = vmul.f32 %v12097_v36, %v3226_v42  ;;  %v12098_v5 = vld [vmem:[#allocation116_spill] sm:$0xff]  ;;  %5042 = vst [vmem:[#allocation8 + $0xe08] sm:$0xff] %v4530_v7  ;;  %v6063_v49 = vld [vmem:[#allocation2 + $0xe88] sm:$0xff]  ;;  %v12101_v46 = vld [vmem:[#allocation115_spill] sm:$0xff] }
 0x4c6   :  { %v4534_v19 = vadd.f32 %v12098_v5, %v3878_v58  ;;  %v6062_v59 = vld [vmem:[#allocation2 + $0xe80] sm:$0xff]  ;;  %v3231_v41 = vmul.f32 %v2719_v52, %v12076_v21  ;;  %v3883_v12 = vmul.f32 %v12099_v14, %v3227_v8  ;;  %v4535_v18 = vadd.f32 %v12100_v25, %v3879_v47  ;;  %5043 = vst [vmem:[#allocation8 + $0xe10] sm:$0xff] %v4531_v26  ;;  %v12102_v36 = vld [vmem:[#allocation118_spill] sm:$0xff]  ;;  %v6065_v26 = vld [vmem:[#allocation2 + $0xe98] sm:$0xff] }
 0x4c7   :  { %v2721_v38 = vsub.f32 %v6062_v59, %v12075_v39  ;;  %v2722_v3 = vsub.f32 %v6063_v49, %v12075_v39  ;;  %v3232_v34 = vmul.f32 %v2720_v10, %v12076_v21  ;;  %v3884_v42 = vmul.f32 %v12101_v46, %v3228_v30  ;;  %5044 = vst [vmem:[#allocation8 + $0xe18] sm:$0xff] %v4532_v32  ;;  %v6064_v7 = vld [vmem:[#allocation2 + $0xe90] sm:$0xff]  ;;  %v12103_v59 = vld [vmem:[#allocation119_spill] sm:$0xff]  ;;  %v12104_v14 = vld [vmem:[#allocation120_spill] sm:$0xff] }
 0x4c8   :  { %v4536_v58 = vadd.f32 %v12102_v36, %v3880_v23  ;;  %v2723_v5 = vsub.f32 %v6064_v7, %v12075_v39  ;;  %v3885_v8 = vmul.f32 %v12103_v59, %v3229_v35  ;;  %v4537_v47 = vadd.f32 %v12104_v14, %v3881_v48  ;;  %5045 = vst [vmem:[#allocation8 + $0xe20] sm:$0xff] %v4533_v28  ;;  %v12105_v49 = vld [vmem:[#allocation121_spill] sm:$0xff]  ;;  %v12106_v46 = vld [vmem:[#allocation122_spill] sm:$0xff]  ;;  %v6066_v32 = vld [vmem:[#allocation2 + $0xea0] sm:$0xff] }
 0x4c9   :  { %v3233_v52 = vmul.f32 %v2721_v38, %v12076_v21  ;;  %v2724_v25 = vsub.f32 %v6065_v26, %v12075_v39  ;;  %v3234_v10 = vmul.f32 %v2722_v3, %v12076_v21  ;;  %v3886_v30 = vmul.f32 %v12105_v49, %v3230_v51  ;;  %5046 = vst [vmem:[#allocation8 + $0xe28] sm:$0xff] %v4534_v19  ;;  %v12107_v7 = vld [vmem:[#allocation123_spill] sm:$0xff]  ;;  %v12108_v59 = vld [vmem:[#allocation124_spill] sm:$0xff]  ;;  %v6067_v28 = vld [vmem:[#allocation2 + $0xea8] sm:$0xff] }
 0x4ca   :  { %v4538_v23 = vadd.f32 %v12106_v46, %v3882_v56  ;;  %v2725_v36 = vsub.f32 %v6066_v32, %v12075_v39  ;;  %v3235_v38 = vmul.f32 %v2723_v5, %v12076_v21  ;;  %v3887_v35 = vmul.f32 %v12107_v7, %v3231_v41  ;;  %5047 = vst [vmem:[#allocation8 + $0xe30] sm:$0xff] %v4535_v18  ;;  %v12109_v26 = vld [vmem:[#allocation125_spill] sm:$0xff]  ;;  %v12110_v49 = vld [vmem:[#allocation126_spill] sm:$0xff]  ;;  %v12111_v32 = vld [vmem:[#allocation127_spill] sm:$0xff] }
 0x4cb   :  { %v4539_v48 = vadd.f32 %v12108_v59, %v3883_v12  ;;  %v2726_v14 = vsub.f32 %v6067_v28, %v12075_v39  ;;  %v3236_v3 = vmul.f32 %v2724_v25, %v12076_v21  ;;  %v3888_v51 = vmul.f32 %v12109_v26, %v3232_v34  ;;  %5048 = vst [vmem:[#allocation8 + $0xe38] sm:$0xff] %v4536_v58  ;;  %v6068_v19 = vld [vmem:[#allocation2 + $0xeb0] sm:$0xff]  ;;  %v12112_v7 = vld [vmem:[#allocation128_spill] sm:$0xff]  ;;  %v6069_v18 = vld [vmem:[#allocation2 + $0xeb8] sm:$0xff] }
 0x4cc   :  { %v4540_v56 = vadd.f32 %v12110_v49, %v3884_v42  ;;  %v2727_v46 = vsub.f32 %v6068_v19, %v12075_v39  ;;  %v3237_v5 = vmul.f32 %v2725_v36, %v12076_v21  ;;  %v3889_v41 = vmul.f32 %v12111_v32, %v3233_v52  ;;  %5049 = vst [vmem:[#allocation8 + $0xe40] sm:$0xff] %v4537_v47  ;;  %v12113_v28 = vld [vmem:[#allocation129_spill] sm:$0xff]  ;;  %v12114_v26 = vld [vmem:[#allocation130_spill] sm:$0xff]  ;;  %v6070_v58 = vld [vmem:[#allocation2 + $0xec0] sm:$0xff] }
 0x4cd   :  { %v4541_v12 = vadd.f32 %v12112_v7, %v3885_v8  ;;  %v2728_v59 = vsub.f32 %v6069_v18, %v12075_v39  ;;  %v3238_v25 = vmul.f32 %v2726_v14, %v12076_v21  ;;  %v3890_v34 = vmul.f32 %v12113_v28, %v3234_v10  ;;  %5050 = vst [vmem:[#allocation8 + $0xe48] sm:$0xff] %v4538_v23  ;;  %v12115_v19 = vld [vmem:[#allocation132_spill] sm:$0xff]  ;;  %v6071_v47 = vld [vmem:[#allocation2 + $0xec8] sm:$0xff]  ;;  %v12117_v18 = vld [vmem:[#allocation134_spill] sm:$0xff] }
 0x4ce   :  { %v4542_v42 = vadd.f32 %v12114_v26, %v3886_v30  ;;  %v2729_v49 = vsub.f32 %v6070_v58, %v12075_v39  ;;  %v3239_v36 = vmul.f32 %v2727_v46, %v12076_v21  ;;  %v3891_v52 = vmul.f32 %v12017_v22, %v3235_v38  ;;  %5051 = vst [vmem:[#allocation8 + $0xe50] sm:$0xff] %v4539_v48  ;;  %v12116_v7 = vld [vmem:[#allocation133_spill] sm:$0xff]  ;;  %v6072_v23 = vld [vmem:[#allocation2 + $0xed0] sm:$0xff]  ;;  %v12118_v26 = vld [vmem:[#allocation135_spill] sm:$0xff] }
 0x4cf   :  { %v4543_v8 = vadd.f32 %v12115_v19, %v3887_v35  ;;  %v2730_v32 = vsub.f32 %v6071_v47, %v12075_v39  ;;  %v3240_v14 = vmul.f32 %v2728_v59, %v12076_v21  ;;  %v3892_v10 = vmul.f32 %v12116_v7, %v3236_v3  ;;  %5052 = vst [vmem:[#allocation8 + $0xe58] sm:$0xff] %v4540_v56  ;;  %v12119_v38 = vld [vmem:[#allocation136_spill] sm:$0xff]  ;;  %v6073_v48 = vld [vmem:[#allocation2 + $0xed8] sm:$0xff]  ;;  %v12120_v19 = vld [vmem:[#allocation137_spill] sm:$0xff] }
 0x4d0   :  { %v4544_v30 = vadd.f32 %v12117_v18, %v3888_v51  ;;  %v2731_v28 = vsub.f32 %v6072_v23, %v12075_v39  ;;  %v3241_v46 = vmul.f32 %v2729_v49, %v12076_v21  ;;  %v3893_v22 = vmul.f32 %v12118_v26, %v3237_v5  ;;  %5053 = vst [vmem:[#allocation8 + $0xe60] sm:$0xff] %v4541_v12  ;;  %v12121_v47 = vld [vmem:[#allocation138_spill] sm:$0xff]  ;;  %v6074_v56 = vld [vmem:[#allocation2 + $0xee0] sm:$0xff]  ;;  %v12122_v18 = vld [vmem:[#allocation139_spill] sm:$0xff] }
 0x4d1   :  { %v4545_v35 = vadd.f32 %v12119_v38, %v3889_v41  ;;  %v2732_v58 = vsub.f32 %v6073_v48, %v12075_v39  ;;  %v3242_v59 = vmul.f32 %v2730_v32, %v12076_v21  ;;  %v3894_v3 = vmul.f32 %v12120_v19, %v3238_v25  ;;  %5054 = vst [vmem:[#allocation8 + $0xe68] sm:$0xff] %v4542_v42  ;;  %v12123_v23 = vld [vmem:[#allocation140_spill] sm:$0xff]  ;;  %v6075_v12 = vld [vmem:[#allocation2 + $0xee8] sm:$0xff]  ;;  %v12124_v38 = vld [vmem:[#allocation142_spill] sm:$0xff] }
 0x4d2   :  { %v4546_v51 = vadd.f32 %v12121_v47, %v3890_v34  ;;  %v2733_v7 = vsub.f32 %v6074_v56, %v12075_v39  ;;  %v3243_v49 = vmul.f32 %v2731_v28, %v12076_v21  ;;  %v3895_v5 = vmul.f32 %v12122_v18, %v3239_v36  ;;  %5055 = vst [vmem:[#allocation8 + $0xe70] sm:$0xff] %v4543_v8  ;;  %v6076_v42 = vld [vmem:[#allocation2 + $0xef0] sm:$0xff]  ;;  %v12125_v19 = vld [vmem:[#allocation143_spill] sm:$0xff]  ;;  %v12126_v47 = vld [vmem:[#allocation144_spill] sm:$0xff] }
 0x4d3   :  { %v4547_v41 = vadd.f32 %v12123_v23, %v3891_v52  ;;  %v2734_v26 = vsub.f32 %v6075_v12, %v12075_v39  ;;  %v3244_v32 = vmul.f32 %v2732_v58, %v12076_v21  ;;  %v3896_v25 = vmul.f32 %v12026_v6, %v3240_v14  ;;  %5056 = vst [vmem:[#allocation8 + $0xe78] sm:$0xff] %v4544_v30  ;;  %v6077_v8 = vld [vmem:[#allocation2 + $0xef8] sm:$0xff]  ;;  %v12127_v18 = vld [vmem:[#allocation145_spill] sm:$0xff]  ;;  %v12128_v14 = vld [vmem:[#allocation146_spill] sm:$0xff] }
 0x4d4   :  { %v4548_v34 = vadd.f32 %v12124_v38, %v3892_v10  ;;  %v2735_v48 = vsub.f32 %v6076_v42, %v12075_v39  ;;  %v3245_v28 = vmul.f32 %v2733_v7, %v12076_v21  ;;  %v3897_v36 = vmul.f32 %v12125_v19, %v3241_v46  ;;  %5057 = vst [vmem:[#allocation8 + $0xe80] sm:$0xff] %v4545_v35  ;;  %v6078_v30 = vld [vmem:[#allocation2 + $0xf00] sm:$0xff]  ;;  %v6079_v35 = vld [vmem:[#allocation2 + $0xf08] sm:$0xff]  ;;  %v12130_v42 = vld [vmem:[#allocation150_spill] sm:$0xff] }
 0x4d5   :  { %v4549_v52 = vadd.f32 %v12126_v47, %v3893_v22  ;;  %v2736_v56 = vsub.f32 %v6077_v8, %v12075_v39  ;;  %v3246_v58 = vmul.f32 %v2734_v26, %v12076_v21  ;;  %v3898_v6 = vmul.f32 %v12127_v18, %v3242_v59  ;;  %5058 = vst [vmem:[#allocation8 + $0xe88] sm:$0xff] %v4546_v51  ;;  %v12129_v38 = vld [vmem:[#allocation149_spill] sm:$0xff]  ;;  %v6080_v51 = vld [vmem:[#allocation2 + $0xf10] sm:$0xff]  ;;  %v12131_v47 = vld [vmem:[#allocation151_spill] sm:$0xff] }
 0x4d6   :  { %v4550_v10 = vadd.f32 %v12128_v14, %v3894_v3  ;;  %v2737_v23 = vsub.f32 %v6078_v30, %v12075_v39  ;;  %v3247_v7 = vmul.f32 %v2735_v48, %v12076_v21  ;;  %v3899_v46 = vmul.f32 %v12031_v40, %v3243_v49  ;;  %5059 = vst [vmem:[#allocation8 + $0xe90] sm:$0xff] %v4547_v41  ;;  %v12132_v49 = vld [vmem:[#allocation152_spill] sm:$0xff]  ;;  %v12134_v18 = vld [vmem:[#allocation154_spill] sm:$0xff] }
 0x4d7   :  { %v4551_v22 = vadd.f32 %v12032_v44, %v3895_v5  ;;  %v2738_v12 = vsub.f32 %v6079_v35, %v12075_v39  ;;  %v3248_v26 = vmul.f32 %v2736_v56, %v12076_v21  ;;  %v3900_v59 = vmul.f32 %v12129_v38, %v3244_v32  ;;  %5060 = vst [vmem:[#allocation8 + $0xe98] sm:$0xff] %v4548_v34  ;;  %v6081_v5 = vld [vmem:[#allocation2 + $0xf18] sm:$0xff]  ;;  %v12133_v56 = vld [vmem:[#allocation153_spill] sm:$0xff]  ;;  %v6082_v34 = vld [vmem:[#allocation2 + $0xf20] sm:$0xff] }
 0x4d8   :  { %v4552_v3 = vadd.f32 %v12130_v42, %v3896_v25  ;;  %v2739_v19 = vsub.f32 %v6080_v51, %v12075_v39  ;;  %v3249_v48 = vmul.f32 %v2737_v23, %v12076_v21  ;;  %v3901_v40 = vmul.f32 %v12131_v47, %v3245_v28  ;;  %5061 = vst [vmem:[#allocation8 + $0xea0] sm:$0xff] %v4549_v52  ;;  %v12135_v23 = vld [vmem:[#allocation155_spill] sm:$0xff]  ;;  %v12136_v35 = vld [vmem:[#allocation156_spill] sm:$0xff]  ;;  %v6083_v52 = vld [vmem:[#allocation2 + $0xf28] sm:$0xff] }
 0x4d9   :  { %v4553_v44 = vadd.f32 %v12132_v49, %v3897_v36  ;;  %v2740_v41 = vsub.f32 %v6081_v5, %v12075_v39  ;;  %v3250_v8 = vmul.f32 %v2738_v12, %v12076_v21  ;;  %v3902_v32 = vmul.f32 %v12133_v56, %v3246_v58  ;;  %5062 = vst [vmem:[#allocation8 + $0xea8] sm:$0xff] %v4550_v10  ;;  %v6084_v10 = vld [vmem:[#allocation2 + $0xf30] sm:$0xff] }
 0x4da   :  { %v4554_v25 = vadd.f32 %v12134_v18, %v3898_v6  ;;  %v2741_v14 = vsub.f32 %v6082_v34, %v12075_v39  ;;  %v3251_v30 = vmul.f32 %v2739_v19, %v12076_v21  ;;  %v3903_v28 = vmul.f32 %v12135_v23, %v3247_v7  ;;  %5063 = vst [vmem:[#allocation8 + $0xeb0] sm:$0xff] %v4551_v22  ;;  %v12137_v19 = vld [vmem:[#allocation160_spill] sm:$0xff]  ;;  %v6085_v22 = vld [vmem:[#allocation2 + $0xf38] sm:$0xff]  ;;  %v12141_v34 = vld [vmem:[#allocation165_spill] sm:$0xff] }
 0x4db   :  { %v4555_v36 = vadd.f32 %v12136_v35, %v3899_v46  ;;  %v2742_v38 = vsub.f32 %v6083_v52, %v12075_v39  ;;  %v3252_v12 = vmul.f32 %v2740_v41, %v12076_v21  ;;  %v3904_v58 = vmul.f32 %v12039_v33, %v3248_v26  ;;  %5064 = vst [vmem:[#allocation8 + $0xeb8] sm:$0xff] %v4552_v3  ;;  %v12138_v26 = vld [vmem:[#allocation162_spill] sm:$0xff]  ;;  %v12139_v41 = vld [vmem:[#allocation163_spill] sm:$0xff]  ;;  %v12144_v52 = vld [vmem:[#allocation168_spill] sm:$0xff] }
 0x4dc   :  { %v4556_v6 = vadd.f32 %v12040_v37, %v3900_v59  ;;  %v2743_v42 = vsub.f32 %v6084_v10, %v12075_v39  ;;  %v3253_v51 = vmul.f32 %v2741_v14, %v12076_v21  ;;  %v3905_v7 = vmul.f32 %v12041_v0, %v3249_v48  ;;  %5065 = vst [vmem:[#allocation8 + $0xec0] sm:$0xff] %v4553_v44  ;;  %v6086_v59 = vld [vmem:[#allocation2 + $0xf40] sm:$0xff]  ;;  %v6087_v44 = vld [vmem:[#allocation2 + $0xf48] sm:$0xff]  ;;  %v12143_v35 = vld [vmem:[#allocation167_spill] sm:$0xff] }
 0x4dd   :  { %v4557_v46 = vadd.f32 %v12137_v19, %v3901_v40  ;;  %v2744_v47 = vsub.f32 %v6085_v22, %v12075_v39  ;;  %v3254_v49 = vmul.f32 %v2742_v38, %v12076_v21  ;;  %v3906_v33 = vmul.f32 %v12043_v16, %v3250_v8  ;;  %5066 = vst [vmem:[#allocation8 + $0xec8] sm:$0xff] %v4554_v25  ;;  %v12140_v48 = vld [vmem:[#allocation164_spill] sm:$0xff]  ;;  %v12142_v8 = vld [vmem:[#allocation166_spill] sm:$0xff] }
 0x4de   :  { %v4558_v37 = vadd.f32 %v12138_v26, %v3902_v32  ;;  %v2745_v3 = vsub.f32 %v6086_v59, %v12075_v39  ;;  %v3255_v5 = vmul.f32 %v2743_v42, %v12076_v21  ;;  %v3907_v0 = vmul.f32 %v12139_v41, %v3251_v30  ;;  %5067 = vst [vmem:[#allocation8 + $0xed0] sm:$0xff] %v4555_v36  ;;  %v6088_v25 = vld [vmem:[#allocation2 + $0xf50] sm:$0xff]  ;;  %v6089_v36 = vld [vmem:[#allocation2 + $0xf58] sm:$0xff]  ;;  %v12145_v42 = vld [vmem:[#allocation169_spill] sm:$0xff] }
 0x4df   :  { %v4559_v40 = vadd.f32 %v12140_v48, %v3903_v28  ;;  %v2746_v56 = vsub.f32 %v6087_v44, %v12075_v39  ;;  %v3256_v18 = vmul.f32 %v2744_v47, %v12076_v21  ;;  %v3908_v16 = vmul.f32 %v12141_v34, %v3252_v12  ;;  %5068 = vst [vmem:[#allocation8 + $0xed8] sm:$0xff] %v4556_v6  ;;  %v12146_v19 = vld [vmem:[#allocation170_spill] sm:$0xff]  ;;  %v6090_v6 = vld [vmem:[#allocation2 + $0xf60] sm:$0xff]  ;;  %v12147_v26 = vld [vmem:[#allocation171_spill] sm:$0xff] }
 0x4e0   :  { %v4560_v32 = vadd.f32 %v12142_v8, %v3904_v58  ;;  %v2747_v14 = vsub.f32 %v6088_v25, %v12075_v39  ;;  %v3257_v23 = vmul.f32 %v2745_v3, %v12076_v21  ;;  %v3909_v30 = vmul.f32 %v12143_v35, %v3253_v51  ;;  %5069 = vst [vmem:[#allocation8 + $0xee0] sm:$0xff] %v4557_v46  ;;  %v12148_v59 = vld [vmem:[#allocation172_spill] sm:$0xff]  ;;  %v6091_v46 = vld [vmem:[#allocation2 + $0xf68] sm:$0xff]  ;;  %v12149_v48 = vld [vmem:[#allocation174_spill] sm:$0xff] }
 0x4e1   :  { %v4561_v28 = vadd.f32 %v12144_v52, %v3905_v7  ;;  %v2748_v38 = vsub.f32 %v6089_v36, %v12075_v39  ;;  %v3258_v10 = vmul.f32 %v2746_v56, %v12076_v21  ;;  %v3910_v12 = vmul.f32 %v12145_v42, %v3254_v49  ;;  %5070 = vst [vmem:[#allocation8 + $0xee8] sm:$0xff] %v4558_v37  ;;  %v6092_v37 = vld [vmem:[#allocation2 + $0xf70] sm:$0xff]  ;;  %v12151_v35 = vld [vmem:[#allocation179_spill] sm:$0xff]  ;;  %v12153_v36 = vld [vmem:[#allocation181_spill] sm:$0xff] }
 0x4e2   :  { %v4562_v58 = vadd.f32 %v12146_v19, %v3906_v33  ;;  %v2749_v22 = vsub.f32 %v6090_v6, %v12075_v39  ;;  %v3259_v47 = vmul.f32 %v2747_v14, %v12076_v21  ;;  %v3911_v51 = vmul.f32 %v12147_v26, %v3255_v5  ;;  %5071 = vst [vmem:[#allocation8 + $0xef0] sm:$0xff] %v4559_v40  ;;  %v6093_v40 = vld [vmem:[#allocation2 + $0xf78] sm:$0xff]  ;;  %v6096_v42 = vld [vmem:[#allocation2 + $0xf90] sm:$0xff] }
 0x4e3   :  { %v4563_v7 = vadd.f32 %v12148_v59, %v3907_v0  ;;  %v2750_v3 = vsub.f32 %v6091_v46, %v12075_v39  ;;  %v3260_v41 = vmul.f32 %v2748_v38, %v12076_v21  ;;  %v3912_v49 = vmul.f32 %v12051_v1, %v3256_v18  ;;  %5072 = vst [vmem:[#allocation8 + $0xef8] sm:$0xff] %v4560_v32  ;;  %v12150_v18 = vld [vmem:[#allocation178_spill] sm:$0xff]  ;;  %v6094_v32 = vld [vmem:[#allocation2 + $0xf80] sm:$0xff]  ;;  %v6097_v26 = vld [vmem:[#allocation2 + $0xf98] sm:$0xff] }
 0x4e4   :  { %v4564_v33 = vadd.f32 %v12149_v48, %v3908_v16  ;;  %v2751_v44 = vsub.f32 %v6092_v37, %v12075_v39  ;;  %v3261_v56 = vmul.f32 %v2749_v22, %v12076_v21  ;;  %v3913_v5 = vmul.f32 %v12053_v61, %v3257_v23  ;;  %5073 = vst [vmem:[#allocation8 + $0xf00] sm:$0xff] %v4561_v28  ;;  %v12152_v23 = vld [vmem:[#allocation180_spill] sm:$0xff]  ;;  %v12154_v38 = vld [vmem:[#allocation182_spill] sm:$0xff]  ;;  %v12156_v22 = vld [vmem:[#allocation17_spill] sm:$0xff] }
 0x4e5   :  { %v4565_v0 = vadd.f32 %v12054_v54, %v3909_v30  ;;  %v2752_v34 = vsub.f32 %v6093_v40, %v12075_v39  ;;  %v3262_v8 = vmul.f32 %v2750_v3, %v12076_v21  ;;  %v3914_v1 = vmul.f32 %v12055_v50, %v3258_v10  ;;  %5074 = vst [vmem:[#allocation8 + $0xf08] sm:$0xff] %v4562_v58  ;;  %v6095_v30 = vld [vmem:[#allocation2 + $0xf88] sm:$0xff]  ;;  %v12155_v58 = vld [vmem:[#allocation183_spill] sm:$0xff]  ;;  %v12158_v3 = vld [vmem:[#allocation18_spill] sm:$0xff] }
 0x4e6   :  { %v4566_v16 = vadd.f32 %v12150_v18, %v3910_v12  ;;  %v2753_v25 = vsub.f32 %v6094_v32, %v12075_v39  ;;  %v3263_v14 = vmul.f32 %v2751_v44, %v12076_v21  ;;  %v3915_v61 = vmul.f32 %v12151_v35, %v3259_v47  ;;  %5075 = vst [vmem:[#allocation8 + $0xf10] sm:$0xff] %v4563_v7  ;;  %v12157_v7 = vld [vmem:[#allocation184_spill] sm:$0xff]  ;;  %v12159_v37 = vld [vmem:[#allocation185_spill] sm:$0xff]  ;;  %v6101_v35 = vld [vmem:[#allocation2 + $0xfb8] sm:$0xff] }
 0x4e7   :  { %v4567_v54 = vadd.f32 %v12152_v23, %v3911_v51  ;;  %v2754_v52 = vsub.f32 %v6095_v30, %v12075_v39  ;;  %v3264_v28 = vmul.f32 %v2752_v34, %v12076_v21  ;;  %v3916_v50 = vmul.f32 %v12153_v36, %v3260_v41  ;;  %5076 = vst [vmem:[#allocation8 + $0xf18] sm:$0xff] %v4564_v33  ;;  %v12160_v34 = vld [vmem:[#allocation186_spill] sm:$0xff]  ;;  %v12161_v18 = vld [vmem:[#allocation20_spill] sm:$0xff] }
 0x4e8   :  { %v4568_v10 = vadd.f32 %v12154_v38, %v3912_v49  ;;  %v2755_v12 = vsub.f32 %v6096_v42, %v12075_v39  ;;  %v3265_v19 = vmul.f32 %v2753_v25, %v12076_v21  ;;  %v3917_v6 = vmul.f32 %v12155_v58, %v3261_v56  ;;  %5077 = vst [vmem:[#allocation8 + $0xf20] sm:$0xff] %v4565_v0  ;;  %v6098_v49 = vld [vmem:[#allocation2 + $0xfa0] sm:$0xff]  ;;  %v12165_v42 = vld [vmem:[#allocation25_spill] sm:$0xff] }
 0x4e9   :  { %v4569_v47 = vadd.f32 %v12156_v22, %v3913_v5  ;;  %v2756_v51 = vsub.f32 %v6097_v26, %v12075_v39  ;;  %v3266_v59 = vmul.f32 %v2754_v52, %v12076_v21  ;;  %v3918_v46 = vmul.f32 %v12157_v7, %v3262_v8  ;;  %5078 = vst [vmem:[#allocation8 + $0xf28] sm:$0xff] %v4566_v16  ;;  %v6099_v5 = vld [vmem:[#allocation2 + $0xfa8] sm:$0xff]  ;;  %v6100_v16 = vld [vmem:[#allocation2 + $0xfb0] sm:$0xff]  ;;  %v12163_v52 = vld [vmem:[#allocation24_spill] sm:$0xff] }
 0x4ea   :  { %v4570_v41 = vadd.f32 %v12158_v3, %v3914_v1  ;;  %v2757_v48 = vsub.f32 %v6098_v49, %v12075_v39  ;;  %v3267_v33 = vmul.f32 %v2755_v12, %v12076_v21  ;;  %v3919_v44 = vmul.f32 %v12159_v37, %v3263_v14  ;;  %5079 = vst [vmem:[#allocation8 + $0xf30] sm:$0xff] %v4567_v54  ;;  %v12162_v54 = vld [vmem:[#allocation188_spill] sm:$0xff]  ;;  %v6103_v12 = vld [vmem:[#allocation2 + $0xfc8] sm:$0xff]  ;;  %v12166_v7 = vld [vmem:[#allocation27_spill] sm:$0xff] }
 0x4eb   :  { %v4571_v56 = vadd.f32 %v12062_v20, %v3915_v61  ;;  %v2758_v0 = vsub.f32 %v6099_v5, %v12075_v39  ;;  %v3268_v40 = vmul.f32 %v2756_v51, %v12076_v21  ;;  %v3920_v8 = vmul.f32 %v12160_v34, %v3264_v28  ;;  %5080 = vst [vmem:[#allocation8 + $0xf38] sm:$0xff] %v4568_v10  ;;  %v6102_v36 = vld [vmem:[#allocation2 + $0xfc0] sm:$0xff]  ;;  %v12164_v10 = vld [vmem:[#allocation189_spill] sm:$0xff]  ;;  %v6105_v3 = vld [vmem:[#allocation2 + $0xfd8] sm:$0xff] }
 0x4ec   :  { %v4572_v1 = vadd.f32 %v12161_v18, %v3916_v50  ;;  %v2759_v32 = vsub.f32 %v6100_v16, %v12075_v39  ;;  %v3269_v25 = vmul.f32 %v2757_v48, %v12076_v21  ;;  %v3921_v14 = vmul.f32 %v12065_v29, %v3265_v19  ;;  %5081 = vst [vmem:[#allocation8 + $0xf40] sm:$0xff] %v4569_v47  ;;  %v6104_v47 = vld [vmem:[#allocation2 + $0xfd0] sm:$0xff]  ;;  %v12167_v48 = vld [vmem:[#allocation192_spill] sm:$0xff]  ;;  %v6107_v5 = vld [vmem:[#allocation2 + $0xfe8] sm:$0xff] }
 0x4ed   :  { %v4573_v20 = vadd.f32 %v12066_v13, %v3917_v6  ;;  %v2760_v61 = vsub.f32 %v6101_v35, %v12075_v39  ;;  %v3270_v23 = vmul.f32 %v2758_v0, %v12076_v21  ;;  %v3922_v30 = vmul.f32 %v12162_v54, %v3266_v59  ;;  %5082 = vst [vmem:[#allocation8 + $0xf48] sm:$0xff] %v4570_v41  ;;  %v6108_v18 = vld [vmem:[#allocation2 + $0xff0] sm:$0xff] }
 0x4ee   :  { %v4574_v28 = vadd.f32 %v12163_v52, %v3918_v46  ;;  %v2761_v50 = vsub.f32 %v6102_v36, %v12075_v39  ;;  %v3271_v38 = vmul.f32 %v2759_v32, %v12076_v21  ;;  %v3923_v29 = vmul.f32 %v12164_v10, %v3267_v33  ;;  %5083 = vst [vmem:[#allocation8 + $0xf50] sm:$0xff] %v4571_v56  ;;  %v6106_v33 = vld [vmem:[#allocation2 + $0xfe0] sm:$0xff]  ;;  %v6109_v32 = vld [vmem:[#allocation2 + $0xff8] sm:$0xff]  ;;  %v12174_v10 = vld [vmem:[#allocation201_spill] sm:$0xff] }
 0x4ef   :  { %v4575_v13 = vadd.f32 %v12165_v42, %v3919_v44  ;;  %v2762_v19 = vsub.f32 %v6103_v12, %v12075_v39  ;;  %v3272_v58 = vmul.f32 %v2760_v61, %v12076_v21  ;;  %v3924_v6 = vmul.f32 %v11973_v63, %v3268_v40  ;;  %5084 = vst [vmem:[#allocation8 + $0xf58] sm:$0xff] %v4572_v1  ;;  %v12169_v61 = vld [vmem:[#allocation197_spill] sm:$0xff] }
 0x4f0   :  { %v4576_v22 = vadd.f32 %v12069_v55, %v3920_v8  ;;  %v2763_v26 = vsub.f32 %v6104_v47, %v12075_v39  ;;  %v3273_v51 = vmul.f32 %v2761_v50, %v12076_v21  ;;  %v3925_v59 = vmul.f32 %v12070_v45, %v3269_v25  ;;  %5085 = vst [vmem:[#allocation8 + $0xf60] sm:$0xff] %v4573_v20  ;;  %v12168_v8 = vld [vmem:[#allocation30_spill] sm:$0xff]  ;;  %v12173_v50 = vld [vmem:[#allocation41_spill] sm:$0xff] }
 0x4f1   :  { %v4577_v46 = vadd.f32 %v12166_v7, %v3921_v14  ;;  %v2764_v41 = vsub.f32 %v6105_v3, %v12075_v39  ;;  %v3274_v49 = vmul.f32 %v2762_v19, %v12076_v21  ;;  %v3926_v63 = vmul.f32 %v12167_v48, %v3270_v23  ;;  %5086 = vst [vmem:[#allocation8 + $0xf68] sm:$0xff] %v4574_v28  ;;  %v12177_v19 = vld [vmem:[#allocation13_spill] sm:$0xff] }
 0x4f2   :  { %v4578_v55 = vadd.f32 %v11880_v2, %v3922_v30  ;;  %v2765_v37 = vsub.f32 %v6106_v33, %v12075_v39  ;;  %v3275_v44 = vmul.f32 %v2763_v26, %v12076_v21  ;;  %v3927_v45 = vmul.f32 %v11976_v4, %v3271_v38  ;;  %5087 = vst [vmem:[#allocation8 + $0xf70] sm:$0xff] %v4575_v13  ;;  %v12170_v30 = vld [vmem:[#allocation199_spill] sm:$0xff]  ;;  %v12176_v13 = vld [vmem:[#allocation50_spill] sm:$0xff] }
 0x4f3   :  { %v4579_v56 = vadd.f32 %v11977_v15, %v3923_v29  ;;  %v2766_v0 = vsub.f32 %v6107_v5, %v12075_v39  ;;  %v3276_v40 = vmul.f32 %v2764_v41, %v12076_v21  ;;  %v3928_v34 = vmul.f32 %v12073_v24, %v3272_v58  ;;  %5088 = vst [vmem:[#allocation8 + $0xf78] sm:$0xff] %v4576_v22 }
 0x4f4   :  { %v4580_v2 = vadd.f32 %v12168_v8, %v3924_v6  ;;  %v2767_v1 = vsub.f32 %v6108_v18, %v12075_v39  ;;  %v3277_v16 = vmul.f32 %v2765_v37, %v12076_v21  ;;  %v3929_v4 = vmul.f32 %v11781_v31, %v3273_v51  ;;  %5089 = vst [vmem:[#allocation8 + $0xf80] sm:$0xff] %v4577_v46 }
 0x4f5   :  { %v4581_v15 = vadd.f32 %v11677_v9, %v3925_v59  ;;  %v2768_v25 = vsub.f32 %v6109_v32, %v12075_v39  ;;  %v3278_v14 = vmul.f32 %v2766_v0, %v12076_v21  ;;  %v3930_v24 = vmul.f32 %v11883_v43, %v3274_v49  ;;  %5090 = vst [vmem:[#allocation8 + $0xf88] sm:$0xff] %v4578_v55  ;;  %v12171_v43 = vld [vmem:[#allocation35_spill] sm:$0xff] }
 0x4f6   :  { %v4582_v20 = vadd.f32 %v11980_v17, %v3926_v63  ;;  %v3279_v35 = vmul.f32 %v2767_v1, %v12076_v21  ;;  %v3931_v23 = vmul.f32 %v12169_v61, %v3275_v44  ;;  %v4583_v54 = vadd.f32 %v11681_v62, %v3927_v45  ;;  %5091 = vst [vmem:[#allocation8 + $0xf90] sm:$0xff] %v4579_v56  ;;  %v12172_v17 = vld [vmem:[#allocation200_spill] sm:$0xff] }
 0x4f7   :  { %v3280_v9 = vmul.f32 %v2768_v25, %v12076_v21  ;;  %v3932_v31 = vmul.f32 %v11887_v57, %v3276_v40  ;;  %v4584_v39 = vadd.f32 %v11785_v11, %v3928_v34  ;;  %5092 = vst [vmem:[#allocation8 + $0xf98] sm:$0xff] %v4580_v2  ;;  %v3933_v52 = vmul.f32 %v12170_v30, %v3277_v16  ;;  %v12175_v21 = vld [vmem:[#allocation98_spill] sm:$0xff] }
 0x4f8   :  { %v4585_v28 = vadd.f32 %v12171_v43, %v3929_v4  ;;  %5093 = vst [vmem:[#allocation8 + $0xfa0] sm:$0xff] %v4581_v15  ;;  %v3934_v36 = vmul.f32 %v12172_v17, %v3278_v14  ;;  %v4586_v38 = vadd.f32 %v12173_v50, %v3930_v24  ;;  %v3935_v62 = vmul.f32 %v12174_v10, %v3279_v35 }
 0x4f9   :  { %5094 = vst [vmem:[#allocation8 + $0xfa8] sm:$0xff] %v4582_v20  ;;  %v4587_v29 = vadd.f32 %v12079_v60, %v3931_v23  ;;  %v3936_v57 = vmul.f32 %v12080_v27, %v3280_v9  ;;  %v4588_v11 = vadd.f32 %v12081_v53, %v3932_v31  ;;  %v4589_v42 = vadd.f32 %v12175_v21, %v3933_v52  ;;  %v12178_v60 = vld [vmem:[#allocation45_spill] sm:$0xff] }
 0x4fa   :  { %5095 = vst [vmem:[#allocation8 + $0xfb0] sm:$0xff] %v4583_v54  ;;  %v4590_v12 = vadd.f32 %v12176_v13, %v3934_v36  ;;  %v4591_v58 = vadd.f32 %v12177_v19, %v3935_v62 }
 0x4fb   :  { %5096 = vst [vmem:[#allocation8 + $0xfb8] sm:$0xff] %v4584_v39  ;;  %v4592_v27 = vadd.f32 %v12178_v60, %v3936_v57 }
 0x4fc   :  { %5097 = vst [vmem:[#allocation8 + $0xfc0] sm:$0xff] %v4585_v28 }
 0x4fd   :  { %5098 = vst [vmem:[#allocation8 + $0xfc8] sm:$0xff] %v4586_v38 }
 0x4fe   :  { %5099 = vst [vmem:[#allocation8 + $0xfd0] sm:$0xff] %v4587_v29 }
 0x4ff   :  { %5100 = vst [vmem:[#allocation8 + $0xfd8] sm:$0xff] %v4588_v11 }
 0x500   :  { %5101 = vst [vmem:[#allocation8 + $0xfe0] sm:$0xff] %v4589_v42 }
 0x501   :  { %5102 = vst [vmem:[#allocation8 + $0xfe8] sm:$0xff] %v4590_v12 }
 0x502   :  { %5103 = vst [vmem:[#allocation8 + $0xff0] sm:$0xff] %v4591_v58 }
 0x503   :  { %5104 = vst [vmem:[#allocation8 + $0xff8] sm:$0xff] %v4592_v27 }
 0x504   :  { %5117 = dma.vmem_to_hbm [thread:$0]  %s5110_s2, 65536, %s5112_s30, [#allocation4], %s6214_s22, %s6214_s22, %s6215_s23  }
 0x505   :  { %6210 = dma.done.wait [#allocation4], 65536  }
 0x506   :  { %6211 = vsyncadd [#allocation4], 4294901760 }
 0x507   :  { %5122 = vsyncpa [#allocation3], 1 }
 0x508   :  { %5123 = vsyncpa [#allocation6], 1 }
 0x509   :  { %5124 = vsyncpa [#allocation4], 1 }

</bundles_post_ra>
